<compile_context>
chip_gen: v7x
topology: tpu7x:2x2x1
jax: 0.10.0
libtpu: 0.0.40
codegen_flags: <defaults>
</compile_context>

<pallas_src>
import math

import jax
import jax.numpy as jnp
from jax.experimental import pallas as pl
from jax.experimental.pallas import tpu as pltpu

# ---------------- configuration (small synthetic shapes) ----------------
NUM_STEPS = 4
NUM_ENVS = 16
NUM_AGENTS = 8          # == max_agents
STATE_SIZE = 16
EMBED_SIZE = 32
NUM_HEADS = 2
HEAD_DIM = EMBED_SIZE // NUM_HEADS
HIDDEN_SIZE = 32
OUT_FEATURES = 6        # single discrete action branch
NEG_SLOPE = 0.01        # PyTorch LeakyReLU default
LN_EPS = 1e-5
LANES = 128

# ---- merged parameter slab row offsets (everything lane-padded to 128, stacked on rows) ----
_WENC_R = 0
_WQKV_R = _WENC_R + STATE_SIZE        # 16
_WO_R = _WQKV_R + EMBED_SIZE          # 48
_W1_R = _WO_R + EMBED_SIZE            # 80
_W2_R = _W1_R + EMBED_SIZE            # 112
_W3_R = _W2_R + HIDDEN_SIZE           # 144
_VBASE = _W3_R + HIDDEN_SIZE          # 176 (start of bias / LN / positional rows)
(_BENC_R, _BQKV_R, _BO_R, _G1_R, _BT1_R, _G2_R, _BT2_R,
 _B1_R, _B2_R, _B3_R) = (_VBASE + i for i in range(10))
_POS_R = _VBASE + 10                  # 186 .. 186+NUM_AGENTS-1
_SLAB_ROWS = ((_POS_R + NUM_AGENTS + 7) // 8) * 8   # 200, sublane-aligned


# ---------------- small in-kernel helpers ----------------
def _leaky_relu(x):
    return jnp.where(x > 0, x, NEG_SLOPE * x)


def _layer_norm(x, gamma, beta):
    mu = jnp.mean(x, axis=-1, keepdims=True)
    var = jnp.mean((x - mu) ** 2, axis=-1, keepdims=True)
    return (x - mu) * jax.lax.rsqrt(var + LN_EPS) * gamma + beta


def _softmax_last(x):
    x = x - jnp.max(x, axis=-1, keepdims=True)
    e = jnp.exp(x)
    # normalization via EUP approx reciprocal instead of a VALU divide
    return e * pl.reciprocal(jnp.sum(e, axis=-1, keepdims=True), approx=True)


# ---------------- Pallas kernel: full forward for TB batch elements ----------------
def policy_kernel(x_ref, slab_ref, out_ref):
    tb, a, s = x_ref.shape
    rows = tb * a
    E, HID, Dh, O = EMBED_SIZE, HIDDEN_SIZE, HEAD_DIM, OUT_FEATURES
    f32 = jnp.float32

    # ---- unpack merged parameter slab (static slices, zero runtime cost) ----
    w_enc = slab_ref[_WENC_R:_WENC_R + STATE_SIZE, 0:E]
    w_qkv = slab_ref[_WQKV_R:_WQKV_R + E, 0:3 * E]
    w1 = slab_ref[_W1_R:_W1_R + E, 0:HID]
    w2 = slab_ref[_W2_R:_W2_R + HID, 0:HID]
    w3 = slab_ref[_W3_R:_W3_R + HID, :]                       # (HID, 128) zero-padded past O

    b_enc = slab_ref[_BENC_R:_BENC_R + 1, 0:E]
    b_qkv = slab_ref[_BQKV_R:_BQKV_R + 1, 0:3 * E]
    bo = slab_ref[_BO_R:_BO_R + 1, 0:E]
    g1 = slab_ref[_G1_R:_G1_R + 1, 0:E]
    bt1 = slab_ref[_BT1_R:_BT1_R + 1, 0:E]
    g2 = slab_ref[_G2_R:_G2_R + 1, 0:E]
    bt2 = slab_ref[_BT2_R:_BT2_R + 1, 0:E]
    b1 = slab_ref[_B1_R:_B1_R + 1, 0:HID]
    b2 = slab_ref[_B2_R:_B2_R + 1, 0:HID]
    b3 = slab_ref[_B3_R:_B3_R + 1, :]                          # (1, 128) zero-padded past O
    pos = slab_ref[_POS_R:_POS_R + a, 0:E]                     # (A, E)

    # ---- StatesEncoder on all TB*A rows at once (single big-M matmul) ----
    x2 = x_ref[...].reshape(rows, s)
    enc = _leaky_relu(jnp.dot(x2, w_enc, preferred_element_type=f32) + b_enc)

    # ---- PositionalEncoding (additive sinusoidal, broadcast over batch) ----
    hcur = (enc.reshape(tb, a, E) + pos[None]).reshape(rows, E)

    # ---- RSA: LN -> fused QKV -> per-head attention -> out-proj -> residual -> LN ----
    hn = _layer_norm(hcur, g1, bt1)
    qkv = jnp.dot(hn, w_qkv, preferred_element_type=f32) + b_qkv      # (rows, 3E)
    q3 = qkv[:, 0:E].reshape(tb, a, E)
    k3 = qkv[:, E:2 * E].reshape(tb, a, E)
    v3 = qkv[:, 2 * E:3 * E].reshape(tb, a, E)

    scale = 1.0 / math.sqrt(Dh)
    attn = jnp.zeros((rows, E), f32)
    for head in range(NUM_HEADS):        # static unroll; per-head out-proj summed (no concat)
        lo, hi = head * Dh, (head + 1) * Dh
        qh, kh, vh = q3[..., lo:hi], k3[..., lo:hi], v3[..., lo:hi]
        scores = jnp.einsum("bad,bcd->bac", qh, kh, preferred_element_type=f32) * scale
        probs = _softmax_last(scores)
        ctx = jnp.einsum("bac,bcd->bad", probs, vh, preferred_element_type=f32)
        wo_h = slab_ref[_WO_R + lo:_WO_R + hi, 0:E]                    # (Dh, E)
        attn = attn + jnp.dot(ctx.reshape(rows, Dh), wo_h, preferred_element_type=f32)
    attn = attn + bo
    h2 = _layer_norm(hcur + attn, g2, bt2)

    # ---- DiscretePolicyNetwork: MLP + Softmax, lane-dense (128-wide) final store ----
    z = _leaky_relu(jnp.dot(h2, w1, preferred_element_type=f32) + b1)
    z = _leaky_relu(jnp.dot(z, w2, preferred_element_type=f32) + b2)
    logits = jnp.dot(z, w3, preferred_element_type=f32) + b3           # (rows, 128)
    lane = jax.lax.broadcasted_iota(jnp.int32, (1, LANES), 1)
    logits = jnp.where(lane < O, logits, -1e30)                        # mask padded lanes
    out_ref[...] = _softmax_last(logits).astype(out_ref.dtype)         # unmasked full-vreg vst


# ---------------- parameter packing (single slab instead of 21 tiny inputs) ----------------
def _pack_params(p):
    def padw(w):
        w = w.astype(jnp.float32)
        return jnp.pad(w, ((0, 0), (0, LANES - w.shape[1])))

    w_qkv = jnp.concatenate([p["wq"], p["wk"], p["wv"]], axis=1)       # (E, 3E) fused QKV
    b_qkv = jnp.concatenate([p["bq"], p["bk"], p["bv"]], axis=1)       # (1, 3E)
    rows = [p["w_enc"], w_qkv, p["wo"], p["w1"], p["w2"], p["w3"],
            p["b_enc"], b_qkv, p["bo"], p["g1"], p["bt1"], p["g2"], p["bt2"],
            p["b1"], p["b2"], p["b3"], p["pos"]]
    slab = jnp.concatenate([padw(r) for r in rows], axis=0)            # (194, 128)
    slab = jnp.pad(slab, ((0, _SLAB_ROWS - slab.shape[0]), (0, 0)))    # (200, 128)
    return slab


def _choose_tb(batch, max_tb=128):
    tb = math.gcd(batch, max_tb)
    while tb > 1 and batch // tb < 2:    # keep >=2 grid blocks so v7x can use both TensorCores
        tb //= 2
    if tb % 8 != 0:                      # keep blocks sublane-aligned
        tb = batch
    return tb


# ---------------- wrapper ----------------
@jax.jit
def policy_network_forward(x4d, params):
    """x4d: (num_steps, num_envs, num_agents, state_size) -> probs (..., out_features)."""
    s0, s1, a, s = x4d.shape
    batch = s0 * s1
    x = x4d.reshape(batch, a, s).astype(jnp.float32)
    slab = _pack_params(params)

    tb = _choose_tb(batch)
    nb = batch // tb

    out = pl.pallas_call(
        policy_kernel,
        out_shape=jax.ShapeDtypeStruct((batch * a, LANES), jnp.float32),
        grid=(nb,),
        in_specs=[
            pl.BlockSpec((tb, a, s), lambda b: (b, 0, 0)),
            pl.BlockSpec(slab.shape, lambda b: (0, 0)),   # constant block idx -> stays resident
        ],
        out_specs=pl.BlockSpec((tb * a, LANES), lambda b: (b, 0)),
        compiler_params=pltpu.CompilerParams(dimension_semantics=("parallel",)),
    )(x, slab)
    return out.reshape(s0, s1, a, LANES)[..., :OUT_FEATURES]


# ---------------- pure-JAX reference (for correctness check) ----------------
def reference_forward(x4d, p):
    s0, s1, a, s = x4d.shape
    x = x4d.reshape(s0 * s1, a, s).astype(jnp.float32)
    h = _leaky_relu(x @ p["w_enc"] + p["b_enc"])
    h = h + p["pos"][None]
    hn = _layer_norm(h, p["g1"], p["bt1"])
    q = hn @ p["wq"] + p["bq"]
    k = hn @ p["wk"] + p["bk"]
    v = hn @ p["wv"] + p["bv"]
    outs = []
    for hidx in range(NUM_HEADS):
        sl = slice(hidx * HEAD_DIM, (hidx + 1) * HEAD_DIM)
        scores = jnp.einsum("bad,bcd->bac", q[..., sl], k[..., sl]) / math.sqrt(HEAD_DIM)
        outs.append(jnp.einsum("bac,bcd->bad", jax.nn.softmax(scores, axis=-1), v[..., sl]))
    attn = jnp.concatenate(outs, axis=-1) @ p["wo"] + p["bo"]
    h = _layer_norm(h + attn, p["g2"], p["bt2"])
    z = _leaky_relu(h @ p["w1"] + p["b1"])
    z = _leaky_relu(z @ p["w2"] + p["b2"])
    probs = jax.nn.softmax(z @ p["w3"] + p["b3"], axis=-1)
    return probs.reshape(s0, s1, a, OUT_FEATURES)


# ---------------- deterministic parameter init ----------------
def make_params(key):
    def dense(key, fan_in, fan_out):
        kw, kb = jax.random.split(key)
        bound = 1.0 / math.sqrt(fan_in)
        w = jax.random.uniform(kw, (fan_in, fan_out), jnp.float32, -bound, bound)
        b = jax.random.uniform(kb, (1, fan_out), jnp.float32, -bound, bound)
        return w, b

    keys = jax.random.split(key, 8)
    p = {}
    p["w_enc"], p["b_enc"] = dense(keys[0], STATE_SIZE, EMBED_SIZE)
    p["wq"], p["bq"] = dense(keys[1], EMBED_SIZE, EMBED_SIZE)
    p["wk"], p["bk"] = dense(keys[2], EMBED_SIZE, EMBED_SIZE)
    p["wv"], p["bv"] = dense(keys[3], EMBED_SIZE, EMBED_SIZE)
    p["wo"], p["bo"] = dense(keys[4], EMBED_SIZE, EMBED_SIZE)
    p["w1"], p["b1"] = dense(keys[5], EMBED_SIZE, HIDDEN_SIZE)
    p["w2"], p["b2"] = dense(keys[6], HIDDEN_SIZE, HIDDEN_SIZE)
    p["w3"], p["b3"] = dense(keys[7], HIDDEN_SIZE, OUT_FEATURES)
    # LayerNorm params
    p["g1"] = jnp.ones((1, EMBED_SIZE), jnp.float32)
    p["bt1"] = jnp.zeros((1, EMBED_SIZE), jnp.float32)
    p["g2"] = jnp.ones((1, EMBED_SIZE), jnp.float32)
    p["bt2"] = jnp.zeros((1, EMBED_SIZE), jnp.float32)
    # sinusoidal positional encoding table (matches PositionalEncoding.__init__)
    position = jnp.arange(NUM_AGENTS, dtype=jnp.float32)[:, None]
    div_term = jnp.exp(jnp.arange(0, EMBED_SIZE, 2, dtype=jnp.float32)
                       * -(math.log(10000.0) / EMBED_SIZE))
    enc = jnp.zeros((NUM_AGENTS, EMBED_SIZE), jnp.float32)
    enc = enc.at[:, 0::2].set(jnp.sin(position * div_term))
    enc = enc.at[:, 1::2].set(jnp.cos(position * div_term))
    p["pos"] = enc
    return p


if __name__ == "__main__":
    key = jax.random.PRNGKey(0)
    kx, kp = jax.random.split(key)
    x = jax.random.normal(kx, (NUM_STEPS, NUM_ENVS, NUM_AGENTS, STATE_SIZE), jnp.float32)
    params = make_params(kp)

    probs = policy_network_forward(x, params)
    probs = jax.block_until_ready(probs)

    ref = reference_forward(x, params)
    assert probs.shape == (NUM_STEPS, NUM_ENVS, NUM_AGENTS, OUT_FEATURES)
    # approx (EUP) reciprocal in the two softmaxes -> slightly looser tolerance than exact f32
    assert jnp.allclose(jnp.sum(probs, axis=-1), 1.0, atol=5e-3)
    assert jnp.allclose(probs, ref, atol=5e-3, rtol=5e-3)
    print("KERNEL_OK")
</pallas_src>

<mosaic_0001>
module attributes {stable_mosaic.version = 11 : i64} {
  func.func @policy_kernel(%arg0: i32, %arg1: memref<32x8x16xf32, #tpu.memory_space<vmem>>, %arg2: memref<200x128xf32, #tpu.memory_space<vmem>>, %arg3: memref<256x128xf32, #tpu.memory_space<vmem>>) attributes {dimension_semantics = [#tpu.dimension_semantics<parallel>], iteration_bounds = array<i64: 2>, scalar_prefetch = 0 : i64, scratch_operands = 0 : i64, tpu.core_type = #tpu.core_type<tc>, window_params = [{transform_indices = @transform_0, window_bounds = array<i64: 32, 8, 16>}, {pipeline_mode = #tpu.pipeline_mode<synchronous>, transform_indices = @transform_1, window_bounds = array<i64: 200, 128>}, {transform_indices = @transform_2, window_bounds = array<i64: 256, 128>}]} {
    %c0 = arith.constant 0 : index
    %c0_0 = arith.constant 0 : index
    %0 = vector.load %arg2[%c0, %c0_0] : memref<200x128xf32, #tpu.memory_space<vmem>>, vector<16x32xf32>
    %c16 = arith.constant 16 : index
    %c0_1 = arith.constant 0 : index
    %1 = vector.load %arg2[%c16, %c0_1] : memref<200x128xf32, #tpu.memory_space<vmem>>, vector<32x96xf32>
    %c80 = arith.constant 80 : index
    %c0_2 = arith.constant 0 : index
    %2 = vector.load %arg2[%c80, %c0_2] : memref<200x128xf32, #tpu.memory_space<vmem>>, vector<32x32xf32>
    %c112 = arith.constant 112 : index
    %c0_3 = arith.constant 0 : index
    %3 = vector.load %arg2[%c112, %c0_3] : memref<200x128xf32, #tpu.memory_space<vmem>>, vector<32x32xf32>
    %c144 = arith.constant 144 : index
    %c0_4 = arith.constant 0 : index
    %4 = vector.load %arg2[%c144, %c0_4] : memref<200x128xf32, #tpu.memory_space<vmem>>, vector<32x128xf32>
    %c176 = arith.constant 176 : index
    %c0_5 = arith.constant 0 : index
    %5 = vector.load %arg2[%c176, %c0_5] : memref<200x128xf32, #tpu.memory_space<vmem>>, vector<1x32xf32>
    %c177 = arith.constant 177 : index
    %c0_6 = arith.constant 0 : index
    %6 = vector.load %arg2[%c177, %c0_6] : memref<200x128xf32, #tpu.memory_space<vmem>>, vector<1x96xf32>
    %c178 = arith.constant 178 : index
    %c0_7 = arith.constant 0 : index
    %7 = vector.load %arg2[%c178, %c0_7] : memref<200x128xf32, #tpu.memory_space<vmem>>, vector<1x32xf32>
    %c179 = arith.constant 179 : index
    %c0_8 = arith.constant 0 : index
    %8 = vector.load %arg2[%c179, %c0_8] : memref<200x128xf32, #tpu.memory_space<vmem>>, vector<1x32xf32>
    %c180 = arith.constant 180 : index
    %c0_9 = arith.constant 0 : index
    %9 = vector.load %arg2[%c180, %c0_9] : memref<200x128xf32, #tpu.memory_space<vmem>>, vector<1x32xf32>
    %c181 = arith.constant 181 : index
    %c0_10 = arith.constant 0 : index
    %10 = vector.load %arg2[%c181, %c0_10] : memref<200x128xf32, #tpu.memory_space<vmem>>, vector<1x32xf32>
    %c182 = arith.constant 182 : index
    %c0_11 = arith.constant 0 : index
    %11 = vector.load %arg2[%c182, %c0_11] : memref<200x128xf32, #tpu.memory_space<vmem>>, vector<1x32xf32>
    %c183 = arith.constant 183 : index
    %c0_12 = arith.constant 0 : index
    %12 = vector.load %arg2[%c183, %c0_12] : memref<200x128xf32, #tpu.memory_space<vmem>>, vector<1x32xf32>
    %c184 = arith.constant 184 : index
    %c0_13 = arith.constant 0 : index
    %13 = vector.load %arg2[%c184, %c0_13] : memref<200x128xf32, #tpu.memory_space<vmem>>, vector<1x32xf32>
    %c185 = arith.constant 185 : index
    %c0_14 = arith.constant 0 : index
    %14 = vector.load %arg2[%c185, %c0_14] : memref<200x128xf32, #tpu.memory_space<vmem>>, vector<1x128xf32>
    %c186 = arith.constant 186 : index
    %c0_15 = arith.constant 0 : index
    %15 = vector.load %arg2[%c186, %c0_15] : memref<200x128xf32, #tpu.memory_space<vmem>>, vector<8x32xf32>
    %c0_16 = arith.constant 0 : index
    %c0_17 = arith.constant 0 : index
    %c0_18 = arith.constant 0 : index
    %16 = vector.load %arg1[%c0_16, %c0_17, %c0_18] : memref<32x8x16xf32, #tpu.memory_space<vmem>>, vector<32x8x16xf32>
    %17 = vector.shape_cast %16 : vector<32x8x16xf32> to vector<256x16xf32>
    %cst = arith.constant dense<0.000000e+00> : vector<256x32xf32>
    %18 = tpu.matmul %17, %0, %cst {dimension_numbers = #tpu.dot_dimension_numbers<[1], [0], [0], [1], [0, 0, 1, 1], [], []>} : vector<256x16xf32>, vector<16x32xf32>, vector<256x32xf32> -> vector<256x32xf32>
    %19 = vector.broadcast %5 : vector<1x32xf32> to vector<256x32xf32>
    %20 = arith.addf %18, %19 : vector<256x32xf32>
    %cst_19 = arith.constant 0.000000e+00 : f32
    %21 = vector.broadcast %cst_19 : f32 to vector<256x32xf32>
    %22 = arith.cmpf ogt, %20, %21 : vector<256x32xf32>
    %cst_20 = arith.constant 0.00999999977 : f32
    %23 = vector.broadcast %cst_20 : f32 to vector<256x32xf32>
    %24 = arith.mulf %23, %20 : vector<256x32xf32>
    %25 = arith.select %22, %20, %24 : vector<256x32xi1>, vector<256x32xf32>
    %26 = vector.shape_cast %25 : vector<256x32xf32> to vector<32x8x32xf32>
    %27 = vector.shape_cast %15 : vector<8x32xf32> to vector<1x8x32xf32>
    %28 = vector.broadcast %27 : vector<1x8x32xf32> to vector<32x8x32xf32>
    %29 = arith.addf %26, %28 : vector<32x8x32xf32>
    %30 = vector.shape_cast %29 : vector<32x8x32xf32> to vector<256x32xf32>
    %cst_21 = arith.constant dense<0.000000e+00> : vector<256xf32>
    %31 = vector.multi_reduction <add>, %30, %cst_21 [1] : vector<256x32xf32> to vector<256xf32>
    %32 = vector.shape_cast %31 : vector<256xf32> to vector<256x1xf32>
    %cst_22 = arith.constant 3.200000e+01 : f32
    %33 = vector.broadcast %cst_22 : f32 to vector<256x1xf32>
    %34 = arith.divf %32, %33 : vector<256x1xf32>
    %35 = vector.broadcast %34 : vector<256x1xf32> to vector<256x32xf32>
    %36 = arith.subf %30, %35 : vector<256x32xf32>
    %37 = arith.mulf %36, %36 : vector<256x32xf32>
    %cst_23 = arith.constant dense<0.000000e+00> : vector<256xf32>
    %38 = vector.multi_reduction <add>, %37, %cst_23 [1] : vector<256x32xf32> to vector<256xf32>
    %39 = vector.shape_cast %38 : vector<256xf32> to vector<256x1xf32>
    %cst_24 = arith.constant 3.200000e+01 : f32
    %40 = vector.broadcast %cst_24 : f32 to vector<256x1xf32>
    %41 = arith.divf %39, %40 : vector<256x1xf32>
    %42 = vector.broadcast %34 : vector<256x1xf32> to vector<256x32xf32>
    %43 = arith.subf %30, %42 : vector<256x32xf32>
    %cst_25 = arith.constant 9.99999974E-6 : f32
    %44 = vector.broadcast %cst_25 : f32 to vector<256x1xf32>
    %45 = arith.addf %41, %44 : vector<256x1xf32>
    %46 = math.rsqrt %45 : vector<256x1xf32>
    %47 = vector.broadcast %46 : vector<256x1xf32> to vector<256x32xf32>
    %48 = arith.mulf %43, %47 : vector<256x32xf32>
    %49 = vector.broadcast %8 : vector<1x32xf32> to vector<256x32xf32>
    %50 = arith.mulf %48, %49 : vector<256x32xf32>
    %51 = vector.broadcast %9 : vector<1x32xf32> to vector<256x32xf32>
    %52 = arith.addf %50, %51 : vector<256x32xf32>
    %cst_26 = arith.constant dense<0.000000e+00> : vector<256x96xf32>
    %53 = tpu.matmul %52, %1, %cst_26 {dimension_numbers = #tpu.dot_dimension_numbers<[1], [0], [0], [1], [0, 0, 1, 1], [], []>} : vector<256x32xf32>, vector<32x96xf32>, vector<256x96xf32> -> vector<256x96xf32>
    %54 = vector.broadcast %6 : vector<1x96xf32> to vector<256x96xf32>
    %55 = arith.addf %53, %54 : vector<256x96xf32>
    %56 = vector.extract_strided_slice %55 {offsets = [0, 0], sizes = [256, 32], strides = [1, 1]} : vector<256x96xf32> to vector<256x32xf32>
    %57 = vector.shape_cast %56 : vector<256x32xf32> to vector<32x8x32xf32>
    %58 = vector.extract_strided_slice %55 {offsets = [0, 32], sizes = [256, 32], strides = [1, 1]} : vector<256x96xf32> to vector<256x32xf32>
    %59 = vector.shape_cast %58 : vector<256x32xf32> to vector<32x8x32xf32>
    %60 = vector.extract_strided_slice %55 {offsets = [0, 64], sizes = [256, 32], strides = [1, 1]} : vector<256x96xf32> to vector<256x32xf32>
    %61 = vector.shape_cast %60 : vector<256x32xf32> to vector<32x8x32xf32>
    %cst_27 = arith.constant 0.000000e+00 : f32
    %62 = vector.broadcast %cst_27 : f32 to vector<256x32xf32>
    %63 = vector.extract_strided_slice %57 {offsets = [0, 0, 0], sizes = [32, 8, 16], strides = [1, 1, 1]} : vector<32x8x32xf32> to vector<32x8x16xf32>
    %64 = vector.extract_strided_slice %59 {offsets = [0, 0, 0], sizes = [32, 8, 16], strides = [1, 1, 1]} : vector<32x8x32xf32> to vector<32x8x16xf32>
    %65 = vector.extract_strided_slice %61 {offsets = [0, 0, 0], sizes = [32, 8, 16], strides = [1, 1, 1]} : vector<32x8x32xf32> to vector<32x8x16xf32>
    "tpu.trace_start"() <{level = 10 : i32, message = "bad,bcd->bac"}> : () -> ()
    %cst_28 = arith.constant dense<0.000000e+00> : vector<32x8x8xf32>
    %66 = tpu.matmul %63, %64, %cst_28 {dimension_numbers = #tpu.dot_dimension_numbers<[2], [2], [1], [1], [0, 0, 0, 1, 1, 1], [0], [0]>} : vector<32x8x16xf32>, vector<32x8x16xf32>, vector<32x8x8xf32> -> vector<32x8x8xf32>
    "tpu.trace_stop"() : () -> ()
    %cst_29 = arith.constant 2.500000e-01 : f32
    %67 = vector.broadcast %cst_29 : f32 to vector<32x8x8xf32>
    %68 = arith.mulf %66, %67 : vector<32x8x8xf32>
    %cst_30 = arith.constant dense<0xFF800000> : vector<32x8xf32>
    %69 = vector.multi_reduction <maximumf>, %68, %cst_30 [2] : vector<32x8x8xf32> to vector<32x8xf32>
    %70 = vector.shape_cast %69 : vector<32x8xf32> to vector<32x8x1xf32>
    %71 = vector.broadcast %70 : vector<32x8x1xf32> to vector<32x8x8xf32>
    %72 = arith.subf %68, %71 : vector<32x8x8xf32>
    %73 = math.exp %72 : vector<32x8x8xf32>
    %cst_31 = arith.constant dense<0.000000e+00> : vector<32x8xf32>
    %74 = vector.multi_reduction <add>, %73, %cst_31 [2] : vector<32x8x8xf32> to vector<32x8xf32>
    %75 = vector.shape_cast %74 : vector<32x8xf32> to vector<32x8x1xf32>
    %76 = tpu.reciprocal %75 {approx = true} : vector<32x8x1xf32> -> vector<32x8x1xf32>
    %77 = vector.broadcast %76 : vector<32x8x1xf32> to vector<32x8x8xf32>
    %78 = arith.mulf %73, %77 : vector<32x8x8xf32>
    "tpu.trace_start"() <{level = 10 : i32, message = "bac,bcd->bad"}> : () -> ()
    %cst_32 = arith.constant dense<0.000000e+00> : vector<32x8x16xf32>
    %79 = tpu.matmul %78, %65, %cst_32 {dimension_numbers = #tpu.dot_dimension_numbers<[2], [1], [1], [2], [0, 0, 0, 1, 1, 2], [0], [0]>} : vector<32x8x8xf32>, vector<32x8x16xf32>, vector<32x8x16xf32> -> vector<32x8x16xf32>
    "tpu.trace_stop"() : () -> ()
    %c48 = arith.constant 48 : index
    %c0_33 = arith.constant 0 : index
    %80 = vector.load %arg2[%c48, %c0_33] : memref<200x128xf32, #tpu.memory_space<vmem>>, vector<16x32xf32>
    %81 = vector.shape_cast %79 : vector<32x8x16xf32> to vector<256x16xf32>
    %cst_34 = arith.constant dense<0.000000e+00> : vector<256x32xf32>
    %82 = tpu.matmul %81, %80, %cst_34 {dimension_numbers = #tpu.dot_dimension_numbers<[1], [0], [0], [1], [0, 0, 1, 1], [], []>} : vector<256x16xf32>, vector<16x32xf32>, vector<256x32xf32> -> vector<256x32xf32>
    %83 = arith.addf %62, %82 : vector<256x32xf32>
    %84 = vector.extract_strided_slice %57 {offsets = [0, 0, 16], sizes = [32, 8, 16], strides = [1, 1, 1]} : vector<32x8x32xf32> to vector<32x8x16xf32>
    %85 = vector.extract_strided_slice %59 {offsets = [0, 0, 16], sizes = [32, 8, 16], strides = [1, 1, 1]} : vector<32x8x32xf32> to vector<32x8x16xf32>
    %86 = vector.extract_strided_slice %61 {offsets = [0, 0, 16], sizes = [32, 8, 16], strides = [1, 1, 1]} : vector<32x8x32xf32> to vector<32x8x16xf32>
    "tpu.trace_start"() <{level = 10 : i32, message = "bad,bcd->bac"}> : () -> ()
    %cst_35 = arith.constant dense<0.000000e+00> : vector<32x8x8xf32>
    %87 = tpu.matmul %84, %85, %cst_35 {dimension_numbers = #tpu.dot_dimension_numbers<[2], [2], [1], [1], [0, 0, 0, 1, 1, 1], [0], [0]>} : vector<32x8x16xf32>, vector<32x8x16xf32>, vector<32x8x8xf32> -> vector<32x8x8xf32>
    "tpu.trace_stop"() : () -> ()
    %cst_36 = arith.constant 2.500000e-01 : f32
    %88 = vector.broadcast %cst_36 : f32 to vector<32x8x8xf32>
    %89 = arith.mulf %87, %88 : vector<32x8x8xf32>
    %cst_37 = arith.constant dense<0xFF800000> : vector<32x8xf32>
    %90 = vector.multi_reduction <maximumf>, %89, %cst_37 [2] : vector<32x8x8xf32> to vector<32x8xf32>
    %91 = vector.shape_cast %90 : vector<32x8xf32> to vector<32x8x1xf32>
    %92 = vector.broadcast %91 : vector<32x8x1xf32> to vector<32x8x8xf32>
    %93 = arith.subf %89, %92 : vector<32x8x8xf32>
    %94 = math.exp %93 : vector<32x8x8xf32>
    %cst_38 = arith.constant dense<0.000000e+00> : vector<32x8xf32>
    %95 = vector.multi_reduction <add>, %94, %cst_38 [2] : vector<32x8x8xf32> to vector<32x8xf32>
    %96 = vector.shape_cast %95 : vector<32x8xf32> to vector<32x8x1xf32>
    %97 = tpu.reciprocal %96 {approx = true} : vector<32x8x1xf32> -> vector<32x8x1xf32>
    %98 = vector.broadcast %97 : vector<32x8x1xf32> to vector<32x8x8xf32>
    %99 = arith.mulf %94, %98 : vector<32x8x8xf32>
    "tpu.trace_start"() <{level = 10 : i32, message = "bac,bcd->bad"}> : () -> ()
    %cst_39 = arith.constant dense<0.000000e+00> : vector<32x8x16xf32>
    %100 = tpu.matmul %99, %86, %cst_39 {dimension_numbers = #tpu.dot_dimension_numbers<[2], [1], [1], [2], [0, 0, 0, 1, 1, 2], [0], [0]>} : vector<32x8x8xf32>, vector<32x8x16xf32>, vector<32x8x16xf32> -> vector<32x8x16xf32>
    "tpu.trace_stop"() : () -> ()
    %c64 = arith.constant 64 : index
    %c0_40 = arith.constant 0 : index
    %101 = vector.load %arg2[%c64, %c0_40] : memref<200x128xf32, #tpu.memory_space<vmem>>, vector<16x32xf32>
    %102 = vector.shape_cast %100 : vector<32x8x16xf32> to vector<256x16xf32>
    %cst_41 = arith.constant dense<0.000000e+00> : vector<256x32xf32>
    %103 = tpu.matmul %102, %101, %cst_41 {dimension_numbers = #tpu.dot_dimension_numbers<[1], [0], [0], [1], [0, 0, 1, 1], [], []>} : vector<256x16xf32>, vector<16x32xf32>, vector<256x32xf32> -> vector<256x32xf32>
    %104 = arith.addf %83, %103 : vector<256x32xf32>
    %105 = vector.broadcast %7 : vector<1x32xf32> to vector<256x32xf32>
    %106 = arith.addf %104, %105 : vector<256x32xf32>
    %107 = arith.addf %30, %106 : vector<256x32xf32>
    %cst_42 = arith.constant dense<0.000000e+00> : vector<256xf32>
    %108 = vector.multi_reduction <add>, %107, %cst_42 [1] : vector<256x32xf32> to vector<256xf32>
    %109 = vector.shape_cast %108 : vector<256xf32> to vector<256x1xf32>
    %cst_43 = arith.constant 3.200000e+01 : f32
    %110 = vector.broadcast %cst_43 : f32 to vector<256x1xf32>
    %111 = arith.divf %109, %110 : vector<256x1xf32>
    %112 = vector.broadcast %111 : vector<256x1xf32> to vector<256x32xf32>
    %113 = arith.subf %107, %112 : vector<256x32xf32>
    %114 = arith.mulf %113, %113 : vector<256x32xf32>
    %cst_44 = arith.constant dense<0.000000e+00> : vector<256xf32>
    %115 = vector.multi_reduction <add>, %114, %cst_44 [1] : vector<256x32xf32> to vector<256xf32>
    %116 = vector.shape_cast %115 : vector<256xf32> to vector<256x1xf32>
    %cst_45 = arith.constant 3.200000e+01 : f32
    %117 = vector.broadcast %cst_45 : f32 to vector<256x1xf32>
    %118 = arith.divf %116, %117 : vector<256x1xf32>
    %119 = vector.broadcast %111 : vector<256x1xf32> to vector<256x32xf32>
    %120 = arith.subf %107, %119 : vector<256x32xf32>
    %cst_46 = arith.constant 9.99999974E-6 : f32
    %121 = vector.broadcast %cst_46 : f32 to vector<256x1xf32>
    %122 = arith.addf %118, %121 : vector<256x1xf32>
    %123 = math.rsqrt %122 : vector<256x1xf32>
    %124 = vector.broadcast %123 : vector<256x1xf32> to vector<256x32xf32>
    %125 = arith.mulf %120, %124 : vector<256x32xf32>
    %126 = vector.broadcast %10 : vector<1x32xf32> to vector<256x32xf32>
    %127 = arith.mulf %125, %126 : vector<256x32xf32>
    %128 = vector.broadcast %11 : vector<1x32xf32> to vector<256x32xf32>
    %129 = arith.addf %127, %128 : vector<256x32xf32>
    %cst_47 = arith.constant dense<0.000000e+00> : vector<256x32xf32>
    %130 = tpu.matmul %129, %2, %cst_47 {dimension_numbers = #tpu.dot_dimension_numbers<[1], [0], [0], [1], [0, 0, 1, 1], [], []>} : vector<256x32xf32>, vector<32x32xf32>, vector<256x32xf32> -> vector<256x32xf32>
    %131 = vector.broadcast %12 : vector<1x32xf32> to vector<256x32xf32>
    %132 = arith.addf %130, %131 : vector<256x32xf32>
    %cst_48 = arith.constant 0.000000e+00 : f32
    %133 = vector.broadcast %cst_48 : f32 to vector<256x32xf32>
    %134 = arith.cmpf ogt, %132, %133 : vector<256x32xf32>
    %cst_49 = arith.constant 0.00999999977 : f32
    %135 = vector.broadcast %cst_49 : f32 to vector<256x32xf32>
    %136 = arith.mulf %135, %132 : vector<256x32xf32>
    %137 = arith.select %134, %132, %136 : vector<256x32xi1>, vector<256x32xf32>
    %cst_50 = arith.constant dense<0.000000e+00> : vector<256x32xf32>
    %138 = tpu.matmul %137, %3, %cst_50 {dimension_numbers = #tpu.dot_dimension_numbers<[1], [0], [0], [1], [0, 0, 1, 1], [], []>} : vector<256x32xf32>, vector<32x32xf32>, vector<256x32xf32> -> vector<256x32xf32>
    %139 = vector.broadcast %13 : vector<1x32xf32> to vector<256x32xf32>
    %140 = arith.addf %138, %139 : vector<256x32xf32>
    %cst_51 = arith.constant 0.000000e+00 : f32
    %141 = vector.broadcast %cst_51 : f32 to vector<256x32xf32>
    %142 = arith.cmpf ogt, %140, %141 : vector<256x32xf32>
    %cst_52 = arith.constant 0.00999999977 : f32
    %143 = vector.broadcast %cst_52 : f32 to vector<256x32xf32>
    %144 = arith.mulf %143, %140 : vector<256x32xf32>
    %145 = arith.select %142, %140, %144 : vector<256x32xi1>, vector<256x32xf32>
    %cst_53 = arith.constant dense<0.000000e+00> : vector<256x128xf32>
    %146 = tpu.matmul %145, %4, %cst_53 {dimension_numbers = #tpu.dot_dimension_numbers<[1], [0], [0], [1], [0, 0, 1, 1], [], []>} : vector<256x32xf32>, vector<32x128xf32>, vector<256x128xf32> -> vector<256x128xf32>
    %147 = vector.broadcast %14 : vector<1x128xf32> to vector<256x128xf32>
    %148 = arith.addf %146, %147 : vector<256x128xf32>
    %149 = tpu.iota {dimensions = array<i32: 1>} : vector<1x128xi32>
    %c6_i32 = arith.constant 6 : i32
    %150 = vector.broadcast %c6_i32 : i32 to vector<1x128xi32>
    %151 = arith.cmpi slt, %149, %150 : vector<1x128xi32>
    %cst_54 = arith.constant -1.000000e+30 : f32
    %152 = vector.shape_cast %151 : vector<1x128xi1> to vector<1x128xi1>
    %153 = vector.broadcast %152 : vector<1x128xi1> to vector<256x128xi1>
    %154 = vector.broadcast %cst_54 : f32 to vector<256x128xf32>
    %155 = arith.select %153, %148, %154 : vector<256x128xi1>, vector<256x128xf32>
    %cst_55 = arith.constant dense<0xFF800000> : vector<256xf32>
    %156 = vector.multi_reduction <maximumf>, %155, %cst_55 [1] : vector<256x128xf32> to vector<256xf32>
    %157 = vector.shape_cast %156 : vector<256xf32> to vector<256x1xf32>
    %158 = vector.broadcast %157 : vector<256x1xf32> to vector<256x128xf32>
    %159 = arith.subf %155, %158 : vector<256x128xf32>
    %160 = math.exp %159 : vector<256x128xf32>
    %cst_56 = arith.constant dense<0.000000e+00> : vector<256xf32>
    %161 = vector.multi_reduction <add>, %160, %cst_56 [1] : vector<256x128xf32> to vector<256xf32>
    %162 = vector.shape_cast %161 : vector<256xf32> to vector<256x1xf32>
    %163 = tpu.reciprocal %162 {approx = true} : vector<256x1xf32> -> vector<256x1xf32>
    %164 = vector.broadcast %163 : vector<256x1xf32> to vector<256x128xf32>
    %165 = arith.mulf %160, %164 : vector<256x128xf32>
    %c0_57 = arith.constant 0 : index
    %c0_58 = arith.constant 0 : index
    %166 = vector.load %arg3[%c0_57, %c0_58] : memref<256x128xf32, #tpu.memory_space<vmem>>, vector<256x128xf32>
    tpu.vector_store %arg3[%c0_57, %c0_58], %165 {strides = array<i32>} : memref<256x128xf32, #tpu.memory_space<vmem>>, vector<256x128xf32>,
    return
  }
  func.func @transform_0(%arg0: i32) -> (i32, i32, i32) {
    %c0_i32 = arith.constant 0 : i32
    %c0_i32_0 = arith.constant 0 : i32
    %c0_i32_1 = arith.constant 0 : i32
    return %arg0, %c0_i32, %c0_i32_0 : i32, i32, i32
  }
  func.func @transform_1(%arg0: i32) -> (i32, i32) {
    %c0_i32 = arith.constant 0 : i32
    %c0_i32_0 = arith.constant 0 : i32
    %c0_i32_1 = arith.constant 0 : i32
    return %c0_i32, %c0_i32_0 : i32, i32
  }
  func.func @transform_2(%arg0: i32) -> (i32, i32) {
    %c0_i32 = arith.constant 0 : i32
    %c0_i32_0 = arith.constant 0 : i32
    return %arg0, %c0_i32 : i32, i32
  }
}

</mosaic_0001>

<bundles_post_ra>
// kernel: policy_network_forward.1
= control target key start
LH: loop header
LB: loop body
LE: loop exit
PB: predicated region body
PF: predicated region fallthrough
CT: control target
= control target key end

     0   :  { %s17448_s9 = smov 0   ;;  %s21348_s0 = inlined_call_operand.vmem [shape: f32[64,8,16], index: 0, kind: input, shape index: {}]   ;;  %s21349_s1 = inlined_call_operand.vmem [shape: f32[200,128], index: 1, kind: input, shape index: {}]   ;;  %s21350_s2 = inlined_call_operand.vmem [shape: f32[512,128], index: 2, kind: output, shape index: {}]  }
   0x1 LB: > { %s14852_s10 = sadd.s32 4294967295, %s17424_s9   ;;  %p14856_p0 = scmp.ge.s32.totalorder %s17424_s9, 1  ;;  %s17424_s9 = sphi %s17448_s9, %s12_s9  }
   0x2   : > { %p113_p1 = scmp.lt.s32.totalorder %s17424_s9, 3 }
   0x4   : > { %p114_p2 = pnand %p14856_p0, %p113_p1 }
   0x6   : > { %117 = sbr.rel (%p114_p2) target bundleno = 3920 (0xf50), region = 28 }
   0xd   : > { %v147_v0 = vld [vmem:[%s21349_s1] sm:$0xff]  ;;  %v148_v1 = vld [vmem:[%s21349_s1 + $0x8] sm:$0xff]  ;;  %s14857_s15 = sshll.u32 %s14852_s10, 5  ;;  %vm212_vm0 = vcmask 130048   ;;  %v17539_v35 = vld [vmem:[%s21349_s1 + $0xb0] ss:$0 sm:$0xff] }
   0xe   : > { %v16811_v2 = vpack.c.bf16 %v148_v1, %v147_v0  ;;  %p136_p3 = scmp.lt.s32.totalorder %s14857_s15, 63  ;;  %v17546_v43 = vld [vmem:[%s21349_s1 + $0xba] sm:$0xff]  ;;  %vm662_vm3 = vcmask 261120   ;;  %s17428_s11 = smov 96  }
   0xf   : > { %s17429_s12 = smov 64   ;;  %s17430_s13 = smov 80  }
  0x10   : > { %16812 = vmatprep.subr.bf16.mxu0 %v16811_v2  ;;  %s21713_s15 = smov (!%p136_p3, %s14857_s15), 63  ;;  %s17431_s14 = smov 112  }
  0x11   : > { %16814 = vmatpush3.bf16.msra.mxu0 %v16811_v2  ;;  %s14858_s16 = sshll.u32 %s21713_s15, 3  ;;  %s17432_s17 = smov 48  }
  0x12   : > { %s17470_s19 = scalar_lea.vmem %s21348_s0, %s14858_s16 }
  0x13   : > { %v176_v3 = vld [vmem:[%s17470_s19] sm:$0xff]  ;;  %v177_v4 = vld [vmem:[%s17470_s19 + $0x8] sm:$0xff]  ;;  %v178_v5 = vld [vmem:[%s17470_s19 + $0x10] sm:$0xff] }
  0x14   : > { %15795 = vmatprep.mubr.msk.f32.mxu0 %vm212_vm0, %v176_v3  ;;  %v179_v6 = vld [vmem:[%s17470_s19 + $0x18] sm:$0xff]  ;;  %v180_v7 = vld [vmem:[%s17470_s19 + $0x20] sm:$0xff]  ;;  %v181_v8 = vld [vmem:[%s17470_s19 + $0x28] sm:$0xff] }
  0x15   : > { %15796 = vmatmul.mubr.msk.f32.vlgmr.msra.gmra.mrb[0].mxu0 %vm212_vm0, %v177_v4  ;;  %v182_v9 = vld [vmem:[%s17470_s19 + $0x30] sm:$0xff]  ;;  %v183_v10 = vld [vmem:[%s17470_s19 + $0x38] sm:$0xff]  ;;  %v184_v11 = vld [vmem:[%s17470_s19 + $0x40] sm:$0xff] }
  0x16   : > { %15798 = vmatprep.mubr.msk.f32.mxu0 %vm212_vm0, %v178_v5  ;;  %v185_v12 = vld [vmem:[%s17470_s19 + $0x48] sm:$0xff]  ;;  %v186_v13 = vld [vmem:[%s17470_s19 + $0x50] sm:$0xff]  ;;  %v187_v14 = vld [vmem:[%s17470_s19 + $0x58] sm:$0xff] }
  0x17   : > { %v188_v15 = vld [vmem:[%s17470_s19 + $0x60] sm:$0xff]  ;;  %v189_v16 = vld [vmem:[%s17470_s19 + $0x68] sm:$0xff]  ;;  %v190_v17 = vld [vmem:[%s17470_s19 + $0x70] sm:$0xff] }
  0x18   : > { %v191_v18 = vld [vmem:[%s17470_s19 + $0x78] sm:$0xff]  ;;  %v192_v19 = vld [vmem:[%s17470_s19 + $0x80] sm:$0xff]  ;;  %v193_v20 = vld [vmem:[%s17470_s19 + $0x88] sm:$0xff] }
  0x19   : > { %15799 = vmatmul.mubr.msk.f32.gmra.mrb[2].mxu0 %vm212_vm0, %v179_v6  ;;  %v194_v21 = vld [vmem:[%s17470_s19 + $0x90] sm:$0xff]  ;;  %v195_v22 = vld [vmem:[%s17470_s19 + $0x98] sm:$0xff]  ;;  %v196_v23 = vld [vmem:[%s17470_s19 + $0xa0] sm:$0xff] }
  0x1a   : > { %15801 = vmatprep.mubr.msk.f32.mxu0 %vm212_vm0, %v180_v7  ;;  %v197_v24 = vld [vmem:[%s17470_s19 + $0xa8] sm:$0xff]  ;;  %v198_v25 = vld [vmem:[%s17470_s19 + $0xb0] sm:$0xff]  ;;  %v199_v26 = vld [vmem:[%s17470_s19 + $0xb8] sm:$0xff] }
  0x1b   : > { %v200_v27 = vld [vmem:[%s17470_s19 + $0xc0] sm:$0xff]  ;;  %v201_v28 = vld [vmem:[%s17470_s19 + $0xc8] sm:$0xff]  ;;  %v202_v29 = vld [vmem:[%s17470_s19 + $0xd0] sm:$0xff] }
  0x1c   : > { %v203_v30 = vld [vmem:[%s17470_s19 + $0xd8] sm:$0xff]  ;;  %v204_v31 = vld [vmem:[%s17470_s19 + $0xe0] sm:$0xff]  ;;  %v205_v32 = vld [vmem:[%s17470_s19 + $0xe8] sm:$0xff] }
  0x1d   : > { %15802 = vmatmul.mubr.msk.f32.gmra.mrb[4].mxu0 %vm212_vm0, %v181_v8  ;;  %v206_v33 = vld [vmem:[%s17470_s19 + $0xf0] sm:$0xff]  ;;  %v207_v34 = vld [vmem:[%s17470_s19 + $0xf8] sm:$0xff] }
  0x1e   : > { %15804 = vmatprep.mubr.msk.f32.mxu0 %vm212_vm0, %v182_v9 }
  0x21   : > { %15805 = vmatmul.mubr.msk.f32.gmra.mrb[6].mxu0 %vm212_vm0, %v183_v10 }
  0x22   : > { %15807 = vmatprep.mubr.msk.f32.mxu0 %vm212_vm0, %v184_v11 }
  0x25   : > { %15808 = vmatmul.mubr.msk.f32.gmra.mrb[8].mxu0 %vm212_vm0, %v185_v12 }
  0x26   : > { %15810 = vmatprep.mubr.msk.f32.mxu0 %vm212_vm0, %v186_v13 }
  0x29   : > { %15811 = vmatmul.mubr.msk.f32.gmra.mrb[10].mxu0 %vm212_vm0, %v187_v14 }
  0x2a   : > { %15813 = vmatprep.mubr.msk.f32.mxu0 %vm212_vm0, %v188_v15 }
  0x2d   : > { %15814 = vmatmul.mubr.msk.f32.gmra.mrb[12].mxu0 %vm212_vm0, %v189_v16 }
  0x2e   : > { %15816 = vmatprep.mubr.msk.f32.mxu0 %vm212_vm0, %v190_v17 }
  0x31   : > { %15817 = vmatmul.mubr.msk.f32.gmra.mrb[14].mxu0 %vm212_vm0, %v191_v18 }
  0x32   : > { %15819 = vmatprep.mubr.msk.f32.mxu0 %vm212_vm0, %v192_v19 }
  0x35   : > { %15820 = vmatmul.mubr.msk.f32.gmra.mrb[16].mxu0 %vm212_vm0, %v193_v20 }
  0x36   : > { %15822 = vmatprep.mubr.msk.f32.mxu0 %vm212_vm0, %v194_v21 }
  0x39   : > { %15823 = vmatmul.mubr.msk.f32.gmra.mrb[18].mxu0 %vm212_vm0, %v195_v22 }
  0x3a   : > { %15825 = vmatprep.mubr.msk.f32.mxu0 %vm212_vm0, %v196_v23 }
  0x3d   : > { %15826 = vmatmul.mubr.msk.f32.gmra.mrb[20].mxu0 %vm212_vm0, %v197_v24 }
  0x3e   : > { %15828 = vmatprep.mubr.msk.f32.mxu0 %vm212_vm0, %v198_v25 }
  0x41   : > { %15829 = vmatmul.mubr.msk.f32.gmra.mrb[22].mxu0 %vm212_vm0, %v199_v26 }
  0x42   : > { %15831 = vmatprep.mubr.msk.f32.mxu0 %vm212_vm0, %v200_v27 }
  0x45   : > { %15832 = vmatmul.mubr.msk.f32.gmra.mrb[24].mxu0 %vm212_vm0, %v201_v28 }
  0x46   : > { %15834 = vmatprep.mubr.msk.f32.mxu0 %vm212_vm0, %v202_v29 }
  0x49   : > { %15835 = vmatmul.mubr.msk.f32.gmra.mrb[26].mxu0 %vm212_vm0, %v203_v30 }
  0x4a   : > { %15837 = vmatprep.mubr.msk.f32.mxu0 %vm212_vm0, %v204_v31 }
  0x4d   : > { %15838 = vmatmul.mubr.msk.f32.gmra.mrb[28].mxu0 %vm212_vm0, %v205_v32 }
  0x4e   : > { %15840 = vmatprep.mubr.msk.f32.mxu0 %vm212_vm0, %v206_v33 }
  0x51   : > { %15841 = vmatmul.mubr.msk.f32.gmra.mrb[30].mxu0 %vm212_vm0, %v207_v34 }
  0xe8   : > { %v15797_v36 = vpop.f32.mrb[0].mxu0 }
  0xe9   : > { %v381_v37 = vadd.f32 %v15797_v36, %v17539_v35  ;;  %v375_v38 = vpop.f32.mrb[1].mxu0 }
  0xea   : > { %v376_v39 = vadd.f32 %v17539_v35, %v375_v38 }
  0xeb   : > { %vm535_vm1 = vcmp.gt.f32.partialorder %v381_v37, 0.0  ;;  %v567_v40 = vmul.f32 0.01, %v381_v37 }
  0xec   : > { %vm534_vm2 = vcmp.gt.f32.partialorder %v376_v39, 0.0  ;;  %v566_v41 = vmul.f32 0.01, %v376_v39  ;;  %v15800_v42 = vpop.f32.mrb[2].mxu0 }
  0xed   : > { %v599_v44 = vsel %vm535_vm1, %v381_v37, %v567_v40  ;;  %v391_v45 = vadd.f32 %v15800_v42, %v17539_v35  ;;  %v385_v46 = vpop.f32.mrb[3].mxu0 }
  0xee   : > { %v598_v47 = vsel %vm534_vm2, %v376_v39, %v566_v41  ;;  %v386_v48 = vadd.f32 %v17539_v35, %v385_v46  ;;  %v17554_v53 = vadd.f32 %v599_v44, %v17546_v43 }
  0xef   : > { %vm537_vm4 = vcmp.gt.f32.partialorder %v391_v45, 0.0  ;;  %v569_v49 = vmul.f32 0.01, %v391_v45  ;;  %v17551_v50 = vadd.f32 %v598_v47, %v17546_v43 }
  0xf0   : > { %vm536_vm5 = vcmp.gt.f32.partialorder %v386_v48, 0.0  ;;  %v568_v51 = vmul.f32 0.01, %v386_v48  ;;  %v15803_v52 = vpop.f32.mrb[4].mxu0  ;;  %21414 = vst [vmem:[#allocation3_spill] sm:$0xff] %v17554_v53  ;;  %v666_v0 = vsel %vm662_vm3, %v17554_v53, 0.0 }
  0xf1   : > { %21413 = vst [vmem:[#allocation2_spill] sm:$0xff] %v17551_v50  ;;  %v401_v54 = vadd.f32 %v15803_v52, %v17539_v35  ;;  %v395_v55 = vpop.f32.mrb[5].mxu0  ;;  %v663_v56 = vsel %vm662_vm3, %v17551_v50, 0.0  ;;  %v601_v57 = vsel %vm537_vm4, %v391_v45, %v569_v49 }
  0xf2   : > { %v600_v58 = vsel %vm536_vm5, %v386_v48, %v568_v51  ;;  %v396_v59 = vadd.f32 %v17539_v35, %v395_v55  ;;  %664 = vadd.xlane.f32.xlu0 %v663_v56  ;;  %v17569_v5 = vadd.f32 %v601_v57, %v17546_v43 }
  0xf3   : > { %vm539_vm6 = vcmp.gt.f32.partialorder %v401_v54, 0.0  ;;  %v571_v60 = vmul.f32 0.01, %v401_v54  ;;  %v17561_v61 = vadd.f32 %v600_v58, %v17546_v43 }
  0xf4   : > { %vm538_vm7 = vcmp.gt.f32.partialorder %v396_v59, 0.0  ;;  %v570_v62 = vmul.f32 0.01, %v396_v59  ;;  %v15806_v63 = vpop.f32.mrb[6].mxu0  ;;  %21416 = vst [vmem:[#allocation5_spill] sm:$0xff] %v17569_v5  ;;  %v672_v16 = vsel %vm662_vm3, %v17569_v5, 0.0 }
  0xf5   : > { %21415 = vst [vmem:[#allocation4_spill] sm:$0xff] %v17561_v61  ;;  %v603_v1 = vsel %vm539_vm6, %v401_v54, %v571_v60  ;;  %v411_v2 = vadd.f32 %v15806_v63, %v17539_v35  ;;  %v405_v3 = vpop.f32.mrb[7].mxu0  ;;  %v669_v4 = vsel %vm662_vm3, %v17561_v61, 0.0 }
  0xf6   : > { %v602_v6 = vsel %vm538_vm7, %v396_v59, %v570_v62  ;;  %v406_v7 = vadd.f32 %v17539_v35, %v405_v3  ;;  %670 = vadd.xlane.f32.xlu1 %v669_v4  ;;  %667 = vadd.xlane.f32.xlu0 %v666_v0  ;;  %v17576_v10 = vadd.f32 %v603_v1, %v17546_v43 }
  0xf7   : > { %vm541_vm8 = vcmp.gt.f32.partialorder %v411_v2, 0.0  ;;  %v573_v8 = vmul.f32 0.01, %v411_v2  ;;  %v17573_v9 = vadd.f32 %v602_v6, %v17546_v43 }
  0xf8   : > { %21418 = vst [vmem:[#allocation7_spill] sm:$0xff] %v17576_v10  ;;  %vm540_vm9 = vcmp.gt.f32.partialorder %v406_v7, 0.0  ;;  %v572_v11 = vmul.f32 0.01, %v406_v7  ;;  %v15809_v12 = vpop.f32.mrb[8].mxu0  ;;  %v678_v22 = vsel %vm662_vm3, %v17576_v10, 0.0 }
  0xf9   : > { %21417 = vst [vmem:[#allocation6_spill] sm:$0xff] %v17573_v9  ;;  %v605_v13 = vsel %vm541_vm8, %v411_v2, %v573_v8  ;;  %v421_v14 = vadd.f32 %v15809_v12, %v17539_v35  ;;  %v415_v15 = vpop.f32.mrb[9].mxu0  ;;  %v675_v17 = vsel %vm662_vm3, %v17573_v9, 0.0 }
  0xfa   : > { %v604_v18 = vsel %vm540_vm9, %v406_v7, %v572_v11  ;;  %v416_v19 = vadd.f32 %v17539_v35, %v415_v15  ;;  %673 = vadd.xlane.f32.xlu1 %v672_v16  ;;  %676 = vadd.xlane.f32.xlu0 %v675_v17  ;;  %v17585_v20 = vadd.f32 %v605_v13, %v17546_v43 }
  0xfb   : > { %vm543_vm10 = vcmp.gt.f32.partialorder %v421_v14, 0.0  ;;  %v575_v21 = vmul.f32 0.01, %v421_v14  ;;  %v17590_v23 = vadd.f32 %v604_v18, %v17546_v43 }
  0xfc   : > { %21419 = vst [vmem:[#allocation8_spill] sm:$0xff] %v17585_v20  ;;  %vm542_vm11 = vcmp.gt.f32.partialorder %v416_v19, 0.0  ;;  %v574_v24 = vmul.f32 0.01, %v416_v19  ;;  %v15812_v25 = vpop.f32.mrb[10].mxu0  ;;  %v684_v32 = vsel %vm662_vm3, %v17585_v20, 0.0 }
  0xfd   : > { %21420 = vst [vmem:[#allocation9_spill] sm:$0xff] %v17590_v23  ;;  %v607_v26 = vsel %vm543_vm10, %v421_v14, %v575_v21  ;;  %v431_v27 = vadd.f32 %v15812_v25, %v17539_v35  ;;  %v425_v28 = vpop.f32.mrb[11].mxu0  ;;  %v681_v29 = vsel %vm662_vm3, %v17590_v23, 0.0 }
  0xfe   : > { %v606_v30 = vsel %vm542_vm11, %v416_v19, %v574_v24  ;;  %v426_v31 = vadd.f32 %v17539_v35, %v425_v28  ;;  %679 = vadd.xlane.f32.xlu1 %v678_v22  ;;  %682 = vadd.xlane.f32.xlu0 %v681_v29  ;;  %v17602_v36 = vadd.f32 %v607_v26, %v17546_v43 }
  0xff   : > { %vm545_vm12 = vcmp.gt.f32.partialorder %v431_v27, 0.0  ;;  %v577_v33 = vmul.f32 0.01, %v431_v27  ;;  %v17599_v34 = vadd.f32 %v606_v30, %v17546_v43 }
 0x100   : > { %21422 = vst [vmem:[#allocation11_spill] sm:$0xff] %v17602_v36  ;;  %vm544_vm13 = vcmp.gt.f32.partialorder %v426_v31, 0.0  ;;  %v576_v37 = vmul.f32 0.01, %v426_v31  ;;  %v15815_v38 = vpop.f32.mrb[12].mxu0  ;;  %v690_v48 = vsel %vm662_vm3, %v17602_v36, 0.0 }
 0x101   : > { %21421 = vst [vmem:[#allocation10_spill] sm:$0xff] %v17599_v34  ;;  %v609_v39 = vsel %vm545_vm12, %v431_v27, %v577_v33  ;;  %v441_v40 = vadd.f32 %v15815_v38, %v17539_v35  ;;  %v435_v41 = vpop.f32.mrb[13].mxu0  ;;  %v687_v42 = vsel %vm662_vm3, %v17599_v34, 0.0 }
 0x102   : > { %v608_v44 = vsel %vm544_vm13, %v426_v31, %v576_v37  ;;  %v436_v45 = vadd.f32 %v17539_v35, %v435_v41  ;;  %685 = vadd.xlane.f32.xlu1 %v684_v32  ;;  %688 = vadd.xlane.f32.xlu0 %v687_v42  ;;  %v17609_v46 = vadd.f32 %v609_v39, %v17546_v43 }
 0x103   : > { %vm547_vm14 = vcmp.gt.f32.partialorder %v441_v40, 0.0  ;;  %v579_v47 = vmul.f32 0.01, %v441_v40  ;;  %v17614_v49 = vadd.f32 %v608_v44, %v17546_v43 }
 0x104   : > { %21423 = vst [vmem:[#allocation12_spill] sm:$0xff] %v17609_v46  ;;  %vm546_vm15 = vcmp.gt.f32.partialorder %v436_v45, 0.0  ;;  %v578_v51 = vmul.f32 0.01, %v436_v45  ;;  %v15818_v52 = vpop.f32.mrb[14].mxu0  ;;  %v696_v60 = vsel %vm662_vm3, %v17609_v46, 0.0 }
 0x105   : > { %21424 = vst [vmem:[#allocation13_spill] sm:$0xff] %v17614_v49  ;;  %v611_v54 = vsel %vm547_vm14, %v441_v40, %v579_v47  ;;  %v451_v55 = vadd.f32 %v15818_v52, %v17539_v35  ;;  %v445_v56 = vpop.f32.mrb[15].mxu0  ;;  %v693_v57 = vsel %vm662_vm3, %v17614_v49, 0.0 }
 0x106   : > { %v610_v58 = vsel %vm546_vm15, %v436_v45, %v578_v51  ;;  %v446_v59 = vadd.f32 %v17539_v35, %v445_v56  ;;  %691 = vadd.xlane.f32.xlu1 %v690_v48  ;;  %694 = vadd.xlane.f32.xlu0 %v693_v57  ;;  %v17626_v0 = vadd.f32 %v611_v54, %v17546_v43 }
 0x107   : > { %vm549_vm1 = vcmp.gt.f32.partialorder %v451_v55, 0.0  ;;  %v581_v62 = vmul.f32 0.01, %v451_v55  ;;  %v17623_v63 = vadd.f32 %v610_v58, %v17546_v43 }
 0x108   : > { %21426 = vst [vmem:[#allocation15_spill] sm:$0xff] %v17626_v0  ;;  %vm548_vm2 = vcmp.gt.f32.partialorder %v446_v59, 0.0  ;;  %v580_v1 = vmul.f32 0.01, %v446_v59  ;;  %v15821_v2 = vpop.f32.mrb[16].mxu0  ;;  %v702_v14 = vsel %vm662_vm3, %v17626_v0, 0.0 }
 0x109   : > { %21425 = vst [vmem:[#allocation14_spill] sm:$0xff] %v17623_v63  ;;  %v613_v3 = vsel %vm549_vm1, %v451_v55, %v581_v62  ;;  %v461_v4 = vadd.f32 %v15821_v2, %v17539_v35  ;;  %v455_v6 = vpop.f32.mrb[17].mxu0  ;;  %v699_v7 = vsel %vm662_vm3, %v17623_v63, 0.0 }
 0x10a   : > { %v612_v8 = vsel %vm548_vm2, %v446_v59, %v580_v1  ;;  %v456_v11 = vadd.f32 %v17539_v35, %v455_v6  ;;  %697 = vadd.xlane.f32.xlu1 %v696_v60  ;;  %700 = vadd.xlane.f32.xlu0 %v699_v7  ;;  %v17633_v12 = vadd.f32 %v613_v3, %v17546_v43 }
 0x10b   : > { %vm551_vm4 = vcmp.gt.f32.partialorder %v461_v4, 0.0  ;;  %v583_v13 = vmul.f32 0.01, %v461_v4  ;;  %v17638_v15 = vadd.f32 %v612_v8, %v17546_v43 }
 0x10c   : > { %21427 = vst [vmem:[#allocation16_spill] sm:$0xff] %v17633_v12  ;;  %vm550_vm5 = vcmp.gt.f32.partialorder %v456_v11, 0.0  ;;  %v582_v16 = vmul.f32 0.01, %v456_v11  ;;  %v15824_v17 = vpop.f32.mrb[18].mxu0  ;;  %v708_v26 = vsel %vm662_vm3, %v17633_v12, 0.0 }
 0x10d   : > { %21428 = vst [vmem:[#allocation17_spill] sm:$0xff] %v17638_v15  ;;  %v615_v18 = vsel %vm551_vm4, %v461_v4, %v583_v13  ;;  %v471_v19 = vadd.f32 %v15824_v17, %v17539_v35  ;;  %v465_v21 = vpop.f32.mrb[19].mxu0  ;;  %v705_v22 = vsel %vm662_vm3, %v17638_v15, 0.0 }
 0x10e   : > { %v614_v24 = vsel %vm550_vm5, %v456_v11, %v582_v16  ;;  %v466_v25 = vadd.f32 %v17539_v35, %v465_v21  ;;  %703 = vadd.xlane.f32.xlu1 %v702_v14  ;;  %706 = vadd.xlane.f32.xlu0 %v705_v22  ;;  %v17650_v29 = vadd.f32 %v615_v18, %v17546_v43 }
 0x10f   : > { %vm553_vm6 = vcmp.gt.f32.partialorder %v471_v19, 0.0  ;;  %v585_v27 = vmul.f32 0.01, %v471_v19  ;;  %v17647_v28 = vadd.f32 %v614_v24, %v17546_v43 }
 0x110   : > { %21430 = vst [vmem:[#allocation19_spill] sm:$0xff] %v17650_v29  ;;  %vm552_vm7 = vcmp.gt.f32.partialorder %v466_v25, 0.0  ;;  %v584_v30 = vmul.f32 0.01, %v466_v25  ;;  %v15827_v31 = vpop.f32.mrb[20].mxu0  ;;  %v714_v44 = vsel %vm662_vm3, %v17650_v29, 0.0 }
 0x111   : > { %21429 = vst [vmem:[#allocation18_spill] sm:$0xff] %v17647_v28  ;;  %v617_v32 = vsel %vm553_vm6, %v471_v19, %v585_v27  ;;  %v481_v33 = vadd.f32 %v15827_v31, %v17539_v35  ;;  %v475_v37 = vpop.f32.mrb[21].mxu0  ;;  %v711_v38 = vsel %vm662_vm3, %v17647_v28, 0.0  ;;  %vm17427_vm6 = vmmov 0  }
 0x112   : > { %v616_v39 = vsel %vm552_vm7, %v466_v25, %v584_v30  ;;  %v476_v40 = vadd.f32 %v17539_v35, %v475_v37  ;;  %709 = vadd.xlane.f32.xlu1 %v708_v26  ;;  %712 = vadd.xlane.f32.xlu0 %v711_v38  ;;  %v17657_v41 = vadd.f32 %v617_v32, %v17546_v43  ;;  %vm3973_vm7 = vcmask 64512  }
 0x113   : > { %vm555_vm8 = vcmp.gt.f32.partialorder %v481_v33, 0.0  ;;  %v587_v42 = vmul.f32 0.01, %v481_v33  ;;  %v17662_v45 = vadd.f32 %v616_v39, %v17546_v43 }
 0x114   : > { %21431 = vst [vmem:[#allocation20_spill] sm:$0xff] %v17657_v41  ;;  %vm554_vm9 = vcmp.gt.f32.partialorder %v476_v40, 0.0  ;;  %v586_v47 = vmul.f32 0.01, %v476_v40  ;;  %v15830_v48 = vpop.f32.mrb[22].mxu0  ;;  %v720_v58 = vsel %vm662_vm3, %v17657_v41, 0.0 }
 0x115   : > { %21432 = vst [vmem:[#allocation21_spill] sm:$0xff] %v17662_v45  ;;  %v619_v51 = vsel %vm555_vm8, %v481_v33, %v587_v42  ;;  %v491_v52 = vadd.f32 %v15830_v48, %v17539_v35  ;;  %v485_v54 = vpop.f32.mrb[23].mxu0  ;;  %v717_v55 = vsel %vm662_vm3, %v17662_v45, 0.0 }
 0x116   : > { %v618_v56 = vsel %vm554_vm9, %v476_v40, %v586_v47  ;;  %v486_v57 = vadd.f32 %v17539_v35, %v485_v54  ;;  %715 = vadd.xlane.f32.xlu1 %v714_v44  ;;  %718 = vadd.xlane.f32.xlu0 %v717_v55  ;;  %v17674_v62 = vadd.f32 %v619_v51, %v17546_v43 }
 0x117   : > { %vm557_vm10 = vcmp.gt.f32.partialorder %v491_v52, 0.0  ;;  %v589_v59 = vmul.f32 0.01, %v491_v52  ;;  %v17671_v60 = vadd.f32 %v618_v56, %v17546_v43 }
 0x118   : > { %21434 = vst [vmem:[#allocation23_spill] sm:$0xff] %v17674_v62  ;;  %vm556_vm11 = vcmp.gt.f32.partialorder %v486_v57, 0.0  ;;  %v588_v1 = vmul.f32 0.01, %v486_v57  ;;  %v15833_v2 = vpop.f32.mrb[24].mxu0  ;;  %v726_v16 = vsel %vm662_vm3, %v17674_v62, 0.0 }
 0x119   : > { %21433 = vst [vmem:[#allocation22_spill] sm:$0xff] %v17671_v60  ;;  %v621_v3 = vsel %vm557_vm10, %v491_v52, %v589_v59  ;;  %v501_v4 = vadd.f32 %v15833_v2, %v17539_v35  ;;  %v495_v6 = vpop.f32.mrb[25].mxu0  ;;  %v723_v7 = vsel %vm662_vm3, %v17671_v60, 0.0 }
 0x11a   : > { %v620_v8 = vsel %vm556_vm11, %v486_v57, %v588_v1  ;;  %v496_v11 = vadd.f32 %v17539_v35, %v495_v6  ;;  %721 = vadd.xlane.f32.xlu1 %v720_v58  ;;  %724 = vadd.xlane.f32.xlu0 %v723_v7  ;;  %v17681_v13 = vadd.f32 %v621_v3, %v17546_v43 }
 0x11b   : > { %vm559_vm12 = vcmp.gt.f32.partialorder %v501_v4, 0.0  ;;  %v591_v14 = vmul.f32 0.01, %v501_v4  ;;  %v17686_v17 = vadd.f32 %v620_v8, %v17546_v43 }
 0x11c   : > { %21435 = vst [vmem:[#allocation24_spill] sm:$0xff] %v17681_v13  ;;  %vm558_vm13 = vcmp.gt.f32.partialorder %v496_v11, 0.0  ;;  %v590_v18 = vmul.f32 0.01, %v496_v11  ;;  %v15836_v19 = vpop.f32.mrb[26].mxu0  ;;  %v732_v30 = vsel %vm662_vm3, %v17681_v13, 0.0 }
 0x11d   : > { %21436 = vst [vmem:[#allocation25_spill] sm:$0xff] %v17686_v17  ;;  %v623_v21 = vsel %vm559_vm12, %v501_v4, %v591_v14  ;;  %v511_v22 = vadd.f32 %v15836_v19, %v17539_v35  ;;  %v505_v24 = vpop.f32.mrb[27].mxu0  ;;  %v729_v25 = vsel %vm662_vm3, %v17686_v17, 0.0 }
 0x11e   : > { %v622_v26 = vsel %vm558_vm13, %v496_v11, %v590_v18  ;;  %v506_v27 = vadd.f32 %v17539_v35, %v505_v24  ;;  %727 = vadd.xlane.f32.xlu1 %v726_v16  ;;  %730 = vadd.xlane.f32.xlu0 %v729_v25  ;;  %v17698_v33 = vadd.f32 %v623_v21, %v17546_v43 }
 0x11f   : > { %vm561_vm14 = vcmp.gt.f32.partialorder %v511_v22, 0.0  ;;  %v593_v31 = vmul.f32 0.01, %v511_v22  ;;  %v17695_v32 = vadd.f32 %v622_v26, %v17546_v43  ;;  %v149_v26 = vld [vmem:[%s21349_s1 + $0x10] sm:$0xff] }
 0x120   : > { %21438 = vst [vmem:[#allocation27_spill] sm:$0xff] %v17698_v33  ;;  %vm560_vm15 = vcmp.gt.f32.partialorder %v506_v27, 0.0  ;;  %v592_v37 = vmul.f32 0.01, %v506_v27  ;;  %v15839_v38 = vpop.f32.mrb[28].mxu0  ;;  %v738_v54 = vsel %vm662_vm3, %v17698_v33, 0.0 }
 0x121   : > { %21437 = vst [vmem:[#allocation26_spill] sm:$0xff] %v17695_v32  ;;  %v625_v39 = vsel %vm561_vm14, %v511_v22, %v593_v31  ;;  %v521_v40 = vadd.f32 %v15839_v38, %v17539_v35  ;;  %v515_v42 = vpop.f32.mrb[29].mxu0  ;;  %v735_v44 = vsel %vm662_vm3, %v17695_v32, 0.0 }
 0x122   : > { %v624_v47 = vsel %vm560_vm15, %v506_v27, %v592_v37  ;;  %v516_v48 = vadd.f32 %v17539_v35, %v515_v42  ;;  %733 = vadd.xlane.f32.xlu1 %v732_v30  ;;  %736 = vadd.xlane.f32.xlu0 %v735_v44  ;;  %v17705_v51 = vadd.f32 %v625_v39, %v17546_v43  ;;  %v150_v27 = vld [vmem:[%s21349_s1 + $0x18] sm:$0xff] }
 0x123   : > { %vm563_vm1 = vcmp.gt.f32.partialorder %v521_v40, 0.0  ;;  %v595_v52 = vmul.f32 0.01, %v521_v40  ;;  %v17710_v55 = vadd.f32 %v624_v47, %v17546_v43  ;;  %v16815_v30 = vpack.c.bf16 %v150_v27, %v149_v26 }
 0x124   : > { %21439 = vst [vmem:[#allocation28_spill] sm:$0xff] %v17705_v51  ;;  %vm562_vm2 = vcmp.gt.f32.partialorder %v516_v48, 0.0  ;;  %v594_v56 = vmul.f32 0.01, %v516_v48  ;;  %v15842_v57 = vpop.f32.mrb[30].mxu0  ;;  %v744_v6 = vsel %vm662_vm3, %v17705_v51, 0.0 }
 0x125   : > { %21440 = vst [vmem:[#allocation29_spill] sm:$0xff] %v17710_v55  ;;  %v627_v58 = vsel %vm563_vm1, %v521_v40, %v595_v52  ;;  %v531_v59 = vadd.f32 %v15842_v57, %v17539_v35  ;;  %v525_v1 = vpop.f32.mrb[31].mxu0  ;;  %v741_v2 = vsel %vm662_vm3, %v17710_v55, 0.0  ;;  %16816 = vmatprep.subr.bf16.mxu0 %v16815_v30  ;;  %16855 = vmatprep.subr.bf16.mxu1 %v16815_v30 }
 0x126   : > { %v626_v3 = vsel %vm562_vm2, %v516_v48, %v594_v56  ;;  %v526_v4 = vadd.f32 %v17539_v35, %v525_v1  ;;  %739 = vadd.xlane.f32.xlu1 %v738_v54  ;;  %742 = vadd.xlane.f32.xlu0 %v741_v2  ;;  %v17722_v11 = vadd.f32 %v627_v58, %v17546_v43 }
 0x127   : > { %vm565_vm4 = vcmp.gt.f32.partialorder %v531_v59, 0.0  ;;  %v597_v7 = vmul.f32 0.01, %v531_v59  ;;  %v17719_v8 = vadd.f32 %v626_v3, %v17546_v43  ;;  %16818 = vmatpush3.bf16.msra.mxu0 %v16815_v30  ;;  %16857 = vmatpush3.bf16.msra.mxu1 %v16815_v30 }
 0x128   : > { %21442 = vst [vmem:[#allocation31_spill] sm:$0xff] %v17722_v11  ;;  %vm564_vm5 = vcmp.gt.f32.partialorder %v526_v4, 0.0  ;;  %v596_v14 = vmul.f32 0.01, %v526_v4  ;;  %v750_v21 = vsel %vm662_vm3, %v17722_v11, 0.0 }
 0x129   : > { %21441 = vst [vmem:[#allocation30_spill] sm:$0xff] %v17719_v8  ;;  %v629_v16 = vsel %vm565_vm4, %v531_v59, %v597_v7  ;;  %v747_v18 = vsel %vm662_vm3, %v17719_v8, 0.0 }
 0x12a   : > { %v628_v35 = vsel %vm564_vm5, %v526_v4, %v596_v14  ;;  %745 = vadd.xlane.f32.xlu1 %v744_v6  ;;  %748 = vadd.xlane.f32.xlu0 %v747_v18  ;;  %v17727_v19 = vadd.f32 %v629_v16, %v17546_v43 }
 0x12b   : > { %v17732_v22 = vadd.f32 %v628_v35, %v17546_v43 }
 0x12c   : > { %21443 = vst [vmem:[#allocation32_spill] sm:$0xff] %v17727_v19  ;;  %v756_v25 = vsel %vm662_vm3, %v17727_v19, 0.0 }
 0x12d   : > { %21444 = vst [vmem:[#allocation33_spill] sm:$0xff] %v17732_v22  ;;  %v753_v24 = vsel %vm662_vm3, %v17732_v22, 0.0 }
 0x12e   : > { %751 = vadd.xlane.f32.xlu1 %v750_v21  ;;  %754 = vadd.xlane.f32.xlu0 %v753_v24 }
 0x132   : > { %757 = vadd.xlane.f32.xlu1 %v756_v25 }
 0x17f   : > { %v665_v43 = vpop.xlane.xlu0 %664 }
 0x180   : > { %v760_v31 = vmul.f32 0.03125, %v665_v43 }
 0x182   : > { %v17745_v37 = vsub.f32 %v17551_v50, %v760_v31 }
 0x183   : > { %v671_v38 = vpop.xlane.xlu1 %670  ;;  %v668_v39 = vpop.xlane.xlu0 %667 }
 0x184   : > { %v762_v40 = vmul.f32 0.03125, %v671_v38  ;;  %v761_v42 = vmul.f32 0.03125, %v668_v39  ;;  %v824_v44 = vmul.f32 %v17745_v37, %v17745_v37 }
 0x186   : > { %v17750_v47 = vsub.f32 %v17561_v61, %v762_v40  ;;  %v17753_v48 = vsub.f32 %v17554_v53, %v761_v42  ;;  %v856_v52 = vsel %vm662_vm3, %v824_v44, 0.0 }
 0x187   : > { %v674_v54 = vpop.xlane.xlu1 %673  ;;  %857 = vadd.xlane.f32.xlu0 %v856_v52  ;;  %v677_v56 = vpop.xlane.xlu0 %676 }
 0x188   : > { %v763_v57 = vmul.f32 0.03125, %v674_v54  ;;  %v764_v58 = vmul.f32 0.03125, %v677_v56  ;;  %v826_v59 = vmul.f32 %v17750_v47, %v17750_v47  ;;  %v825_v1 = vmul.f32 %v17753_v48, %v17753_v48 }
 0x18a   : > { %v17761_v2 = vsub.f32 %v17569_v5, %v763_v57  ;;  %v17764_v3 = vsub.f32 %v17573_v9, %v764_v58  ;;  %v862_v4 = vsel %vm662_vm3, %v826_v59, 0.0  ;;  %v859_v6 = vsel %vm662_vm3, %v825_v1, 0.0 }
 0x18b   : > { %v680_v7 = vpop.xlane.xlu1 %679  ;;  %863 = vadd.xlane.f32.xlu0 %v862_v4  ;;  %860 = vadd.xlane.f32.xlu1 %v859_v6  ;;  %v683_v14 = vpop.xlane.xlu0 %682 }
 0x18c   : > { %v765_v16 = vmul.f32 0.03125, %v680_v7  ;;  %v766_v18 = vmul.f32 0.03125, %v683_v14  ;;  %v827_v35 = vmul.f32 %v17761_v2, %v17761_v2  ;;  %v828_v21 = vmul.f32 %v17764_v3, %v17764_v3 }
 0x18e   : > { %v17773_v24 = vsub.f32 %v17576_v10, %v765_v16  ;;  %v17776_v25 = vsub.f32 %v17590_v23, %v766_v18  ;;  %v865_v26 = vsel %vm662_vm3, %v827_v35, 0.0  ;;  %v868_v27 = vsel %vm662_vm3, %v828_v21, 0.0 }
 0x18f   : > { %v686_v30 = vpop.xlane.xlu1 %685  ;;  %866 = vadd.xlane.f32.xlu1 %v865_v26  ;;  %869 = vadd.xlane.f32.xlu0 %v868_v27  ;;  %v689_v43 = vpop.xlane.xlu0 %688 }
 0x190   : > { %v767_v31 = vmul.f32 0.03125, %v686_v30  ;;  %v768_v38 = vmul.f32 0.03125, %v689_v43  ;;  %v829_v39 = vmul.f32 %v17773_v24, %v17773_v24  ;;  %v830_v40 = vmul.f32 %v17776_v25, %v17776_v25 }
 0x192   : > { %v17785_v42 = vsub.f32 %v17585_v20, %v767_v31  ;;  %v17788_v44 = vsub.f32 %v17599_v34, %v768_v38  ;;  %v871_v52 = vsel %vm662_vm3, %v829_v39, 0.0  ;;  %v874_v54 = vsel %vm662_vm3, %v830_v40, 0.0 }
 0x193   : > { %v692_v56 = vpop.xlane.xlu1 %691  ;;  %872 = vadd.xlane.f32.xlu1 %v871_v52  ;;  %875 = vadd.xlane.f32.xlu0 %v874_v54  ;;  %v695_v57 = vpop.xlane.xlu0 %694 }
 0x194   : > { %v769_v58 = vmul.f32 0.03125, %v692_v56  ;;  %v770_v59 = vmul.f32 0.03125, %v695_v57  ;;  %v831_v1 = vmul.f32 %v17785_v42, %v17785_v42  ;;  %v832_v4 = vmul.f32 %v17788_v44, %v17788_v44 }
 0x196   : > { %v17797_v6 = vsub.f32 %v17602_v36, %v769_v58  ;;  %v17800_v7 = vsub.f32 %v17614_v49, %v770_v59  ;;  %v877_v14 = vsel %vm662_vm3, %v831_v1, 0.0  ;;  %v880_v16 = vsel %vm662_vm3, %v832_v4, 0.0 }
 0x197   : > { %v698_v18 = vpop.xlane.xlu1 %697  ;;  %878 = vadd.xlane.f32.xlu1 %v877_v14  ;;  %881 = vadd.xlane.f32.xlu0 %v880_v16  ;;  %v701_v35 = vpop.xlane.xlu0 %700 }
 0x198   : > { %v771_v21 = vmul.f32 0.03125, %v698_v18  ;;  %v772_v26 = vmul.f32 0.03125, %v701_v35  ;;  %v833_v27 = vmul.f32 %v17797_v6, %v17797_v6  ;;  %v834_v30 = vmul.f32 %v17800_v7, %v17800_v7 }
 0x19a   : > { %v17809_v43 = vsub.f32 %v17609_v46, %v771_v21  ;;  %v17812_v31 = vsub.f32 %v17623_v63, %v772_v26  ;;  %v883_v38 = vsel %vm662_vm3, %v833_v27, 0.0  ;;  %v886_v39 = vsel %vm662_vm3, %v834_v30, 0.0 }
 0x19b   : > { %v704_v40 = vpop.xlane.xlu1 %703  ;;  %884 = vadd.xlane.f32.xlu1 %v883_v38  ;;  %887 = vadd.xlane.f32.xlu0 %v886_v39  ;;  %v707_v52 = vpop.xlane.xlu0 %706 }
 0x19c   : > { %v773_v54 = vmul.f32 0.03125, %v704_v40  ;;  %v774_v56 = vmul.f32 0.03125, %v707_v52  ;;  %v835_v57 = vmul.f32 %v17809_v43, %v17809_v43  ;;  %v836_v58 = vmul.f32 %v17812_v31, %v17812_v31 }
 0x19e   : > { %v17821_v59 = vsub.f32 %v17626_v0, %v773_v54  ;;  %v17824_v1 = vsub.f32 %v17638_v15, %v774_v56  ;;  %v889_v4 = vsel %vm662_vm3, %v835_v57, 0.0  ;;  %v892_v14 = vsel %vm662_vm3, %v836_v58, 0.0 }
 0x19f   : > { %v710_v16 = vpop.xlane.xlu1 %709  ;;  %890 = vadd.xlane.f32.xlu1 %v889_v4  ;;  %893 = vadd.xlane.f32.xlu0 %v892_v14  ;;  %v713_v18 = vpop.xlane.xlu0 %712 }
 0x1a0   : > { %v775_v35 = vmul.f32 0.03125, %v710_v16  ;;  %v776_v21 = vmul.f32 0.03125, %v713_v18  ;;  %v837_v26 = vmul.f32 %v17821_v59, %v17821_v59  ;;  %v838_v27 = vmul.f32 %v17824_v1, %v17824_v1 }
 0x1a2   : > { %v17833_v30 = vsub.f32 %v17633_v12, %v775_v35  ;;  %v17836_v38 = vsub.f32 %v17647_v28, %v776_v21  ;;  %v895_v39 = vsel %vm662_vm3, %v837_v26, 0.0  ;;  %v898_v40 = vsel %vm662_vm3, %v838_v27, 0.0 }
 0x1a3   : > { %v716_v52 = vpop.xlane.xlu1 %715  ;;  %896 = vadd.xlane.f32.xlu1 %v895_v39  ;;  %899 = vadd.xlane.f32.xlu0 %v898_v40  ;;  %v719_v54 = vpop.xlane.xlu0 %718 }
 0x1a4   : > { %v777_v56 = vmul.f32 0.03125, %v716_v52  ;;  %v778_v57 = vmul.f32 0.03125, %v719_v54  ;;  %v839_v58 = vmul.f32 %v17833_v30, %v17833_v30  ;;  %v840_v4 = vmul.f32 %v17836_v38, %v17836_v38  ;;  %v151_v54 = vld [vmem:[%s21349_s1 + $0x20] sm:$0xff] }
 0x1a6   : > { %v17845_v14 = vsub.f32 %v17650_v29, %v777_v56  ;;  %v17848_v16 = vsub.f32 %v17662_v45, %v778_v57  ;;  %v901_v18 = vsel %vm662_vm3, %v839_v58, 0.0  ;;  %v904_v35 = vsel %vm662_vm3, %v840_v4, 0.0  ;;  %v152_v56 = vld [vmem:[%s21349_s1 + $0x28] sm:$0xff] }
 0x1a7   : > { %v722_v21 = vpop.xlane.xlu1 %721  ;;  %902 = vadd.xlane.f32.xlu1 %v901_v18  ;;  %905 = vadd.xlane.f32.xlu0 %v904_v35  ;;  %v725_v26 = vpop.xlane.xlu0 %724  ;;  %v16819_v57 = vpack.c.bf16 %v152_v56, %v151_v54 }
 0x1a8   : > { %v779_v27 = vmul.f32 0.03125, %v722_v21  ;;  %v780_v39 = vmul.f32 0.03125, %v725_v26  ;;  %v841_v40 = vmul.f32 %v17845_v14, %v17845_v14  ;;  %v842_v52 = vmul.f32 %v17848_v16, %v17848_v16 }
 0x1a9   : > { %16820 = vmatprep.subr.bf16.mxu0 %v16819_v57  ;;  %16856 = vmatprep.subr.bf16.mxu1 %v16819_v57 }
 0x1aa   : > { %v17863_v58 = vsub.f32 %v17657_v41, %v779_v27  ;;  %v17866_v4 = vsub.f32 %v17671_v60, %v780_v39  ;;  %v907_v18 = vsel %vm662_vm3, %v841_v40, 0.0  ;;  %v910_v35 = vsel %vm662_vm3, %v842_v52, 0.0  ;;  %16822 = vmatpush3.bf16.msra.mxu0 %v16819_v57  ;;  %16858 = vmatpush3.bf16.msra.mxu1 %v16819_v57 }
 0x1ab   : > { %v728_v21 = vpop.xlane.xlu1 %727  ;;  %908 = vadd.xlane.f32.xlu1 %v907_v18  ;;  %911 = vadd.xlane.f32.xlu0 %v910_v35  ;;  %v731_v26 = vpop.xlane.xlu0 %730 }
 0x1ac   : > { %v781_v45 = vmul.f32 0.03125, %v728_v21  ;;  %v782_v28 = vmul.f32 0.03125, %v731_v26  ;;  %v843_v29 = vmul.f32 %v17863_v58, %v17863_v58  ;;  %v844_v27 = vmul.f32 %v17866_v4, %v17866_v4 }
 0x1ae   : > { %v17875_v39 = vsub.f32 %v17674_v62, %v781_v45  ;;  %v17878_v40 = vsub.f32 %v17686_v17, %v782_v28  ;;  %v913_v52 = vsel %vm662_vm3, %v843_v29, 0.0  ;;  %v916_v54 = vsel %vm662_vm3, %v844_v27, 0.0 }
 0x1af   : > { %v734_v56 = vpop.xlane.xlu1 %733  ;;  %914 = vadd.xlane.f32.xlu1 %v913_v52  ;;  %917 = vadd.xlane.f32.xlu0 %v916_v54  ;;  %v737_v18 = vpop.xlane.xlu0 %736 }
 0x1b0   : > { %v783_v35 = vmul.f32 0.03125, %v734_v56  ;;  %v784_v21 = vmul.f32 0.03125, %v737_v18  ;;  %v845_v26 = vmul.f32 %v17875_v39, %v17875_v39  ;;  %v846_v45 = vmul.f32 %v17878_v40, %v17878_v40 }
 0x1b2   : > { %v17887_v57 = vsub.f32 %v17681_v13, %v783_v35  ;;  %v17890_v28 = vsub.f32 %v17695_v32, %v784_v21  ;;  %v919_v29 = vsel %vm662_vm3, %v845_v26, 0.0  ;;  %v922_v27 = vsel %vm662_vm3, %v846_v45, 0.0 }
 0x1b3   : > { %v740_v52 = vpop.xlane.xlu1 %739  ;;  %920 = vadd.xlane.f32.xlu1 %v919_v29  ;;  %923 = vadd.xlane.f32.xlu0 %v922_v27  ;;  %v743_v54 = vpop.xlane.xlu0 %742 }
 0x1b4   : > { %v785_v56 = vmul.f32 0.03125, %v740_v52  ;;  %v786_v18 = vmul.f32 0.03125, %v743_v54  ;;  %v847_v17 = vmul.f32 %v17887_v57, %v17887_v57  ;;  %v848_v35 = vmul.f32 %v17890_v28, %v17890_v28 }
 0x1b6   : > { %v17899_v13 = vsub.f32 %v17698_v33, %v785_v56  ;;  %v17902_v21 = vsub.f32 %v17710_v55, %v786_v18  ;;  %v925_v26 = vsel %vm662_vm3, %v847_v17, 0.0  ;;  %v928_v45 = vsel %vm662_vm3, %v848_v35, 0.0 }
 0x1b7   : > { %v746_v29 = vpop.xlane.xlu1 %745  ;;  %926 = vadd.xlane.f32.xlu1 %v925_v26  ;;  %929 = vadd.xlane.f32.xlu0 %v928_v45  ;;  %v749_v27 = vpop.xlane.xlu0 %748 }
 0x1b8   : > { %v787_v52 = vmul.f32 0.03125, %v746_v29  ;;  %v788_v54 = vmul.f32 0.03125, %v749_v27  ;;  %v849_v32 = vmul.f32 %v17899_v13, %v17899_v13  ;;  %v850_v56 = vmul.f32 %v17902_v21, %v17902_v21 }
 0x1ba   : > { %v17911_v33 = vsub.f32 %v17705_v51, %v787_v52  ;;  %v17914_v18 = vsub.f32 %v17719_v8, %v788_v54  ;;  %v931_v17 = vsel %vm662_vm3, %v849_v32, 0.0  ;;  %v934_v35 = vsel %vm662_vm3, %v850_v56, 0.0 }
 0x1bb   : > { %v752_v26 = vpop.xlane.xlu1 %751  ;;  %932 = vadd.xlane.f32.xlu1 %v931_v17  ;;  %935 = vadd.xlane.f32.xlu0 %v934_v35  ;;  %v755_v45 = vpop.xlane.xlu0 %754 }
 0x1bc   : > { %v789_v29 = vmul.f32 0.03125, %v752_v26  ;;  %v790_v27 = vmul.f32 0.03125, %v755_v45  ;;  %v851_v55 = vmul.f32 %v17911_v33, %v17911_v33  ;;  %v852_v52 = vmul.f32 %v17914_v18, %v17914_v18 }
 0x1be   : > { %v17923_v51 = vsub.f32 %v17722_v11, %v789_v29  ;;  %v17926_v54 = vsub.f32 %v17732_v22, %v790_v27  ;;  %v937_v32 = vsel %vm662_vm3, %v851_v55, 0.0  ;;  %v940_v56 = vsel %vm662_vm3, %v852_v52, 0.0 }
 0x1bf   : > { %v758_v17 = vpop.xlane.xlu1 %757  ;;  %938 = vadd.xlane.f32.xlu1 %v937_v32  ;;  %941 = vadd.xlane.f32.xlu0 %v940_v56 }
 0x1c0   : > { %v791_v35 = vmul.f32 0.03125, %v758_v17  ;;  %v853_v26 = vmul.f32 %v17923_v51, %v17923_v51  ;;  %v854_v45 = vmul.f32 %v17926_v54, %v17926_v54 }
 0x1c2   : > { %v17935_v29 = vsub.f32 %v17727_v19, %v791_v35  ;;  %v943_v27 = vsel %vm662_vm3, %v853_v26, 0.0  ;;  %v946_v22 = vsel %vm662_vm3, %v854_v45, 0.0 }
 0x1c3   : > { %944 = vadd.xlane.f32.xlu1 %v943_v27  ;;  %947 = vadd.xlane.f32.xlu0 %v946_v22 }
 0x1c4   : > { %v855_v55 = vmul.f32 %v17935_v29, %v17935_v29 }
 0x1c6   : > { %v949_v52 = vsel %vm662_vm3, %v855_v55, 0.0 }
 0x1c7   : > { %950 = vadd.xlane.f32.xlu1 %v949_v52 }
 0x214   : > { %v858_v32 = vpop.xlane.xlu0 %857 }
 0x215   : > { %v952_v56 = vmul.f32 0.03125, %v858_v32 }
 0x217   : > { %v984_v17 = vadd.f32 1e-05, %v952_v56 }
 0x218   : > { %v861_v8 = vpop.xlane.xlu1 %860  ;;  %v864_v11 = vpop.xlane.xlu0 %863 }
 0x219   : > { %16906 = vrsqrt.f32 %v984_v17  ;;  %v953_v35 = vmul.f32 0.03125, %v861_v8  ;;  %v954_v19 = vmul.f32 0.03125, %v864_v11  ;;  %v17945_v8 = vld [vmem:[%s21349_s1 + $0xb3] ss:$0 sm:$0xff] }
 0x21b   : > { %v985_v60 = vadd.f32 1e-05, %v953_v35  ;;  %v986_v26 = vadd.f32 1e-05, %v954_v19 }
 0x21c   : > { %v867_v62 = vpop.xlane.xlu1 %866  ;;  %v870_v45 = vpop.xlane.xlu0 %869 }
 0x21d   : > { %16908 = vrsqrt.f32 %v985_v60  ;;  %v955_v22 = vmul.f32 0.03125, %v867_v62  ;;  %v956_v27 = vmul.f32 0.03125, %v870_v45 }
 0x21e   : > { %16910 = vrsqrt.f32 %v986_v26 }
 0x21f   : > { %v987_v41 = vadd.f32 1e-05, %v955_v22  ;;  %v988_v15 = vadd.f32 1e-05, %v956_v27 }
 0x220   : > { %v873_v55 = vpop.xlane.xlu1 %872  ;;  %v876_v52 = vpop.xlane.xlu0 %875 }
 0x221   : > { %16912 = vrsqrt.f32 %v987_v41  ;;  %v957_v32 = vmul.f32 0.03125, %v873_v55  ;;  %v958_v56 = vmul.f32 0.03125, %v876_v52  ;;  %v17951_v41 = vld [vmem:[%s21349_s1 + $0xb4] ss:$0 sm:$0xff] }
 0x222   : > { %16914 = vrsqrt.f32 %v988_v15 }
 0x223   : > { %v16907_v12 = vpop.eup %16906  ;;  %v989_v11 = vadd.f32 1e-05, %v957_v32  ;;  %v990_v19 = vadd.f32 1e-05, %v958_v56 }
 0x224   : > { %v879_v60 = vpop.xlane.xlu1 %878  ;;  %v882_v62 = vpop.xlane.xlu0 %881  ;;  %v1048_v17 = vmul.f32 %v16907_v12, %v17745_v37 }
 0x225   : > { %16916 = vrsqrt.f32 %v989_v11  ;;  %v959_v35 = vmul.f32 0.03125, %v879_v60  ;;  %v960_v26 = vmul.f32 0.03125, %v882_v62 }
 0x226   : > { %16918 = vrsqrt.f32 %v990_v19  ;;  %v1084_v15 = vmul.f32 %v17945_v8, %v1048_v17 }
 0x227   : > { %v16909_v45 = vpop.eup %16908  ;;  %v991_v22 = vadd.f32 1e-05, %v959_v35  ;;  %v992_v27 = vadd.f32 1e-05, %v960_v26 }
 0x228   : > { %v16911_v55 = vpop.eup %16910  ;;  %v1049_v52 = vmul.f32 %v16909_v45, %v17753_v48  ;;  %v885_v32 = vpop.xlane.xlu1 %884  ;;  %v1120_v12 = vadd.f32 %v17951_v41, %v1084_v15 }
 0x229   : > { %v888_v56 = vpop.xlane.xlu0 %887  ;;  %16920 = vrsqrt.f32 %v991_v22  ;;  %v961_v37 = vmul.f32 0.03125, %v885_v32  ;;  %v1050_v60 = vmul.f32 %v16911_v55, %v17750_v47 }
 0x22a   : > { %v962_v11 = vmul.f32 0.03125, %v888_v56  ;;  %v1085_v62 = vmul.f32 %v17945_v8, %v1049_v52  ;;  %16922 = vrsqrt.f32 %v992_v27  ;;  %15851 = vmatprep.mubr.msk.f32.mxu0 %vm662_vm3, %v1120_v12 }
 0x22b   : > { %v16913_v19 = vpop.eup %16912  ;;  %v993_v17 = vadd.f32 1e-05, %v961_v37  ;;  %v1086_v26 = vmul.f32 %v17945_v8, %v1050_v60 }
 0x22c   : > { %v994_v35 = vadd.f32 1e-05, %v962_v11  ;;  %v16915_v48 = vpop.eup %16914  ;;  %v891_v45 = vpop.xlane.xlu1 %890  ;;  %v1121_v15 = vadd.f32 %v17951_v41, %v1085_v62  ;;  %v1051_v22 = vmul.f32 %v16913_v19, %v17761_v2 }
 0x22d   : > { %v894_v63 = vpop.xlane.xlu0 %893  ;;  %16924 = vrsqrt.f32 %v993_v17  ;;  %v963_v32 = vmul.f32 0.03125, %v891_v45  ;;  %v1122_v55 = vadd.f32 %v17951_v41, %v1086_v26  ;;  %v1052_v52 = vmul.f32 %v16915_v48, %v17764_v3 }
 0x22e   : > { %v964_v47 = vmul.f32 0.03125, %v894_v63  ;;  %16926 = vrsqrt.f32 %v994_v35  ;;  %15852 = vmatmul.mubr.msk.f32.vlgmr.msra.gmra.mrb[32].mxu0 %vm662_vm3, %v1121_v15  ;;  %v1087_v27 = vmul.f32 %v17945_v8, %v1051_v22 }
 0x22f   : > { %v16917_v56 = vpop.eup %16916  ;;  %v995_v12 = vadd.f32 1e-05, %v963_v32  ;;  %15854 = vmatprep.mubr.msk.f32.mxu0 %vm662_vm3, %v1122_v55  ;;  %v1088_v63 = vmul.f32 %v17945_v8, %v1052_v52 }
 0x230   : > { %v996_v37 = vadd.f32 1e-05, %v964_v47  ;;  %v16919_v11 = vpop.eup %16918  ;;  %v897_v60 = vpop.xlane.xlu1 %896  ;;  %v1123_v62 = vadd.f32 %v17951_v41, %v1087_v27  ;;  %v1053_v19 = vmul.f32 %v16917_v56, %v17773_v24 }
 0x231   : > { %v900_v2 = vpop.xlane.xlu0 %899  ;;  %16928 = vrsqrt.f32 %v995_v12  ;;  %v965_v17 = vmul.f32 0.03125, %v897_v60  ;;  %v1054_v26 = vmul.f32 %v16919_v11, %v17776_v25  ;;  %v1124_v3 = vadd.f32 %v17951_v41, %v1088_v63 }
 0x232   : > { %v966_v35 = vmul.f32 0.03125, %v900_v2  ;;  %16930 = vrsqrt.f32 %v996_v37  ;;  %15855 = vmatmul.mubr.msk.f32.gmra.mrb[34].mxu0 %vm662_vm3, %v1123_v62  ;;  %v1089_v48 = vmul.f32 %v17945_v8, %v1053_v19 }
 0x233   : > { %v16921_v45 = vpop.eup %16920  ;;  %v997_v15 = vadd.f32 1e-05, %v965_v17  ;;  %v1090_v32 = vmul.f32 %v17945_v8, %v1054_v26  ;;  %15857 = vmatprep.mubr.msk.f32.mxu0 %vm662_vm3, %v1124_v3 }
 0x234   : > { %v998_v22 = vadd.f32 1e-05, %v966_v35  ;;  %v16923_v47 = vpop.eup %16922  ;;  %v903_v24 = vpop.xlane.xlu1 %902  ;;  %v1125_v27 = vadd.f32 %v17951_v41, %v1089_v48  ;;  %v1055_v25 = vmul.f32 %v16921_v45, %v17785_v42 }
 0x235   : > { %v906_v55 = vpop.xlane.xlu0 %905  ;;  %16932 = vrsqrt.f32 %v997_v15  ;;  %v967_v52 = vmul.f32 0.03125, %v903_v24  ;;  %v1126_v12 = vadd.f32 %v17951_v41, %v1090_v32  ;;  %v1056_v11 = vmul.f32 %v16923_v47, %v17788_v44 }
 0x236   : > { %v968_v56 = vmul.f32 0.03125, %v906_v55  ;;  %16934 = vrsqrt.f32 %v998_v22  ;;  %15858 = vmatmul.mubr.msk.f32.gmra.mrb[36].mxu0 %vm662_vm3, %v1125_v27  ;;  %v1091_v37 = vmul.f32 %v17945_v8, %v1055_v25 }
 0x237   : > { %v16925_v60 = vpop.eup %16924  ;;  %v999_v2 = vadd.f32 1e-05, %v967_v52  ;;  %15860 = vmatprep.mubr.msk.f32.mxu0 %vm662_vm3, %v1126_v12  ;;  %v1092_v35 = vmul.f32 %v17945_v8, %v1056_v11 }
 0x238   : > { %v1000_v62 = vadd.f32 1e-05, %v968_v56  ;;  %v16927_v63 = vpop.eup %16926  ;;  %v909_v19 = vpop.xlane.xlu1 %908  ;;  %v1127_v17 = vadd.f32 %v17951_v41, %v1091_v37  ;;  %v1057_v26 = vmul.f32 %v16925_v60, %v17797_v6 }
 0x239   : > { %v912_v42 = vpop.xlane.xlu0 %911  ;;  %16936 = vrsqrt.f32 %v999_v2  ;;  %v969_v3 = vmul.f32 0.03125, %v909_v19  ;;  %v1058_v45 = vmul.f32 %v16927_v63, %v17800_v7  ;;  %v1128_v44 = vadd.f32 %v17951_v41, %v1092_v35 }
 0x23a   : > { %v970_v48 = vmul.f32 0.03125, %v912_v42  ;;  %16938 = vrsqrt.f32 %v1000_v62  ;;  %15861 = vmatmul.mubr.msk.f32.gmra.mrb[38].mxu0 %vm662_vm3, %v1127_v17  ;;  %v1093_v15 = vmul.f32 %v17945_v8, %v1057_v26 }
 0x23b   : > { %v16929_v22 = vpop.eup %16928  ;;  %v1001_v32 = vadd.f32 1e-05, %v969_v3  ;;  %v1094_v24 = vmul.f32 %v17945_v8, %v1058_v45  ;;  %15863 = vmatprep.mubr.msk.f32.mxu0 %vm662_vm3, %v1128_v44 }
 0x23c   : > { %v1002_v47 = vadd.f32 1e-05, %v970_v48  ;;  %v16931_v55 = vpop.eup %16930  ;;  %v915_v6 = vpop.xlane.xlu1 %914  ;;  %v1129_v25 = vadd.f32 %v17951_v41, %v1093_v15  ;;  %v1059_v7 = vmul.f32 %v16929_v22, %v17809_v43 }
 0x23d   : > { %v918_v27 = vpop.xlane.xlu0 %917  ;;  %16940 = vrsqrt.f32 %v1001_v32  ;;  %v971_v52 = vmul.f32 0.03125, %v915_v6  ;;  %v1130_v12 = vadd.f32 %v17951_v41, %v1094_v24  ;;  %v1060_v11 = vmul.f32 %v16931_v55, %v17812_v31 }
 0x23e   : > { %v972_v56 = vmul.f32 0.03125, %v918_v27  ;;  %16942 = vrsqrt.f32 %v1002_v47  ;;  %15864 = vmatmul.mubr.msk.f32.gmra.mrb[40].mxu0 %vm662_vm3, %v1129_v25  ;;  %v1095_v37 = vmul.f32 %v17945_v8, %v1059_v7 }
 0x23f   : > { %v16933_v60 = vpop.eup %16932  ;;  %v1003_v2 = vadd.f32 1e-05, %v971_v52  ;;  %15866 = vmatprep.mubr.msk.f32.mxu0 %vm662_vm3, %v1130_v12  ;;  %v1096_v17 = vmul.f32 %v17945_v8, %v1060_v11 }
 0x240   : > { %v1004_v62 = vadd.f32 1e-05, %v972_v56  ;;  %v16935_v63 = vpop.eup %16934  ;;  %v921_v19 = vpop.xlane.xlu1 %920  ;;  %v1131_v42 = vadd.f32 %v17951_v41, %v1095_v37  ;;  %v1061_v35 = vmul.f32 %v16933_v60, %v17821_v59 }
 0x241   : > { %v924_v43 = vpop.xlane.xlu0 %923  ;;  %16944 = vrsqrt.f32 %v1003_v2  ;;  %v973_v26 = vmul.f32 0.03125, %v921_v19  ;;  %v1062_v48 = vmul.f32 %v16935_v63, %v17824_v1  ;;  %v1132_v31 = vadd.f32 %v17951_v41, %v1096_v17 }
 0x242   : > { %v974_v3 = vmul.f32 0.03125, %v924_v43  ;;  %16946 = vrsqrt.f32 %v1004_v62  ;;  %15867 = vmatmul.mubr.msk.f32.gmra.mrb[42].mxu0 %vm662_vm3, %v1131_v42  ;;  %v1097_v45 = vmul.f32 %v17945_v8, %v1061_v35 }
 0x243   : > { %v16937_v44 = vpop.eup %16936  ;;  %v1005_v15 = vadd.f32 1e-05, %v973_v26  ;;  %v1098_v32 = vmul.f32 %v17945_v8, %v1062_v48  ;;  %15869 = vmatprep.mubr.msk.f32.mxu0 %vm662_vm3, %v1132_v31 }
 0x244   : > { %v1006_v22 = vadd.f32 1e-05, %v974_v3  ;;  %v16939_v47 = vpop.eup %16938  ;;  %v927_v59 = vpop.xlane.xlu1 %926  ;;  %v1133_v55 = vadd.f32 %v17951_v41, %v1097_v45  ;;  %v1063_v1 = vmul.f32 %v16937_v44, %v17833_v30 }
 0x245   : > { %v930_v24 = vpop.xlane.xlu0 %929  ;;  %16948 = vrsqrt.f32 %v1005_v15  ;;  %v975_v6 = vmul.f32 0.03125, %v927_v59  ;;  %v1134_v25 = vadd.f32 %v17951_v41, %v1098_v32  ;;  %v1064_v52 = vmul.f32 %v16939_v47, %v17836_v38 }
 0x246   : > { %v976_v27 = vmul.f32 0.03125, %v930_v24  ;;  %16950 = vrsqrt.f32 %v1006_v22  ;;  %15870 = vmatmul.mubr.msk.f32.gmra.mrb[44].mxu0 %vm662_vm3, %v1133_v55  ;;  %v1099_v7 = vmul.f32 %v17945_v8, %v1063_v1 }
 0x247   : > { %v16941_v56 = vpop.eup %16940  ;;  %v1007_v12 = vadd.f32 1e-05, %v975_v6  ;;  %15872 = vmatprep.mubr.msk.f32.mxu1 %vm662_vm3, %v1134_v25  ;;  %v1100_v62 = vmul.f32 %v17945_v8, %v1064_v52 }
 0x248   : > { %v1008_v37 = vadd.f32 1e-05, %v976_v27  ;;  %v16943_v11 = vpop.eup %16942  ;;  %v933_v60 = vpop.xlane.xlu1 %932  ;;  %v1135_v2 = vadd.f32 %v17951_v41, %v1099_v7  ;;  %v1065_v63 = vmul.f32 %v16941_v56, %v17845_v14 }
 0x249   : > { %v936_v30 = vpop.xlane.xlu0 %935  ;;  %16952 = vrsqrt.f32 %v1007_v12  ;;  %v977_v19 = vmul.f32 0.03125, %v933_v60  ;;  %v1066_v42 = vmul.f32 %v16943_v11, %v17848_v16  ;;  %v1136_v38 = vadd.f32 %v17951_v41, %v1100_v62 }
 0x24a   : > { %v978_v43 = vmul.f32 0.03125, %v936_v30  ;;  %16954 = vrsqrt.f32 %v1008_v37  ;;  %15873 = vmatmul.mubr.msk.f32.vlgmr.msra.gmra.mrb[0].mxu1 %vm662_vm3, %v1135_v2  ;;  %v1101_v17 = vmul.f32 %v17945_v8, %v1065_v63 }
 0x24b   : > { %v16945_v35 = vpop.eup %16944  ;;  %v1009_v26 = vadd.f32 1e-05, %v977_v19  ;;  %v1102_v48 = vmul.f32 %v17945_v8, %v1066_v42  ;;  %15875 = vmatprep.mubr.msk.f32.mxu1 %vm662_vm3, %v1136_v38 }
 0x24c   : > { %v1010_v3 = vadd.f32 1e-05, %v978_v43  ;;  %v16947_v31 = vpop.eup %16946  ;;  %v939_v14 = vpop.xlane.xlu1 %938  ;;  %v1137_v44 = vadd.f32 %v17951_v41, %v1101_v17  ;;  %v1067_v16 = vmul.f32 %v16945_v35, %v17863_v58 }
 0x24d   : > { %v942_v45 = vpop.xlane.xlu0 %941  ;;  %16956 = vrsqrt.f32 %v1009_v26  ;;  %v979_v15 = vmul.f32 0.03125, %v939_v14  ;;  %v1138_v32 = vadd.f32 %v17951_v41, %v1102_v48  ;;  %v1068_v59 = vmul.f32 %v16947_v31, %v17866_v4 }
 0x24e   : > { %v980_v22 = vmul.f32 0.03125, %v942_v45  ;;  %16958 = vrsqrt.f32 %v1010_v3  ;;  %15876 = vmatmul.mubr.msk.f32.gmra.mrb[2].mxu1 %vm662_vm3, %v1137_v44  ;;  %v1103_v47 = vmul.f32 %v17945_v8, %v1067_v16 }
 0x24f   : > { %v16949_v24 = vpop.eup %16948  ;;  %v1011_v55 = vadd.f32 1e-05, %v979_v15  ;;  %15878 = vmatprep.mubr.msk.f32.mxu1 %vm662_vm3, %v1138_v32  ;;  %v1104_v7 = vmul.f32 %v17945_v8, %v1068_v59 }
 0x250   : > { %v1012_v1 = vadd.f32 1e-05, %v980_v22  ;;  %v16951_v6 = vpop.eup %16950  ;;  %v945_v27 = vpop.xlane.xlu1 %944  ;;  %v1139_v25 = vadd.f32 %v17951_v41, %v1103_v47  ;;  %v1069_v52 = vmul.f32 %v16949_v24, %v17875_v39 }
 0x251   : > { %v948_v58 = vpop.xlane.xlu0 %947  ;;  %16960 = vrsqrt.f32 %v1011_v55  ;;  %v981_v56 = vmul.f32 0.03125, %v945_v27  ;;  %v1070_v37 = vmul.f32 %v16951_v6, %v17878_v40  ;;  %v1140_v4 = vadd.f32 %v17951_v41, %v1104_v7 }
 0x252   : > { %v982_v12 = vmul.f32 0.03125, %v948_v58  ;;  %16962 = vrsqrt.f32 %v1012_v1  ;;  %15879 = vmatmul.mubr.msk.f32.gmra.mrb[4].mxu1 %vm662_vm3, %v1139_v25  ;;  %v1105_v11 = vmul.f32 %v17945_v8, %v1069_v52 }
 0x253   : > { %v16953_v60 = vpop.eup %16952  ;;  %v1013_v30 = vadd.f32 1e-05, %v981_v56  ;;  %v1106_v62 = vmul.f32 %v17945_v8, %v1070_v37  ;;  %15881 = vmatprep.mubr.msk.f32.mxu1 %vm662_vm3, %v1140_v4 }
 0x254   : > { %v1014_v2 = vadd.f32 1e-05, %v982_v12  ;;  %v16955_v63 = vpop.eup %16954  ;;  %v951_v39 = vpop.xlane.xlu1 %950  ;;  %v1141_v19 = vadd.f32 %v17951_v41, %v1105_v11  ;;  %v1071_v40 = vmul.f32 %v16953_v60, %v17887_v57  ;;  %v21370_v12 = vmov 0.0  }
 0x255   : > { %16964 = vrsqrt.f32 %v1013_v30  ;;  %v983_v43 = vmul.f32 0.03125, %v951_v39  ;;  %v1142_v42 = vadd.f32 %v17951_v41, %v1106_v62  ;;  %v1072_v38 = vmul.f32 %v16955_v63, %v17890_v28  ;;  %15899 = vmatprep.subr.mxu0 %v21370_v12  ;;  %15909 = vmatprep.subr.mxu1 %v21370_v12 }
 0x256   : > { %16966 = vrsqrt.f32 %v1014_v2  ;;  %15882 = vmatmul.mubr.msk.f32.gmra.mrb[6].mxu1 %vm662_vm3, %v1141_v19  ;;  %v1107_v17 = vmul.f32 %v17945_v8, %v1071_v40  ;;  %15901 = vmatprep.mubr.msk.f32.mxu0 %vm17427_vm6, %v21370_v12 }
 0x257   : > { %v16957_v35 = vpop.eup %16956  ;;  %v1015_v26 = vadd.f32 1e-05, %v983_v43  ;;  %15884 = vmatprep.mubr.msk.f32.mxu1 %vm662_vm3, %v1142_v42  ;;  %v1108_v3 = vmul.f32 %v17945_v8, %v1072_v38 }
 0x258   : > { %v16959_v48 = vpop.eup %16958  ;;  %v1143_v57 = vadd.f32 %v17951_v41, %v1107_v17  ;;  %v1073_v31 = vmul.f32 %v16957_v35, %v17899_v13 }
 0x259   : > { %16968 = vrsqrt.f32 %v1015_v26  ;;  %v1144_v14 = vadd.f32 %v17951_v41, %v1108_v3  ;;  %v1074_v28 = vmul.f32 %v16959_v48, %v17902_v21 }
 0x25a   : > { %15885 = vmatmul.mubr.msk.f32.gmra.mrb[8].mxu1 %vm662_vm3, %v1143_v57  ;;  %v1109_v45 = vmul.f32 %v17945_v8, %v1073_v31 }
 0x25b   : > { %v16961_v44 = vpop.eup %16960  ;;  %15887 = vmatprep.mubr.msk.f32.mxu1 %vm662_vm3, %v1144_v14  ;;  %v1110_v16 = vmul.f32 %v17945_v8, %v1074_v28 }
 0x25c   : > { %v16963_v15 = vpop.eup %16962  ;;  %v1145_v22 = vadd.f32 %v17951_v41, %v1109_v45  ;;  %v1075_v32 = vmul.f32 %v16961_v44, %v17911_v33 }
 0x25d   : > { %v1146_v13 = vadd.f32 %v17951_v41, %v1110_v16  ;;  %v1076_v47 = vmul.f32 %v16963_v15, %v17914_v18 }
 0x25e   : > { %15888 = vmatmul.mubr.msk.f32.gmra.mrb[10].mxu1 %vm662_vm3, %v1145_v22  ;;  %v1111_v21 = vmul.f32 %v17945_v8, %v1075_v32 }
 0x25f   : > { %v16965_v59 = vpop.eup %16964  ;;  %15890 = vmatprep.mubr.msk.f32.mxu1 %vm662_vm3, %v1146_v13  ;;  %v1112_v24 = vmul.f32 %v17945_v8, %v1076_v47 }
 0x260   : > { %v16967_v55 = vpop.eup %16966  ;;  %v1147_v1 = vadd.f32 %v17951_v41, %v1111_v21  ;;  %v1077_v6 = vmul.f32 %v16965_v59, %v17923_v51 }
 0x261   : > { %v1148_v33 = vadd.f32 %v17951_v41, %v1112_v24  ;;  %v1078_v27 = vmul.f32 %v16967_v55, %v17926_v54 }
 0x262   : > { %15891 = vmatmul.mubr.msk.f32.gmra.mrb[12].mxu1 %vm662_vm3, %v1147_v1  ;;  %v1113_v18 = vmul.f32 %v17945_v8, %v1077_v6 }
 0x263   : > { %v16969_v58 = vpop.eup %16968  ;;  %15893 = vmatprep.mubr.msk.f32.mxu1 %vm662_vm3, %v1148_v33  ;;  %v1114_v25 = vmul.f32 %v17945_v8, %v1078_v27 }
 0x264   : > { %v1149_v7 = vadd.f32 %v17951_v41, %v1113_v18  ;;  %v1079_v52 = vmul.f32 %v16969_v58, %v17935_v29  ;;  %v18089_v29 = vld [vmem:[%s21349_s1 + $0xb1] ss:$0 sm:$0xff] }
 0x265   : > { %v1150_v56 = vadd.f32 %v17951_v41, %v1114_v25 }
 0x266   : > { %15894 = vmatmul.mubr.msk.f32.gmra.mrb[14].mxu1 %vm662_vm3, %v1149_v7  ;;  %v1115_v51 = vmul.f32 %v17945_v8, %v1079_v52 }
 0x267   : > { %15896 = vmatprep.mubr.msk.f32.mxu1 %vm662_vm3, %v1150_v56 }
 0x268   : > { %v1151_v54 = vadd.f32 %v17951_v41, %v1115_v51 }
 0x26a   : > { %15897 = vmatmul.mubr.msk.f32.gmra.mrb[16].mxu1 %vm662_vm3, %v1151_v54 }
 0x26b   : > { %15911 = vmatprep.mubr.msk.f32.mxu1 %vm17427_vm6, %v21370_v12 }
 0x301   : > { %v15853_v8 = vpop.f32.mrb[32].mxu0 }
 0x302   : > { %v18092_v41 = vadd.f32 %v15853_v8, %v18089_v29  ;;  %v1318_v37 = vpop.f32.mrb[33].mxu0 }
 0x303   : > { %v18095_v4 = vadd.f32 %v18089_v29, %v1318_v37 }
 0x304   : > { %21445 = vst [vmem:[#allocation34_spill] sm:$0xff] %v18092_v41  ;;  %1555 = vrot.lane.b32.xlu1 %v18092_v41, %s17428_s11 }
 0x305   : > { %21446 = vst [vmem:[#allocation35_spill] sm:$0xff] %v18095_v4  ;;  %1478 = vrot.lane.b32.xlu0 %v18095_v4, %s17428_s11  ;;  %v15856_v11 = vpop.f32.mrb[34].mxu0 }
 0x306   : > { %v1328_v60 = vpop.f32.mrb[35].mxu0  ;;  %v18107_v63 = vadd.f32 %v15856_v11, %v18089_v29 }
 0x307   : > { %v18102_v30 = vadd.f32 %v18089_v29, %v1328_v60 }
 0x308   : > { %21448 = vst [vmem:[#allocation37_spill] sm:$0xff] %v18107_v63 }
 0x309   : > { %21447 = vst [vmem:[#allocation36_spill] sm:$0xff] %v18102_v30  ;;  %1632 = vrot.lane.b32.xlu1 %v18102_v30, %s17428_s11  ;;  %v15859_v2 = vpop.f32.mrb[36].mxu0 }
 0x30a   : > { %v1338_v62 = vpop.f32.mrb[37].mxu0  ;;  %v18117_v43 = vadd.f32 %v15859_v2, %v18089_v29 }
 0x30b   : > { %v18110_v39 = vadd.f32 %v18089_v29, %v1338_v62 }
 0x30c   : > { %21450 = vst [vmem:[#allocation39_spill] sm:$0xff] %v18117_v43 }
 0x30d   : > { %21449 = vst [vmem:[#allocation38_spill] sm:$0xff] %v18110_v39  ;;  %1709 = vrot.lane.b32.xlu1 %v18107_v63, %s17428_s11  ;;  %1786 = vrot.lane.b32.xlu0 %v18110_v39, %s17428_s11  ;;  %v15862_v19 = vpop.f32.mrb[38].mxu0 }
 0x30e   : > { %v1348_v40 = vpop.f32.mrb[39].mxu0  ;;  %v18127_v35 = vadd.f32 %v15862_v19, %v18089_v29 }
 0x30f   : > { %v18120_v42 = vadd.f32 %v18089_v29, %v1348_v40 }
 0x310   : > { %21452 = vst [vmem:[#allocation41_spill] sm:$0xff] %v18127_v35 }
 0x311   : > { %21451 = vst [vmem:[#allocation40_spill] sm:$0xff] %v18120_v42  ;;  %1863 = vrot.lane.b32.xlu1 %v18117_v43, %s17428_s11  ;;  %1940 = vrot.lane.b32.xlu0 %v18120_v42, %s17428_s11  ;;  %v15865_v38 = vpop.f32.mrb[40].mxu0 }
 0x312   : > { %v1358_v17 = vpop.f32.mrb[41].mxu0  ;;  %v18137_v57 = vadd.f32 %v15865_v38, %v18089_v29 }
 0x313   : > { %v18130_v26 = vadd.f32 %v18089_v29, %v1358_v17 }
 0x314   : > { %21454 = vst [vmem:[#allocation43_spill] sm:$0xff] %v18137_v57 }
 0x315   : > { %21453 = vst [vmem:[#allocation42_spill] sm:$0xff] %v18130_v26  ;;  %2017 = vrot.lane.b32.xlu1 %v18127_v35, %s17428_s11  ;;  %2094 = vrot.lane.b32.xlu0 %v18130_v26, %s17428_s11  ;;  %v15868_v3 = vpop.f32.mrb[42].mxu0 }
 0x316   : > { %v1368_v48 = vpop.f32.mrb[43].mxu0  ;;  %v18147_v45 = vadd.f32 %v15868_v3, %v18089_v29 }
 0x317   : > { %v18140_v31 = vadd.f32 %v18089_v29, %v1368_v48 }
 0x318   : > { %21456 = vst [vmem:[#allocation45_spill] sm:$0xff] %v18147_v45 }
 0x319   : > { %21455 = vst [vmem:[#allocation44_spill] sm:$0xff] %v18140_v31  ;;  %2171 = vrot.lane.b32.xlu1 %v18137_v57, %s17428_s11  ;;  %2248 = vrot.lane.b32.xlu0 %v18140_v31, %s17428_s11  ;;  %v15871_v14 = vpop.f32.mrb[44].mxu0 }
 0x31a   : > { %v1378_v28 = vpop.f32.mrb[45].mxu0  ;;  %v18157_v22 = vadd.f32 %v15871_v14, %v18089_v29 }
 0x31b   : > { %v18150_v44 = vadd.f32 %v18089_v29, %v1378_v28 }
 0x31c   : > { %21458 = vst [vmem:[#allocation47_spill] sm:$0xff] %v18157_v22 }
 0x31d   : > { %21457 = vst [vmem:[#allocation46_spill] sm:$0xff] %v18150_v44  ;;  %2325 = vrot.lane.b32.xlu1 %v18147_v45, %s17428_s11  ;;  %2402 = vrot.lane.b32.xlu0 %v18150_v44, %s17428_s11  ;;  %v15874_v16 = vpop.f32.mrb[0].mxu1 }
 0x31e   : > { %v1388_v15 = vpop.f32.mrb[1].mxu1  ;;  %v18167_v21 = vadd.f32 %v15874_v16, %v18089_v29 }
 0x31f   : > { %v18160_v32 = vadd.f32 %v18089_v29, %v1388_v15 }
 0x321   : > { %2479 = vrot.lane.b32.xlu1 %v18157_v22, %s17428_s11  ;;  %2556 = vrot.lane.b32.xlu0 %v18160_v32, %s17428_s11  ;;  %v15877_v13 = vpop.f32.mrb[2].mxu1 }
 0x322   : > { %v1398_v47 = vpop.f32.mrb[3].mxu1  ;;  %v18177_v1 = vadd.f32 %v15877_v13, %v18089_v29 }
 0x323   : > { %v18170_v59 = vadd.f32 %v18089_v29, %v1398_v47 }
 0x325   : > { %2633 = vrot.lane.b32.xlu1 %v18167_v21, %s17428_s11  ;;  %2710 = vrot.lane.b32.xlu0 %v18170_v59, %s17428_s11  ;;  %v15880_v24 = vpop.f32.mrb[4].mxu1 }
 0x326   : > { %v1408_v55 = vpop.f32.mrb[5].mxu1  ;;  %v18187_v18 = vadd.f32 %v15880_v24, %v18089_v29 }
 0x327   : > { %v18180_v6 = vadd.f32 %v18089_v29, %v1408_v55 }
 0x329   : > { %2787 = vrot.lane.b32.xlu1 %v18177_v1, %s17428_s11  ;;  %2864 = vrot.lane.b32.xlu0 %v18180_v6, %s17428_s11  ;;  %v15883_v33 = vpop.f32.mrb[6].mxu1 }
 0x32a   : > { %v1418_v27 = vpop.f32.mrb[7].mxu1  ;;  %v18197_v52 = vadd.f32 %v15883_v33, %v18089_v29 }
 0x32b   : > { %v18190_v58 = vadd.f32 %v18089_v29, %v1418_v27 }
 0x32d   : > { %2941 = vrot.lane.b32.xlu1 %v18187_v18, %s17428_s11  ;;  %3018 = vrot.lane.b32.xlu0 %v18190_v58, %s17428_s11  ;;  %v15886_v25 = vpop.f32.mrb[8].mxu1 }
 0x32e   : > { %v1428_v7 = vpop.f32.mrb[9].mxu1  ;;  %v18207_v8 = vadd.f32 %v15886_v25, %v18089_v29 }
 0x32f   : > { %v18200_v56 = vadd.f32 %v18089_v29, %v1428_v7 }
 0x331   : > { %3095 = vrot.lane.b32.xlu1 %v18197_v52, %s17428_s11  ;;  %3172 = vrot.lane.b32.xlu0 %v18200_v56, %s17428_s11  ;;  %v15889_v51 = vpop.f32.mrb[10].mxu1 }
 0x332   : > { %v1438_v54 = vpop.f32.mrb[11].mxu1  ;;  %v18217_v2 = vadd.f32 %v15889_v51, %v18089_v29 }
 0x333   : > { %v18210_v37 = vadd.f32 %v18089_v29, %v1438_v54 }
 0x335   : > { %21459 = vst [vmem:[#allocation48_spill] sm:$0xff] %v18210_v37  ;;  %3249 = vrot.lane.b32.xlu1 %v18207_v8, %s17428_s11  ;;  %3326 = vrot.lane.b32.xlu0 %v18210_v37, %s17428_s11  ;;  %v15892_v11 = vpop.f32.mrb[12].mxu1 }
 0x336   : > { %v1448_v60 = vpop.f32.mrb[13].mxu1  ;;  %v18227_v38 = vadd.f32 %v15892_v11, %v18089_v29 }
 0x337   : > { %v18220_v62 = vadd.f32 %v18089_v29, %v1448_v60 }
 0x338   : > { %21461 = vst [vmem:[#allocation50_spill] sm:$0xff] %v18227_v38 }
 0x339   : > { %21460 = vst [vmem:[#allocation49_spill] sm:$0xff] %v18220_v62  ;;  %3403 = vrot.lane.b32.xlu1 %v18217_v2, %s17428_s11  ;;  %3480 = vrot.lane.b32.xlu0 %v18220_v62, %s17428_s11  ;;  %v15895_v19 = vpop.f32.mrb[14].mxu1 }
 0x33a   : > { %v1458_v40 = vpop.f32.mrb[15].mxu1  ;;  %v18240_v28 = vadd.f32 %v15895_v19, %v18089_v29 }
 0x33b   : > { %v18230_v17 = vadd.f32 %v18089_v29, %v1458_v40 }
 0x33c   : > { %21464 = vst [vmem:[#allocation53_spill] sm:$0xff] %v18240_v28 }
 0x33d   : > { %21462 = vst [vmem:[#allocation51_spill] sm:$0xff] %v18230_v17  ;;  %3557 = vrot.lane.b32.xlu1 %v18227_v38, %s17428_s11  ;;  %3634 = vrot.lane.b32.xlu0 %v18230_v17, %s17428_s11  ;;  %v15898_v3 = vpop.f32.mrb[16].mxu1 }
 0x33e   : > { %v18237_v48 = vadd.f32 %v15898_v3, %v18089_v29  ;;  %v1468_v14 = vpop.f32.mrb[17].mxu1 }
 0x33f   : > { %v18243_v16 = vadd.f32 %v18089_v29, %v1468_v14 }
 0x340   : > { %21463 = vst [vmem:[#allocation52_spill] sm:$0xff] %v18237_v48 }
 0x341   : > { %21465 = vst [vmem:[#allocation54_spill] sm:$0xff] %v18243_v16  ;;  %3711 = vrot.lane.b32.xlu1 %v18240_v28, %s17428_s11  ;;  %3788 = vrot.lane.b32.xlu0 %v18243_v16, %s17428_s11 }
 0x345   : > { %3865 = vrot.lane.b32.xlu1 %v18237_v48, %s17428_s11  ;;  %4326 = vrot.lane.b32.xlu0 %v18095_v4, %s17429_s12 }
 0x349   : > { %4402 = vrot.lane.b32.xlu1 %v18092_v41, %s17429_s12  ;;  %4478 = vrot.lane.b32.xlu0 %v18102_v30, %s17429_s12 }
 0x34d   : > { %4554 = vrot.lane.b32.xlu1 %v18107_v63, %s17429_s12  ;;  %4630 = vrot.lane.b32.xlu0 %v18110_v39, %s17429_s12 }
 0x351   : > { %4706 = vrot.lane.b32.xlu1 %v18117_v43, %s17429_s12  ;;  %4782 = vrot.lane.b32.xlu0 %v18120_v42, %s17429_s12 }
 0x355   : > { %4858 = vrot.lane.b32.xlu1 %v18127_v35, %s17429_s12  ;;  %4934 = vrot.lane.b32.xlu0 %v18130_v26, %s17429_s12 }
 0x359   : > { %5010 = vrot.lane.b32.xlu1 %v18137_v57, %s17429_s12  ;;  %5086 = vrot.lane.b32.xlu0 %v18140_v31, %s17429_s12 }
 0x35d   : > { %5162 = vrot.lane.b32.xlu1 %v18147_v45, %s17429_s12  ;;  %5238 = vrot.lane.b32.xlu0 %v18150_v44, %s17429_s12 }
 0x361   : > { %5314 = vrot.lane.b32.xlu1 %v18157_v22, %s17429_s12  ;;  %5390 = vrot.lane.b32.xlu0 %v18160_v32, %s17429_s12 }
 0x365   : > { %5466 = vrot.lane.b32.xlu1 %v18167_v21, %s17429_s12  ;;  %5542 = vrot.lane.b32.xlu0 %v18170_v59, %s17429_s12 }
 0x369   : > { %5618 = vrot.lane.b32.xlu1 %v18177_v1, %s17429_s12  ;;  %5694 = vrot.lane.b32.xlu0 %v18180_v6, %s17429_s12 }
 0x36d   : > { %5770 = vrot.lane.b32.xlu1 %v18187_v18, %s17429_s12  ;;  %5846 = vrot.lane.b32.xlu0 %v18190_v58, %s17429_s12 }
 0x371   : > { %5922 = vrot.lane.b32.xlu1 %v18197_v52, %s17429_s12  ;;  %6150 = vrot.lane.b32.xlu0 %v18210_v37, %s17429_s12 }
 0x375   : > { %5998 = vrot.lane.b32.xlu1 %v18200_v56, %s17429_s12  ;;  %6302 = vrot.lane.b32.xlu0 %v18220_v62, %s17429_s12 }
 0x376   : > { %v1556_v29 = vpop.permute.xlu1 %1555 }
 0x377   : > { %v1479_v15 = vpop.permute.xlu0 %1478 }
 0x378   : > { %15900 = vmatpush3.xpose.msk.msra.mxu0 %vm212_vm0, %v1479_v15 }
 0x379   : > { %6074 = vrot.lane.b32.xlu1 %v18207_v8, %s17429_s12  ;;  %6454 = vrot.lane.b32.xlu0 %v18230_v17, %s17429_s12 }
 0x37a   : > { %15904 = vmatprep.subr.mxu0 %v21370_v12 }
 0x37b   : > { %v1633_v13 = vpop.permute.xlu1 %1632  ;;  %15902 = vmatmul.mubr.msk.f32.vlgmr.msra.gmra.mrb[46].mxu0 %vm212_vm0, %v18095_v4 }
 0x37c   : > { %15905 = vmatpush3.xpose.msk.msra.mxu0 %vm212_vm0, %v1556_v29  ;;  %15910 = vmatpush3.xpose.msk.msra.mxu1 %vm212_vm0, %v1633_v13 }
 0x37d   : > { %6226 = vrot.lane.b32.xlu1 %v18217_v2, %s17429_s12  ;;  %6762 = vrot.lane.b32.xlu0 %v18095_v4, %s17430_s13 }
 0x37e   : > { %15906 = vmatprep.mubr.msk.f32.mxu0 %vm17427_vm6, %v21370_v12  ;;  %15914 = vmatprep.subr.mxu0 %v21370_v12 }
 0x37f   : > { %v1710_v47 = vpop.permute.xlu1 %1709  ;;  %15907 = vmatmul.mubr.msk.f32.vlgmr.msra.gmra.mrb[48].mxu0 %vm212_vm0, %v18092_v41  ;;  %15912 = vmatmul.mubr.msk.f32.vlgmr.msra.gmra.mrb[18].mxu1 %vm212_vm0, %v18102_v30  ;;  %v1787_v24 = vpop.permute.xlu0 %1786 }
 0x380   : > { %15919 = vmatprep.subr.mxu1 %v21370_v12  ;;  %15915 = vmatpush3.xpose.msk.msra.mxu0 %vm212_vm0, %v1710_v47 }
 0x381   : > { %15920 = vmatpush3.xpose.msk.msra.mxu1 %vm212_vm0, %v1787_v24  ;;  %6378 = vrot.lane.b32.xlu1 %v18227_v38, %s17429_s12 }
 0x382   : > { %6760 = vrot.lane.b32.xlu0 %v18095_v4, %s17431_s14  ;;  %15916 = vmatprep.mubr.msk.f32.mxu0 %vm17427_vm6, %v21370_v12 }
 0x383   : > { %15921 = vmatprep.mubr.msk.f32.mxu1 %vm17427_vm6, %v21370_v12  ;;  %v1864_v55 = vpop.permute.xlu1 %1863  ;;  %15917 = vmatmul.mubr.msk.f32.vlgmr.msra.gmra.mrb[50].mxu0 %vm212_vm0, %v18107_v63  ;;  %v1941_v33 = vpop.permute.xlu0 %1940 }
 0x384   : > { %15922 = vmatmul.mubr.msk.f32.vlgmr.msra.gmra.mrb[20].mxu1 %vm212_vm0, %v18110_v39  ;;  %15924 = vmatprep.subr.mxu0 %v21370_v12 }
 0x385   : > { %15929 = vmatprep.subr.mxu1 %v21370_v12  ;;  %15925 = vmatpush3.xpose.msk.msra.mxu0 %vm212_vm0, %v1864_v55 }
 0x386   : > { %15930 = vmatpush3.xpose.msk.msra.mxu1 %vm212_vm0, %v1941_v33  ;;  %6530 = vrot.lane.b32.xlu1 %v18240_v28, %s17429_s12 }
 0x387   : > { %6918 = vrot.lane.b32.xlu0 %v18102_v30, %s17430_s13  ;;  %15926 = vmatprep.mubr.msk.f32.mxu0 %vm17427_vm6, %v21370_v12  ;;  %v2018_v27 = vpop.permute.xlu1 %2017  ;;  %v2095_v25 = vpop.permute.xlu0 %2094 }
 0x388   : > { %15931 = vmatprep.mubr.msk.f32.mxu1 %vm17427_vm6, %v21370_v12  ;;  %15927 = vmatmul.mubr.msk.f32.vlgmr.msra.gmra.mrb[52].mxu0 %vm212_vm0, %v18117_v43 }
 0x389   : > { %15932 = vmatmul.mubr.msk.f32.vlgmr.msra.gmra.mrb[22].mxu1 %vm212_vm0, %v18120_v42  ;;  %15934 = vmatprep.subr.mxu0 %v21370_v12 }
 0x38a   : > { %15939 = vmatprep.subr.mxu1 %v21370_v12  ;;  %15935 = vmatpush3.xpose.msk.msra.mxu0 %vm212_vm0, %v2018_v27 }
 0x38b   : > { %15940 = vmatpush3.xpose.msk.msra.mxu1 %vm212_vm0, %v2095_v25  ;;  %6682 = vrot.lane.b32.xlu1 %v18237_v48, %s17429_s12  ;;  %v2172_v7 = vpop.permute.xlu1 %2171  ;;  %v2249_v51 = vpop.permute.xlu0 %2248 }
 0x38c   : > { %6916 = vrot.lane.b32.xlu0 %v18102_v30, %s17431_s14  ;;  %15936 = vmatprep.mubr.msk.f32.mxu0 %vm17427_vm6, %v21370_v12 }
 0x38d   : > { %15941 = vmatprep.mubr.msk.f32.mxu1 %vm17427_vm6, %v21370_v12  ;;  %15937 = vmatmul.mubr.msk.f32.vlgmr.msra.gmra.mrb[54].mxu0 %vm212_vm0, %v18127_v35 }
 0x38e   : > { %15942 = vmatmul.mubr.msk.f32.vlgmr.msra.gmra.mrb[24].mxu1 %vm212_vm0, %v18130_v26  ;;  %15944 = vmatprep.subr.mxu0 %v21370_v12 }
 0x38f   : > { %15949 = vmatprep.subr.mxu1 %v21370_v12  ;;  %15945 = vmatpush3.xpose.msk.msra.mxu0 %vm212_vm0, %v2172_v7  ;;  %v2326_v54 = vpop.permute.xlu1 %2325  ;;  %v2403_v11 = vpop.permute.xlu0 %2402 }
 0x390   : > { %15950 = vmatpush3.xpose.msk.msra.mxu1 %vm212_vm0, %v2249_v51  ;;  %6840 = vrot.lane.b32.xlu1 %v18092_v41, %s17430_s13 }
 0x391   : > { %7074 = vrot.lane.b32.xlu0 %v18110_v39, %s17430_s13  ;;  %15946 = vmatprep.mubr.msk.f32.mxu0 %vm17427_vm6, %v21370_v12 }
 0x392   : > { %15951 = vmatprep.mubr.msk.f32.mxu1 %vm17427_vm6, %v21370_v12  ;;  %15947 = vmatmul.mubr.msk.f32.vlgmr.msra.gmra.mrb[56].mxu0 %vm212_vm0, %v18137_v57 }
 0x393   : > { %15952 = vmatmul.mubr.msk.f32.vlgmr.msra.gmra.mrb[26].mxu1 %vm212_vm0, %v18140_v31  ;;  %15954 = vmatprep.subr.mxu0 %v21370_v12  ;;  %v2480_v60 = vpop.permute.xlu1 %2479  ;;  %v2557_v19 = vpop.permute.xlu0 %2556 }
 0x394   : > { %15959 = vmatprep.subr.mxu1 %v21370_v12  ;;  %15955 = vmatpush3.xpose.msk.msra.mxu0 %vm212_vm0, %v2326_v54 }
 0x395   : > { %15960 = vmatpush3.xpose.msk.msra.mxu1 %vm212_vm0, %v2403_v11  ;;  %6838 = vrot.lane.b32.xlu1 %v18092_v41, %s17431_s14 }
 0x396   : > { %7072 = vrot.lane.b32.xlu0 %v18110_v39, %s17431_s14  ;;  %15956 = vmatprep.mubr.msk.f32.mxu0 %vm17427_vm6, %v21370_v12 }
 0x397   : > { %15961 = vmatprep.mubr.msk.f32.mxu1 %vm17427_vm6, %v21370_v12  ;;  %15957 = vmatmul.mubr.msk.f32.vlgmr.msra.gmra.mrb[58].mxu0 %vm212_vm0, %v18147_v45  ;;  %v2634_v40 = vpop.permute.xlu1 %2633  ;;  %v2711_v3 = vpop.permute.xlu0 %2710 }
 0x398   : > { %15962 = vmatmul.mubr.msk.f32.vlgmr.msra.gmra.mrb[28].mxu1 %vm212_vm0, %v18150_v44  ;;  %15964 = vmatprep.subr.mxu0 %v21370_v12 }
 0x399   : > { %15969 = vmatprep.subr.mxu1 %v21370_v12  ;;  %15965 = vmatpush3.xpose.msk.msra.mxu0 %vm212_vm0, %v2480_v60 }
 0x39a   : > { %15970 = vmatpush3.xpose.msk.msra.mxu1 %vm212_vm0, %v2557_v19  ;;  %6996 = vrot.lane.b32.xlu1 %v18107_v63, %s17430_s13 }
 0x39b   : > { %7230 = vrot.lane.b32.xlu0 %v18120_v42, %s17430_s13  ;;  %15966 = vmatprep.mubr.msk.f32.mxu0 %vm17427_vm6, %v21370_v12  ;;  %v2788_v14 = vpop.permute.xlu1 %2787  ;;  %v2865_v29 = vpop.permute.xlu0 %2864 }
 0x39c   : > { %15971 = vmatprep.mubr.msk.f32.mxu1 %vm17427_vm6, %v21370_v12  ;;  %15967 = vmatmul.mubr.msk.f32.vlgmr.msra.gmra.mrb[60].mxu0 %vm212_vm0, %v18157_v22 }
 0x39d   : > { %15972 = vmatmul.mubr.msk.f32.vlgmr.msra.gmra.mrb[30].mxu1 %vm212_vm0, %v18160_v32  ;;  %15974 = vmatprep.subr.mxu0 %v21370_v12 }
 0x39e   : > { %15979 = vmatprep.subr.mxu1 %v21370_v12  ;;  %15975 = vmatpush3.xpose.msk.msra.mxu0 %vm212_vm0, %v2634_v40 }
 0x39f   : > { %15980 = vmatpush3.xpose.msk.msra.mxu1 %vm212_vm0, %v2711_v3  ;;  %6994 = vrot.lane.b32.xlu1 %v18107_v63, %s17431_s14  ;;  %v2942_v15 = vpop.permute.xlu1 %2941  ;;  %v3019_v13 = vpop.permute.xlu0 %3018 }
 0x3a0   : > { %7228 = vrot.lane.b32.xlu0 %v18120_v42, %s17431_s14  ;;  %15976 = vmatprep.mubr.msk.f32.mxu0 %vm17427_vm6, %v21370_v12 }
 0x3a1   : > { %15981 = vmatprep.mubr.msk.f32.mxu1 %vm17427_vm6, %v21370_v12  ;;  %15977 = vmatmul.mubr.msk.f32.vlgmr.msra.gmra.mrb[62].mxu0 %vm212_vm0, %v18167_v21 }
 0x3a2   : > { %15982 = vmatmul.mubr.msk.f32.vlgmr.msra.gmra.mrb[32].mxu1 %vm212_vm0, %v18170_v59  ;;  %15984 = vmatprep.subr.mxu0 %v21370_v12 }
 0x3a3   : > { %15989 = vmatprep.subr.mxu1 %v21370_v12  ;;  %15985 = vmatpush3.xpose.msk.msra.mxu0 %vm212_vm0, %v2788_v14  ;;  %v3096_v47 = vpop.permute.xlu1 %3095  ;;  %v3173_v24 = vpop.permute.xlu0 %3172 }
 0x3a4   : > { %15990 = vmatpush3.xpose.msk.msra.mxu1 %vm212_vm0, %v2865_v29  ;;  %7152 = vrot.lane.b32.xlu1 %v18117_v43, %s17430_s13 }
 0x3a5   : > { %7386 = vrot.lane.b32.xlu0 %v18130_v26, %s17430_s13  ;;  %15986 = vmatprep.mubr.msk.f32.mxu0 %vm17427_vm6, %v21370_v12 }
 0x3a6   : > { %15991 = vmatprep.mubr.msk.f32.mxu1 %vm17427_vm6, %v21370_v12  ;;  %15987 = vmatmul.mubr.msk.f32.vlgmr.msra.gmra.mrb[64].mxu0 %vm212_vm0, %v18177_v1 }
 0x3a7   : > { %15992 = vmatmul.mubr.msk.f32.vlgmr.msra.gmra.mrb[34].mxu1 %vm212_vm0, %v18180_v6  ;;  %15994 = vmatprep.subr.mxu0 %v21370_v12  ;;  %v3250_v55 = vpop.permute.xlu1 %3249  ;;  %v3327_v33 = vpop.permute.xlu0 %3326 }
 0x3a8   : > { %15999 = vmatprep.subr.mxu1 %v21370_v12  ;;  %15995 = vmatpush3.xpose.msk.msra.mxu0 %vm212_vm0, %v2942_v15 }
 0x3a9   : > { %16000 = vmatpush3.xpose.msk.msra.mxu1 %vm212_vm0, %v3019_v13  ;;  %7150 = vrot.lane.b32.xlu1 %v18117_v43, %s17431_s14 }
 0x3aa   : > { %7384 = vrot.lane.b32.xlu0 %v18130_v26, %s17431_s14  ;;  %15996 = vmatprep.mubr.msk.f32.mxu0 %vm17427_vm6, %v21370_v12 }
 0x3ab   : > { %16001 = vmatprep.mubr.msk.f32.mxu1 %vm17427_vm6, %v21370_v12  ;;  %15997 = vmatmul.mubr.msk.f32.vlgmr.msra.gmra.mrb[66].mxu0 %vm212_vm0, %v18187_v18  ;;  %v3404_v27 = vpop.permute.xlu1 %3403  ;;  %v3481_v25 = vpop.permute.xlu0 %3480 }
 0x3ac   : > { %16002 = vmatmul.mubr.msk.f32.vlgmr.msra.gmra.mrb[36].mxu1 %vm212_vm0, %v18190_v58  ;;  %16004 = vmatprep.subr.mxu0 %v21370_v12 }
 0x3ad   : > { %16009 = vmatprep.subr.mxu1 %v21370_v12  ;;  %16005 = vmatpush3.xpose.msk.msra.mxu0 %vm212_vm0, %v3096_v47 }
 0x3ae   : > { %16010 = vmatpush3.xpose.msk.msra.mxu1 %vm212_vm0, %v3173_v24  ;;  %7308 = vrot.lane.b32.xlu1 %v18127_v35, %s17430_s13 }
 0x3af   : > { %7542 = vrot.lane.b32.xlu0 %v18140_v31, %s17430_s13  ;;  %16006 = vmatprep.mubr.msk.f32.mxu0 %vm17427_vm6, %v21370_v12  ;;  %v3558_v7 = vpop.permute.xlu1 %3557  ;;  %v3635_v51 = vpop.permute.xlu0 %3634 }
 0x3b0   : > { %16011 = vmatprep.mubr.msk.f32.mxu1 %vm17427_vm6, %v21370_v12  ;;  %16007 = vmatmul.mubr.msk.f32.vlgmr.msra.gmra.mrb[68].mxu0 %vm212_vm0, %v18197_v52 }
 0x3b1   : > { %16012 = vmatmul.mubr.msk.f32.vlgmr.msra.gmra.mrb[38].mxu1 %vm212_vm0, %v18200_v56  ;;  %16014 = vmatprep.subr.mxu0 %v21370_v12 }
 0x3b2   : > { %16019 = vmatprep.subr.mxu1 %v21370_v12  ;;  %16015 = vmatpush3.xpose.msk.msra.mxu0 %vm212_vm0, %v3250_v55 }
 0x3b3   : > { %16020 = vmatpush3.xpose.msk.msra.mxu1 %vm212_vm0, %v3327_v33  ;;  %7306 = vrot.lane.b32.xlu1 %v18127_v35, %s17431_s14  ;;  %v3712_v54 = vpop.permute.xlu1 %3711  ;;  %v3789_v11 = vpop.permute.xlu0 %3788 }
 0x3b4   : > { %7540 = vrot.lane.b32.xlu0 %v18140_v31, %s17431_s14  ;;  %16016 = vmatprep.mubr.msk.f32.mxu0 %vm17427_vm6, %v21370_v12 }
 0x3b5   : > { %16021 = vmatprep.mubr.msk.f32.mxu1 %vm17427_vm6, %v21370_v12  ;;  %16017 = vmatmul.mubr.msk.f32.vlgmr.msra.gmra.mrb[70].mxu0 %vm212_vm0, %v18207_v8 }
 0x3b6   : > { %16022 = vmatmul.mubr.msk.f32.vlgmr.msra.gmra.mrb[40].mxu1 %vm212_vm0, %v18210_v37  ;;  %16024 = vmatprep.subr.mxu0 %v21370_v12 }
 0x3b7   : > { %16029 = vmatprep.subr.mxu1 %v21370_v12  ;;  %16025 = vmatpush3.xpose.msk.msra.mxu0 %vm212_vm0, %v3404_v27  ;;  %v3866_v60 = vpop.permute.xlu1 %3865  ;;  %v4327_v19 = vpop.permute.xlu0 %4326 }
 0x3b8   : > { %16030 = vmatpush3.xpose.msk.msra.mxu1 %vm212_vm0, %v3481_v25  ;;  %7464 = vrot.lane.b32.xlu1 %v18137_v57, %s17430_s13 }
 0x3b9   : > { %7698 = vrot.lane.b32.xlu0 %v18150_v44, %s17430_s13  ;;  %16026 = vmatprep.mubr.msk.f32.mxu0 %vm17427_vm6, %v21370_v12 }
 0x3ba   : > { %16031 = vmatprep.mubr.msk.f32.mxu1 %vm17427_vm6, %v21370_v12  ;;  %16027 = vmatmul.mubr.msk.f32.vlgmr.msra.gmra.mrb[72].mxu0 %vm212_vm0, %v18217_v2 }
 0x3bb   : > { %16032 = vmatmul.mubr.msk.f32.vlgmr.msra.gmra.mrb[42].mxu1 %vm212_vm0, %v18220_v62  ;;  %16034 = vmatprep.subr.mxu0 %v21370_v12  ;;  %v4403_v40 = vpop.permute.xlu1 %4402  ;;  %v18573_v29 = vpop.permute.xlu0 %4478 }
 0x3bc   : > { %16039 = vmatprep.subr.mxu1 %v21370_v12  ;;  %16035 = vmatpush3.xpose.msk.msra.mxu0 %vm212_vm0, %v3558_v7 }
 0x3bd   : > { %16040 = vmatpush3.xpose.msk.msra.mxu1 %vm212_vm0, %v3635_v51  ;;  %7462 = vrot.lane.b32.xlu1 %v18137_v57, %s17431_s14 }
 0x3be   : > { %7696 = vrot.lane.b32.xlu0 %v18150_v44, %s17431_s14  ;;  %16036 = vmatprep.mubr.msk.f32.mxu0 %vm17427_vm6, %v21370_v12 }
 0x3bf   : > { %16041 = vmatprep.mubr.msk.f32.mxu1 %vm17427_vm6, %v21370_v12  ;;  %16037 = vmatmul.mubr.msk.f32.vlgmr.msra.gmra.mrb[74].mxu0 %vm212_vm0, %v18227_v38  ;;  %v18569_v3 = vpop.permute.xlu1 %4554  ;;  %v18577_v13 = vpop.permute.xlu0 %4630 }
 0x3c0   : > { %16042 = vmatmul.mubr.msk.f32.vlgmr.msra.gmra.mrb[44].mxu1 %vm212_vm0, %v18230_v17  ;;  %16044 = vmatprep.subr.mxu0 %v21370_v12 }
 0x3c1   : > { %16049 = vmatprep.subr.mxu1 %v21370_v12  ;;  %16045 = vmatpush3.xpose.msk.msra.mxu0 %vm212_vm0, %v3712_v54 }
 0x3c2   : > { %16050 = vmatpush3.xpose.msk.msra.mxu1 %vm212_vm0, %v3789_v11  ;;  %7620 = vrot.lane.b32.xlu1 %v18147_v45, %s17430_s13 }
 0x3c3   : > { %7854 = vrot.lane.b32.xlu0 %v18160_v32, %s17430_s13  ;;  %16046 = vmatprep.mubr.msk.f32.mxu0 %vm17427_vm6, %v21370_v12  ;;  %v18571_v14 = vpop.permute.xlu1 %4706  ;;  %v18581_v24 = vpop.permute.xlu0 %4782 }
 0x3c4   : > { %16051 = vmatprep.mubr.msk.f32.mxu1 %vm17427_vm6, %v21370_v12  ;;  %16047 = vmatmul.mubr.msk.f32.vlgmr.msra.gmra.mrb[76].mxu0 %vm212_vm0, %v18240_v28 }
 0x3c5   : > { %16052 = vmatmul.mubr.msk.f32.vlgmr.msra.gmra.mrb[46].mxu1 %vm212_vm0, %v18243_v16  ;;  %16054 = vmatprep.subr.mxu0 %v21370_v12 }
 0x3c6   : > { %16059 = vmatprep.subr.mxu1 %v21370_v12  ;;  %16055 = vmatpush3.xpose.msk.msra.mxu0 %vm212_vm0, %v3866_v60 }
 0x3c7   : > { %16060 = vmatpush3.msra.mxu1 %v4327_v19  ;;  %7618 = vrot.lane.b32.xlu1 %v18147_v45, %s17431_s14  ;;  %v18575_v15 = vpop.permute.xlu1 %4858  ;;  %v18585_v33 = vpop.permute.xlu0 %4934 }
 0x3c8   : > { %6606 = vrot.lane.b32.xlu0 %v18243_v16, %s17429_s12  ;;  %16056 = vmatprep.mubr.msk.f32.mxu0 %vm17427_vm6, %v21370_v12  ;;  %21467 = vst [vmem:[#allocation56_spill] sm:$0xff] %v18585_v33  ;;  %s21279_s12 = scalar_lea.vmem %s21350_s2, %s14858_s16 }
 0x3c9   : > { %16057 = vmatmul.mubr.msk.f32.vlgmr.msra.gmra.mrb[78].mxu0 %vm212_vm0, %v18237_v48  ;;  %16064 = vmatprep.subr.mxu0 %v21370_v12 }
 0x3ca   : > { %16065 = vmatpush3.msra.mxu0 %v4403_v40  ;;  %16061 = vmatprep.mubr.msk.f32.mxu1 %vm17427_vm6, %v21370_v12 }
 0x3cb   : > { %7776 = vrot.lane.b32.xlu1 %v18157_v22, %s17430_s13  ;;  %16069 = vmatprep.subr.mxu1 %v21370_v12  ;;  %v18579_v47 = vpop.permute.xlu1 %5010  ;;  %v18589_v25 = vpop.permute.xlu0 %5086 }
 0x3cc   : > { %16066 = vmatprep.mubr.msk.f32.mxu0 %vm17427_vm6, %v21370_v12  ;;  %16074 = vmatprep.subr.mxu0 %v21370_v12  ;;  %21469 = vst [vmem:[#allocation58_spill] sm:$0xff] %v18589_v25 }
 0x3cf   : > { %7774 = vrot.lane.b32.xlu1 %v18157_v22, %s17431_s14  ;;  %v18583_v55 = vpop.permute.xlu1 %5162  ;;  %v18593_v51 = vpop.permute.xlu0 %5238 }
 0x3d0   : > { %21466 = vst [vmem:[#allocation55_spill] sm:$0xff] %v18583_v55  ;;  %21471 = vst [vmem:[#allocation60_spill] sm:$0xff] %v18593_v51 }
 0x3d3   : > { %7932 = vrot.lane.b32.xlu1 %v18167_v21, %s17430_s13  ;;  %v18587_v27 = vpop.permute.xlu1 %5314  ;;  %v18605_v23 = vpop.permute.xlu0 %5390 }
 0x3d4   : > { %21468 = vst [vmem:[#allocation57_spill] sm:$0xff] %v18587_v27  ;;  %21473 = vst [vmem:[#allocation62_spill] sm:$0xff] %v18605_v23 }
 0x3d7   : > { %v18591_v7 = vpop.permute.xlu1 %5466  ;;  %v18619_v61 = vpop.permute.xlu0 %5542 }
 0x3d8   : > { %21470 = vst [vmem:[#allocation59_spill] sm:$0xff] %v18591_v7  ;;  %21475 = vst [vmem:[#allocation64_spill] sm:$0xff] %v18619_v61 }
 0x3db   : > { %v18597_v19 = vpop.permute.xlu1 %5618  ;;  %v18631_v44 = vpop.permute.xlu0 %5694 }
 0x3dc   : > { %21472 = vst [vmem:[#allocation61_spill] sm:$0xff] %v18597_v19  ;;  %21477 = vst [vmem:[#allocation66_spill] sm:$0xff] %v18631_v44 }
 0x3df   : > { %v18647_v57 = vpop.permute.xlu0 %5846 }
 0x3e0   : > { %21479 = vst [vmem:[#allocation68_spill] sm:$0xff] %v18647_v57 }
 0x3e3   : > { %v18661_v43 = vpop.permute.xlu0 %6150 }
 0x3e4   : > { %21481 = vst [vmem:[#allocation70_spill] sm:$0xff] %v18661_v43 }
 0x3e7   : > { %v18675_v43 = vpop.permute.xlu0 %6302 }
 0x3e8   : > { %21483 = vst [vmem:[#allocation72_spill] sm:$0xff] %v18675_v43 }
 0x3eb   : > { %v18689_v43 = vpop.permute.xlu0 %6454 }
 0x3ec   : > { %21485 = vst [vmem:[#allocation74_spill] sm:$0xff] %v18689_v43 }
 0x44e   : > { %v1550_v54 = vpop.f32.mrb[46].mxu0 }
 0x44f   : > { %v18595_v11 = vmul.f32 0.25, %v1550_v54  ;;  %v15903_v60 = vpop.f32.mrb[47].mxu0 }
 0x451   : > { %v3974_v40 = vsel %vm3973_vm7, %v18595_v11, -inf }
 0x452   : > { %v1704_v12 = vpop.f32.mrb[18].mxu1  ;;  %3975 = vmax.xlane.f32.xlu0 %v3974_v40  ;;  %v1627_v0 = vpop.f32.mrb[48].mxu0 }
 0x453   : > { %v18601_v49 = vmul.f32 0.25, %v1704_v12  ;;  %v18603_v46 = vmul.f32 0.25, %v1627_v0  ;;  %v15908_v34 = vpop.f32.mrb[49].mxu0  ;;  %v15913_v36 = vpop.f32.mrb[19].mxu1 }
 0x454   : > { %v18613_v0 = vpop.permute.xlu1 %5770 }
 0x455   : > { %v3980_v54 = vsel %vm3973_vm7, %v18601_v49, -inf  ;;  %v3977_v60 = vsel %vm3973_vm7, %v18603_v46, -inf  ;;  %21474 = vst [vmem:[#allocation63_spill] sm:$0xff] %v18613_v0  ;;  %v18703_v0 = vpop.permute.xlu0 %6762 }
 0x456   : > { %3981 = vmax.xlane.f32.xlu0 %v3980_v54  ;;  %3978 = vmax.xlane.f32.xlu1 %v3977_v60  ;;  %v1781_v20 = vpop.f32.mrb[50].mxu0  ;;  %21487 = vst [vmem:[#allocation76_spill] sm:$0xff] %v18703_v0 }
 0x457   : > { %v18611_v9 = vmul.f32 0.25, %v1781_v20  ;;  %v1858_v40 = vpop.f32.mrb[20].mxu1  ;;  %v15918_v12 = vpop.f32.mrb[51].mxu0 }
 0x458   : > { %v15923_v10 = vpop.f32.mrb[21].mxu1  ;;  %v18615_v34 = vmul.f32 0.25, %v1858_v40  ;;  %v18629_v12 = vpop.permute.xlu1 %5922 }
 0x459   : > { %v3983_v36 = vsel %vm3973_vm7, %v18611_v9, -inf  ;;  %21476 = vst [vmem:[#allocation65_spill] sm:$0xff] %v18629_v12  ;;  %v18717_v0 = vpop.permute.xlu0 %6760 }
 0x45a   : > { %3984 = vmax.xlane.f32.xlu0 %v3983_v36  ;;  %v3986_v10 = vsel %vm3973_vm7, %v18615_v34, -inf  ;;  %21489 = vst [vmem:[#allocation78_spill] sm:$0xff] %v18717_v0 }
 0x45b   : > { %v1935_v5 = vpop.f32.mrb[52].mxu0 }
 0x45c   : > { %v18621_v50 = vmul.f32 0.25, %v1935_v5  ;;  %v2012_v54 = vpop.f32.mrb[22].mxu1  ;;  %v15928_v60 = vpop.f32.mrb[53].mxu0 }
 0x45d   : > { %v18623_v20 = vmul.f32 0.25, %v2012_v54  ;;  %v15933_v53 = vpop.f32.mrb[23].mxu1  ;;  %v18641_v26 = vpop.permute.xlu1 %5998 }
 0x45e   : > { %v3989_v40 = vsel %vm3973_vm7, %v18621_v50, -inf  ;;  %3987 = vmax.xlane.f32.xlu0 %v3986_v10  ;;  %21478 = vst [vmem:[#allocation67_spill] sm:$0xff] %v18641_v26  ;;  %v18731_v0 = vpop.permute.xlu0 %6918 }
 0x45f   : > { %3990 = vmax.xlane.f32.xlu1 %v3989_v40  ;;  %v3992_v53 = vsel %vm3973_vm7, %v18623_v20, -inf  ;;  %21491 = vst [vmem:[#allocation80_spill] sm:$0xff] %v18731_v0 }
 0x460   : > { %v2089_v36 = vpop.f32.mrb[54].mxu0 }
 0x461   : > { %v18633_v5 = vmul.f32 0.25, %v2089_v36  ;;  %v2166_v31 = vpop.f32.mrb[24].mxu1  ;;  %v15938_v60 = vpop.f32.mrb[55].mxu0 }
 0x462   : > { %v18637_v54 = vmul.f32 0.25, %v2166_v31  ;;  %v15943_v22 = vpop.f32.mrb[25].mxu1  ;;  %3993 = vmax.xlane.f32.xlu0 %v3992_v53  ;;  %v18745_v0 = vpop.permute.xlu0 %6916 }
 0x463   : > { %v3995_v10 = vsel %vm3973_vm7, %v18633_v5, -inf  ;;  %21493 = vst [vmem:[#allocation82_spill] sm:$0xff] %v18745_v0 }
 0x464   : > { %3996 = vmax.xlane.f32.xlu1 %v3995_v10  ;;  %v3998_v36 = vsel %vm3973_vm7, %v18637_v54, -inf }
 0x465   : > { %v2243_v40 = vpop.f32.mrb[56].mxu0 }
 0x466   : > { %v18645_v45 = vmul.f32 0.25, %v2243_v40  ;;  %v2320_v60 = vpop.f32.mrb[26].mxu1  ;;  %v15948_v42 = vpop.f32.mrb[57].mxu0  ;;  %3999 = vmax.xlane.f32.xlu0 %v3998_v36 }
 0x467   : > { %v18649_v31 = vmul.f32 0.25, %v2320_v60  ;;  %v15953_v22 = vpop.f32.mrb[27].mxu1  ;;  %v18657_v42 = vpop.permute.xlu1 %6074 }
 0x468   : > { %v4001_v53 = vsel %vm3973_vm7, %v18645_v45, -inf  ;;  %21480 = vst [vmem:[#allocation69_spill] sm:$0xff] %v18657_v42  ;;  %v18759_v51 = vpop.permute.xlu0 %7074 }
 0x469   : > { %4002 = vmax.xlane.f32.xlu1 %v4001_v53  ;;  %v4004_v10 = vsel %vm3973_vm7, %v18649_v31, -inf  ;;  %21495 = vst [vmem:[#allocation84_spill] sm:$0xff] %v18759_v51 }
 0x46a   : > { %v2397_v39 = vpop.f32.mrb[58].mxu0  ;;  %4005 = vmax.xlane.f32.xlu0 %v4004_v10 }
 0x46b   : > { %v18655_v35 = vmul.f32 0.25, %v2397_v39  ;;  %v2474_v40 = vpop.f32.mrb[28].mxu1  ;;  %v15958_v30 = vpop.f32.mrb[59].mxu0 }
 0x46c   : > { %v18659_v36 = vmul.f32 0.25, %v2474_v40  ;;  %v15963_v60 = vpop.f32.mrb[29].mxu1  ;;  %v18671_v42 = vpop.permute.xlu1 %6226 }
 0x46d   : > { %v4007_v22 = vsel %vm3973_vm7, %v18655_v35, -inf  ;;  %21482 = vst [vmem:[#allocation71_spill] sm:$0xff] %v18671_v42 }
 0x46e   : > { %4008 = vmax.xlane.f32.xlu1 %v4007_v22  ;;  %v4010_v53 = vsel %vm3973_vm7, %v18659_v36, -inf }
 0x46f   : > { %v2551_v4 = vpop.f32.mrb[60].mxu0  ;;  %4011 = vmax.xlane.f32.xlu0 %v4010_v53 }
 0x470   : > { %v18667_v39 = vmul.f32 0.25, %v2551_v4  ;;  %v2628_v10 = vpop.f32.mrb[30].mxu1  ;;  %v15968_v30 = vpop.f32.mrb[61].mxu0 }
 0x471   : > { %v18669_v26 = vmul.f32 0.25, %v2628_v10  ;;  %v15973_v40 = vpop.f32.mrb[31].mxu1  ;;  %v18685_v12 = vpop.permute.xlu1 %6378 }
 0x472   : > { %v4013_v60 = vsel %vm3973_vm7, %v18667_v39, -inf  ;;  %21484 = vst [vmem:[#allocation73_spill] sm:$0xff] %v18685_v12 }
 0x473   : > { %4014 = vmax.xlane.f32.xlu1 %v4013_v60  ;;  %v4016_v22 = vsel %vm3973_vm7, %v18669_v26, -inf }
 0x474   : > { %v2705_v63 = vpop.f32.mrb[62].mxu0  ;;  %4017 = vmax.xlane.f32.xlu0 %v4016_v22 }
 0x475   : > { %v18679_v4 = vmul.f32 0.25, %v2705_v63  ;;  %v2782_v53 = vpop.f32.mrb[32].mxu1  ;;  %v15978_v30 = vpop.f32.mrb[63].mxu0 }
 0x476   : > { %v18681_v10 = vmul.f32 0.25, %v2782_v53  ;;  %v15983_v40 = vpop.f32.mrb[33].mxu1  ;;  %v18699_v12 = vpop.permute.xlu1 %6530 }
 0x477   : > { %v4019_v42 = vsel %vm3973_vm7, %v18679_v4, -inf  ;;  %21486 = vst [vmem:[#allocation75_spill] sm:$0xff] %v18699_v12 }
 0x478   : > { %4020 = vmax.xlane.f32.xlu1 %v4019_v42  ;;  %v4022_v60 = vsel %vm3973_vm7, %v18681_v10, -inf }
 0x479   : > { %v2859_v57 = vpop.f32.mrb[64].mxu0  ;;  %4023 = vmax.xlane.f32.xlu0 %v4022_v60 }
 0x47a   : > { %v18691_v63 = vmul.f32 0.25, %v2859_v57  ;;  %v2936_v22 = vpop.f32.mrb[34].mxu1  ;;  %v15988_v30 = vpop.f32.mrb[65].mxu0 }
 0x47b   : > { %v18693_v53 = vmul.f32 0.25, %v2936_v22  ;;  %v15993_v40 = vpop.f32.mrb[35].mxu1  ;;  %v18713_v19 = vpop.permute.xlu1 %6682 }
 0x47c   : > { %v4025_v16 = vsel %vm3973_vm7, %v18691_v63, -inf  ;;  %21488 = vst [vmem:[#allocation77_spill] sm:$0xff] %v18713_v19 }
 0x47d   : > { %4026 = vmax.xlane.f32.xlu1 %v4025_v16  ;;  %v4028_v42 = vsel %vm3973_vm7, %v18693_v53, -inf }
 0x47e   : > { %v3013_v41 = vpop.f32.mrb[66].mxu0  ;;  %4029 = vmax.xlane.f32.xlu0 %v4028_v42 }
 0x47f   : > { %v18701_v43 = vmul.f32 0.25, %v3013_v41  ;;  %v3090_v57 = vpop.f32.mrb[36].mxu1  ;;  %v15998_v60 = vpop.f32.mrb[67].mxu0 }
 0x480   : > { %v18705_v22 = vmul.f32 0.25, %v3090_v57  ;;  %v16003_v30 = vpop.f32.mrb[37].mxu1  ;;  %v18727_v19 = vpop.permute.xlu1 %6840 }
 0x481   : > { %v4031_v40 = vsel %vm3973_vm7, %v18701_v43, -inf  ;;  %21490 = vst [vmem:[#allocation79_spill] sm:$0xff] %v18727_v19 }
 0x482   : > { %4032 = vmax.xlane.f32.xlu1 %v4031_v40  ;;  %v4034_v16 = vsel %vm3973_vm7, %v18705_v22, -inf }
 0x483   : > { %v3167_v44 = vpop.f32.mrb[68].mxu0  ;;  %4035 = vmax.xlane.f32.xlu0 %v4034_v16 }
 0x484   : > { %v18711_v12 = vmul.f32 0.25, %v3167_v44  ;;  %v3244_v41 = vpop.f32.mrb[38].mxu1  ;;  %v16008_v42 = vpop.f32.mrb[69].mxu0 }
 0x485   : > { %v18715_v60 = vmul.f32 0.25, %v3244_v41  ;;  %v16013_v57 = vpop.f32.mrb[39].mxu1  ;;  %v18741_v23 = vpop.permute.xlu1 %6838 }
 0x486   : > { %v4037_v30 = vsel %vm3973_vm7, %v18711_v12, -inf  ;;  %21492 = vst [vmem:[#allocation81_spill] sm:$0xff] %v18741_v23 }
 0x487   : > { %4038 = vmax.xlane.f32.xlu1 %v4037_v30  ;;  %v4040_v40 = vsel %vm3973_vm7, %v18715_v60, -inf }
 0x488   : > { %v3321_v17 = vpop.f32.mrb[70].mxu0  ;;  %4041 = vmax.xlane.f32.xlu0 %v4040_v40 }
 0x489   : > { %v18723_v44 = vmul.f32 0.25, %v3321_v17  ;;  %v3398_v16 = vpop.f32.mrb[40].mxu1  ;;  %v16018_v42 = vpop.f32.mrb[71].mxu0 }
 0x48a   : > { %v18725_v61 = vmul.f32 0.25, %v3398_v16  ;;  %v16023_v41 = vpop.f32.mrb[41].mxu1  ;;  %v18755_v23 = vpop.permute.xlu1 %6996 }
 0x48b   : > { %v4043_v57 = vsel %vm3973_vm7, %v18723_v44, -inf  ;;  %21494 = vst [vmem:[#allocation83_spill] sm:$0xff] %v18755_v23 }
 0x48c   : > { %4044 = vmax.xlane.f32.xlu1 %v4043_v57  ;;  %v4046_v30 = vsel %vm3973_vm7, %v18725_v61, -inf }
 0x48d   : > { %v3475_v48 = vpop.f32.mrb[72].mxu0  ;;  %4047 = vmax.xlane.f32.xlu0 %v4046_v30 }
 0x48e   : > { %v18735_v17 = vmul.f32 0.25, %v3475_v48  ;;  %v3552_v40 = vpop.f32.mrb[42].mxu1  ;;  %v16028_v42 = vpop.f32.mrb[73].mxu0 }
 0x48f   : > { %v18737_v16 = vmul.f32 0.25, %v3552_v40  ;;  %v16033_v41 = vpop.f32.mrb[43].mxu1  ;;  %v18767_v23 = vpop.permute.xlu1 %6994 }
 0x490   : > { %v4049_v19 = vsel %vm3973_vm7, %v18735_v17, -inf  ;;  %21496 = vst [vmem:[#allocation85_spill] sm:$0xff] %v18767_v23 }
 0x491   : > { %4050 = vmax.xlane.f32.xlu1 %v4049_v19  ;;  %v4052_v57 = vsel %vm3973_vm7, %v18737_v16, -inf }
 0x492   : > { %v3629_v7 = vpop.f32.mrb[74].mxu0  ;;  %4053 = vmax.xlane.f32.xlu0 %v4052_v57 }
 0x493   : > { %v18747_v48 = vmul.f32 0.25, %v3629_v7  ;;  %v3706_v30 = vpop.f32.mrb[44].mxu1  ;;  %v16038_v42 = vpop.f32.mrb[75].mxu0 }
 0x494   : > { %v18749_v40 = vmul.f32 0.25, %v3706_v30  ;;  %v16043_v41 = vpop.f32.mrb[45].mxu1 }
 0x495   : > { %v4055_v62 = vsel %vm3973_vm7, %v18747_v48, -inf }
 0x496   : > { %4056 = vmax.xlane.f32.xlu1 %v4055_v62  ;;  %v4058_v19 = vsel %vm3973_vm7, %v18749_v40, -inf }
 0x497   : > { %v3783_v28 = vpop.f32.mrb[76].mxu0  ;;  %4059 = vmax.xlane.f32.xlu0 %v4058_v19 }
 0x498   : > { %v18757_v0 = vmul.f32 0.25, %v3783_v28  ;;  %v3860_v7 = vpop.f32.mrb[46].mxu1  ;;  %v16048_v57 = vpop.f32.mrb[77].mxu0 }
 0x499   : > { %v18761_v30 = vmul.f32 0.25, %v3860_v7  ;;  %v16053_v42 = vpop.f32.mrb[47].mxu1  ;;  %v18771_v57 = vpop.permute.xlu0 %7072 }
 0x49a   : > { %v4061_v41 = vsel %vm3973_vm7, %v18757_v0, -inf  ;;  %21497 = vst [vmem:[#allocation86_spill] sm:$0xff] %v18771_v57  ;;  %v18775_v42 = vpop.permute.xlu1 %7152 }
 0x49b   : > { %4062 = vmax.xlane.f32.xlu1 %v4061_v41  ;;  %v4064_v62 = vsel %vm3973_vm7, %v18761_v30, -inf  ;;  %21498 = vst [vmem:[#allocation87_spill] sm:$0xff] %v18775_v42 }
 0x49c   : > { %v3937_v27 = vpop.f32.mrb[78].mxu0  ;;  %4065 = vmax.xlane.f32.xlu0 %v4064_v62 }
 0x49d   : > { %v18769_v28 = vmul.f32 0.25, %v3937_v27  ;;  %v16058_v19 = vpop.f32.mrb[79].mxu0  ;;  %v18777_v51 = vpop.permute.xlu0 %7230 }
 0x49e   : > { %21499 = vst [vmem:[#allocation88_spill] sm:$0xff] %v18777_v51  ;;  %v18779_v41 = vpop.permute.xlu1 %7150 }
 0x49f   : > { %v4067_v7 = vsel %vm3973_vm7, %v18769_v28, -inf  ;;  %21500 = vst [vmem:[#allocation89_spill] sm:$0xff] %v18779_v41 }
 0x4a0   : > { %4068 = vmax.xlane.f32.xlu1 %v4067_v7 }
 0x4a1   : > { %v18781_v25 = vpop.permute.xlu0 %7228 }
 0x4a2   : > { %21501 = vst [vmem:[#allocation90_spill] sm:$0xff] %v18781_v25  ;;  %v18783_v62 = vpop.permute.xlu1 %7308 }
 0x4a3   : > { %21502 = vst [vmem:[#allocation91_spill] sm:$0xff] %v18783_v62 }
 0x4a5   : > { %v18785_v23 = vpop.permute.xlu0 %7386 }
 0x4a6   : > { %21503 = vst [vmem:[#allocation92_spill] sm:$0xff] %v18785_v23  ;;  %v18787_v27 = vpop.permute.xlu1 %7306 }
 0x4a7   : > { %21504 = vst [vmem:[#allocation93_spill] sm:$0xff] %v18787_v27 }
 0x4a9   : > { %v18789_v19 = vpop.permute.xlu0 %7384 }
 0x4aa   : > { %21505 = vst [vmem:[#allocation94_spill] sm:$0xff] %v18789_v19  ;;  %v18791_v57 = vpop.permute.xlu1 %7464 }
 0x4ab   : > { %21506 = vst [vmem:[#allocation95_spill] sm:$0xff] %v18791_v57 }
 0x4ad   : > { %v18793_v37 = vpop.permute.xlu0 %7542 }
 0x4ae   : > { %21507 = vst [vmem:[#allocation96_spill] sm:$0xff] %v18793_v37  ;;  %v18795_v7 = vpop.permute.xlu1 %7462 }
 0x4af   : > { %21508 = vst [vmem:[#allocation97_spill] sm:$0xff] %v18795_v7 }
 0x4b1   : > { %v18797_v42 = vpop.permute.xlu0 %7540 }
 0x4b2   : > { %21509 = vst [vmem:[#allocation98_spill] sm:$0xff] %v18797_v42  ;;  %v18799_v51 = vpop.permute.xlu1 %7620 }
 0x4b3   : > { %21510 = vst [vmem:[#allocation99_spill] sm:$0xff] %v18799_v51 }
 0x4b5   : > { %v18801_v41 = vpop.permute.xlu0 %7698 }
 0x4b6   : > { %21511 = vst [vmem:[#allocation100_spill] sm:$0xff] %v18801_v41  ;;  %v18803_v25 = vpop.permute.xlu1 %7618 }
 0x4b7   : > { %21512 = vst [vmem:[#allocation101_spill] sm:$0xff] %v18803_v25 }
 0x4b9   : > { %v18805_v62 = vpop.permute.xlu0 %7696 }
 0x4ba   : > { %21513 = vst [vmem:[#allocation102_spill] sm:$0xff] %v18805_v62  ;;  %v18807_v23 = vpop.permute.xlu1 %7776 }
 0x4bb   : > { %21514 = vst [vmem:[#allocation103_spill] sm:$0xff] %v18807_v23 }
 0x4bd   : > { %v18809_v27 = vpop.permute.xlu0 %7854 }
 0x4be   : > { %21515 = vst [vmem:[#allocation104_spill] sm:$0xff] %v18809_v27  ;;  %v18811_v19 = vpop.permute.xlu1 %7774 }
 0x4bf   : > { %21516 = vst [vmem:[#allocation105_spill] sm:$0xff] %v18811_v19 }
 0x4c1   : > { %v18813_v57 = vpop.permute.xlu0 %6606 }
 0x4c2   : > { %21517 = vst [vmem:[#allocation106_spill] sm:$0xff] %v18813_v57  ;;  %v18815_v37 = vpop.permute.xlu1 %7932 }
 0x4c3   : > { %21518 = vst [vmem:[#allocation107_spill] sm:$0xff] %v18815_v37 }
 0x4df   : > { %v3976_v7 = vpop.xlane.xlu0 %3975 }
 0x4e0   : > { %v4070_v42 = vsub.f32 %v18595_v11, %v3976_v7 }
 0x4e2   : > { %v4102_v51 = vmul.f32 1.442695, %v4070_v42 }
 0x4e3   : > { %v3979_v55 = vpop.xlane.xlu1 %3978  ;;  %v3982_v41 = vpop.xlane.xlu0 %3981 }
 0x4e4   : > { %16970 = vpow2.f32 %v4102_v51  ;;  %v4071_v25 = vsub.f32 %v18603_v46, %v3979_v55  ;;  %v4072_v62 = vsub.f32 %v18601_v49, %v3982_v41 }
 0x4e6   : > { %v4104_v23 = vmul.f32 1.442695, %v4071_v25  ;;  %v4106_v38 = vmul.f32 1.442695, %v4072_v62 }
 0x4e7   : > { %v3985_v27 = vpop.xlane.xlu0 %3984 }
 0x4e8   : > { %16972 = vpow2.f32 %v4104_v23  ;;  %v4073_v19 = vsub.f32 %v18611_v9, %v3985_v27 }
 0x4e9   : > { %16974 = vpow2.f32 %v4106_v38 }
 0x4ea   : > { %v4108_v57 = vmul.f32 1.442695, %v4073_v19 }
 0x4eb   : > { %v3988_v37 = vpop.xlane.xlu0 %3987 }
 0x4ec   : > { %16976 = vpow2.f32 %v4108_v57  ;;  %v3991_v33 = vpop.xlane.xlu1 %3990  ;;  %v4074_v11 = vsub.f32 %v18615_v34, %v3988_v37 }
 0x4ed   : > { %v4075_v42 = vsub.f32 %v18621_v50, %v3991_v33 }
 0x4ee   : > { %v18823_v51 = vpop.eup %16970  ;;  %v4110_v46 = vmul.f32 1.442695, %v4074_v11 }
 0x4ef   : > { %v4112_v55 = vmul.f32 1.442695, %v4075_v42  ;;  %v3994_v49 = vpop.xlane.xlu0 %3993  ;;  %v4166_v25 = vsel %vm3973_vm7, %v18823_v51, 0.0 }
 0x4f0   : > { %16978 = vpow2.f32 %v4110_v46  ;;  %v4076_v9 = vsub.f32 %v18623_v20, %v3994_v49  ;;  %4167 = vadd.xlane.f32.xlu0 %v4166_v25 }
 0x4f1   : > { %16980 = vpow2.f32 %v4112_v55  ;;  %v3997_v23 = vpop.xlane.xlu1 %3996 }
 0x4f2   : > { %v18828_v38 = vpop.eup %16972  ;;  %v4077_v37 = vsub.f32 %v18633_v5, %v3997_v23  ;;  %v4114_v34 = vmul.f32 1.442695, %v4076_v9 }
 0x4f3   : > { %v18831_v50 = vpop.eup %16974  ;;  %v4000_v33 = vpop.xlane.xlu0 %3999  ;;  %v4169_v57 = vsel %vm3973_vm7, %v18828_v38, 0.0 }
 0x4f4   : > { %v4116_v41 = vmul.f32 1.442695, %v4077_v37  ;;  %16982 = vpow2.f32 %v4114_v34  ;;  %v4078_v62 = vsub.f32 %v18637_v54, %v4000_v33  ;;  %4170 = vadd.xlane.f32.xlu1 %v4169_v57  ;;  %v4172_v20 = vsel %vm3973_vm7, %v18831_v50, 0.0 }
 0x4f5   : > { %4173 = vadd.xlane.f32.xlu0 %v4172_v20 }
 0x4f6   : > { %v18838_v27 = vpop.eup %16976  ;;  %16984 = vpow2.f32 %v4116_v41  ;;  %v4003_v5 = vpop.xlane.xlu1 %4002  ;;  %v4118_v19 = vmul.f32 1.442695, %v4078_v62 }
 0x4f7   : > { %v4079_v7 = vsub.f32 %v18645_v45, %v4003_v5  ;;  %v4006_v11 = vpop.xlane.xlu0 %4005  ;;  %v4175_v42 = vsel %vm3973_vm7, %v18838_v27, 0.0 }
 0x4f8   : > { %16986 = vpow2.f32 %v4118_v19  ;;  %v4080_v46 = vsub.f32 %v18649_v31, %v4006_v11  ;;  %4176 = vadd.xlane.f32.xlu1 %v4175_v42 }
 0x4f9   : > { %v4120_v54 = vmul.f32 1.442695, %v4079_v7 }
 0x4fa   : > { %v18844_v55 = vpop.eup %16978  ;;  %v4122_v49 = vmul.f32 1.442695, %v4080_v46 }
 0x4fb   : > { %v18846_v25 = vpop.eup %16980  ;;  %16988 = vpow2.f32 %v4120_v54  ;;  %v4009_v9 = vpop.xlane.xlu1 %4008  ;;  %v4178_v23 = vsel %vm3973_vm7, %v18844_v55, 0.0 }
 0x4fc   : > { %v4081_v45 = vsub.f32 %v18655_v35, %v4009_v9  ;;  %16990 = vpow2.f32 %v4122_v49  ;;  %v4012_v37 = vpop.xlane.xlu0 %4011  ;;  %v4181_v34 = vsel %vm3973_vm7, %v18846_v25, 0.0  ;;  %4179 = vadd.xlane.f32.xlu0 %v4178_v23 }
 0x4fd   : > { %v4082_v31 = vsub.f32 %v18659_v36, %v4012_v37  ;;  %4182 = vadd.xlane.f32.xlu1 %v4181_v34 }
 0x4fe   : > { %v18854_v33 = vpop.eup %16982  ;;  %v4124_v57 = vmul.f32 1.442695, %v4081_v45 }
 0x4ff   : > { %v4126_v41 = vmul.f32 1.442695, %v4082_v31  ;;  %v4184_v62 = vsel %vm3973_vm7, %v18854_v33, 0.0 }
 0x500   : > { %v18858_v20 = vpop.eup %16984  ;;  %16992 = vpow2.f32 %v4124_v57  ;;  %v4015_v35 = vpop.xlane.xlu1 %4014  ;;  %4185 = vadd.xlane.f32.xlu0 %v4184_v62 }
 0x501   : > { %v4083_v5 = vsub.f32 %v18667_v39, %v4015_v35  ;;  %16994 = vpow2.f32 %v4126_v41  ;;  %v4018_v19 = vpop.xlane.xlu0 %4017  ;;  %v4187_v36 = vsel %vm3973_vm7, %v18858_v20, 0.0 }
 0x502   : > { %v18863_v7 = vpop.eup %16986  ;;  %v4084_v11 = vsub.f32 %v18669_v26, %v4018_v19  ;;  %4188 = vadd.xlane.f32.xlu1 %v4187_v36 }
 0x503   : > { %v4128_v42 = vmul.f32 1.442695, %v4083_v5  ;;  %v4190_v46 = vsel %vm3973_vm7, %v18863_v7, 0.0 }
 0x504   : > { %v4130_v54 = vmul.f32 1.442695, %v4084_v11  ;;  %4191 = vadd.xlane.f32.xlu0 %v4190_v46 }
 0x505   : > { %v18868_v49 = vpop.eup %16988  ;;  %16996 = vpow2.f32 %v4128_v42  ;;  %v4021_v39 = vpop.xlane.xlu1 %4020 }
 0x506   : > { %v18870_v9 = vpop.eup %16990  ;;  %v4085_v23 = vsub.f32 %v18679_v4, %v4021_v39  ;;  %16998 = vpow2.f32 %v4130_v54  ;;  %v4024_v45 = vpop.xlane.xlu0 %4023  ;;  %v4193_v26 = vsel %vm3973_vm7, %v18868_v49, 0.0 }
 0x507   : > { %v4086_v37 = vsub.f32 %v18681_v10, %v4024_v45  ;;  %4194 = vadd.xlane.f32.xlu1 %v4193_v26  ;;  %v4196_v34 = vsel %vm3973_vm7, %v18870_v9, 0.0 }
 0x508   : > { %v4132_v31 = vmul.f32 1.442695, %v4085_v23  ;;  %4197 = vadd.xlane.f32.xlu0 %v4196_v34 }
 0x509   : > { %v4134_v57 = vmul.f32 1.442695, %v4086_v37 }
 0x50a   : > { %v18878_v41 = vpop.eup %16992  ;;  %17000 = vpow2.f32 %v4132_v31  ;;  %v4027_v62 = vpop.xlane.xlu1 %4026 }
 0x50b   : > { %v18880_v35 = vpop.eup %16994  ;;  %v4087_v4 = vsub.f32 %v18691_v63, %v4027_v62  ;;  %17002 = vpow2.f32 %v4134_v57  ;;  %v4030_v5 = vpop.xlane.xlu0 %4029  ;;  %v4199_v10 = vsel %vm3973_vm7, %v18878_v41, 0.0 }
 0x50c   : > { %v4088_v19 = vsub.f32 %v18693_v53, %v4030_v5  ;;  %4200 = vadd.xlane.f32.xlu1 %v4199_v10  ;;  %v4202_v36 = vsel %vm3973_vm7, %v18880_v35, 0.0 }
 0x50d   : > { %v4136_v11 = vmul.f32 1.442695, %v4087_v4  ;;  %4203 = vadd.xlane.f32.xlu0 %v4202_v36 }
 0x50e   : > { %v4138_v42 = vmul.f32 1.442695, %v4088_v19 }
 0x50f   : > { %v18888_v46 = vpop.eup %16996  ;;  %17004 = vpow2.f32 %v4136_v11  ;;  %v4033_v54 = vpop.xlane.xlu1 %4032 }
 0x510   : > { %v18890_v39 = vpop.eup %16998  ;;  %v4089_v63 = vsub.f32 %v18701_v43, %v4033_v54  ;;  %17006 = vpow2.f32 %v4138_v42  ;;  %v4036_v23 = vpop.xlane.xlu0 %4035  ;;  %v4205_v53 = vsel %vm3973_vm7, %v18888_v46, 0.0 }
 0x511   : > { %v4090_v45 = vsub.f32 %v18705_v22, %v4036_v23  ;;  %4206 = vadd.xlane.f32.xlu1 %v4205_v53  ;;  %v4208_v37 = vsel %vm3973_vm7, %v18890_v39, 0.0 }
 0x512   : > { %v4140_v26 = vmul.f32 1.442695, %v4089_v63 }
 0x513   : > { %v4142_v34 = vmul.f32 1.442695, %v4090_v45 }
 0x514   : > { %v18898_v31 = vpop.eup %17000  ;;  %17008 = vpow2.f32 %v4140_v26  ;;  %v4039_v57 = vpop.xlane.xlu1 %4038 }
 0x515   : > { %v18900_v62 = vpop.eup %17002  ;;  %v4091_v43 = vsub.f32 %v18711_v12, %v4039_v57  ;;  %17010 = vpow2.f32 %v4142_v34  ;;  %v4042_v4 = vpop.xlane.xlu0 %4041  ;;  %v4211_v5 = vsel %vm3973_vm7, %v18898_v31, 0.0  ;;  %4209 = vadd.xlane.f32.xlu1 %v4208_v37 }
 0x516   : > { %v4092_v22 = vsub.f32 %v18715_v60, %v4042_v4  ;;  %4212 = vadd.xlane.f32.xlu0 %v4211_v5  ;;  %v4214_v10 = vsel %vm3973_vm7, %v18900_v62, 0.0 }
 0x517   : > { %v4144_v19 = vmul.f32 1.442695, %v4091_v43 }
 0x518   : > { %v4146_v36 = vmul.f32 1.442695, %v4092_v22 }
 0x519   : > { %v18908_v11 = vpop.eup %17004  ;;  %17012 = vpow2.f32 %v4144_v19  ;;  %v4045_v42 = vpop.xlane.xlu1 %4044  ;;  %4215 = vadd.xlane.f32.xlu1 %v4214_v10 }
 0x51a   : > { %v18910_v12 = vpop.eup %17006  ;;  %v4093_v54 = vsub.f32 %v18723_v44, %v4045_v42  ;;  %17014 = vpow2.f32 %v4146_v36  ;;  %v4048_v63 = vpop.xlane.xlu0 %4047  ;;  %v4217_v60 = vsel %vm3973_vm7, %v18908_v11, 0.0 }
 0x51b   : > { %v4094_v23 = vsub.f32 %v18725_v61, %v4048_v63  ;;  %4218 = vadd.xlane.f32.xlu0 %v4217_v60  ;;  %v4220_v53 = vsel %vm3973_vm7, %v18910_v12, 0.0 }
 0x51c   : > { %v4148_v45 = vmul.f32 1.442695, %v4093_v54 }
 0x51d   : > { %v4150_v26 = vmul.f32 1.442695, %v4094_v23  ;;  %4221 = vadd.xlane.f32.xlu1 %v4220_v53 }
 0x51e   : > { %v18918_v37 = vpop.eup %17008  ;;  %17016 = vpow2.f32 %v4148_v45  ;;  %v4051_v34 = vpop.xlane.xlu1 %4050 }
 0x51f   : > { %v18920_v57 = vpop.eup %17010  ;;  %v4095_v44 = vsub.f32 %v18735_v17, %v4051_v34  ;;  %17018 = vpow2.f32 %v4150_v26  ;;  %v4054_v43 = vpop.xlane.xlu0 %4053  ;;  %v4223_v61 = vsel %vm3973_vm7, %v18918_v37, 0.0 }
 0x520   : > { %v4096_v4 = vsub.f32 %v18737_v16, %v4054_v43  ;;  %4224 = vadd.xlane.f32.xlu0 %v4223_v61  ;;  %v4226_v5 = vsel %vm3973_vm7, %v18920_v57, 0.0 }
 0x521   : > { %v4152_v22 = vmul.f32 1.442695, %v4095_v44  ;;  %4227 = vadd.xlane.f32.xlu1 %v4226_v5 }
 0x522   : > { %v4154_v10 = vmul.f32 1.442695, %v4096_v4 }
 0x523   : > { %v18928_v19 = vpop.eup %17012  ;;  %17020 = vpow2.f32 %v4152_v22  ;;  %v4057_v36 = vpop.xlane.xlu1 %4056 }
 0x524   : > { %v18930_v42 = vpop.eup %17014  ;;  %v4097_v17 = vsub.f32 %v18747_v48, %v4057_v36  ;;  %17022 = vpow2.f32 %v4154_v10  ;;  %v4060_v54 = vpop.xlane.xlu0 %4059  ;;  %v4229_v16 = vsel %vm3973_vm7, %v18928_v19, 0.0 }
 0x525   : > { %v4098_v63 = vsub.f32 %v18749_v40, %v4060_v54  ;;  %4230 = vadd.xlane.f32.xlu0 %v4229_v16  ;;  %v4232_v60 = vsel %vm3973_vm7, %v18930_v42, 0.0 }
 0x526   : > { %v4156_v23 = vmul.f32 1.442695, %v4097_v17  ;;  %4233 = vadd.xlane.f32.xlu1 %v4232_v60 }
 0x527   : > { %v4158_v53 = vmul.f32 1.442695, %v4098_v63 }
 0x528   : > { %v18938_v45 = vpop.eup %17016  ;;  %17024 = vpow2.f32 %v4156_v23  ;;  %v4063_v26 = vpop.xlane.xlu1 %4062 }
 0x529   : > { %v18940_v34 = vpop.eup %17018  ;;  %v4099_v48 = vsub.f32 %v18757_v0, %v4063_v26  ;;  %17026 = vpow2.f32 %v4158_v53  ;;  %v4235_v44 = vsel %vm3973_vm7, %v18938_v45, 0.0  ;;  %v4066_v63 = vpop.xlane.xlu0 %4065 }
 0x52a   : > { %4236 = vadd.xlane.f32.xlu0 %v4235_v44  ;;  %v4238_v40 = vsel %vm3973_vm7, %v18940_v34, 0.0  ;;  %v4100_v60 = vsub.f32 %v18761_v30, %v4066_v63 }
 0x52b   : > { %v4160_v43 = vmul.f32 1.442695, %v4099_v48  ;;  %4239 = vadd.xlane.f32.xlu1 %v4238_v40 }
 0x52c   : > { %v4162_v26 = vmul.f32 1.442695, %v4100_v60 }
 0x52d   : > { %v18947_v61 = vpop.eup %17020  ;;  %17028 = vpow2.f32 %v4160_v43  ;;  %v4069_v23 = vpop.xlane.xlu1 %4068 }
 0x52e   : > { %v18949_v4 = vpop.eup %17022  ;;  %v4241_v5 = vsel %vm3973_vm7, %v18947_v61, 0.0  ;;  %v4101_v53 = vsub.f32 %v18769_v28, %v4069_v23  ;;  %17030 = vpow2.f32 %v4162_v26 }
 0x52f   : > { %4242 = vadd.xlane.f32.xlu0 %v4241_v5  ;;  %v4244_v0 = vsel %vm3973_vm7, %v18949_v4, 0.0 }
 0x530   : > { %4245 = vadd.xlane.f32.xlu1 %v4244_v0  ;;  %v4164_v48 = vmul.f32 1.442695, %v4101_v53 }
 0x532   : > { %v18955_v22 = vpop.eup %17024  ;;  %17032 = vpow2.f32 %v4164_v48  ;;  %v21519_v48 = vmov 0.0  }
 0x533   : > { %v18957_v10 = vpop.eup %17026  ;;  %v4247_v36 = vsel %vm3973_vm7, %v18955_v22, 0.0 }
 0x534   : > { %4248 = vadd.xlane.f32.xlu0 %v4247_v36  ;;  %v4250_v17 = vsel %vm3973_vm7, %v18957_v10, 0.0 }
 0x535   : > { %4251 = vadd.xlane.f32.xlu1 %v4250_v17 }
 0x537   : > { %v18963_v54 = vpop.eup %17028 }
 0x538   : > { %v4253_v16 = vsel %vm3973_vm7, %v18963_v54, 0.0  ;;  %v18973_v44 = vpop.eup %17030 }
 0x539   : > { %4254 = vadd.xlane.f32.xlu0 %v4253_v16  ;;  %v4256_v40 = vsel %vm3973_vm7, %v18973_v44, 0.0 }
 0x53c   : > { %v18977_v43 = vpop.eup %17032 }
 0x53d   : > { %v4259_v5 = vsel %vm3973_vm7, %v18977_v43, 0.0 }
 0x546   : > { %7930 = vrot.lane.b32.xlu1 %v18167_v21, %s17431_s14 }
 0x54f   : > { %7852 = vrot.lane.b32.xlu0 %v18160_v32, %s17431_s14 }
 0x56a   : > { %4257 = vadd.xlane.f32.xlu1 %v4256_v40 }
 0x56e   : > { %4260 = vadd.xlane.f32.xlu0 %v4259_v5 }
 0x57b   : > { %8088 = vrot.lane.b32.xlu1 %v18177_v1, %s17430_s13 }
 0x57d   : > { %v4168_v30 = vpop.xlane.xlu0 %4167 }
 0x57e   : > { %17034 = vrcp.f32 %v4168_v30 }
 0x57f   : > { %8086 = vrot.lane.b32.xlu1 %v18177_v1, %s17431_s14 }
 0x581   : > { %v4171_v28 = vpop.xlane.xlu1 %4170 }
 0x582   : > { %17036 = vrcp.f32 %v4171_v28  ;;  %v4174_v0 = vpop.xlane.xlu0 %4173 }
 0x583   : > { %8244 = vrot.lane.b32.xlu1 %v18187_v18, %s17430_s13  ;;  %17038 = vrcp.f32 %v4174_v0 }
 0x584   : > { %8010 = vrot.lane.b32.xlu0 %v18170_v59, %s17430_s13 }
 0x585   : > { %v4177_v36 = vpop.xlane.xlu1 %4176 }
 0x586   : > { %17040 = vrcp.f32 %v4177_v36 }
 0x587   : > { %8242 = vrot.lane.b32.xlu1 %v18187_v18, %s17431_s14 }
 0x588   : > { %v17035_v17 = vpop.eup %17034  ;;  %8008 = vrot.lane.b32.xlu0 %v18170_v59, %s17431_s14 }
 0x589   : > { %v4180_v16 = vpop.xlane.xlu0 %4179  ;;  %v4294_v63 = vmul.f32 %v17035_v17, %v18823_v51 }
 0x58a   : > { %v4183_v60 = vpop.xlane.xlu1 %4182  ;;  %17042 = vrcp.f32 %v4180_v16 }
 0x58b   : > { %8400 = vrot.lane.b32.xlu1 %v18197_v52, %s17430_s13  ;;  %17044 = vrcp.f32 %v4183_v60  ;;  %16062 = vmatmul.mubr.msk.f32.vlgmr.msra.gmra.mrb[48].mxu1 %vm3973_vm7, %v4294_v63 }
 0x58c   : > { %v17037_v23 = vpop.eup %17036  ;;  %8166 = vrot.lane.b32.xlu0 %v18180_v6, %s17430_s13  ;;  %16070 = vmatpush3.msra.mxu1 %v18573_v29 }
 0x58d   : > { %v17039_v53 = vpop.eup %17038  ;;  %v4186_v26 = vpop.xlane.xlu0 %4185  ;;  %16071 = vmatprep.mubr.msk.f32.mxu1 %vm17427_vm6, %v21519_v48  ;;  %16079 = vmatprep.subr.mxu1 %v21519_v48  ;;  %v4295_v51 = vmul.f32 %v17037_v23, %v18828_v38  ;;  %v21521_v23 = vld [vmem:[#allocation50_spill] sm:$0xff] }
 0x58e   : > { %17046 = vrcp.f32 %v4186_v26  ;;  %v4296_v40 = vmul.f32 %v17039_v53, %v18831_v50  ;;  %v21522_v26 = vld [vmem:[#allocation55_spill] sm:$0xff] }
 0x58f   : > { %8398 = vrot.lane.b32.xlu1 %v18197_v52, %s17431_s14  ;;  %v4189_v5 = vpop.xlane.xlu1 %4188  ;;  %16067 = vmatmul.mubr.msk.f32.vlgmr.msra.gmra.mrb[80].mxu0 %vm3973_vm7, %v4295_v51 }
 0x590   : > { %v17041_v30 = vpop.eup %17040  ;;  %8164 = vrot.lane.b32.xlu0 %v18180_v6, %s17431_s14  ;;  %17048 = vrcp.f32 %v4189_v5  ;;  %16075 = vmatpush3.msra.mxu0 %v18569_v3 }
 0x591   : > { %16072 = vmatmul.mubr.msk.f32.vlgmr.msra.gmra.mrb[50].mxu1 %vm3973_vm7, %v4296_v40  ;;  %v4192_v29 = vpop.xlane.xlu0 %4191  ;;  %16076 = vmatprep.mubr.msk.f32.mxu0 %vm17427_vm6, %v21519_v48  ;;  %v4297_v38 = vmul.f32 %v17041_v30, %v18838_v27  ;;  %v21524_v40 = vld [vmem:[#allocation58_spill] sm:$0xff] }
 0x592   : > { %16080 = vmatpush3.msra.mxu1 %v18577_v13  ;;  %17050 = vrcp.f32 %v4192_v29  ;;  %16084 = vmatprep.subr.mxu0 %v21519_v48 }
 0x593   : > { %8556 = vrot.lane.b32.xlu1 %v18207_v8, %s17430_s13  ;;  %16077 = vmatmul.mubr.msk.f32.vlgmr.msra.gmra.mrb[82].mxu0 %vm3973_vm7, %v4297_v38 }
 0x594   : > { %v17043_v50 = vpop.eup %17042  ;;  %8322 = vrot.lane.b32.xlu0 %v18190_v58, %s17430_s13  ;;  %v4195_v3 = vpop.xlane.xlu1 %4194  ;;  %16085 = vmatpush3.msra.mxu0 %v18571_v14 }
 0x595   : > { %v17045_v28 = vpop.eup %17044  ;;  %17052 = vrcp.f32 %v4195_v3  ;;  %v4198_v27 = vpop.xlane.xlu0 %4197  ;;  %16086 = vmatprep.mubr.msk.f32.mxu0 %vm17427_vm6, %v21519_v48  ;;  %16094 = vmatprep.subr.mxu0 %v21519_v48  ;;  %v4298_v13 = vmul.f32 %v17043_v50, %v18844_v55 }
 0x596   : > { %16081 = vmatprep.mubr.msk.f32.mxu1 %vm17427_vm6, %v21519_v48  ;;  %16089 = vmatprep.subr.mxu1 %v21519_v48  ;;  %v4299_v0 = vmul.f32 %v17045_v28, %v18846_v25  ;;  %17054 = vrcp.f32 %v4198_v27  ;;  %v21526_v28 = vld [vmem:[#allocation60_spill] sm:$0xff] }
 0x597   : > { %8554 = vrot.lane.b32.xlu1 %v18207_v8, %s17431_s14  ;;  %16082 = vmatmul.mubr.msk.f32.vlgmr.msra.gmra.mrb[52].mxu1 %vm3973_vm7, %v4298_v13 }
 0x598   : > { %v17047_v14 = vpop.eup %17046  ;;  %8320 = vrot.lane.b32.xlu0 %v18190_v58, %s17431_s14  ;;  %16087 = vmatmul.mubr.msk.f32.vlgmr.msra.gmra.mrb[84].mxu0 %vm3973_vm7, %v4299_v0  ;;  %v21527_v0 = vld [vmem:[#allocation53_spill] sm:$0xff] }
 0x599   : > { %v4201_v55 = vpop.xlane.xlu1 %4200  ;;  %16095 = vmatpush3.msra.mxu0 %v18575_v15  ;;  %16090 = vmatpush3.msra.mxu1 %v18581_v24  ;;  %v4300_v36 = vmul.f32 %v17047_v14, %v18854_v33  ;;  %v21520_v33 = vld [vmem:[#allocation56_spill] sm:$0xff]  ;;  %v21528_v14 = vld [vmem:[#allocation49_spill] sm:$0xff] }
 0x59a   : > { %v17049_v25 = vpop.eup %17048  ;;  %17056 = vrcp.f32 %v4201_v55  ;;  %v4204_v17 = vpop.xlane.xlu0 %4203  ;;  %16096 = vmatprep.mubr.msk.f32.mxu0 %vm17427_vm6, %v21519_v48  ;;  %16104 = vmatprep.subr.mxu0 %v21519_v48 }
 0x59b   : > { %8712 = vrot.lane.b32.xlu1 %v18217_v2, %s17430_s13  ;;  %16091 = vmatprep.mubr.msk.f32.mxu1 %vm17427_vm6, %v21519_v48  ;;  %v4301_v15 = vmul.f32 %v17049_v25, %v18858_v20  ;;  %17058 = vrcp.f32 %v4204_v17  ;;  %v21530_v25 = vld [vmem:[#allocation62_spill] sm:$0xff] }
 0x59c   : > { %v17051_v16 = vpop.eup %17050  ;;  %8478 = vrot.lane.b32.xlu0 %v18200_v56, %s17430_s13  ;;  %16099 = vmatprep.subr.mxu1 %v21519_v48 }
 0x59d   : > { %16097 = vmatmul.mubr.msk.f32.vlgmr.msra.gmra.mrb[86].mxu0 %vm3973_vm7, %v4301_v15  ;;  %16092 = vmatmul.mubr.msk.f32.vlgmr.msra.gmra.mrb[54].mxu1 %vm3973_vm7, %v4300_v36  ;;  %v4302_v63 = vmul.f32 %v17051_v16, %v18863_v7 }
 0x59e   : > { %v4207_v24 = vpop.xlane.xlu1 %4206  ;;  %16105 = vmatpush3.msra.mxu0 %v18579_v47  ;;  %16100 = vmatpush3.msra.mxu1 %v21520_v33 }
 0x59f   : > { %v17053_v60 = vpop.eup %17052  ;;  %8710 = vrot.lane.b32.xlu1 %v18217_v2, %s17431_s14  ;;  %17060 = vrcp.f32 %v4207_v24  ;;  %16106 = vmatprep.mubr.msk.f32.mxu0 %vm17427_vm6, %v21519_v48 }
 0x5a0   : > { %8476 = vrot.lane.b32.xlu0 %v18200_v56, %s17431_s14  ;;  %16114 = vmatprep.subr.mxu0 %v21519_v48  ;;  %v4303_v20 = vmul.f32 %v17053_v60, %v18868_v49  ;;  %v17055_v47 = vpop.eup %17054  ;;  %v21523_v49 = vld [vmem:[#allocation48_spill] sm:$0xff] }
 0x5a1   : > { %16101 = vmatprep.mubr.msk.f32.mxu1 %vm17427_vm6, %v21519_v48  ;;  %16109 = vmatprep.subr.mxu1 %v21519_v48  ;;  %v4304_v30 = vmul.f32 %v17055_v47, %v18870_v9  ;;  %v21533_v47 = vld [vmem:[#allocation51_spill] sm:$0xff] }
 0x5a2   : > { %v4210_v7 = vpop.xlane.xlu1 %4209  ;;  %16107 = vmatmul.mubr.msk.f32.vlgmr.msra.gmra.mrb[88].mxu0 %vm3973_vm7, %v4303_v20  ;;  %16102 = vmatmul.mubr.msk.f32.vlgmr.msra.gmra.mrb[56].mxu1 %vm3973_vm7, %v4302_v63  ;;  %v21532_v63 = vld [vmem:[#allocation64_spill] sm:$0xff] }
 0x5a3   : > { %8868 = vrot.lane.b32.xlu1 %v21521_v23, %s17430_s13  ;;  %17062 = vrcp.f32 %v4210_v7  ;;  %v4213_v53 = vpop.xlane.xlu0 %4212  ;;  %16115 = vmatpush3.msra.mxu0 %v21522_v26  ;;  %v21534_v7 = vld [vmem:[#allocation61_spill] sm:$0xff] }
 0x5a4   : > { %v17057_v51 = vpop.eup %17056  ;;  %8634 = vrot.lane.b32.xlu0 %v21523_v49, %s17430_s13  ;;  %17064 = vrcp.f32 %v4213_v53  ;;  %16110 = vmatpush3.msra.mxu1 %v21524_v40  ;;  %v21535_v40 = vld [vmem:[#allocation66_spill] sm:$0xff] }
 0x5a5   : > { %16116 = vmatprep.mubr.msk.f32.mxu0 %vm17427_vm6, %v21519_v48  ;;  %16124 = vmatprep.subr.mxu0 %v21519_v48  ;;  %v4305_v5 = vmul.f32 %v17057_v51, %v18878_v41  ;;  %v17059_v29 = vpop.eup %17058  ;;  %v21525_v41 = vld [vmem:[#allocation57_spill] sm:$0xff] }
 0x5a6   : > { %v4216_v38 = vpop.xlane.xlu1 %4215  ;;  %16111 = vmatprep.mubr.msk.f32.mxu1 %vm17427_vm6, %v21519_v48  ;;  %16119 = vmatprep.subr.mxu1 %v21519_v48  ;;  %v4306_v3 = vmul.f32 %v17059_v29, %v18880_v35 }
 0x5a7   : > { %8866 = vrot.lane.b32.xlu1 %v21521_v23, %s17431_s14  ;;  %17066 = vrcp.f32 %v4216_v38  ;;  %16117 = vmatmul.mubr.msk.f32.vlgmr.msra.gmra.mrb[90].mxu0 %vm3973_vm7, %v4305_v5  ;;  %v21536_v5 = vld [vmem:[#allocation63_spill] sm:$0xff] }
 0x5a8   : > { %8632 = vrot.lane.b32.xlu0 %v21523_v49, %s17431_s14  ;;  %v4219_v50 = vpop.xlane.xlu0 %4218  ;;  %16125 = vmatpush3.msra.mxu0 %v21525_v41  ;;  %v21538_v41 = vld [vmem:[#allocation54_spill] sm:$0xff] }
 0x5a9   : > { %v17061_v9 = vpop.eup %17060  ;;  %17068 = vrcp.f32 %v4219_v50  ;;  %16112 = vmatmul.mubr.msk.f32.vlgmr.msra.gmra.mrb[58].mxu1 %vm3973_vm7, %v4304_v30  ;;  %16126 = vmatprep.mubr.msk.f32.mxu0 %vm17427_vm6, %v21519_v48  ;;  %v21537_v50 = vld [vmem:[#allocation34_spill] sm:$0xff] }
 0x5aa   : > { %16120 = vmatpush3.msra.mxu1 %v21526_v28  ;;  %v4222_v27 = vpop.xlane.xlu1 %4221  ;;  %16134 = vmatprep.subr.mxu0 %v21519_v48  ;;  %v4307_v13 = vmul.f32 %v17061_v9, %v18888_v46  ;;  %v21529_v46 = vld [vmem:[#allocation59_spill] sm:$0xff]  ;;  %v21540_v28 = vld [vmem:[#allocation65_spill] sm:$0xff] }
 0x5ab   : > { %9024 = vrot.lane.b32.xlu1 %v21527_v0, %s17430_s13  ;;  %16121 = vmatprep.mubr.msk.f32.mxu1 %vm17427_vm6, %v21519_v48  ;;  %17070 = vrcp.f32 %v4222_v27 }
 0x5ac   : > { %8790 = vrot.lane.b32.xlu0 %v21528_v14, %s17430_s13  ;;  %16129 = vmatprep.subr.mxu1 %v21519_v48 }
 0x5ad   : > { %v17063_v35 = vpop.eup %17062  ;;  %v4225_v55 = vpop.xlane.xlu0 %4224  ;;  %16127 = vmatmul.mubr.msk.f32.vlgmr.msra.gmra.mrb[92].mxu0 %vm3973_vm7, %v4307_v13  ;;  %16122 = vmatmul.mubr.msk.f32.vlgmr.msra.gmra.mrb[60].mxu1 %vm3973_vm7, %v4306_v3  ;;  %v21539_v3 = vld [vmem:[#allocation68_spill] sm:$0xff] }
 0x5ae   : > { %v17065_v36 = vpop.eup %17064  ;;  %17072 = vrcp.f32 %v4225_v55  ;;  %16135 = vmatpush3.msra.mxu0 %v21529_v46  ;;  %16130 = vmatpush3.msra.mxu1 %v21530_v25  ;;  %v4228_v17 = vpop.xlane.xlu1 %4227  ;;  %v4308_v15 = vmul.f32 %v17063_v35, %v18890_v39  ;;  %v21541_v35 = vld [vmem:[#allocation37_spill] sm:$0xff]  ;;  %v21542_v46 = vld [vmem:[#allocation67_spill] sm:$0xff] }
 0x5af   : > { %9022 = vrot.lane.b32.xlu1 %v21527_v0, %s17431_s14  ;;  %16136 = vmatprep.mubr.msk.f32.mxu0 %vm17427_vm6, %v21519_v48  ;;  %v4309_v16 = vmul.f32 %v17065_v36, %v18898_v31  ;;  %17074 = vrcp.f32 %v4228_v17  ;;  %v21531_v31 = vld [vmem:[#allocation52_spill] sm:$0xff]  ;;  %v21543_v25 = vld [vmem:[#allocation69_spill] sm:$0xff] }
 0x5b0   : > { %8788 = vrot.lane.b32.xlu0 %v21528_v14, %s17431_s14  ;;  %16144 = vmatprep.subr.mxu0 %v21519_v48 }
 0x5b1   : > { %v17067_v24 = vpop.eup %17066  ;;  %16131 = vmatprep.mubr.msk.f32.mxu1 %vm17427_vm6, %v21519_v48  ;;  %16139 = vmatprep.subr.mxu1 %v21519_v48 }
 0x5b2   : > { %v4231_v39 = vpop.xlane.xlu0 %4230  ;;  %16132 = vmatmul.mubr.msk.f32.vlgmr.msra.gmra.mrb[62].mxu1 %vm3973_vm7, %v4308_v15  ;;  %16137 = vmatmul.mubr.msk.f32.vlgmr.msra.gmra.mrb[94].mxu0 %vm3973_vm7, %v4309_v16  ;;  %v4310_v20 = vmul.f32 %v17067_v24, %v18900_v62  ;;  %v21544_v16 = vld [vmem:[#allocation35_spill] sm:$0xff] }
 0x5b3   : > { %v17069_v33 = vpop.eup %17068  ;;  %17076 = vrcp.f32 %v4231_v39  ;;  %9180 = vrot.lane.b32.xlu1 %v21531_v31, %s17430_s13  ;;  %16140 = vmatpush3.msra.mxu1 %v21532_v63  ;;  %v4234_v60 = vpop.xlane.xlu1 %4233  ;;  %v21545_v24 = vld [vmem:[#allocation39_spill] sm:$0xff]  ;;  %v21547_v63 = vld [vmem:[#allocation70_spill] sm:$0xff] }
 0x5b4   : > { %8946 = vrot.lane.b32.xlu0 %v21533_v47, %s17430_s13  ;;  %16145 = vmatpush3.msra.mxu0 %v21534_v7  ;;  %v4311_v53 = vmul.f32 %v17069_v33, %v18908_v11  ;;  %17078 = vrcp.f32 %v4234_v60  ;;  %v21549_v7 = vld [vmem:[#allocation41_spill] sm:$0xff] }
 0x5b5   : > { %16141 = vmatprep.mubr.msk.f32.mxu1 %vm17427_vm6, %v21519_v48  ;;  %16146 = vmatprep.mubr.msk.f32.mxu0 %vm17427_vm6, %v21519_v48  ;;  %v17071_v26 = vpop.eup %17070 }
 0x5b6   : > { %16149 = vmatprep.subr.mxu1 %v21519_v48  ;;  %16154 = vmatprep.subr.mxu0 %v21519_v48  ;;  %v4312_v30 = vmul.f32 %v17071_v26, %v18910_v12 }
 0x5b7   : > { %v4237_v62 = vpop.xlane.xlu0 %4236  ;;  %9178 = vrot.lane.b32.xlu1 %v21531_v31, %s17431_s14  ;;  %16142 = vmatmul.mubr.msk.f32.vlgmr.msra.gmra.mrb[64].mxu1 %vm3973_vm7, %v4310_v20  ;;  %v21548_v20 = vld [vmem:[#allocation71_spill] sm:$0xff] }
 0x5b8   : > { %v17073_v51 = vpop.eup %17072  ;;  %8944 = vrot.lane.b32.xlu0 %v21533_v47, %s17431_s14  ;;  %17080 = vrcp.f32 %v4237_v62  ;;  %16147 = vmatmul.mubr.msk.f32.vlgmr.msra.gmra.mrb[96].mxu0 %vm3973_vm7, %v4311_v53  ;;  %v4240_v11 = vpop.xlane.xlu1 %4239 }
 0x5b9   : > { %16150 = vmatpush3.msra.mxu1 %v21535_v40  ;;  %16155 = vmatpush3.msra.mxu0 %v21536_v5  ;;  %v4313_v29 = vmul.f32 %v17073_v51, %v18918_v37  ;;  %v17075_v38 = vpop.eup %17074  ;;  %17082 = vrcp.f32 %v4240_v11  ;;  %v21552_v11 = vld [vmem:[#allocation73_spill] sm:$0xff]  ;;  %v21553_v40 = vld [vmem:[#allocation43_spill] sm:$0xff] }
 0x5ba   : > { %16151 = vmatprep.mubr.msk.f32.mxu1 %vm17427_vm6, %v21519_v48  ;;  %16156 = vmatprep.mubr.msk.f32.mxu0 %vm17427_vm6, %v21519_v48  ;;  %v4314_v27 = vmul.f32 %v17075_v38, %v18920_v57 }
 0x5bb   : > { %9716 = vrot.lane.b32.xlu1 %v21537_v50, %s17432_s17  ;;  %16159 = vmatprep.subr.mxu1 %v21519_v48  ;;  %v21556_v50 = vld [vmem:[#allocation75_spill] sm:$0xff] }
 0x5bc   : > { %9102 = vrot.lane.b32.xlu0 %v21538_v41, %s17430_s13  ;;  %v4243_v12 = vpop.xlane.xlu0 %4242  ;;  %16164 = vmatprep.subr.mxu0 %v21519_v48 }
 0x5bd   : > { %v17077_v37 = vpop.eup %17076  ;;  %17084 = vrcp.f32 %v4243_v12  ;;  %16152 = vmatmul.mubr.msk.f32.vlgmr.msra.gmra.mrb[66].mxu1 %vm3973_vm7, %v4312_v30  ;;  %16157 = vmatmul.mubr.msk.f32.vlgmr.msra.gmra.mrb[98].mxu0 %vm3973_vm7, %v4313_v29  ;;  %v4246_v9 = vpop.xlane.xlu1 %4245  ;;  %v21557_v12 = vld [vmem:[#allocation45_spill] sm:$0xff] }
 0x5be   : > { %16160 = vmatpush3.msra.mxu1 %v21539_v3  ;;  %16165 = vmatpush3.msra.mxu0 %v21540_v28  ;;  %v4315_v13 = vmul.f32 %v17077_v37, %v18928_v19  ;;  %v17079_v55 = vpop.eup %17078  ;;  %17086 = vrcp.f32 %v4246_v9  ;;  %v21558_v9 = vld [vmem:[#allocation42_spill] sm:$0xff]  ;;  %v21561_v3 = vld [vmem:[#allocation47_spill] sm:$0xff]  ;;  %v21562_v28 = vld [vmem:[#allocation44_spill] sm:$0xff] }
 0x5bf   : > { %9868 = vrot.lane.b32.xlu1 %v21541_v35, %s17432_s17  ;;  %16161 = vmatprep.mubr.msk.f32.mxu1 %vm17427_vm6, %v21519_v48  ;;  %v4316_v17 = vmul.f32 %v17079_v55, %v18930_v42  ;;  %v21566_v55 = vld [vmem:[#allocation79_spill] sm:$0xff] }
 0x5c0   : > { %9100 = vrot.lane.b32.xlu0 %v21538_v41, %s17431_s14  ;;  %16166 = vmatprep.mubr.msk.f32.mxu0 %vm17427_vm6, %v21519_v48 }
 0x5c1   : > { %v4249_v36 = vpop.xlane.xlu0 %4248  ;;  %16169 = vmatprep.subr.mxu1 %v21519_v48  ;;  %16174 = vmatprep.subr.mxu0 %v21519_v48 }
 0x5c2   : > { %v17081_v57 = vpop.eup %17080  ;;  %17088 = vrcp.f32 %v4249_v36  ;;  %16162 = vmatmul.mubr.msk.f32.vlgmr.msra.gmra.mrb[68].mxu1 %vm3973_vm7, %v4314_v27  ;;  %16167 = vmatmul.mubr.msk.f32.vlgmr.msra.gmra.mrb[100].mxu0 %vm3973_vm7, %v4315_v13  ;;  %v4252_v19 = vpop.xlane.xlu1 %4251  ;;  %v21563_v27 = vld [vmem:[#allocation46_spill] sm:$0xff] }
 0x5c3   : > { %16170 = vmatpush3.msra.mxu1 %v21542_v46  ;;  %16175 = vmatpush3.msra.mxu0 %v21543_v25  ;;  %v4317_v15 = vmul.f32 %v17081_v57, %v18938_v45  ;;  %v17083_v39 = vpop.eup %17082  ;;  %17090 = vrcp.f32 %v4252_v19  ;;  %v21546_v45 = vld [vmem:[#allocation36_spill] sm:$0xff]  ;;  %v21568_v19 = vld [vmem:[#allocation81_spill] sm:$0xff]  ;;  %v21569_v46 = vld [vmem:[#allocation83_spill] sm:$0xff] }
 0x5c4   : > { %9640 = vrot.lane.b32.xlu0 %v21544_v16, %s17432_s17  ;;  %10020 = vrot.lane.b32.xlu1 %v21545_v24, %s17432_s17  ;;  %v4318_v60 = vmul.f32 %v17083_v39, %v18940_v34  ;;  %v21550_v34 = vld [vmem:[#allocation38_spill] sm:$0xff]  ;;  %v21571_v16 = vld [vmem:[#allocation84_spill] sm:$0xff]  ;;  %v21572_v24 = vld [vmem:[#allocation85_spill] sm:$0xff] }
 0x5c5   : > { %16171 = vmatprep.mubr.msk.f32.mxu1 %vm17427_vm6, %v21519_v48  ;;  %16176 = vmatprep.mubr.msk.f32.mxu0 %vm17427_vm6, %v21519_v48  ;;  %v21573_v39 = vld [vmem:[#allocation87_spill] sm:$0xff] }
 0x5c6   : > { %v4255_v33 = vpop.xlane.xlu0 %4254  ;;  %16179 = vmatprep.subr.mxu1 %v21519_v48  ;;  %16184 = vmatprep.subr.mxu0 %v21519_v48 }
 0x5c7   : > { %v17085_v42 = vpop.eup %17084  ;;  %17092 = vrcp.f32 %v4255_v33  ;;  %16172 = vmatmul.mubr.msk.f32.vlgmr.msra.gmra.mrb[70].mxu1 %vm3973_vm7, %v4316_v17  ;;  %16177 = vmatmul.mubr.msk.f32.vlgmr.msra.gmra.mrb[102].mxu0 %vm3973_vm7, %v4317_v15  ;;  %v21570_v17 = vld [vmem:[#allocation82_spill] sm:$0xff] }
 0x5c8   : > { %9792 = vrot.lane.b32.xlu0 %v21546_v45, %s17432_s17  ;;  %16180 = vmatpush3.msra.mxu1 %v21547_v63  ;;  %v4319_v53 = vmul.f32 %v17085_v42, %v18947_v61  ;;  %v17087_v26 = vpop.eup %17086  ;;  %v21551_v61 = vld [vmem:[#allocation72_spill] sm:$0xff]  ;;  %v21574_v42 = vld [vmem:[#allocation86_spill] sm:$0xff] }
 0x5c9   : > { %16185 = vmatpush3.msra.mxu0 %v21548_v20  ;;  %10172 = vrot.lane.b32.xlu1 %v21549_v7, %s17432_s17  ;;  %v4320_v51 = vmul.f32 %v17087_v26, %v18949_v4  ;;  %v21554_v4 = vld [vmem:[#allocation40_spill] sm:$0xff]  ;;  %v21577_v20 = vld [vmem:[#allocation91_spill] sm:$0xff] }
 0x5ca   : > { %16181 = vmatprep.mubr.msk.f32.mxu1 %vm17427_vm6, %v21519_v48  ;;  %16186 = vmatprep.mubr.msk.f32.mxu0 %vm17427_vm6, %v21519_v48  ;;  %v21575_v63 = vld [vmem:[#allocation88_spill] sm:$0xff] }
 0x5cb   : > { %16189 = vmatprep.subr.mxu1 %v21519_v48  ;;  %16194 = vmatprep.subr.mxu0 %v21519_v48 }
 0x5cc   : > { %v17089_v62 = vpop.eup %17088  ;;  %9944 = vrot.lane.b32.xlu0 %v21550_v34, %s17432_s17  ;;  %16182 = vmatmul.mubr.msk.f32.vlgmr.msra.gmra.mrb[72].mxu1 %vm3973_vm7, %v4318_v60  ;;  %v21576_v60 = vld [vmem:[#allocation89_spill] sm:$0xff] }
 0x5cd   : > { %16187 = vmatmul.mubr.msk.f32.vlgmr.msra.gmra.mrb[104].mxu0 %vm3973_vm7, %v4319_v53  ;;  %16190 = vmatpush3.msra.mxu1 %v21551_v61  ;;  %v4321_v5 = vmul.f32 %v17089_v62, %v18955_v22  ;;  %v17091_v30 = vpop.eup %17090  ;;  %v21555_v22 = vld [vmem:[#allocation74_spill] sm:$0xff]  ;;  %v21579_v62 = vld [vmem:[#allocation92_spill] sm:$0xff]  ;;  %v21580_v34 = vld [vmem:[#allocation93_spill] sm:$0xff] }
 0x5ce   : > { %16195 = vmatpush3.msra.mxu0 %v21552_v11  ;;  %10324 = vrot.lane.b32.xlu1 %v21553_v40, %s17432_s17  ;;  %v4322_v38 = vmul.f32 %v17091_v30, %v18957_v10  ;;  %v21559_v10 = vld [vmem:[#allocation106_spill] sm:$0xff]  ;;  %v21581_v61 = vld [vmem:[#allocation95_spill] sm:$0xff]  ;;  %v21584_v30 = vld [vmem:[#allocation97_spill] sm:$0xff] }
 0x5cf   : > { %16191 = vmatprep.mubr.msk.f32.mxu1 %vm17427_vm6, %v21519_v48  ;;  %16196 = vmatprep.mubr.msk.f32.mxu0 %vm17427_vm6, %v21519_v48  ;;  %v21578_v53 = vld [vmem:[#allocation90_spill] sm:$0xff] }
 0x5d0   : > { %16199 = vmatprep.subr.mxu1 %v21519_v48  ;;  %16204 = vmatprep.subr.mxu0 %v21519_v48  ;;  %v21582_v11 = vld [vmem:[#allocation94_spill] sm:$0xff] }
 0x5d1   : > { %v17093_v29 = vpop.eup %17092  ;;  %10096 = vrot.lane.b32.xlu0 %v21554_v4, %s17432_s17  ;;  %16192 = vmatmul.mubr.msk.f32.vlgmr.msra.gmra.mrb[74].mxu1 %vm3973_vm7, %v4320_v51 }
 0x5d2   : > { %16197 = vmatmul.mubr.msk.f32.vlgmr.msra.gmra.mrb[106].mxu0 %vm3973_vm7, %v4321_v5  ;;  %16200 = vmatpush3.msra.mxu1 %v21555_v22  ;;  %v4323_v37 = vmul.f32 %v17093_v29, %v18963_v54  ;;  %v21560_v54 = vld [vmem:[#allocation77_spill] sm:$0xff]  ;;  %v21583_v5 = vld [vmem:[#allocation96_spill] sm:$0xff]  ;;  %v21585_v29 = vld [vmem:[#allocation99_spill] sm:$0xff] }
 0x5d3   : > { %16205 = vmatpush3.msra.mxu0 %v21556_v50  ;;  %10476 = vrot.lane.b32.xlu1 %v21557_v12, %s17432_s17  ;;  %v21586_v22 = vld [vmem:[#allocation98_spill] sm:$0xff]  ;;  %v21587_v50 = vld [vmem:[#allocation100_spill] sm:$0xff]  ;;  %v21588_v12 = vld [vmem:[#allocation101_spill] sm:$0xff] }
 0x5d4   : > { %16201 = vmatprep.mubr.msk.f32.mxu1 %vm17427_vm6, %v21519_v48  ;;  %16206 = vmatprep.mubr.msk.f32.mxu0 %vm17427_vm6, %v21519_v48 }
 0x5d5   : > { %16209 = vmatprep.subr.mxu1 %v21519_v48  ;;  %16214 = vmatprep.subr.mxu0 %v21519_v48 }
 0x5d6   : > { %10248 = vrot.lane.b32.xlu0 %v21558_v9, %s17432_s17  ;;  %16202 = vmatmul.mubr.msk.f32.vlgmr.msra.gmra.mrb[76].mxu1 %vm3973_vm7, %v4322_v38 }
 0x5d7   : > { %16207 = vmatmul.mubr.msk.f32.vlgmr.msra.gmra.mrb[108].mxu0 %vm3973_vm7, %v4323_v37  ;;  %16210 = vmatpush3.msra.mxu1 %v21559_v10  ;;  %v21589_v37 = vld [vmem:[#allocation103_spill] sm:$0xff]  ;;  %v21590_v10 = vld [vmem:[#allocation102_spill] sm:$0xff] }
 0x5d8   : > { %16215 = vmatpush3.msra.mxu0 %v21560_v54  ;;  %10628 = vrot.lane.b32.xlu1 %v21561_v3, %s17432_s17  ;;  %v21591_v54 = vld [vmem:[#allocation104_spill] sm:$0xff]  ;;  %v21592_v3 = vld [vmem:[#allocation105_spill] sm:$0xff] }
 0x5d9   : > { %16211 = vmatprep.mubr.msk.f32.mxu1 %vm17427_vm6, %v21519_v48  ;;  %16216 = vmatprep.mubr.msk.f32.mxu0 %vm17427_vm6, %v21519_v48 }
 0x5da   : > { %10400 = vrot.lane.b32.xlu0 %v21562_v28, %s17432_s17  ;;  %16219 = vmatprep.subr.mxu1 %v21519_v48 }
 0x5db   : > { %16224 = vmatprep.subr.mxu0 %v21519_v48 }
 0x5dc   : > { %10780 = vrot.lane.b32.xlu1 %v18167_v21, %s17432_s17  ;;  %v19281_v21 = vpop.permute.xlu0 %7852 }
 0x5de   : > { %10552 = vrot.lane.b32.xlu0 %v21563_v27, %s17432_s17  ;;  %v21593_v27 = vld [vmem:[#allocation107_spill] sm:$0xff] }
 0x5e0   : > { %10932 = vrot.lane.b32.xlu1 %v18177_v1, %s17432_s17 }
 0x5e2   : > { %10704 = vrot.lane.b32.xlu0 %v18160_v32, %s17432_s17  ;;  %v19275_v32 = vpop.permute.xlu1 %7930 }
 0x5e4   : > { %11084 = vrot.lane.b32.xlu1 %v18187_v18, %s17432_s17 }
 0x5e6   : > { %10856 = vrot.lane.b32.xlu0 %v18170_v59, %s17432_s17 }
 0x5e8   : > { %11160 = vrot.lane.b32.xlu1 %v18190_v58, %s17432_s17 }
 0x5ea   : > { %11008 = vrot.lane.b32.xlu0 %v18180_v6, %s17432_s17 }
 0x5ec   : > { %11236 = vrot.lane.b32.xlu1 %v18197_v52, %s17432_s17 }
 0x5ee   : > { %11312 = vrot.lane.b32.xlu0 %v18200_v56, %s17432_s17 }
 0x5f0   : > { %11388 = vrot.lane.b32.xlu1 %v18207_v8, %s17432_s17 }
 0x5f2   : > { %11464 = vrot.lane.b32.xlu0 %v21523_v49, %s17432_s17 }
 0x5f4   : > { %11540 = vrot.lane.b32.xlu1 %v18217_v2, %s17432_s17 }
 0x5f6   : > { %11616 = vrot.lane.b32.xlu0 %v21528_v14, %s17432_s17 }
 0x5f7   : > { %v4258_v59 = vpop.xlane.xlu1 %4257 }
 0x5f8   : > { %11692 = vrot.lane.b32.xlu1 %v21521_v23, %s17432_s17  ;;  %17094 = vrcp.f32 %v4258_v59  ;;  %v21564_v23 = vld [vmem:[#allocation76_spill] sm:$0xff] }
 0x5fb   : > { %v4261_v1 = vpop.xlane.xlu0 %4260  ;;  %v19285_v6 = vpop.permute.xlu1 %8088 }
 0x5fc   : > { %17096 = vrcp.f32 %v4261_v1 }
 0x5ff   : > { %v19287_v18 = vpop.permute.xlu0 %8010  ;;  %v19289_v58 = vpop.permute.xlu1 %8086 }
 0x602   : > { %v17095_v52 = vpop.eup %17094 }
 0x603   : > { %v19291_v56 = vpop.permute.xlu0 %8008  ;;  %v19293_v8 = vpop.permute.xlu1 %8244  ;;  %v4324_v2 = vmul.f32 %v17095_v52, %v18973_v44  ;;  %v21565_v44 = vld [vmem:[#allocation78_spill] sm:$0xff] }
 0x605   : > { %16212 = vmatmul.mubr.msk.f32.vlgmr.msra.gmra.mrb[78].mxu1 %vm3973_vm7, %v4324_v2 }
 0x606   : > { %v17097_v49 = vpop.eup %17096  ;;  %16220 = vmatpush3.xpose.msk.msra.mxu1 %vm212_vm0, %v21564_v23  ;;  %16221 = vmatprep.mubr.msk.f32.mxu1 %vm17427_vm6, %v21519_v48 }
 0x607   : > { %v19301_v14 = vpop.permute.xlu0 %8166  ;;  %v4325_v13 = vmul.f32 %v17097_v49, %v18977_v43  ;;  %v19304_v35 = vpop.permute.xlu1 %8242  ;;  %16229 = vmatprep.subr.mxu1 %v21519_v48  ;;  %v21567_v43 = vld [vmem:[#allocation80_spill] sm:$0xff] }
 0x609   : > { %16217 = vmatmul.mubr.msk.f32.vlgmr.msra.gmra.mrb[110].mxu0 %vm3973_vm7, %v4325_v13  ;;  %16222 = vmatmul.mubr.msk.f32.vlgmr.msra.gmra.mrb[80].mxu1 %vm212_vm0, %v21565_v44 }
 0x60a   : > { %16225 = vmatpush3.xpose.msk.msra.mxu0 %vm212_vm0, %v21566_v55  ;;  %16226 = vmatprep.mubr.msk.f32.mxu0 %vm17427_vm6, %v21519_v48 }
 0x60b   : > { %v19314_v36 = vpop.permute.xlu0 %8164  ;;  %16234 = vmatprep.subr.mxu0 %v21519_v48  ;;  %16230 = vmatpush3.xpose.msk.msra.mxu1 %vm212_vm0, %v21567_v43  ;;  %v19319_v57 = vpop.permute.xlu1 %8400 }
 0x60c   : > { %16231 = vmatprep.mubr.msk.f32.mxu1 %vm17427_vm6, %v21519_v48  ;;  %16239 = vmatprep.subr.mxu1 %v21519_v48 }
 0x60d   : > { %16227 = vmatmul.mubr.msk.f32.vlgmr.msra.gmra.mrb[112].mxu0 %vm212_vm0, %v21568_v19 }
 0x60e   : > { %16235 = vmatpush3.xpose.msk.msra.mxu0 %vm212_vm0, %v21569_v46  ;;  %16236 = vmatprep.mubr.msk.f32.mxu0 %vm17427_vm6, %v21519_v48 }
 0x60f   : > { %v19330_v25 = vpop.permute.xlu0 %8322  ;;  %16244 = vmatprep.subr.mxu0 %v21519_v48  ;;  %16232 = vmatmul.mubr.msk.f32.vlgmr.msra.gmra.mrb[82].mxu1 %vm212_vm0, %v21570_v17  ;;  %v19335_v15 = vpop.permute.xlu1 %8398 }
 0x610   : > { %16240 = vmatpush3.xpose.msk.msra.mxu1 %vm212_vm0, %v21571_v16  ;;  %16241 = vmatprep.mubr.msk.f32.mxu1 %vm17427_vm6, %v21519_v48 }
 0x611   : > { %16237 = vmatmul.mubr.msk.f32.vlgmr.msra.gmra.mrb[114].mxu0 %vm212_vm0, %v21572_v24  ;;  %16249 = vmatprep.subr.mxu1 %v21519_v48 }
 0x612   : > { %16245 = vmatpush3.xpose.msk.msra.mxu0 %vm212_vm0, %v21573_v39  ;;  %16246 = vmatprep.mubr.msk.f32.mxu0 %vm17427_vm6, %v21519_v48 }
 0x613   : > { %v19348_v33 = vpop.permute.xlu0 %8320  ;;  %16254 = vmatprep.subr.mxu0 %v21519_v48  ;;  %16242 = vmatmul.mubr.msk.f32.vlgmr.msra.gmra.mrb[84].mxu1 %vm212_vm0, %v21574_v42  ;;  %v19353_v45 = vpop.permute.xlu1 %8556 }
 0x614   : > { %16250 = vmatpush3.xpose.msk.msra.mxu1 %vm212_vm0, %v21575_v63  ;;  %16251 = vmatprep.mubr.msk.f32.mxu1 %vm17427_vm6, %v21519_v48 }
 0x615   : > { %16247 = vmatmul.mubr.msk.f32.vlgmr.msra.gmra.mrb[116].mxu0 %vm212_vm0, %v21576_v60  ;;  %16259 = vmatprep.subr.mxu1 %v21519_v48 }
 0x616   : > { %16255 = vmatpush3.xpose.msk.msra.mxu0 %vm212_vm0, %v21577_v20  ;;  %16256 = vmatprep.mubr.msk.f32.mxu0 %vm17427_vm6, %v21519_v48 }
 0x617   : > { %v19366_v7 = vpop.permute.xlu0 %8478  ;;  %16264 = vmatprep.subr.mxu0 %v21519_v48  ;;  %16252 = vmatmul.mubr.msk.f32.vlgmr.msra.gmra.mrb[86].mxu1 %vm212_vm0, %v21578_v53  ;;  %v19371_v26 = vpop.permute.xlu1 %8554 }
 0x618   : > { %16260 = vmatpush3.xpose.msk.msra.mxu1 %vm212_vm0, %v21579_v62  ;;  %16261 = vmatprep.mubr.msk.f32.mxu1 %vm17427_vm6, %v21519_v48 }
 0x619   : > { %16257 = vmatmul.mubr.msk.f32.vlgmr.msra.gmra.mrb[118].mxu0 %vm212_vm0, %v21580_v34  ;;  %16269 = vmatprep.subr.mxu1 %v21519_v48 }
 0x61a   : > { %16265 = vmatpush3.xpose.msk.msra.mxu0 %vm212_vm0, %v21581_v61  ;;  %16266 = vmatprep.mubr.msk.f32.mxu0 %vm17427_vm6, %v21519_v48 }
 0x61b   : > { %v19384_v51 = vpop.permute.xlu0 %8476  ;;  %16274 = vmatprep.subr.mxu0 %v21519_v48  ;;  %16262 = vmatmul.mubr.msk.f32.vlgmr.msra.gmra.mrb[88].mxu1 %vm212_vm0, %v21582_v11  ;;  %v19389_v40 = vpop.permute.xlu1 %8712 }
 0x61c   : > { %16270 = vmatpush3.xpose.msk.msra.mxu1 %vm212_vm0, %v21583_v5  ;;  %16271 = vmatprep.mubr.msk.f32.mxu1 %vm17427_vm6, %v21519_v48 }
 0x61d   : > { %16267 = vmatmul.mubr.msk.f32.vlgmr.msra.gmra.mrb[120].mxu0 %vm212_vm0, %v21584_v30  ;;  %16279 = vmatprep.subr.mxu1 %v21519_v48 }
 0x61e   : > { %16275 = vmatpush3.xpose.msk.msra.mxu0 %vm212_vm0, %v21585_v29  ;;  %16276 = vmatprep.mubr.msk.f32.mxu0 %vm17427_vm6, %v21519_v48 }
 0x61f   : > { %v8635_v4 = vpop.permute.xlu0 %8634  ;;  %16284 = vmatprep.subr.mxu0 %v21519_v48  ;;  %16272 = vmatmul.mubr.msk.f32.vlgmr.msra.gmra.mrb[90].mxu1 %vm212_vm0, %v21586_v22  ;;  %v19405_v38 = vpop.permute.xlu1 %8710 }
 0x620   : > { %16280 = vmatpush3.xpose.msk.msra.mxu1 %vm212_vm0, %v21587_v50  ;;  %16281 = vmatprep.mubr.msk.f32.mxu1 %vm17427_vm6, %v21519_v48 }
 0x621   : > { %16277 = vmatmul.mubr.msk.f32.vlgmr.msra.gmra.mrb[122].mxu0 %vm212_vm0, %v21588_v12  ;;  %16289 = vmatprep.subr.mxu1 %v21519_v48 }
 0x622   : > { %16285 = vmatpush3.xpose.msk.msra.mxu0 %vm212_vm0, %v21589_v37  ;;  %16286 = vmatprep.mubr.msk.f32.mxu0 %vm17427_vm6, %v21519_v48 }
 0x623   : > { %v8633_v9 = vpop.permute.xlu0 %8632  ;;  %16294 = vmatprep.subr.mxu0 %v21519_v48  ;;  %16282 = vmatmul.mubr.msk.f32.vlgmr.msra.gmra.mrb[92].mxu1 %vm212_vm0, %v21590_v10  ;;  %v8869_v28 = vpop.permute.xlu1 %8868 }
 0x624   : > { %16290 = vmatpush3.xpose.msk.msra.mxu1 %vm212_vm0, %v21591_v54  ;;  %16291 = vmatprep.mubr.msk.f32.mxu1 %vm17427_vm6, %v21519_v48 }
 0x625   : > { %16287 = vmatmul.mubr.msk.f32.vlgmr.msra.gmra.mrb[124].mxu0 %vm212_vm0, %v21592_v3  ;;  %16299 = vmatprep.subr.mxu1 %v21519_v48 }
 0x626   : > { %16295 = vmatpush3.xpose.msk.msra.mxu0 %vm212_vm0, %v21593_v27  ;;  %16296 = vmatprep.mubr.msk.f32.mxu0 %vm17427_vm6, %v21519_v48 }
 0x627   : > { %v8791_v59 = vpop.permute.xlu0 %8790  ;;  %16304 = vmatprep.subr.mxu0 %v21519_v48  ;;  %16292 = vmatmul.mubr.msk.f32.vlgmr.msra.gmra.mrb[94].mxu1 %vm212_vm0, %v19281_v21  ;;  %v8867_v1 = vpop.permute.xlu1 %8866 }
 0x628   : > { %16300 = vmatpush3.xpose.msk.msra.mxu1 %vm212_vm0, %v19287_v18  ;;  %16301 = vmatprep.mubr.msk.f32.mxu1 %vm17427_vm6, %v21519_v48 }
 0x629   : > { %16297 = vmatmul.mubr.msk.f32.vlgmr.msra.gmra.mrb[126].mxu0 %vm212_vm0, %v19275_v32  ;;  %16309 = vmatprep.subr.mxu1 %v21519_v48 }
 0x62a   : > { %16305 = vmatpush3.xpose.msk.msra.mxu0 %vm212_vm0, %v19285_v6  ;;  %16306 = vmatprep.mubr.msk.f32.mxu0 %vm17427_vm6, %v21519_v48 }
 0x62b   : > { %v8789_v52 = vpop.permute.xlu0 %8788  ;;  %16314 = vmatprep.subr.mxu0 %v21519_v48  ;;  %16302 = vmatmul.mubr.msk.f32.vlgmr.msra.gmra.mrb[96].mxu1 %vm212_vm0, %v19291_v56  ;;  %v9025_v21 = vpop.permute.xlu1 %9024 }
 0x62c   : > { %16310 = vmatpush3.xpose.msk.msra.mxu1 %vm212_vm0, %v19301_v14  ;;  %16311 = vmatprep.mubr.msk.f32.mxu1 %vm17427_vm6, %v21519_v48 }
 0x62d   : > { %16307 = vmatmul.mubr.msk.f32.vlgmr.msra.gmra.mrb[128].mxu0 %vm212_vm0, %v19289_v58  ;;  %16319 = vmatprep.subr.mxu1 %v21519_v48 }
 0x62e   : > { %16315 = vmatpush3.xpose.msk.msra.mxu0 %vm212_vm0, %v19293_v8  ;;  %16316 = vmatprep.mubr.msk.f32.mxu0 %vm17427_vm6, %v21519_v48 }
 0x62f   : > { %v8947_v32 = vpop.permute.xlu0 %8946  ;;  %16324 = vmatprep.subr.mxu0 %v21519_v48  ;;  %16312 = vmatmul.mubr.msk.f32.vlgmr.msra.gmra.mrb[98].mxu1 %vm212_vm0, %v19314_v36  ;;  %v9023_v18 = vpop.permute.xlu1 %9022 }
 0x630   : > { %16320 = vmatpush3.xpose.msk.msra.mxu1 %vm212_vm0, %v19330_v25  ;;  %16321 = vmatprep.mubr.msk.f32.mxu1 %vm17427_vm6, %v21519_v48 }
 0x631   : > { %16317 = vmatmul.mubr.msk.f32.vlgmr.msra.gmra.mrb[130].mxu0 %vm212_vm0, %v19304_v35  ;;  %16329 = vmatprep.subr.mxu1 %v21519_v48 }
 0x632   : > { %16325 = vmatpush3.xpose.msk.msra.mxu0 %vm212_vm0, %v19319_v57  ;;  %16326 = vmatprep.mubr.msk.f32.mxu0 %vm17427_vm6, %v21519_v48 }
 0x633   : > { %16334 = vmatprep.subr.mxu0 %v21519_v48  ;;  %16322 = vmatmul.mubr.msk.f32.vlgmr.msra.gmra.mrb[100].mxu1 %vm212_vm0, %v19348_v33  ;;  %v8945_v6 = vpop.permute.xlu0 %8944  ;;  %v9181_v56 = vpop.permute.xlu1 %9180 }
 0x634   : > { %16330 = vmatpush3.xpose.msk.msra.mxu1 %vm212_vm0, %v19366_v7  ;;  %16331 = vmatprep.mubr.msk.f32.mxu1 %vm17427_vm6, %v21519_v48 }
 0x635   : > { %16327 = vmatmul.mubr.msk.f32.vlgmr.msra.gmra.mrb[132].mxu0 %vm212_vm0, %v19335_v15  ;;  %16339 = vmatprep.subr.mxu1 %v21519_v48 }
 0x636   : > { %16335 = vmatpush3.xpose.msk.msra.mxu0 %vm212_vm0, %v19353_v45  ;;  %16336 = vmatprep.mubr.msk.f32.mxu0 %vm17427_vm6, %v21519_v48 }
 0x637   : > { %16344 = vmatprep.subr.mxu0 %v21519_v48  ;;  %16332 = vmatmul.mubr.msk.f32.vlgmr.msra.gmra.mrb[102].mxu1 %vm212_vm0, %v19384_v51  ;;  %v9103_v58 = vpop.permute.xlu0 %9102  ;;  %v9179_v2 = vpop.permute.xlu1 %9178 }
 0x638   : > { %16340 = vmatpush3.xpose.msk.msra.mxu1 %vm212_vm0, %v8635_v4  ;;  %16341 = vmatprep.mubr.msk.f32.mxu1 %vm17427_vm6, %v21519_v48 }
 0x639   : > { %16337 = vmatmul.mubr.msk.f32.vlgmr.msra.gmra.mrb[134].mxu0 %vm212_vm0, %v19371_v26  ;;  %16349 = vmatprep.subr.mxu1 %v21519_v48 }
 0x63a   : > { %16345 = vmatpush3.xpose.msk.msra.mxu0 %vm212_vm0, %v19389_v40  ;;  %16346 = vmatprep.mubr.msk.f32.mxu0 %vm17427_vm6, %v21519_v48 }
 0x63b   : > { %16354 = vmatprep.subr.mxu0 %v21519_v48  ;;  %16342 = vmatmul.mubr.msk.f32.vlgmr.msra.gmra.mrb[104].mxu1 %vm212_vm0, %v8633_v9  ;;  %v9101_v8 = vpop.permute.xlu0 %9100  ;;  %v9717_v23 = vpop.permute.xlu1 %9716 }
 0x63c   : > { %16350 = vmatpush3.xpose.msk.msra.mxu1 %vm212_vm0, %v8791_v59  ;;  %16351 = vmatprep.mubr.msk.f32.mxu1 %vm17427_vm6, %v21519_v48 }
 0x63d   : > { %16347 = vmatmul.mubr.msk.f32.vlgmr.msra.gmra.mrb[136].mxu0 %vm212_vm0, %v19405_v38  ;;  %16359 = vmatprep.subr.mxu1 %v21519_v48 }
 0x63e   : > { %16355 = vmatpush3.xpose.msk.msra.mxu0 %vm212_vm0, %v8869_v28  ;;  %16356 = vmatprep.mubr.msk.f32.mxu0 %vm17427_vm6, %v21519_v48 }
 0x63f   : > { %16364 = vmatprep.subr.mxu0 %v21519_v48  ;;  %16352 = vmatmul.mubr.msk.f32.vlgmr.msra.gmra.mrb[106].mxu1 %vm212_vm0, %v8789_v52  ;;  %v9641_v49 = vpop.permute.xlu0 %9640 }
 0x640   : > { %16360 = vmatpush3.xpose.msk.msra.mxu1 %vm212_vm0, %v8947_v32  ;;  %16361 = vmatprep.mubr.msk.f32.mxu1 %vm17427_vm6, %v21519_v48 }
 0x641   : > { %16357 = vmatmul.mubr.msk.f32.vlgmr.msra.gmra.mrb[138].mxu0 %vm212_vm0, %v8867_v1  ;;  %16369 = vmatprep.subr.mxu1 %v21519_v48 }
 0x642   : > { %16365 = vmatpush3.xpose.msk.msra.mxu0 %vm212_vm0, %v9025_v21  ;;  %16366 = vmatprep.mubr.msk.f32.mxu0 %vm17427_vm6, %v21519_v48 }
 0x643   : > { %16374 = vmatprep.subr.mxu0 %v21519_v48  ;;  %16362 = vmatmul.mubr.msk.f32.vlgmr.msra.gmra.mrb[108].mxu1 %vm212_vm0, %v8945_v6 }
 0x644   : > { %16370 = vmatpush3.xpose.msk.msra.mxu1 %vm212_vm0, %v9103_v58  ;;  %16371 = vmatprep.mubr.msk.f32.mxu1 %vm17427_vm6, %v21519_v48 }
 0x645   : > { %16367 = vmatmul.mubr.msk.f32.vlgmr.msra.gmra.mrb[140].mxu0 %vm212_vm0, %v9023_v18  ;;  %16379 = vmatprep.subr.mxu1 %v21519_v48 }
 0x646   : > { %16375 = vmatpush3.xpose.msk.msra.mxu0 %vm212_vm0, %v9181_v56  ;;  %16376 = vmatprep.mubr.msk.f32.mxu0 %vm17427_vm6, %v21519_v48 }
 0x647   : > { %16384 = vmatprep.subr.mxu0 %v21519_v48  ;;  %16372 = vmatmul.mubr.msk.f32.vlgmr.msra.gmra.mrb[110].mxu1 %vm212_vm0, %v9101_v8 }
 0x648   : > { %16380 = vmatpush3.msra.mxu1 %v9641_v49  ;;  %16381 = vmatprep.mubr.msk.f32.mxu1 %vm17427_vm6, %v21519_v48 }
 0x649   : > { %16377 = vmatmul.mubr.msk.f32.vlgmr.msra.gmra.mrb[142].mxu0 %vm212_vm0, %v9179_v2  ;;  %16389 = vmatprep.subr.mxu1 %v21519_v48 }
 0x64a   : > { %16385 = vmatpush3.msra.mxu0 %v9717_v23  ;;  %16386 = vmatprep.mubr.msk.f32.mxu0 %vm17427_vm6, %v21519_v48 }
 0x64b   : > { %16394 = vmatprep.subr.mxu0 %v21519_v48 }
 0x65e   : > { %v19541_v14 = vpop.f32.mrb[48].mxu1 }
 0x65f   : > { %21594 = vst [vmem:[#allocation56_spill] sm:$0xff] %v19541_v14  ;;  %v16063_v13 = vpop.f32.mrb[49].mxu1 }
 0x662   : > { %v19543_v35 = vpop.f32.mrb[80].mxu0 }
 0x663   : > { %21595 = vst [vmem:[#allocation50_spill] sm:$0xff] %v19543_v35  ;;  %v16068_v55 = vpop.f32.mrb[81].mxu0 }
 0x664   : > { %v19545_v44 = vpop.f32.mrb[50].mxu1 }
 0x665   : > { %21596 = vst [vmem:[#allocation55_spill] sm:$0xff] %v19545_v44  ;;  %v16073_v36 = vpop.f32.mrb[51].mxu1 }
 0x666   : > { %v19547_v43 = vpop.f32.mrb[82].mxu0 }
 0x667   : > { %21597 = vst [vmem:[#allocation48_spill] sm:$0xff] %v19547_v43  ;;  %v16078_v57 = vpop.f32.mrb[83].mxu0 }
 0x66a   : > { %v19549_v19 = vpop.f32.mrb[52].mxu1 }
 0x66b   : > { %21598 = vst [vmem:[#allocation58_spill] sm:$0xff] %v19549_v19  ;;  %v19551_v46 = vpop.f32.mrb[84].mxu0  ;;  %v16083_v25 = vpop.f32.mrb[53].mxu1 }
 0x66c   : > { %21599 = vst [vmem:[#allocation57_spill] sm:$0xff] %v19551_v46  ;;  %v16088_v17 = vpop.f32.mrb[85].mxu0 }
 0x670   : > { %v19553_v15 = vpop.f32.mrb[54].mxu1  ;;  %v19555_v16 = vpop.f32.mrb[86].mxu0 }
 0x671   : > { %21600 = vst [vmem:[#allocation60_spill] sm:$0xff] %v19553_v15  ;;  %21601 = vst [vmem:[#allocation53_spill] sm:$0xff] %v19555_v16  ;;  %v16093_v24 = vpop.f32.mrb[55].mxu1  ;;  %v16098_v39 = vpop.f32.mrb[87].mxu0 }
 0x675   : > { %v19557_v33 = vpop.f32.mrb[56].mxu1  ;;  %v19559_v42 = vpop.f32.mrb[88].mxu0 }
 0x676   : > { %21602 = vst [vmem:[#allocation49_spill] sm:$0xff] %v19557_v33  ;;  %21603 = vst [vmem:[#allocation59_spill] sm:$0xff] %v19559_v42  ;;  %v16103_v45 = vpop.f32.mrb[57].mxu1  ;;  %v16108_v63 = vpop.f32.mrb[89].mxu0 }
 0x67a   : > { %v19561_v60 = vpop.f32.mrb[90].mxu0 }
 0x67b   : > { %21604 = vst [vmem:[#allocation62_spill] sm:$0xff] %v19561_v60  ;;  %v16118_v20 = vpop.f32.mrb[91].mxu0 }
 0x67c   : > { %v19563_v7 = vpop.f32.mrb[58].mxu1 }
 0x67d   : > { %21605 = vst [vmem:[#allocation52_spill] sm:$0xff] %v19563_v7  ;;  %v16113_v53 = vpop.f32.mrb[59].mxu1 }
 0x680   : > { %v19565_v26 = vpop.f32.mrb[60].mxu1  ;;  %v19567_v62 = vpop.f32.mrb[92].mxu0 }
 0x681   : > { %21606 = vst [vmem:[#allocation64_spill] sm:$0xff] %v19565_v26  ;;  %21607 = vst [vmem:[#allocation51_spill] sm:$0xff] %v19567_v62  ;;  %v16123_v34 = vpop.f32.mrb[61].mxu1  ;;  %v16128_v61 = vpop.f32.mrb[93].mxu0 }
 0x685   : > { %v19569_v51 = vpop.f32.mrb[62].mxu1  ;;  %v19571_v11 = vpop.f32.mrb[94].mxu0 }
 0x686   : > { %21608 = vst [vmem:[#allocation61_spill] sm:$0xff] %v19569_v51  ;;  %21609 = vst [vmem:[#allocation66_spill] sm:$0xff] %v19571_v11  ;;  %v16133_v40 = vpop.f32.mrb[63].mxu1  ;;  %v16138_v5 = vpop.f32.mrb[95].mxu0 }
 0x68a   : > { %v19573_v30 = vpop.f32.mrb[64].mxu1 }
 0x68b   : > { %21610 = vst [vmem:[#allocation63_spill] sm:$0xff] %v19573_v30  ;;  %v19575_v29 = vpop.f32.mrb[96].mxu0  ;;  %v16143_v4 = vpop.f32.mrb[65].mxu1 }
 0x68c   : > { %21611 = vst [vmem:[#allocation34_spill] sm:$0xff] %v19575_v29  ;;  %v16148_v22 = vpop.f32.mrb[97].mxu0 }
 0x690   : > { %v19577_v38 = vpop.f32.mrb[66].mxu1  ;;  %v19579_v50 = vpop.f32.mrb[98].mxu0 }
 0x691   : > { %21612 = vst [vmem:[#allocation54_spill] sm:$0xff] %v19577_v38  ;;  %21613 = vst [vmem:[#allocation68_spill] sm:$0xff] %v19579_v50  ;;  %v16153_v12 = vpop.f32.mrb[67].mxu1  ;;  %v16158_v37 = vpop.f32.mrb[99].mxu0 }
 0x695   : > { %v19581_v9 = vpop.f32.mrb[68].mxu1  ;;  %v19583_v10 = vpop.f32.mrb[100].mxu0 }
 0x696   : > { %21614 = vst [vmem:[#allocation65_spill] sm:$0xff] %v19581_v9  ;;  %21615 = vst [vmem:[#allocation37_spill] sm:$0xff] %v19583_v10  ;;  %v16163_v54 = vpop.f32.mrb[69].mxu1  ;;  %v16168_v3 = vpop.f32.mrb[101].mxu0 }
 0x69a   : > { %v19585_v28 = vpop.f32.mrb[70].mxu1  ;;  %v19587_v27 = vpop.f32.mrb[102].mxu0 }
 0x69b   : > { %21616 = vst [vmem:[#allocation67_spill] sm:$0xff] %v19585_v28  ;;  %21617 = vst [vmem:[#allocation69_spill] sm:$0xff] %v19587_v27  ;;  %v16173_v59 = vpop.f32.mrb[71].mxu1  ;;  %v16178_v1 = vpop.f32.mrb[103].mxu0 }
 0x69f   : > { %v19589_v52 = vpop.f32.mrb[72].mxu1 }
 0x6a0   : > { %21618 = vst [vmem:[#allocation35_spill] sm:$0xff] %v19589_v52  ;;  %v19591_v32 = vpop.f32.mrb[104].mxu0  ;;  %v16183_v21 = vpop.f32.mrb[73].mxu1 }
 0x6a1   : > { %21619 = vst [vmem:[#allocation39_spill] sm:$0xff] %v19591_v32  ;;  %v16188_v6 = vpop.f32.mrb[105].mxu0 }
 0x6a4   : > { %v19593_v18 = vpop.f32.mrb[74].mxu1 }
 0x6a5   : > { %21620 = vst [vmem:[#allocation36_spill] sm:$0xff] %v19593_v18  ;;  %v19595_v58 = vpop.f32.mrb[106].mxu0  ;;  %v16193_v56 = vpop.f32.mrb[75].mxu1 }
 0x6a6   : > { %21621 = vst [vmem:[#allocation70_spill] sm:$0xff] %v19595_v58  ;;  %v16198_v8 = vpop.f32.mrb[107].mxu0 }
 0x6a9   : > { %v19597_v2 = vpop.f32.mrb[76].mxu1 }
 0x6aa   : > { %21622 = vst [vmem:[#allocation71_spill] sm:$0xff] %v19597_v2  ;;  %v19599_v49 = vpop.f32.mrb[108].mxu0  ;;  %v16203_v23 = vpop.f32.mrb[77].mxu1 }
 0x6ab   : > { %21623 = vst [vmem:[#allocation41_spill] sm:$0xff] %v19599_v49  ;;  %v16208_v13 = vpop.f32.mrb[109].mxu0 }
 0x6d8   : > { %v19601_v55 = vpop.f32.mrb[78].mxu1 }
 0x6d9   : > { %21624 = vst [vmem:[#allocation38_spill] sm:$0xff] %v19601_v55  ;;  %v16213_v36 = vpop.f32.mrb[79].mxu1 }
 0x6dc   : > { %v19603_v57 = vpop.f32.mrb[110].mxu0  ;;  %v6834_v25 = vpop.f32.mrb[80].mxu1 }
 0x6dd   : > { %21625 = vst [vmem:[#allocation72_spill] sm:$0xff] %v19603_v57  ;;  %v16218_v17 = vpop.f32.mrb[111].mxu0  ;;  %v19605_v24 = vmul.f32 0.25, %v6834_v25  ;;  %v16223_v39 = vpop.f32.mrb[81].mxu1 }
 0x6df   : > { %v9288_v45 = vsel %vm3973_vm7, %v19605_v24, -inf }
 0x6e0   : > { %v6912_v63 = vpop.f32.mrb[112].mxu0  ;;  %9289 = vmax.xlane.f32.xlu0 %v9288_v45 }
 0x6e1   : > { %v19609_v20 = vmul.f32 0.25, %v6912_v63  ;;  %v16228_v53 = vpop.f32.mrb[113].mxu0 }
 0x6e2   : > { %v6990_v34 = vpop.f32.mrb[82].mxu1 }
 0x6e3   : > { %v19611_v61 = vmul.f32 0.25, %v6990_v34  ;;  %v9291_v40 = vsel %vm3973_vm7, %v19609_v20, -inf  ;;  %v16233_v5 = vpop.f32.mrb[83].mxu1 }
 0x6e4   : > { %9292 = vmax.xlane.f32.xlu1 %v9291_v40  ;;  %v7068_v4 = vpop.f32.mrb[114].mxu0 }
 0x6e5   : > { %v19615_v22 = vmul.f32 0.25, %v7068_v4  ;;  %v16238_v12 = vpop.f32.mrb[115].mxu0  ;;  %v9294_v37 = vsel %vm3973_vm7, %v19611_v61, -inf }
 0x6e6   : > { %9295 = vmax.xlane.f32.xlu0 %v9294_v37  ;;  %v7146_v54 = vpop.f32.mrb[84].mxu1 }
 0x6e7   : > { %v16243_v3 = vpop.f32.mrb[85].mxu1  ;;  %v19619_v1 = vmul.f32 0.25, %v7146_v54  ;;  %v9297_v56 = vsel %vm3973_vm7, %v19615_v22, -inf }
 0x6e8   : > { %v7224_v59 = vpop.f32.mrb[116].mxu0 }
 0x6e9   : > { %v19621_v21 = vmul.f32 0.25, %v7224_v59  ;;  %v16248_v6 = vpop.f32.mrb[117].mxu0  ;;  %v9300_v45 = vsel %vm3973_vm7, %v19619_v1, -inf }
 0x6ea   : > { %v7302_v8 = vpop.f32.mrb[86].mxu1  ;;  %9298 = vmax.xlane.f32.xlu0 %v9297_v56 }
 0x6eb   : > { %v9303_v23 = vsel %vm3973_vm7, %v19621_v21, -inf  ;;  %v16253_v13 = vpop.f32.mrb[87].mxu1  ;;  %v19627_v25 = vmul.f32 0.25, %v7302_v8 }
 0x6ec   : > { %9304 = vmax.xlane.f32.xlu1 %v9303_v23  ;;  %v7380_v36 = vpop.f32.mrb[118].mxu0 }
 0x6ed   : > { %v19629_v17 = vmul.f32 0.25, %v7380_v36  ;;  %v16258_v39 = vpop.f32.mrb[119].mxu0  ;;  %v9306_v37 = vsel %vm3973_vm7, %v19627_v25, -inf }
 0x6ee   : > { %v7458_v63 = vpop.f32.mrb[88].mxu1  ;;  %9301 = vmax.xlane.f32.xlu0 %v9300_v45 }
 0x6ef   : > { %v9309_v53 = vsel %vm3973_vm7, %v19629_v17, -inf  ;;  %v16263_v34 = vpop.f32.mrb[89].mxu1  ;;  %v19635_v5 = vmul.f32 0.25, %v7458_v63 }
 0x6f0   : > { %9310 = vmax.xlane.f32.xlu1 %v9309_v53  ;;  %v7536_v40 = vpop.f32.mrb[120].mxu0 }
 0x6f1   : > { %v19637_v4 = vmul.f32 0.25, %v7536_v40  ;;  %v16268_v12 = vpop.f32.mrb[121].mxu0  ;;  %v9312_v13 = vsel %vm3973_vm7, %v19635_v5, -inf }
 0x6f2   : > { %v7614_v54 = vpop.f32.mrb[90].mxu1  ;;  %9307 = vmax.xlane.f32.xlu0 %v9306_v37 }
 0x6f3   : > { %v9315_v3 = vsel %vm3973_vm7, %v19637_v4, -inf  ;;  %v16273_v59 = vpop.f32.mrb[91].mxu1  ;;  %v19643_v56 = vmul.f32 0.25, %v7614_v54 }
 0x6f4   : > { %9316 = vmax.xlane.f32.xlu1 %v9315_v3  ;;  %v7692_v6 = vpop.f32.mrb[122].mxu0 }
 0x6f5   : > { %v19645_v8 = vmul.f32 0.25, %v7692_v6  ;;  %v16278_v23 = vpop.f32.mrb[123].mxu0  ;;  %v9318_v12 = vsel %vm3973_vm7, %v19643_v56, -inf }
 0x6f6   : > { %v7770_v36 = vpop.f32.mrb[92].mxu1  ;;  %9313 = vmax.xlane.f32.xlu0 %v9312_v13 }
 0x6f7   : > { %v9321_v39 = vsel %vm3973_vm7, %v19645_v8, -inf  ;;  %v16283_v45 = vpop.f32.mrb[93].mxu1  ;;  %v19651_v53 = vmul.f32 0.25, %v7770_v36 }
 0x6f8   : > { %9322 = vmax.xlane.f32.xlu1 %v9321_v39  ;;  %v7848_v63 = vpop.f32.mrb[124].mxu0 }
 0x6f9   : > { %v19653_v34 = vmul.f32 0.25, %v7848_v63  ;;  %v16288_v40 = vpop.f32.mrb[125].mxu0  ;;  %v9324_v36 = vsel %vm3973_vm7, %v19651_v53, -inf }
 0x6fa   : > { %v7926_v37 = vpop.f32.mrb[94].mxu1  ;;  %9319 = vmax.xlane.f32.xlu0 %v9318_v12 }
 0x6fb   : > { %v9327_v54 = vsel %vm3973_vm7, %v19653_v34, -inf  ;;  %v16293_v3 = vpop.f32.mrb[95].mxu1  ;;  %v19659_v6 = vmul.f32 0.25, %v7926_v37 }
 0x6fc   : > { %9328 = vmax.xlane.f32.xlu1 %v9327_v54  ;;  %v8004_v59 = vpop.f32.mrb[126].mxu0 }
 0x6fd   : > { %v19661_v23 = vmul.f32 0.25, %v8004_v59  ;;  %v16298_v13 = vpop.f32.mrb[127].mxu0  ;;  %v9330_v3 = vsel %vm3973_vm7, %v19659_v6, -inf }
 0x6fe   : > { %9325 = vmax.xlane.f32.xlu0 %v9324_v36  ;;  %v8082_v39 = vpop.f32.mrb[96].mxu1 }
 0x6ff   : > { %v9333_v45 = vsel %vm3973_vm7, %v19661_v23, -inf  ;;  %v16303_v63 = vpop.f32.mrb[97].mxu1  ;;  %v19667_v12 = vmul.f32 0.25, %v8082_v39 }
 0x700   : > { %9334 = vmax.xlane.f32.xlu1 %v9333_v45  ;;  %v8160_v40 = vpop.f32.mrb[128].mxu0 }
 0x701   : > { %v19669_v54 = vmul.f32 0.25, %v8160_v40  ;;  %v16308_v37 = vpop.f32.mrb[129].mxu0  ;;  %v9336_v63 = vsel %vm3973_vm7, %v19667_v12, -inf }
 0x702   : > { %9331 = vmax.xlane.f32.xlu0 %v9330_v3  ;;  %v8238_v59 = vpop.f32.mrb[98].mxu1 }
 0x703   : > { %v9339_v13 = vsel %vm3973_vm7, %v19669_v54, -inf  ;;  %v16313_v36 = vpop.f32.mrb[99].mxu1  ;;  %v19675_v55 = vmul.f32 0.25, %v8238_v59 }
 0x704   : > { %9340 = vmax.xlane.f32.xlu1 %v9339_v13  ;;  %v8316_v57 = vpop.f32.mrb[130].mxu0 }
 0x705   : > { %v19677_v45 = vmul.f32 0.25, %v8316_v57  ;;  %v16318_v39 = vpop.f32.mrb[131].mxu0  ;;  %v9342_v57 = vsel %vm3973_vm7, %v19675_v55, -inf }
 0x706   : > { %9337 = vmax.xlane.f32.xlu0 %v9336_v63  ;;  %v8394_v40 = vpop.f32.mrb[100].mxu1 }
 0x707   : > { %v9345_v37 = vsel %vm3973_vm7, %v19677_v45, -inf  ;;  %v16323_v3 = vpop.f32.mrb[101].mxu1  ;;  %v19685_v13 = vmul.f32 0.25, %v8394_v40 }
 0x708   : > { %9346 = vmax.xlane.f32.xlu1 %v9345_v37  ;;  %v8472_v49 = vpop.f32.mrb[132].mxu0 }
 0x709   : > { %v19683_v2 = vmul.f32 0.25, %v8472_v49  ;;  %v16328_v59 = vpop.f32.mrb[133].mxu0  ;;  %v9348_v40 = vsel %vm3973_vm7, %v19685_v13, -inf }
 0x70a   : > { %9343 = vmax.xlane.f32.xlu0 %v9342_v57  ;;  %v8550_v36 = vpop.f32.mrb[102].mxu1 }
 0x70b   : > { %v9351_v39 = vsel %vm3973_vm7, %v19683_v2, -inf  ;;  %v16333_v63 = vpop.f32.mrb[103].mxu1  ;;  %v19693_v37 = vmul.f32 0.25, %v8550_v36 }
 0x70c   : > { %9352 = vmax.xlane.f32.xlu1 %v9351_v39  ;;  %v8628_v58 = vpop.f32.mrb[134].mxu0 }
 0x70d   : > { %v19691_v18 = vmul.f32 0.25, %v8628_v58  ;;  %v16338_v49 = vpop.f32.mrb[135].mxu0  ;;  %v9354_v36 = vsel %vm3973_vm7, %v19693_v37, -inf }
 0x70e   : > { %9349 = vmax.xlane.f32.xlu0 %v9348_v40  ;;  %v8706_v3 = vpop.f32.mrb[104].mxu1 }
 0x70f   : > { %v9357_v59 = vsel %vm3973_vm7, %v19691_v18, -inf  ;;  %v16343_v57 = vpop.f32.mrb[105].mxu1  ;;  %v19701_v39 = vmul.f32 0.25, %v8706_v3 }
 0x710   : > { %9358 = vmax.xlane.f32.xlu1 %v9357_v59  ;;  %v8784_v32 = vpop.f32.mrb[136].mxu0 }
 0x711   : > { %v19699_v52 = vmul.f32 0.25, %v8784_v32  ;;  %v16348_v58 = vpop.f32.mrb[137].mxu0  ;;  %v9360_v3 = vsel %vm3973_vm7, %v19701_v39, -inf }
 0x712   : > { %9355 = vmax.xlane.f32.xlu0 %v9354_v36  ;;  %v8862_v63 = vpop.f32.mrb[106].mxu1 }
 0x713   : > { %v9363_v49 = vsel %vm3973_vm7, %v19699_v52, -inf  ;;  %v16353_v40 = vpop.f32.mrb[107].mxu1  ;;  %v19709_v59 = vmul.f32 0.25, %v8862_v63 }
 0x714   : > { %9364 = vmax.xlane.f32.xlu1 %v9363_v49  ;;  %v8940_v27 = vpop.f32.mrb[138].mxu0 }
 0x715   : > { %v19707_v28 = vmul.f32 0.25, %v8940_v27  ;;  %v16358_v32 = vpop.f32.mrb[139].mxu0  ;;  %v9366_v63 = vsel %vm3973_vm7, %v19709_v59, -inf }
 0x716   : > { %9361 = vmax.xlane.f32.xlu0 %v9360_v3  ;;  %v9018_v57 = vpop.f32.mrb[108].mxu1 }
 0x717   : > { %v9369_v58 = vsel %vm3973_vm7, %v19707_v28, -inf  ;;  %v16363_v36 = vpop.f32.mrb[109].mxu1  ;;  %v19717_v49 = vmul.f32 0.25, %v9018_v57 }
 0x718   : > { %9370 = vmax.xlane.f32.xlu1 %v9369_v58  ;;  %v9096_v10 = vpop.f32.mrb[140].mxu0  ;;  %v19729_v36 = vpop.permute.xlu1 %9868 }
 0x719   : > { %v19715_v9 = vmul.f32 0.25, %v9096_v10  ;;  %v16368_v27 = vpop.f32.mrb[141].mxu0  ;;  %v9372_v57 = vsel %vm3973_vm7, %v19717_v49, -inf }
 0x71a   : > { %9367 = vmax.xlane.f32.xlu0 %v9366_v63  ;;  %v9174_v40 = vpop.f32.mrb[110].mxu1 }
 0x71b   : > { %v9375_v32 = vsel %vm3973_vm7, %v19715_v9, -inf  ;;  %v16373_v3 = vpop.f32.mrb[111].mxu1  ;;  %v19725_v58 = vmul.f32 0.25, %v9174_v40 }
 0x71c   : > { %9376 = vmax.xlane.f32.xlu1 %v9375_v32  ;;  %v9252_v50 = vpop.f32.mrb[142].mxu0  ;;  %v19735_v32 = vpop.permute.xlu1 %10020 }
 0x71d   : > { %v19723_v38 = vmul.f32 0.25, %v9252_v50  ;;  %v16378_v10 = vpop.f32.mrb[143].mxu0  ;;  %v9378_v63 = vsel %vm3973_vm7, %v19725_v58, -inf  ;;  %v19737_v50 = vpop.permute.xlu0 %9792 }
 0x71e   : > { %9373 = vmax.xlane.f32.xlu0 %v9372_v57 }
 0x71f   : > { %v9381_v27 = vsel %vm3973_vm7, %v19723_v38, -inf }
 0x720   : > { %9382 = vmax.xlane.f32.xlu1 %v9381_v27  ;;  %v19739_v40 = vpop.permute.xlu1 %10172 }
 0x721   : > { %v19741_v3 = vpop.permute.xlu0 %9944 }
 0x722   : > { %9379 = vmax.xlane.f32.xlu0 %v9378_v63 }
 0x724   : > { %v19743_v10 = vpop.permute.xlu1 %10324 }
 0x725   : > { %v19747_v57 = vpop.permute.xlu0 %10096 }
 0x728   : > { %v19749_v27 = vpop.permute.xlu1 %10476 }
 0x729   : > { %v19753_v63 = vpop.permute.xlu0 %10248 }
 0x72c   : > { %v19755_v29 = vpop.permute.xlu1 %10628 }
 0x72d   : > { %v19757_v30 = vpop.permute.xlu0 %10400 }
 0x730   : > { %v19759_v11 = vpop.permute.xlu1 %10780 }
 0x731   : > { %11844 = vrot.lane.b32.xlu1 %v21527_v0, %s17432_s17  ;;  %v19761_v51 = vpop.permute.xlu0 %10552 }
 0x734   : > { %v19763_v62 = vpop.permute.xlu1 %10932 }
 0x735   : > { %21626 = vst [vmem:[#allocation73_spill] sm:$0xff] %v19763_v62  ;;  %v19765_v0 = vpop.permute.xlu0 %10704 }
 0x738   : > { %11768 = vrot.lane.b32.xlu0 %v21533_v47, %s17432_s17  ;;  %v19767_v26 = vpop.permute.xlu1 %11084 }
 0x739   : > { %21627 = vst [vmem:[#allocation43_spill] sm:$0xff] %v19767_v26  ;;  %v19769_v60 = vpop.permute.xlu0 %10856 }
 0x73c   : > { %v19771_v7 = vpop.permute.xlu1 %11160 }
 0x73d   : > { %21628 = vst [vmem:[#allocation40_spill] sm:$0xff] %v19771_v7  ;;  %v19773_v47 = vpop.permute.xlu0 %11008 }
 0x73e   : > { %21629 = vst [vmem:[#allocation74_spill] sm:$0xff] %v19773_v47 }
 0x740   : > { %v19775_v42 = vpop.permute.xlu1 %11236 }
 0x741   : > { %21630 = vst [vmem:[#allocation75_spill] sm:$0xff] %v19775_v42  ;;  %v19777_v33 = vpop.permute.xlu0 %11312 }
 0x742   : > { %21631 = vst [vmem:[#allocation45_spill] sm:$0xff] %v19777_v33 }
 0x744   : > { %v19779_v16 = vpop.permute.xlu1 %11388 }
 0x745   : > { %21632 = vst [vmem:[#allocation42_spill] sm:$0xff] %v19779_v16  ;;  %v19781_v15 = vpop.permute.xlu0 %11464 }
 0x746   : > { %21633 = vst [vmem:[#allocation106_spill] sm:$0xff] %v19781_v15 }
 0x748   : > { %v19783_v46 = vpop.permute.xlu1 %11540 }
 0x749   : > { %21634 = vst [vmem:[#allocation77_spill] sm:$0xff] %v19783_v46  ;;  %v19785_v19 = vpop.permute.xlu0 %11616 }
 0x74a   : > { %21635 = vst [vmem:[#allocation47_spill] sm:$0xff] %v19785_v19 }
 0x74c   : > { %v19787_v43 = vpop.permute.xlu1 %11692 }
 0x74d   : > { %21636 = vst [vmem:[#allocation44_spill] sm:$0xff] %v19787_v43 }
 0x76d   : > { %v9290_v44 = vpop.xlane.xlu0 %9289 }
 0x76e   : > { %v9384_v35 = vsub.f32 %v19605_v24, %v9290_v44 }
 0x770   : > { %v9416_v14 = vmul.f32 1.442695, %v9384_v35 }
 0x771   : > { %v9293_v7 = vpop.xlane.xlu1 %9292 }
 0x772   : > { %v9385_v26 = vsub.f32 %v19609_v20, %v9293_v7  ;;  %17098 = vpow2.f32 %v9416_v14 }
 0x773   : > { %v9296_v42 = vpop.xlane.xlu0 %9295 }
 0x774   : > { %v9418_v33 = vmul.f32 1.442695, %v9385_v26  ;;  %v9386_v16 = vsub.f32 %v19611_v61, %v9296_v42 }
 0x776   : > { %17100 = vpow2.f32 %v9418_v33  ;;  %v9420_v15 = vmul.f32 1.442695, %v9386_v16 }
 0x777   : > { %v9299_v47 = vpop.xlane.xlu0 %9298 }
 0x778   : > { %17102 = vpow2.f32 %v9420_v15  ;;  %v9387_v19 = vsub.f32 %v19615_v22, %v9299_v47 }
 0x779   : > { %v9305_v46 = vpop.xlane.xlu1 %9304 }
 0x77a   : > { %v9389_v43 = vsub.f32 %v19621_v21, %v9305_v46  ;;  %v9422_v62 = vmul.f32 1.442695, %v9387_v19 }
 0x77b   : > { %v9302_v44 = vpop.xlane.xlu0 %9301 }
 0x77c   : > { %v19794_v35 = vpop.eup %17098  ;;  %v9426_v24 = vmul.f32 1.442695, %v9389_v43  ;;  %17104 = vpow2.f32 %v9422_v62  ;;  %v9388_v14 = vsub.f32 %v19619_v1, %v9302_v44 }
 0x77d   : > { %v9311_v7 = vpop.xlane.xlu1 %9310  ;;  %v9480_v33 = vsel %vm3973_vm7, %v19794_v35, 0.0 }
 0x77e   : > { %17106 = vpow2.f32 %v9426_v24  ;;  %v9391_v15 = vsub.f32 %v19629_v17, %v9311_v7  ;;  %v9424_v16 = vmul.f32 1.442695, %v9388_v14  ;;  %9481 = vadd.xlane.f32.xlu0 %v9480_v33 }
 0x77f   : > { %v9308_v42 = vpop.xlane.xlu0 %9307 }
 0x780   : > { %v19800_v26 = vpop.eup %17100  ;;  %v9430_v19 = vmul.f32 1.442695, %v9391_v15  ;;  %17108 = vpow2.f32 %v9424_v16  ;;  %v9390_v46 = vsub.f32 %v19627_v25, %v9308_v42 }
 0x781   : > { %v9317_v43 = vpop.xlane.xlu1 %9316  ;;  %v9483_v62 = vsel %vm3973_vm7, %v19800_v26, 0.0 }
 0x782   : > { %v19805_v20 = vpop.eup %17102  ;;  %17110 = vpow2.f32 %v9430_v19  ;;  %v9393_v61 = vsub.f32 %v19637_v4, %v9317_v43  ;;  %v9428_v22 = vmul.f32 1.442695, %v9390_v46  ;;  %9484 = vadd.xlane.f32.xlu1 %v9483_v62 }
 0x783   : > { %v9314_v1 = vpop.xlane.xlu0 %9313  ;;  %v9486_v21 = vsel %vm3973_vm7, %v19805_v20, 0.0 }
 0x784   : > { %v9434_v17 = vmul.f32 1.442695, %v9393_v61  ;;  %17112 = vpow2.f32 %v9428_v22  ;;  %v9392_v47 = vsub.f32 %v19635_v5, %v9314_v1  ;;  %9487 = vadd.xlane.f32.xlu0 %v9486_v21 }
 0x785   : > { %v9323_v25 = vpop.xlane.xlu1 %9322 }
 0x786   : > { %v19811_v44 = vpop.eup %17104  ;;  %17114 = vpow2.f32 %v9434_v17  ;;  %v9395_v24 = vsub.f32 %v19645_v8, %v9323_v25  ;;  %v9432_v14 = vmul.f32 1.442695, %v9392_v47 }
 0x787   : > { %v9320_v7 = vpop.xlane.xlu0 %9319  ;;  %v9489_v4 = vsel %vm3973_vm7, %v19811_v44, 0.0 }
 0x788   : > { %v19816_v33 = vpop.eup %17106  ;;  %v9438_v15 = vmul.f32 1.442695, %v9395_v24  ;;  %17116 = vpow2.f32 %v9432_v14  ;;  %v9394_v16 = vsub.f32 %v19643_v56, %v9320_v7  ;;  %9490 = vadd.xlane.f32.xlu1 %v9489_v4 }
 0x789   : > { %v9329_v5 = vpop.xlane.xlu1 %9328  ;;  %v9495_v43 = vsel %vm3973_vm7, %v19816_v33, 0.0 }
 0x78a   : > { %v19819_v42 = vpop.eup %17108  ;;  %17118 = vpow2.f32 %v9438_v15  ;;  %v9397_v19 = vsub.f32 %v19653_v34, %v9329_v5  ;;  %v9436_v46 = vmul.f32 1.442695, %v9394_v16 }
 0x78b   : > { %v9326_v8 = vpop.xlane.xlu0 %9325  ;;  %v9492_v62 = vsel %vm3973_vm7, %v19819_v42, 0.0 }
 0x78c   : > { %v19826_v61 = vpop.eup %17110  ;;  %v9442_v22 = vmul.f32 1.442695, %v9397_v19  ;;  %17120 = vpow2.f32 %v9436_v46  ;;  %v9396_v56 = vsub.f32 %v19651_v53, %v9326_v8  ;;  %9496 = vadd.xlane.f32.xlu1 %v9495_v43  ;;  %9493 = vadd.xlane.f32.xlu0 %v9492_v62 }
 0x78d   : > { %v9335_v1 = vpop.xlane.xlu1 %9334  ;;  %v9501_v25 = vsel %vm3973_vm7, %v19826_v61, 0.0 }
 0x78e   : > { %v19829_v21 = vpop.eup %17112  ;;  %17122 = vpow2.f32 %v9442_v22  ;;  %v9399_v34 = vsub.f32 %v19661_v23, %v9335_v1  ;;  %v9440_v17 = vmul.f32 1.442695, %v9396_v56 }
 0x78f   : > { %v9332_v47 = vpop.xlane.xlu0 %9331  ;;  %v9498_v24 = vsel %vm3973_vm7, %v19829_v21, 0.0 }
 0x790   : > { %v19836_v14 = vpop.eup %17114  ;;  %v9446_v7 = vmul.f32 1.442695, %v9399_v34  ;;  %17124 = vpow2.f32 %v9440_v17  ;;  %v9398_v53 = vsub.f32 %v19659_v6, %v9332_v47  ;;  %9502 = vadd.xlane.f32.xlu1 %v9501_v25  ;;  %9499 = vadd.xlane.f32.xlu0 %v9498_v24 }
 0x791   : > { %v9341_v4 = vpop.xlane.xlu1 %9340  ;;  %v9507_v19 = vsel %vm3973_vm7, %v19836_v14, 0.0 }
 0x792   : > { %v19839_v15 = vpop.eup %17116  ;;  %17126 = vpow2.f32 %v9446_v7  ;;  %v9401_v23 = vsub.f32 %v19669_v54, %v9341_v4  ;;  %v9444_v16 = vmul.f32 1.442695, %v9398_v53 }
 0x793   : > { %v9338_v5 = vpop.xlane.xlu0 %9337  ;;  %v9504_v46 = vsel %vm3973_vm7, %v19839_v15, 0.0 }
 0x794   : > { %v19846_v8 = vpop.eup %17118  ;;  %v9450_v43 = vmul.f32 1.442695, %v9401_v23  ;;  %17128 = vpow2.f32 %v9444_v16  ;;  %v9400_v6 = vsub.f32 %v19667_v12, %v9338_v5  ;;  %9508 = vadd.xlane.f32.xlu1 %v9507_v19  ;;  %9505 = vadd.xlane.f32.xlu0 %v9504_v46 }
 0x795   : > { %v9347_v62 = vpop.xlane.xlu1 %9346  ;;  %v9513_v34 = vsel %vm3973_vm7, %v19846_v8, 0.0 }
 0x796   : > { %v19849_v22 = vpop.eup %17120  ;;  %17130 = vpow2.f32 %v9450_v43  ;;  %v9403_v54 = vsub.f32 %v19677_v45, %v9347_v62  ;;  %v9448_v56 = vmul.f32 1.442695, %v9400_v6 }
 0x797   : > { %v9344_v1 = vpop.xlane.xlu0 %9343  ;;  %v9510_v17 = vsel %vm3973_vm7, %v19849_v22, 0.0 }
 0x798   : > { %v19856_v47 = vpop.eup %17122  ;;  %v9454_v25 = vmul.f32 1.442695, %v9403_v54  ;;  %17132 = vpow2.f32 %v9448_v56  ;;  %v9402_v12 = vsub.f32 %v19675_v55, %v9344_v1  ;;  %9514 = vadd.xlane.f32.xlu1 %v9513_v34  ;;  %9511 = vadd.xlane.f32.xlu0 %v9510_v17 }
 0x799   : > { %v9353_v24 = vpop.xlane.xlu1 %9352  ;;  %v9519_v23 = vsel %vm3973_vm7, %v19856_v47, 0.0 }
 0x79a   : > { %v19859_v7 = vpop.eup %17124  ;;  %17134 = vpow2.f32 %v9454_v25  ;;  %v9405_v45 = vsub.f32 %v19683_v2, %v9353_v24  ;;  %v9452_v53 = vmul.f32 1.442695, %v9402_v12 }
 0x79b   : > { %v9350_v4 = vpop.xlane.xlu0 %9349  ;;  %v9516_v16 = vsel %vm3973_vm7, %v19859_v7, 0.0 }
 0x79c   : > { %v19866_v5 = vpop.eup %17126  ;;  %v9458_v19 = vmul.f32 1.442695, %v9405_v45  ;;  %17136 = vpow2.f32 %v9452_v53  ;;  %v9404_v55 = vsub.f32 %v19685_v13, %v9350_v4  ;;  %9520 = vadd.xlane.f32.xlu1 %v9519_v23  ;;  %9517 = vadd.xlane.f32.xlu0 %v9516_v16 }
 0x79d   : > { %v9359_v46 = vpop.xlane.xlu1 %9358  ;;  %v9525_v54 = vsel %vm3973_vm7, %v19866_v5, 0.0 }
 0x79e   : > { %v19869_v43 = vpop.eup %17128  ;;  %17138 = vpow2.f32 %v9458_v19  ;;  %v9407_v2 = vsub.f32 %v19691_v18, %v9359_v46  ;;  %v9456_v6 = vmul.f32 1.442695, %v9404_v55 }
 0x79f   : > { %v9356_v62 = vpop.xlane.xlu0 %9355  ;;  %v9522_v56 = vsel %vm3973_vm7, %v19869_v43, 0.0 }
 0x7a0   : > { %v19876_v1 = vpop.eup %17130  ;;  %v9462_v34 = vmul.f32 1.442695, %v9407_v2  ;;  %17140 = vpow2.f32 %v9456_v6  ;;  %v9406_v13 = vsub.f32 %v19693_v37, %v9356_v62  ;;  %9526 = vadd.xlane.f32.xlu0 %v9525_v54  ;;  %9523 = vadd.xlane.f32.xlu1 %v9522_v56 }
 0x7a1   : > { %v9365_v17 = vpop.xlane.xlu1 %9364  ;;  %v9531_v45 = vsel %vm3973_vm7, %v19876_v1, 0.0 }
 0x7a2   : > { %v19879_v25 = vpop.eup %17132  ;;  %17142 = vpow2.f32 %v9462_v34  ;;  %v9409_v18 = vsub.f32 %v19699_v52, %v9365_v17  ;;  %v9460_v12 = vmul.f32 1.442695, %v9406_v13 }
 0x7a3   : > { %v9362_v24 = vpop.xlane.xlu0 %9361  ;;  %v9528_v53 = vsel %vm3973_vm7, %v19879_v25, 0.0 }
 0x7a4   : > { %v19886_v4 = vpop.eup %17134  ;;  %v9466_v23 = vmul.f32 1.442695, %v9409_v18  ;;  %17144 = vpow2.f32 %v9460_v12  ;;  %v9408_v37 = vsub.f32 %v19701_v39, %v9362_v24  ;;  %9532 = vadd.xlane.f32.xlu0 %v9531_v45  ;;  %9529 = vadd.xlane.f32.xlu1 %v9528_v53 }
 0x7a5   : > { %v9371_v16 = vpop.xlane.xlu1 %9370  ;;  %v9537_v2 = vsel %vm3973_vm7, %v19886_v4, 0.0 }
 0x7a6   : > { %v19889_v19 = vpop.eup %17136  ;;  %17146 = vpow2.f32 %v9466_v23  ;;  %v9411_v52 = vsub.f32 %v19707_v28, %v9371_v16  ;;  %v9464_v55 = vmul.f32 1.442695, %v9408_v37 }
 0x7a7   : > { %v9368_v46 = vpop.xlane.xlu0 %9367  ;;  %v9534_v6 = vsel %vm3973_vm7, %v19889_v19, 0.0 }
 0x7a8   : > { %v19896_v62 = vpop.eup %17138  ;;  %v9470_v54 = vmul.f32 1.442695, %v9411_v52  ;;  %17148 = vpow2.f32 %v9464_v55  ;;  %v9410_v39 = vsub.f32 %v19709_v59, %v9368_v46  ;;  %9538 = vadd.xlane.f32.xlu0 %v9537_v2  ;;  %9535 = vadd.xlane.f32.xlu1 %v9534_v6 }
 0x7a9   : > { %v9377_v56 = vpop.xlane.xlu1 %9376  ;;  %v9543_v18 = vsel %vm3973_vm7, %v19896_v62, 0.0 }
 0x7aa   : > { %v19899_v34 = vpop.eup %17140  ;;  %17150 = vpow2.f32 %v9470_v54  ;;  %v9413_v28 = vsub.f32 %v19715_v9, %v9377_v56  ;;  %v9468_v13 = vmul.f32 1.442695, %v9410_v39 }
 0x7ab   : > { %v9374_v17 = vpop.xlane.xlu0 %9373  ;;  %v9540_v12 = vsel %vm3973_vm7, %v19899_v34, 0.0 }
 0x7ac   : > { %v19906_v24 = vpop.eup %17142  ;;  %v9474_v45 = vmul.f32 1.442695, %v9413_v28  ;;  %17152 = vpow2.f32 %v9468_v13  ;;  %v9412_v59 = vsub.f32 %v19717_v49, %v9374_v17  ;;  %9544 = vadd.xlane.f32.xlu0 %v9543_v18  ;;  %9541 = vadd.xlane.f32.xlu1 %v9540_v12 }
 0x7ad   : > { %v9383_v53 = vpop.xlane.xlu1 %9382  ;;  %v9549_v52 = vsel %vm3973_vm7, %v19906_v24, 0.0 }
 0x7ae   : > { %v19909_v23 = vpop.eup %17144  ;;  %17154 = vpow2.f32 %v9474_v45  ;;  %v9415_v9 = vsub.f32 %v19723_v38, %v9383_v53  ;;  %v9472_v37 = vmul.f32 1.442695, %v9412_v59 }
 0x7af   : > { %v9380_v16 = vpop.xlane.xlu0 %9379  ;;  %v9546_v55 = vsel %vm3973_vm7, %v19909_v23, 0.0 }
 0x7b0   : > { %v19916_v46 = vpop.eup %17146  ;;  %v9478_v2 = vmul.f32 1.442695, %v9415_v9  ;;  %17156 = vpow2.f32 %v9472_v37  ;;  %v9414_v49 = vsub.f32 %v19725_v58, %v9380_v16  ;;  %9550 = vadd.xlane.f32.xlu0 %v9549_v52  ;;  %9547 = vadd.xlane.f32.xlu1 %v9546_v55 }
 0x7b1   : > { %v9555_v54 = vsel %vm3973_vm7, %v19916_v46, 0.0  ;;  %v19955_v52 = vpop.permute.xlu1 %11844 }
 0x7b2   : > { %v19919_v6 = vpop.eup %17148  ;;  %17158 = vpow2.f32 %v9478_v2  ;;  %v9476_v38 = vmul.f32 1.442695, %v9414_v49 }
 0x7b3   : > { %v9552_v39 = vsel %vm3973_vm7, %v19919_v6, 0.0  ;;  %v19953_v16 = vpop.permute.xlu0 %11768 }
 0x7b4   : > { %v19925_v56 = vpop.eup %17150  ;;  %17160 = vpow2.f32 %v9476_v38  ;;  %9556 = vadd.xlane.f32.xlu0 %v9555_v54  ;;  %9553 = vadd.xlane.f32.xlu1 %v9552_v39 }
 0x7b5   : > { %v9561_v58 = vsel %vm3973_vm7, %v19925_v56, 0.0 }
 0x7b6   : > { %v19927_v28 = vpop.eup %17152 }
 0x7b7   : > { %v9558_v13 = vsel %vm3973_vm7, %v19927_v28, 0.0 }
 0x7b8   : > { %v19933_v17 = vpop.eup %17154  ;;  %9562 = vadd.xlane.f32.xlu0 %v9561_v58  ;;  %9559 = vadd.xlane.f32.xlu1 %v9558_v13 }
 0x7b9   : > { %v9567_v12 = vsel %vm3973_vm7, %v19933_v17, 0.0 }
 0x7ba   : > { %v19935_v18 = vpop.eup %17156 }
 0x7bb   : > { %v9564_v45 = vsel %vm3973_vm7, %v19935_v18, 0.0 }
 0x7bc   : > { %v19941_v59 = vpop.eup %17158  ;;  %9568 = vadd.xlane.f32.xlu0 %v9567_v12  ;;  %9565 = vadd.xlane.f32.xlu1 %v9564_v45 }
 0x7bd   : > { %v9573_v9 = vsel %vm3973_vm7, %v19941_v59, 0.0 }
 0x7be   : > { %v19943_v53 = vpop.eup %17160 }
 0x7bf   : > { %v9570_v37 = vsel %vm3973_vm7, %v19943_v53, 0.0 }
 0x7c0   : > { %9574 = vadd.xlane.f32.xlu0 %v9573_v9  ;;  %9571 = vadd.xlane.f32.xlu1 %v9570_v37 }
 0x7d1   : > { %11996 = vrot.lane.b32.xlu1 %v21531_v31, %s17432_s17 }
 0x7d6   : > { %11920 = vrot.lane.b32.xlu0 %v21538_v41, %s17432_s17 }
 0x80b   : > { %v9482_v55 = vpop.xlane.xlu0 %9481 }
 0x80c   : > { %17162 = vrcp.f32 %v9482_v55 }
 0x80f   : > { %v9485_v2 = vpop.xlane.xlu1 %9484 }
 0x810   : > { %17164 = vrcp.f32 %v9485_v2 }
 0x811   : > { %v9488_v49 = vpop.xlane.xlu0 %9487 }
 0x812   : > { %17166 = vrcp.f32 %v9488_v49 }
 0x815   : > { %v9491_v38 = vpop.xlane.xlu1 %9490 }
 0x816   : > { %v17163_v54 = vpop.eup %17162  ;;  %17168 = vrcp.f32 %v9491_v38 }
 0x817   : > { %v9608_v39 = vmul.f32 %v17163_v54, %v19794_v35 }
 0x819   : > { %v9497_v58 = vpop.xlane.xlu1 %9496  ;;  %v9494_v31 = vpop.xlane.xlu0 %9493  ;;  %16382 = vmatmul.mubr.msk.f32.vlgmr.msra.gmra.mrb[112].mxu1 %vm3973_vm7, %v9608_v39 }
 0x81a   : > { %v17165_v41 = vpop.eup %17164  ;;  %17170 = vrcp.f32 %v9497_v58  ;;  %16390 = vmatpush3.msra.mxu1 %v19737_v50  ;;  %16391 = vmatprep.mubr.msk.f32.mxu1 %vm17427_vm6, %v21519_v48 }
 0x81b   : > { %17172 = vrcp.f32 %v9494_v31  ;;  %v9609_v13 = vmul.f32 %v17165_v41, %v19800_v26  ;;  %16399 = vmatprep.subr.mxu1 %v21519_v48 }
 0x81c   : > { %v17167_v12 = vpop.eup %17166 }
 0x81d   : > { %16387 = vmatmul.mubr.msk.f32.vlgmr.msra.gmra.mrb[144].mxu0 %vm3973_vm7, %v9609_v13  ;;  %v9503_v35 = vpop.xlane.xlu1 %9502  ;;  %v9500_v45 = vpop.xlane.xlu0 %9499  ;;  %v9610_v9 = vmul.f32 %v17167_v12, %v19805_v20 }
 0x81e   : > { %16395 = vmatpush3.msra.mxu0 %v19729_v36  ;;  %17174 = vrcp.f32 %v9503_v35  ;;  %16396 = vmatprep.mubr.msk.f32.mxu0 %vm17427_vm6, %v21519_v48 }
 0x81f   : > { %17176 = vrcp.f32 %v9500_v45  ;;  %16392 = vmatmul.mubr.msk.f32.vlgmr.msra.gmra.mrb[114].mxu1 %vm3973_vm7, %v9610_v9  ;;  %16404 = vmatprep.subr.mxu0 %v21519_v48 }
 0x820   : > { %v17169_v50 = vpop.eup %17168  ;;  %16400 = vmatpush3.msra.mxu1 %v19741_v3  ;;  %16401 = vmatprep.mubr.msk.f32.mxu1 %vm17427_vm6, %v21519_v48 }
 0x821   : > { %v9509_v26 = vpop.xlane.xlu1 %9508  ;;  %v9506_v37 = vpop.xlane.xlu0 %9505  ;;  %v9611_v20 = vmul.f32 %v17169_v50, %v19811_v44  ;;  %16409 = vmatprep.subr.mxu1 %v21519_v48 }
 0x822   : > { %17178 = vrcp.f32 %v9509_v26 }
 0x823   : > { %17180 = vrcp.f32 %v9506_v37  ;;  %16397 = vmatmul.mubr.msk.f32.vlgmr.msra.gmra.mrb[146].mxu0 %vm3973_vm7, %v9611_v20  ;;  %v21638_v20 = vld [vmem:[#allocation74_spill] sm:$0xff] }
 0x824   : > { %v17171_v36 = vpop.eup %17170  ;;  %16405 = vmatpush3.msra.mxu0 %v19735_v32  ;;  %16406 = vmatprep.mubr.msk.f32.mxu0 %vm17427_vm6, %v21519_v48 }
 0x825   : > { %v17173_v3 = vpop.eup %17172  ;;  %v9515_v55 = vpop.xlane.xlu1 %9514  ;;  %16414 = vmatprep.subr.mxu0 %v21519_v48  ;;  %v9613_v49 = vmul.f32 %v17171_v36, %v19816_v33  ;;  %v21639_v36 = vld [vmem:[#allocation43_spill] sm:$0xff] }
 0x826   : > { %v9512_v2 = vpop.xlane.xlu0 %9511  ;;  %17182 = vrcp.f32 %v9515_v55  ;;  %v9612_v44 = vmul.f32 %v17173_v3, %v19819_v42 }
 0x827   : > { %17184 = vrcp.f32 %v9512_v2  ;;  %16407 = vmatmul.mubr.msk.f32.vlgmr.msra.gmra.mrb[148].mxu0 %vm3973_vm7, %v9613_v49 }
 0x828   : > { %v17175_v38 = vpop.eup %17174  ;;  %16402 = vmatmul.mubr.msk.f32.vlgmr.msra.gmra.mrb[116].mxu1 %vm3973_vm7, %v9612_v44  ;;  %16415 = vmatpush3.msra.mxu0 %v19739_v40  ;;  %v21640_v44 = vld [vmem:[#allocation40_spill] sm:$0xff] }
 0x829   : > { %v17177_v32 = vpop.eup %17176  ;;  %16410 = vmatpush3.msra.mxu1 %v19747_v57  ;;  %v9521_v54 = vpop.xlane.xlu1 %9520  ;;  %16411 = vmatprep.mubr.msk.f32.mxu1 %vm17427_vm6, %v21519_v48  ;;  %v9615_v33 = vmul.f32 %v17175_v38, %v19826_v61  ;;  %v21641_v38 = vld [vmem:[#allocation75_spill] sm:$0xff] }
 0x82a   : > { %v9518_v39 = vpop.xlane.xlu0 %9517  ;;  %17186 = vrcp.f32 %v9521_v54  ;;  %16416 = vmatprep.mubr.msk.f32.mxu0 %vm17427_vm6, %v21519_v48  ;;  %16419 = vmatprep.subr.mxu1 %v21519_v48  ;;  %v9614_v42 = vmul.f32 %v17177_v32, %v19829_v21 }
 0x82b   : > { %17188 = vrcp.f32 %v9518_v39  ;;  %16424 = vmatprep.subr.mxu0 %v21519_v48  ;;  %16417 = vmatmul.mubr.msk.f32.vlgmr.msra.gmra.mrb[150].mxu0 %vm3973_vm7, %v9615_v33 }
 0x82c   : > { %v17179_v40 = vpop.eup %17178  ;;  %16412 = vmatmul.mubr.msk.f32.vlgmr.msra.gmra.mrb[118].mxu1 %vm3973_vm7, %v9614_v42  ;;  %16425 = vmatpush3.msra.mxu0 %v19743_v10  ;;  %v21642_v42 = vld [vmem:[#allocation45_spill] sm:$0xff] }
 0x82d   : > { %v17181_v57 = vpop.eup %17180  ;;  %16420 = vmatpush3.msra.mxu1 %v19753_v63  ;;  %v9524_v61 = vpop.xlane.xlu1 %9523  ;;  %16421 = vmatprep.mubr.msk.f32.mxu1 %vm17427_vm6, %v21519_v48  ;;  %v9617_v21 = vmul.f32 %v17179_v40, %v19836_v14  ;;  %v21643_v40 = vld [vmem:[#allocation42_spill] sm:$0xff] }
 0x82e   : > { %v9527_v58 = vpop.xlane.xlu0 %9526  ;;  %17190 = vrcp.f32 %v9524_v61  ;;  %16426 = vmatprep.mubr.msk.f32.mxu0 %vm17427_vm6, %v21519_v48  ;;  %16429 = vmatprep.subr.mxu1 %v21519_v48  ;;  %v9616_v31 = vmul.f32 %v17181_v57, %v19839_v15 }
 0x82f   : > { %17192 = vrcp.f32 %v9527_v58  ;;  %16434 = vmatprep.subr.mxu0 %v21519_v48  ;;  %16427 = vmatmul.mubr.msk.f32.vlgmr.msra.gmra.mrb[152].mxu0 %vm3973_vm7, %v9617_v21 }
 0x830   : > { %v17183_v10 = vpop.eup %17182  ;;  %16422 = vmatmul.mubr.msk.f32.vlgmr.msra.gmra.mrb[120].mxu1 %vm3973_vm7, %v9616_v31  ;;  %16435 = vmatpush3.msra.mxu0 %v19749_v27  ;;  %v21644_v31 = vld [vmem:[#allocation106_spill] sm:$0xff] }
 0x831   : > { %v17185_v63 = vpop.eup %17184  ;;  %16430 = vmatpush3.msra.mxu1 %v19757_v30  ;;  %v9530_v14 = vpop.xlane.xlu1 %9529  ;;  %16431 = vmatprep.mubr.msk.f32.mxu1 %vm17427_vm6, %v21519_v48  ;;  %v9619_v15 = vmul.f32 %v17183_v10, %v19846_v8  ;;  %v21645_v10 = vld [vmem:[#allocation77_spill] sm:$0xff] }
 0x832   : > { %v9533_v41 = vpop.xlane.xlu0 %9532  ;;  %17194 = vrcp.f32 %v9530_v14  ;;  %16436 = vmatprep.mubr.msk.f32.mxu0 %vm17427_vm6, %v21519_v48  ;;  %16439 = vmatprep.subr.mxu1 %v21519_v48  ;;  %v9618_v13 = vmul.f32 %v17185_v63, %v19849_v22 }
 0x833   : > { %17196 = vrcp.f32 %v9533_v41  ;;  %16444 = vmatprep.subr.mxu0 %v21519_v48  ;;  %16437 = vmatmul.mubr.msk.f32.vlgmr.msra.gmra.mrb[154].mxu0 %vm3973_vm7, %v9619_v15 }
 0x834   : > { %v17187_v30 = vpop.eup %17186  ;;  %16432 = vmatmul.mubr.msk.f32.vlgmr.msra.gmra.mrb[122].mxu1 %vm3973_vm7, %v9618_v13  ;;  %16445 = vmatpush3.msra.mxu0 %v19755_v29  ;;  %v21646_v13 = vld [vmem:[#allocation47_spill] sm:$0xff] }
 0x835   : > { %v17189_v27 = vpop.eup %17188  ;;  %16440 = vmatpush3.msra.mxu1 %v19761_v51  ;;  %v9536_v8 = vpop.xlane.xlu1 %9535  ;;  %16441 = vmatprep.mubr.msk.f32.mxu1 %vm17427_vm6, %v21519_v48  ;;  %v9621_v22 = vmul.f32 %v17187_v30, %v19856_v47  ;;  %v21647_v30 = vld [vmem:[#allocation44_spill] sm:$0xff] }
 0x836   : > { %v9539_v12 = vpop.xlane.xlu0 %9538  ;;  %17198 = vrcp.f32 %v9536_v8  ;;  %16446 = vmatprep.mubr.msk.f32.mxu0 %vm17427_vm6, %v21519_v48  ;;  %16449 = vmatprep.subr.mxu1 %v21519_v48  ;;  %v9620_v35 = vmul.f32 %v17189_v27, %v19859_v7 }
 0x837   : > { %17200 = vrcp.f32 %v9539_v12  ;;  %16454 = vmatprep.subr.mxu0 %v21519_v48  ;;  %16447 = vmatmul.mubr.msk.f32.vlgmr.msra.gmra.mrb[156].mxu0 %vm3973_vm7, %v9621_v22  ;;  %v12073_v12 = vld [vmem:[%s21349_s1 + $0x48] sm:$0xff] }
 0x838   : > { %v17191_v51 = vpop.eup %17190  ;;  %16442 = vmatmul.mubr.msk.f32.vlgmr.msra.gmra.mrb[124].mxu1 %vm3973_vm7, %v9620_v35  ;;  %16455 = vmatpush3.msra.mxu0 %v19759_v11 }
 0x839   : > { %v17193_v29 = vpop.eup %17192  ;;  %16450 = vmatpush3.msra.mxu1 %v19765_v0  ;;  %v9542_v47 = vpop.xlane.xlu1 %9541  ;;  %16451 = vmatprep.mubr.msk.f32.mxu1 %vm17427_vm6, %v21519_v48  ;;  %v9622_v7 = vmul.f32 %v17191_v51, %v19869_v43  ;;  %v21637_v43 = vld [vmem:[#allocation73_spill] sm:$0xff] }
 0x83a   : > { %v9545_v45 = vpop.xlane.xlu0 %9544  ;;  %17202 = vrcp.f32 %v9542_v47  ;;  %16456 = vmatprep.mubr.msk.f32.mxu0 %vm17427_vm6, %v21519_v48  ;;  %16459 = vmatprep.subr.mxu1 %v21519_v48  ;;  %v9623_v9 = vmul.f32 %v17193_v29, %v19866_v5 }
 0x83b   : > { %17204 = vrcp.f32 %v9545_v45  ;;  %16464 = vmatprep.subr.mxu0 %v21519_v48  ;;  %v6758_v45 = vld [vmem:[%s21349_s1 + $0x30] sm:$0xff] }
 0x83c   : > { %v17195_v11 = vpop.eup %17194  ;;  %16452 = vmatmul.mubr.msk.f32.vlgmr.msra.gmra.mrb[126].mxu1 %vm3973_vm7, %v9622_v7  ;;  %16457 = vmatmul.mubr.msk.f32.vlgmr.msra.gmra.mrb[158].mxu0 %vm3973_vm7, %v9623_v9 }
 0x83d   : > { %v17197_v0 = vpop.eup %17196  ;;  %16460 = vmatpush3.msra.mxu1 %v19769_v60  ;;  %16465 = vmatpush3.msra.mxu0 %v21637_v43  ;;  %v9548_v50 = vpop.xlane.xlu1 %9547  ;;  %v9624_v37 = vmul.f32 %v17195_v11, %v19879_v25 }
 0x83e   : > { %v9551_v26 = vpop.xlane.xlu0 %9550  ;;  %17206 = vrcp.f32 %v9548_v50  ;;  %16461 = vmatprep.mubr.msk.f32.mxu1 %vm17427_vm6, %v21519_v48  ;;  %16466 = vmatprep.mubr.msk.f32.mxu0 %vm17427_vm6, %v21519_v48  ;;  %v9625_v5 = vmul.f32 %v17197_v0, %v19876_v1 }
 0x83f   : > { %17208 = vrcp.f32 %v9551_v26  ;;  %16469 = vmatprep.subr.mxu1 %v21519_v48  ;;  %16474 = vmatprep.subr.mxu0 %v21519_v48 }
 0x840   : > { %v17199_v60 = vpop.eup %17198  ;;  %16462 = vmatmul.mubr.msk.f32.vlgmr.msra.gmra.mrb[128].mxu1 %vm3973_vm7, %v9624_v37  ;;  %16467 = vmatmul.mubr.msk.f32.vlgmr.msra.gmra.mrb[160].mxu0 %vm3973_vm7, %v9625_v5 }
 0x841   : > { %v17201_v25 = vpop.eup %17200  ;;  %16470 = vmatpush3.msra.mxu1 %v21638_v20  ;;  %16475 = vmatpush3.msra.mxu0 %v21639_v36  ;;  %v9554_v3 = vpop.xlane.xlu1 %9553  ;;  %v9626_v2 = vmul.f32 %v17199_v60, %v19889_v19 }
 0x842   : > { %v9557_v55 = vpop.xlane.xlu0 %9556  ;;  %17210 = vrcp.f32 %v9554_v3  ;;  %16471 = vmatprep.mubr.msk.f32.mxu1 %vm17427_vm6, %v21519_v48  ;;  %16476 = vmatprep.mubr.msk.f32.mxu0 %vm17427_vm6, %v21519_v48  ;;  %v9627_v1 = vmul.f32 %v17201_v25, %v19886_v4 }
 0x843   : > { %17212 = vrcp.f32 %v9557_v55  ;;  %16479 = vmatprep.subr.mxu1 %v21519_v48  ;;  %16484 = vmatprep.subr.mxu0 %v21519_v48 }
 0x844   : > { %v17203_v49 = vpop.eup %17202  ;;  %16472 = vmatmul.mubr.msk.f32.vlgmr.msra.gmra.mrb[130].mxu1 %vm3973_vm7, %v9626_v2  ;;  %16477 = vmatmul.mubr.msk.f32.vlgmr.msra.gmra.mrb[162].mxu0 %vm3973_vm7, %v9627_v1 }
 0x845   : > { %v17205_v19 = vpop.eup %17204  ;;  %16480 = vmatpush3.msra.mxu1 %v21640_v44  ;;  %16485 = vmatpush3.msra.mxu0 %v21641_v38  ;;  %v9560_v32 = vpop.xlane.xlu1 %9559  ;;  %v9628_v39 = vmul.f32 %v17203_v49, %v19899_v34 }
 0x846   : > { %v9563_v54 = vpop.xlane.xlu0 %9562  ;;  %17214 = vrcp.f32 %v9560_v32  ;;  %16481 = vmatprep.mubr.msk.f32.mxu1 %vm17427_vm6, %v21519_v48  ;;  %16486 = vmatprep.mubr.msk.f32.mxu0 %vm17427_vm6, %v21519_v48  ;;  %v9629_v4 = vmul.f32 %v17205_v19, %v19896_v62 }
 0x847   : > { %17216 = vrcp.f32 %v9563_v54  ;;  %16489 = vmatprep.subr.mxu1 %v21519_v48  ;;  %16494 = vmatprep.subr.mxu0 %v21519_v48 }
 0x848   : > { %v17207_v33 = vpop.eup %17206  ;;  %16482 = vmatmul.mubr.msk.f32.vlgmr.msra.gmra.mrb[132].mxu1 %vm3973_vm7, %v9628_v39  ;;  %16487 = vmatmul.mubr.msk.f32.vlgmr.msra.gmra.mrb[164].mxu0 %vm3973_vm7, %v9629_v4 }
 0x849   : > { %v17209_v34 = vpop.eup %17208  ;;  %16490 = vmatpush3.msra.mxu1 %v21642_v42  ;;  %16495 = vmatpush3.msra.mxu0 %v21643_v40  ;;  %v9566_v57 = vpop.xlane.xlu1 %9565  ;;  %v9630_v58 = vmul.f32 %v17207_v33, %v19909_v23 }
 0x84a   : > { %v9569_v61 = vpop.xlane.xlu0 %9568  ;;  %17218 = vrcp.f32 %v9566_v57  ;;  %16491 = vmatprep.mubr.msk.f32.mxu1 %vm17427_vm6, %v21519_v48  ;;  %16496 = vmatprep.mubr.msk.f32.mxu0 %vm17427_vm6, %v21519_v48  ;;  %v9631_v62 = vmul.f32 %v17209_v34, %v19906_v24 }
 0x84b   : > { %17220 = vrcp.f32 %v9569_v61  ;;  %16499 = vmatprep.subr.mxu1 %v21519_v48  ;;  %16504 = vmatprep.subr.mxu0 %v21519_v48 }
 0x84c   : > { %v17211_v21 = vpop.eup %17210  ;;  %16492 = vmatmul.mubr.msk.f32.vlgmr.msra.gmra.mrb[134].mxu1 %vm3973_vm7, %v9630_v58  ;;  %16497 = vmatmul.mubr.msk.f32.vlgmr.msra.gmra.mrb[166].mxu0 %vm3973_vm7, %v9631_v62 }
 0x84d   : > { %v17213_v23 = vpop.eup %17212  ;;  %16500 = vmatpush3.msra.mxu1 %v21644_v31  ;;  %16505 = vmatpush3.msra.mxu0 %v21645_v10  ;;  %v9572_v63 = vpop.xlane.xlu1 %9571  ;;  %v9632_v41 = vmul.f32 %v17211_v21, %v19919_v6 }
 0x84e   : > { %v9575_v14 = vpop.xlane.xlu0 %9574  ;;  %17222 = vrcp.f32 %v9572_v63  ;;  %16501 = vmatprep.mubr.msk.f32.mxu1 %vm17427_vm6, %v21519_v48  ;;  %16506 = vmatprep.mubr.msk.f32.mxu0 %vm17427_vm6, %v21519_v48  ;;  %v9633_v24 = vmul.f32 %v17213_v23, %v19916_v46 }
 0x84f   : > { %17224 = vrcp.f32 %v9575_v14  ;;  %16509 = vmatprep.subr.mxu1 %v21519_v48  ;;  %16514 = vmatprep.subr.mxu0 %v21519_v48 }
 0x850   : > { %v17215_v15 = vpop.eup %17214  ;;  %16502 = vmatmul.mubr.msk.f32.vlgmr.msra.gmra.mrb[136].mxu1 %vm3973_vm7, %v9632_v41  ;;  %16507 = vmatmul.mubr.msk.f32.vlgmr.msra.gmra.mrb[168].mxu0 %vm3973_vm7, %v9633_v24 }
 0x851   : > { %v17217_v6 = vpop.eup %17216  ;;  %16510 = vmatpush3.msra.mxu1 %v21646_v13  ;;  %16515 = vmatpush3.msra.mxu0 %v21647_v30  ;;  %v9634_v27 = vmul.f32 %v17215_v15, %v19927_v28  ;;  %v12072_v28 = vld [vmem:[%s21349_s1 + $0x40] sm:$0xff]  ;;  %v11997_v47 = vpop.permute.xlu1 %11996 }
 0x852   : > { %16511 = vmatprep.mubr.msk.f32.mxu1 %vm17427_vm6, %v21519_v48  ;;  %16516 = vmatprep.mubr.msk.f32.mxu0 %vm17427_vm6, %v21519_v48  ;;  %v9635_v46 = vmul.f32 %v17217_v6, %v19925_v56  ;;  %v16823_v51 = vpack.c.bf16 %v12073_v12, %v12072_v28 }
 0x853   : > { %16519 = vmatprep.subr.mxu1 %v21519_v48  ;;  %16524 = vmatprep.subr.mxu0 %v21519_v48 }
 0x854   : > { %v17219_v8 = vpop.eup %17218  ;;  %16512 = vmatmul.mubr.msk.f32.vlgmr.msra.gmra.mrb[138].mxu1 %vm3973_vm7, %v9634_v27  ;;  %16517 = vmatmul.mubr.msk.f32.vlgmr.msra.gmra.mrb[170].mxu0 %vm3973_vm7, %v9635_v46 }
 0x855   : > { %v17221_v22 = vpop.eup %17220  ;;  %16520 = vmatpush3.msra.mxu1 %v19953_v16  ;;  %16525 = vmatpush3.msra.mxu0 %v19955_v52  ;;  %v9636_v56 = vmul.f32 %v17219_v8, %v19935_v18  ;;  %v11921_v16 = vpop.permute.xlu0 %11920 }
 0x856   : > { %16521 = vmatprep.mubr.msk.f32.mxu1 %vm17427_vm6, %v21519_v48  ;;  %16526 = vmatprep.mubr.msk.f32.mxu0 %vm17427_vm6, %v21519_v48  ;;  %v9637_v35 = vmul.f32 %v17221_v22, %v19933_v17 }
 0x857   : > { %16529 = vmatprep.subr.mxu1 %v21519_v48  ;;  %16534 = vmatprep.subr.mxu0 %v21519_v48 }
 0x858   : > { %v17223_v29 = vpop.eup %17222  ;;  %16522 = vmatmul.mubr.msk.f32.vlgmr.msra.gmra.mrb[140].mxu1 %vm3973_vm7, %v9636_v56  ;;  %16527 = vmatmul.mubr.msk.f32.vlgmr.msra.gmra.mrb[172].mxu0 %vm3973_vm7, %v9637_v35 }
 0x859   : > { %v17225_v18 = vpop.eup %17224  ;;  %16530 = vmatpush3.msra.mxu1 %v11921_v16  ;;  %16535 = vmatpush3.msra.mxu0 %v11997_v47  ;;  %v9638_v52 = vmul.f32 %v17223_v29, %v19943_v53  ;;  %v6759_v53 = vld [vmem:[%s21349_s1 + $0x38] sm:$0xff] }
 0x85a   : > { %16531 = vmatprep.mubr.msk.f32.mxu1 %vm17427_vm6, %v21519_v48  ;;  %16536 = vmatprep.mubr.msk.f32.mxu0 %vm17427_vm6, %v21519_v48  ;;  %v9639_v17 = vmul.f32 %v17225_v18, %v19941_v59  ;;  %v16827_v7 = vpack.c.bf16 %v6759_v53, %v6758_v45 }
 0x85b   : > { %16824 = vmatprep.subr.bf16.mxu1 %v16823_v51 }
 0x85c   : > { %16532 = vmatmul.mubr.msk.f32.vlgmr.msra.gmra.mrb[142].mxu1 %vm3973_vm7, %v9638_v52  ;;  %16537 = vmatmul.mubr.msk.f32.vlgmr.msra.gmra.mrb[174].mxu0 %vm3973_vm7, %v9639_v17 }
 0x85d   : > { %16826 = vmatpush3.bf16.msra.mxu1 %v16823_v51 }
 0x85e   : > { %16828 = vmatprep.subr.bf16.mxu1 %v16827_v7 }
 0x8ec   : > { %v9712_v9 = vpop.f32.mrb[112].mxu1 }
 0x8ed   : > { %v16383_v48 = vpop.f32.mrb[113].mxu1  ;;  %16543 = vmatprep.mubr.msk.f32.mxu1 %vm212_vm0, %v9712_v9  ;;  %v21648_v9 = vld [vmem:[#allocation56_spill] sm:$0xff] }
 0x8ee   : > { %v21649_v48 = vld [vmem:[#allocation50_spill] sm:$0xff] }
 0x8f0   : > { %v9788_v59 = vpop.f32.mrb[144].mxu0 }
 0x8f1   : > { %v16388_v11 = vpop.f32.mrb[145].mxu0  ;;  %16544 = vmatmul.mubr.msk.f32.vlgmr.msra.gmra.mrb[144].mxu1 %vm212_vm0, %v9788_v59  ;;  %v21650_v59 = vld [vmem:[#allocation55_spill] sm:$0xff] }
 0x8f2   : > { %v9864_v0 = vpop.f32.mrb[114].mxu1  ;;  %16830 = vmatpush3.bf16.msra.mxu1 %v16827_v7  ;;  %v21651_v11 = vld [vmem:[#allocation48_spill] sm:$0xff] }
 0x8f3   : > { %v16393_v43 = vpop.f32.mrb[115].mxu1  ;;  %16546 = vmatprep.mubr.msk.f32.mxu1 %vm212_vm0, %v9864_v0  ;;  %v21652_v0 = vld [vmem:[#allocation58_spill] sm:$0xff] }
 0x8f4   : > { %v21653_v43 = vld [vmem:[#allocation57_spill] sm:$0xff] }
 0x8f6   : > { %v9940_v50 = vpop.f32.mrb[146].mxu0 }
 0x8f7   : > { %v16398_v26 = vpop.f32.mrb[147].mxu0  ;;  %16547 = vmatmul.mubr.msk.f32.gmra.mrb[146].mxu1 %vm212_vm0, %v9940_v50  ;;  %v21654_v50 = vld [vmem:[#allocation60_spill] sm:$0xff] }
 0x8f8   : > { %v21655_v26 = vld [vmem:[#allocation53_spill] sm:$0xff] }
 0x8fa   : > { %v10092_v37 = vpop.f32.mrb[148].mxu0 }
 0x8fb   : > { %v10016_v5 = vpop.f32.mrb[116].mxu1  ;;  %v16408_v60 = vpop.f32.mrb[149].mxu0 }
 0x8fc   : > { %v16403_v25 = vpop.f32.mrb[117].mxu1  ;;  %16549 = vmatprep.mubr.msk.f32.mxu1 %vm212_vm0, %v10016_v5  ;;  %v21657_v5 = vld [vmem:[#allocation59_spill] sm:$0xff]  ;;  %v21658_v60 = vld [vmem:[#allocation52_spill] sm:$0xff] }
 0x8fd   : > { %16550 = vmatmul.mubr.msk.f32.gmra.mrb[148].mxu1 %vm212_vm0, %v10092_v37  ;;  %v21656_v37 = vld [vmem:[#allocation49_spill] sm:$0xff]  ;;  %v21659_v25 = vld [vmem:[#allocation62_spill] sm:$0xff] }
 0x8fe   : > { %v10244_v20 = vpop.f32.mrb[150].mxu0 }
 0x8ff   : > { %v10168_v36 = vpop.f32.mrb[118].mxu1  ;;  %v16418_v3 = vpop.f32.mrb[151].mxu0 }
 0x900   : > { %v16413_v55 = vpop.f32.mrb[119].mxu1  ;;  %16552 = vmatprep.mubr.msk.f32.mxu1 %vm212_vm0, %v10168_v36  ;;  %v21661_v36 = vld [vmem:[#allocation51_spill] sm:$0xff]  ;;  %v21662_v3 = vld [vmem:[#allocation61_spill] sm:$0xff] }
 0x901   : > { %16553 = vmatmul.mubr.msk.f32.gmra.mrb[150].mxu1 %vm212_vm0, %v10244_v20  ;;  %v21660_v20 = vld [vmem:[#allocation64_spill] sm:$0xff]  ;;  %v21663_v55 = vld [vmem:[#allocation66_spill] sm:$0xff] }
 0x902   : > { %v10396_v2 = vpop.f32.mrb[152].mxu0 }
 0x903   : > { %v10320_v1 = vpop.f32.mrb[120].mxu1  ;;  %v16428_v49 = vpop.f32.mrb[153].mxu0 }
 0x904   : > { %v16423_v19 = vpop.f32.mrb[121].mxu1  ;;  %16555 = vmatprep.mubr.msk.f32.mxu1 %vm212_vm0, %v10320_v1  ;;  %v21665_v1 = vld [vmem:[#allocation34_spill] sm:$0xff] }
 0x905   : > { %16556 = vmatmul.mubr.msk.f32.gmra.mrb[152].mxu1 %vm212_vm0, %v10396_v2  ;;  %v21664_v2 = vld [vmem:[#allocation63_spill] sm:$0xff]  ;;  %v21666_v49 = vld [vmem:[#allocation54_spill] sm:$0xff]  ;;  %v21667_v19 = vld [vmem:[#allocation68_spill] sm:$0xff] }
 0x906   : > { %v10548_v44 = vpop.f32.mrb[154].mxu0 }
 0x907   : > { %v10472_v38 = vpop.f32.mrb[122].mxu1  ;;  %v16438_v32 = vpop.f32.mrb[155].mxu0 }
 0x908   : > { %v16433_v54 = vpop.f32.mrb[123].mxu1  ;;  %16558 = vmatprep.mubr.msk.f32.mxu1 %vm212_vm0, %v10472_v38  ;;  %v21669_v38 = vld [vmem:[#allocation37_spill] sm:$0xff]  ;;  %v21670_v32 = vld [vmem:[#allocation67_spill] sm:$0xff] }
 0x909   : > { %16559 = vmatmul.mubr.msk.f32.gmra.mrb[154].mxu1 %vm212_vm0, %v10548_v44  ;;  %v21668_v44 = vld [vmem:[#allocation65_spill] sm:$0xff] }
 0x90a   : > { %v10700_v39 = vpop.f32.mrb[156].mxu0  ;;  %v21671_v54 = vld [vmem:[#allocation69_spill] sm:$0xff] }
 0x90b   : > { %v10624_v4 = vpop.f32.mrb[124].mxu1  ;;  %v16448_v33 = vpop.f32.mrb[157].mxu0 }
 0x90c   : > { %v16443_v34 = vpop.f32.mrb[125].mxu1  ;;  %16561 = vmatprep.mubr.msk.f32.mxu1 %vm212_vm0, %v10624_v4  ;;  %v21673_v4 = vld [vmem:[#allocation39_spill] sm:$0xff]  ;;  %v21674_v33 = vld [vmem:[#allocation36_spill] sm:$0xff] }
 0x90d   : > { %16562 = vmatmul.mubr.msk.f32.gmra.mrb[156].mxu1 %vm212_vm0, %v10700_v39  ;;  %v21672_v39 = vld [vmem:[#allocation35_spill] sm:$0xff]  ;;  %v21675_v34 = vld [vmem:[#allocation70_spill] sm:$0xff] }
 0x90f   : > { %v10776_v42 = vpop.f32.mrb[126].mxu1  ;;  %v10852_v40 = vpop.f32.mrb[158].mxu0 }
 0x910   : > { %v16453_v57 = vpop.f32.mrb[127].mxu1  ;;  %v16458_v61 = vpop.f32.mrb[159].mxu0  ;;  %16564 = vmatprep.mubr.msk.f32.mxu1 %vm212_vm0, %v10776_v42  ;;  %v21676_v42 = vld [vmem:[#allocation71_spill] sm:$0xff] }
 0x911   : > { %16565 = vmatmul.mubr.msk.f32.gmra.mrb[158].mxu1 %vm212_vm0, %v10852_v40  ;;  %v21677_v40 = vld [vmem:[#allocation41_spill] sm:$0xff]  ;;  %v21678_v57 = vld [vmem:[#allocation38_spill] sm:$0xff]  ;;  %v21679_v61 = vld [vmem:[#allocation72_spill] sm:$0xff] }
 0x913   : > { %v10928_v58 = vpop.f32.mrb[128].mxu1  ;;  %v11004_v62 = vpop.f32.mrb[160].mxu0 }
 0x914   : > { %v16463_v21 = vpop.f32.mrb[129].mxu1  ;;  %v16468_v23 = vpop.f32.mrb[161].mxu0  ;;  %16567 = vmatprep.mubr.msk.f32.mxu1 %vm212_vm0, %v10928_v58  ;;  %v20248_v58 = vld [vmem:[%s21349_s1 + $0xb2] ss:$0 sm:$0xff] }
 0x915   : > { %16568 = vmatmul.mubr.msk.f32.gmra.mrb[160].mxu1 %vm212_vm0, %v11004_v62 }
 0x917   : > { %v11080_v31 = vpop.f32.mrb[130].mxu1  ;;  %v11156_v10 = vpop.f32.mrb[162].mxu0 }
 0x918   : > { %v16473_v63 = vpop.f32.mrb[131].mxu1  ;;  %v16478_v14 = vpop.f32.mrb[163].mxu0  ;;  %16570 = vmatprep.mubr.msk.f32.mxu1 %vm212_vm0, %v11080_v31 }
 0x919   : > { %16571 = vmatmul.mubr.msk.f32.gmra.mrb[162].mxu1 %vm212_vm0, %v11156_v10  ;;  %v21680_v10 = vld [vmem:[#allocation3_spill] sm:$0xff]  ;;  %v21681_v14 = vld [vmem:[#allocation2_spill] sm:$0xff] }
 0x91b   : > { %v11232_v41 = vpop.f32.mrb[132].mxu1  ;;  %v11308_v24 = vpop.f32.mrb[164].mxu0 }
 0x91c   : > { %v16483_v15 = vpop.f32.mrb[133].mxu1  ;;  %v16488_v6 = vpop.f32.mrb[165].mxu0  ;;  %16573 = vmatprep.mubr.msk.f32.mxu1 %vm212_vm0, %v11232_v41 }
 0x91d   : > { %16574 = vmatmul.mubr.msk.f32.gmra.mrb[164].mxu1 %vm212_vm0, %v11308_v24 }
 0x91f   : > { %v11384_v13 = vpop.f32.mrb[134].mxu1  ;;  %v11460_v30 = vpop.f32.mrb[166].mxu0 }
 0x920   : > { %v16493_v27 = vpop.f32.mrb[135].mxu1  ;;  %v16498_v46 = vpop.f32.mrb[167].mxu0  ;;  %16576 = vmatprep.mubr.msk.f32.mxu1 %vm212_vm0, %v11384_v13 }
 0x921   : > { %16577 = vmatmul.mubr.msk.f32.gmra.mrb[166].mxu1 %vm212_vm0, %v11460_v30  ;;  %v21682_v46 = vld [vmem:[#allocation5_spill] sm:$0xff] }
 0x923   : > { %v11536_v8 = vpop.f32.mrb[136].mxu1  ;;  %v11612_v28 = vpop.f32.mrb[168].mxu0 }
 0x924   : > { %v16503_v12 = vpop.f32.mrb[137].mxu1  ;;  %v16508_v22 = vpop.f32.mrb[169].mxu0  ;;  %16579 = vmatprep.mubr.msk.f32.mxu1 %vm212_vm0, %v11536_v8 }
 0x925   : > { %16580 = vmatmul.mubr.msk.f32.gmra.mrb[168].mxu1 %vm212_vm0, %v11612_v28 }
 0x927   : > { %v11688_v56 = vpop.f32.mrb[138].mxu1  ;;  %v11764_v35 = vpop.f32.mrb[170].mxu0 }
 0x928   : > { %v16513_v51 = vpop.f32.mrb[139].mxu1  ;;  %v16518_v29 = vpop.f32.mrb[171].mxu0  ;;  %16582 = vmatprep.mubr.msk.f32.mxu1 %vm212_vm0, %v11688_v56 }
 0x929   : > { %16583 = vmatmul.mubr.msk.f32.gmra.mrb[170].mxu1 %vm212_vm0, %v11764_v35  ;;  %v21683_v35 = vld [vmem:[#allocation4_spill] sm:$0xff] }
 0x92b   : > { %v11840_v47 = vpop.f32.mrb[140].mxu1  ;;  %v11916_v16 = vpop.f32.mrb[172].mxu0 }
 0x92c   : > { %v16523_v18 = vpop.f32.mrb[141].mxu1  ;;  %v16528_v52 = vpop.f32.mrb[173].mxu0  ;;  %16585 = vmatprep.mubr.msk.f32.mxu1 %vm212_vm0, %v11840_v47  ;;  %v21684_v47 = vld [vmem:[#allocation7_spill] sm:$0xff] }
 0x92d   : > { %16586 = vmatmul.mubr.msk.f32.gmra.mrb[172].mxu1 %vm212_vm0, %v11916_v16 }
 0x92f   : > { %v11992_v17 = vpop.f32.mrb[142].mxu1  ;;  %v12068_v45 = vpop.f32.mrb[174].mxu0 }
 0x930   : > { %v16533_v53 = vpop.f32.mrb[143].mxu1  ;;  %v16538_v7 = vpop.f32.mrb[175].mxu0  ;;  %16588 = vmatprep.mubr.msk.f32.mxu1 %vm212_vm0, %v11992_v17 }
 0x931   : > { %16589 = vmatmul.mubr.msk.f32.gmra.mrb[174].mxu1 %vm212_vm0, %v12068_v45  ;;  %v21685_v53 = vld [vmem:[#allocation6_spill] sm:$0xff] }
 0x932   : > { %16595 = vmatprep.mubr.msk.f32.mxu1 %vm212_vm0, %v21648_v9 }
 0x935   : > { %16596 = vmatmul.mubr.msk.f32.vlgmr.msra.gmra.mrb[144].mxu1 %vm212_vm0, %v21649_v48 }
 0x936   : > { %16598 = vmatprep.mubr.msk.f32.mxu1 %vm212_vm0, %v21650_v59  ;;  %v21686_v59 = vld [vmem:[#allocation8_spill] sm:$0xff] }
 0x939   : > { %16599 = vmatmul.mubr.msk.f32.gmra.mrb[146].mxu1 %vm212_vm0, %v21651_v11 }
 0x93a   : > { %16601 = vmatprep.mubr.msk.f32.mxu1 %vm212_vm0, %v21652_v0 }
 0x93d   : > { %16602 = vmatmul.mubr.msk.f32.gmra.mrb[148].mxu1 %vm212_vm0, %v21653_v43 }
 0x93e   : > { %16604 = vmatprep.mubr.msk.f32.mxu1 %vm212_vm0, %v21654_v50 }
 0x941   : > { %16605 = vmatmul.mubr.msk.f32.gmra.mrb[150].mxu1 %vm212_vm0, %v21655_v26 }
 0x942   : > { %16607 = vmatprep.mubr.msk.f32.mxu1 %vm212_vm0, %v21656_v37  ;;  %v21687_v37 = vld [vmem:[#allocation9_spill] sm:$0xff] }
 0x945   : > { %16608 = vmatmul.mubr.msk.f32.gmra.mrb[152].mxu1 %vm212_vm0, %v21657_v5 }
 0x946   : > { %16610 = vmatprep.mubr.msk.f32.mxu1 %vm212_vm0, %v21658_v60 }
 0x949   : > { %16611 = vmatmul.mubr.msk.f32.gmra.mrb[154].mxu1 %vm212_vm0, %v21659_v25 }
 0x94a   : > { %16613 = vmatprep.mubr.msk.f32.mxu1 %vm212_vm0, %v21660_v20  ;;  %v21688_v20 = vld [vmem:[#allocation11_spill] sm:$0xff] }
 0x94d   : > { %16614 = vmatmul.mubr.msk.f32.gmra.mrb[156].mxu1 %vm212_vm0, %v21661_v36 }
 0x94e   : > { %16616 = vmatprep.mubr.msk.f32.mxu1 %vm212_vm0, %v21662_v3 }
 0x951   : > { %16617 = vmatmul.mubr.msk.f32.gmra.mrb[158].mxu1 %vm212_vm0, %v21663_v55 }
 0x952   : > { %16619 = vmatprep.mubr.msk.f32.mxu1 %vm212_vm0, %v21664_v2 }
 0x955   : > { %16620 = vmatmul.mubr.msk.f32.gmra.mrb[160].mxu1 %vm212_vm0, %v21665_v1 }
 0x956   : > { %16622 = vmatprep.mubr.msk.f32.mxu1 %vm212_vm0, %v21666_v49  ;;  %v21689_v49 = vld [vmem:[#allocation10_spill] sm:$0xff] }
 0x959   : > { %16623 = vmatmul.mubr.msk.f32.gmra.mrb[162].mxu1 %vm212_vm0, %v21667_v19 }
 0x95a   : > { %16625 = vmatprep.mubr.msk.f32.mxu1 %vm212_vm0, %v21668_v44 }
 0x95d   : > { %16626 = vmatmul.mubr.msk.f32.gmra.mrb[164].mxu1 %vm212_vm0, %v21669_v38 }
 0x95e   : > { %16628 = vmatprep.mubr.msk.f32.mxu1 %vm212_vm0, %v21670_v32  ;;  %v21690_v32 = vld [vmem:[#allocation12_spill] sm:$0xff] }
 0x961   : > { %16629 = vmatmul.mubr.msk.f32.gmra.mrb[166].mxu1 %vm212_vm0, %v21671_v54 }
 0x962   : > { %16631 = vmatprep.mubr.msk.f32.mxu1 %vm212_vm0, %v21672_v39 }
 0x965   : > { %16632 = vmatmul.mubr.msk.f32.gmra.mrb[168].mxu1 %vm212_vm0, %v21673_v4 }
 0x966   : > { %16634 = vmatprep.mubr.msk.f32.mxu1 %vm212_vm0, %v21674_v33 }
 0x969   : > { %16635 = vmatmul.mubr.msk.f32.gmra.mrb[170].mxu1 %vm212_vm0, %v21675_v34 }
 0x96a   : > { %16637 = vmatprep.mubr.msk.f32.mxu1 %vm212_vm0, %v21676_v42  ;;  %v21691_v42 = vld [vmem:[#allocation13_spill] sm:$0xff] }
 0x96d   : > { %16638 = vmatmul.mubr.msk.f32.gmra.mrb[172].mxu1 %vm212_vm0, %v21677_v40 }
 0x96e   : > { %16640 = vmatprep.mubr.msk.f32.mxu1 %vm212_vm0, %v21678_v57 }
 0x971   : > { %16641 = vmatmul.mubr.msk.f32.gmra.mrb[174].mxu1 %vm212_vm0, %v21679_v61 }
 0xa08   : > { %v16597_v62 = vpop.f32.mrb[144].mxu1 }
 0xa09   : > { %v12721_v21 = vadd.f32 %v16597_v62, %v20248_v58  ;;  %v12557_v23 = vpop.f32.mrb[145].mxu1  ;;  %v21692_v62 = vld [vmem:[#allocation15_spill] sm:$0xff] }
 0xa0a   : > { %v12720_v31 = vadd.f32 %v20248_v58, %v12557_v23 }
 0xa0b   : > { %v20253_v63 = vadd.f32 %v12721_v21, %v21680_v10 }
 0xa0c   : > { %v20256_v41 = vadd.f32 %v12720_v31, %v21681_v14  ;;  %v16600_v24 = vpop.f32.mrb[146].mxu1 }
 0xa0d   : > { %v12723_v15 = vadd.f32 %v16600_v24, %v20248_v58  ;;  %v12567_v6 = vpop.f32.mrb[147].mxu1  ;;  %v12787_v13 = vsel %vm662_vm3, %v20253_v63, 0.0  ;;  %v21693_v24 = vld [vmem:[#allocation14_spill] sm:$0xff] }
 0xa0e   : > { %v12722_v30 = vadd.f32 %v20248_v58, %v12567_v6  ;;  %12788 = vadd.xlane.f32.xlu1 %v12787_v13  ;;  %v12784_v27 = vsel %vm662_vm3, %v20256_v41, 0.0 }
 0xa0f   : > { %v20265_v8 = vadd.f32 %v12723_v15, %v21682_v46  ;;  %12785 = vadd.xlane.f32.xlu0 %v12784_v27 }
 0xa10   : > { %v16603_v28 = vpop.f32.mrb[148].mxu1  ;;  %v20271_v51 = vadd.f32 %v12722_v30, %v21683_v35  ;;  %v21694_v30 = vld [vmem:[#allocation16_spill] sm:$0xff] }
 0xa11   : > { %v12725_v12 = vadd.f32 %v16603_v28, %v20248_v58  ;;  %v12577_v22 = vpop.f32.mrb[149].mxu1  ;;  %v12793_v56 = vsel %vm662_vm3, %v20265_v8, 0.0 }
 0xa12   : > { %v12724_v29 = vadd.f32 %v20248_v58, %v12577_v22  ;;  %v12790_v48 = vsel %vm662_vm3, %v20271_v51, 0.0 }
 0xa13   : > { %v20275_v16 = vadd.f32 %v12725_v12, %v21684_v47  ;;  %12794 = vadd.xlane.f32.xlu0 %v12793_v56  ;;  %v21695_v56 = vld [vmem:[#allocation17_spill] sm:$0xff] }
 0xa14   : > { %v16606_v18 = vpop.f32.mrb[150].mxu1  ;;  %v20281_v7 = vadd.f32 %v12724_v29, %v21685_v53 }
 0xa15   : > { %v12727_v52 = vadd.f32 %v16606_v18, %v20248_v58  ;;  %v12587_v17 = vpop.f32.mrb[151].mxu1  ;;  %v12799_v45 = vsel %vm662_vm3, %v20275_v16, 0.0  ;;  %v21696_v18 = vld [vmem:[#allocation19_spill] sm:$0xff] }
 0xa16   : > { %v12726_v9 = vadd.f32 %v20248_v58, %v12587_v17  ;;  %12800 = vadd.xlane.f32.xlu1 %v12799_v45  ;;  %v12796_v25 = vsel %vm662_vm3, %v20281_v7, 0.0 }
 0xa17   : > { %v20287_v11 = vadd.f32 %v12727_v52, %v21686_v59  ;;  %12791 = vadd.xlane.f32.xlu0 %v12790_v48  ;;  %v21697_v48 = vld [vmem:[#allocation18_spill] sm:$0xff] }
 0xa18   : > { %v16609_v0 = vpop.f32.mrb[152].mxu1  ;;  %v20293_v5 = vadd.f32 %v12726_v9, %v21687_v37 }
 0xa19   : > { %v12729_v43 = vadd.f32 %v16609_v0, %v20248_v58  ;;  %v12597_v50 = vpop.f32.mrb[153].mxu1  ;;  %v12805_v26 = vsel %vm662_vm3, %v20287_v11, 0.0 }
 0xa1a   : > { %v12728_v60 = vadd.f32 %v20248_v58, %v12597_v50  ;;  %12806 = vadd.xlane.f32.xlu1 %v12805_v26  ;;  %v12802_v38 = vsel %vm662_vm3, %v20293_v5, 0.0  ;;  %v21698_v50 = vld [vmem:[#allocation20_spill] sm:$0xff] }
 0xa1b   : > { %v20299_v36 = vadd.f32 %v12729_v43, %v21688_v20  ;;  %12797 = vadd.xlane.f32.xlu0 %v12796_v25 }
 0xa1c   : > { %v16612_v3 = vpop.f32.mrb[154].mxu1  ;;  %v20305_v19 = vadd.f32 %v12728_v60, %v21689_v49  ;;  %v21700_v49 = vld [vmem:[#allocation23_spill] sm:$0xff] }
 0xa1d   : > { %v12731_v55 = vadd.f32 %v16612_v3, %v20248_v58  ;;  %v12607_v2 = vpop.f32.mrb[155].mxu1  ;;  %v12811_v1 = vsel %vm662_vm3, %v20299_v36, 0.0  ;;  %v21699_v3 = vld [vmem:[#allocation21_spill] sm:$0xff] }
 0xa1e   : > { %v12730_v44 = vadd.f32 %v20248_v58, %v12607_v2  ;;  %12812 = vadd.xlane.f32.xlu1 %v12811_v1  ;;  %v12808_v61 = vsel %vm662_vm3, %v20305_v19, 0.0 }
 0xa1f   : > { %v20311_v54 = vadd.f32 %v12731_v55, %v21690_v32  ;;  %12803 = vadd.xlane.f32.xlu0 %v12802_v38 }
 0xa20   : > { %v16615_v39 = vpop.f32.mrb[156].mxu1  ;;  %v20317_v40 = vadd.f32 %v12730_v44, %v21691_v42 }
 0xa21   : > { %v12733_v4 = vadd.f32 %v16615_v39, %v20248_v58  ;;  %v12617_v33 = vpop.f32.mrb[157].mxu1  ;;  %v12817_v34 = vsel %vm662_vm3, %v20311_v54, 0.0 }
 0xa22   : > { %v12732_v57 = vadd.f32 %v20248_v58, %v12617_v33  ;;  %12818 = vadd.xlane.f32.xlu1 %v12817_v34  ;;  %v12814_v13 = vsel %vm662_vm3, %v20317_v40, 0.0  ;;  %v21701_v33 = vld [vmem:[#allocation22_spill] sm:$0xff] }
 0xa23   : > { %v20323_v21 = vadd.f32 %v12733_v4, %v21692_v62  ;;  %12809 = vadd.xlane.f32.xlu0 %v12808_v61  ;;  %v21702_v61 = vld [vmem:[#allocation24_spill] sm:$0xff] }
 0xa24   : > { %v16618_v23 = vpop.f32.mrb[158].mxu1  ;;  %v20329_v15 = vadd.f32 %v12732_v57, %v21693_v24  ;;  %v21703_v24 = vld [vmem:[#allocation25_spill] sm:$0xff] }
 0xa25   : > { %v12735_v31 = vadd.f32 %v16618_v23, %v20248_v58  ;;  %v12627_v10 = vpop.f32.mrb[159].mxu1  ;;  %v12823_v14 = vsel %vm662_vm3, %v20323_v21, 0.0 }
 0xa26   : > { %v12734_v6 = vadd.f32 %v20248_v58, %v12627_v10  ;;  %12824 = vadd.xlane.f32.xlu1 %v12823_v14  ;;  %v12820_v47 = vsel %vm662_vm3, %v20329_v15, 0.0 }
 0xa27   : > { %v20335_v27 = vadd.f32 %v12735_v31, %v21694_v30  ;;  %12815 = vadd.xlane.f32.xlu0 %v12814_v13 }
 0xa28   : > { %v16621_v46 = vpop.f32.mrb[160].mxu1  ;;  %v20341_v35 = vadd.f32 %v12734_v6, %v21695_v56 }
 0xa29   : > { %v12737_v28 = vadd.f32 %v16621_v46, %v20248_v58  ;;  %v12637_v12 = vpop.f32.mrb[161].mxu1  ;;  %v12829_v22 = vsel %vm662_vm3, %v20335_v27, 0.0  ;;  %v21704_v46 = vld [vmem:[#allocation27_spill] sm:$0xff] }
 0xa2a   : > { %v12736_v29 = vadd.f32 %v20248_v58, %v12637_v12  ;;  %12830 = vadd.xlane.f32.xlu1 %v12829_v22  ;;  %v12826_v43 = vsel %vm662_vm3, %v20341_v35, 0.0 }
 0xa2b   : > { %v20347_v52 = vadd.f32 %v12737_v28, %v21696_v18  ;;  %12821 = vadd.xlane.f32.xlu0 %v12820_v47  ;;  %v21705_v47 = vld [vmem:[#allocation26_spill] sm:$0xff] }
 0xa2c   : > { %v16624_v17 = vpop.f32.mrb[162].mxu1  ;;  %v20353_v59 = vadd.f32 %v12736_v29, %v21697_v48 }
 0xa2d   : > { %v12739_v45 = vadd.f32 %v16624_v17, %v20248_v58  ;;  %v12647_v53 = vpop.f32.mrb[163].mxu1  ;;  %v12835_v9 = vsel %vm662_vm3, %v20347_v52, 0.0 }
 0xa2e   : > { %v12738_v0 = vadd.f32 %v20248_v58, %v12647_v53  ;;  %12836 = vadd.xlane.f32.xlu1 %v12835_v9  ;;  %v12832_v1 = vsel %vm662_vm3, %v20353_v59, 0.0  ;;  %v21706_v53 = vld [vmem:[#allocation28_spill] sm:$0xff] }
 0xa2f   : > { %v20359_v26 = vadd.f32 %v12739_v45, %v21698_v50  ;;  %12827 = vadd.xlane.f32.xlu0 %v12826_v43 }
 0xa30   : > { %v16627_v37 = vpop.f32.mrb[164].mxu1  ;;  %v20365_v55 = vadd.f32 %v12738_v0, %v21699_v3  ;;  %v21708_v3 = vld [vmem:[#allocation31_spill] sm:$0xff] }
 0xa31   : > { %v12741_v60 = vadd.f32 %v16627_v37, %v20248_v58  ;;  %v12657_v25 = vpop.f32.mrb[165].mxu1  ;;  %v12841_v20 = vsel %vm662_vm3, %v20359_v26, 0.0  ;;  %v21707_v37 = vld [vmem:[#allocation29_spill] sm:$0xff] }
 0xa32   : > { %v12740_v2 = vadd.f32 %v20248_v58, %v12657_v25  ;;  %12842 = vadd.xlane.f32.xlu1 %v12841_v20  ;;  %v12838_v57 = vsel %vm662_vm3, %v20365_v55, 0.0 }
 0xa33   : > { %v20371_v44 = vadd.f32 %v12741_v60, %v21700_v49  ;;  %12833 = vadd.xlane.f32.xlu0 %v12832_v1 }
 0xa34   : > { %v16630_v38 = vpop.f32.mrb[166].mxu1  ;;  %v20377_v34 = vadd.f32 %v12740_v2, %v21701_v33 }
 0xa35   : > { %v12743_v32 = vadd.f32 %v16630_v38, %v20248_v58  ;;  %v12667_v39 = vpop.f32.mrb[167].mxu1  ;;  %v12847_v4 = vsel %vm662_vm3, %v20371_v44, 0.0 }
 0xa36   : > { %v12742_v42 = vadd.f32 %v20248_v58, %v12667_v39  ;;  %12848 = vadd.xlane.f32.xlu1 %v12847_v4  ;;  %v12844_v30 = vsel %vm662_vm3, %v20377_v34, 0.0  ;;  %v21709_v39 = vld [vmem:[#allocation30_spill] sm:$0xff] }
 0xa37   : > { %v20383_v62 = vadd.f32 %v12743_v32, %v21702_v61  ;;  %12839 = vadd.xlane.f32.xlu0 %v12838_v57  ;;  %v21710_v57 = vld [vmem:[#allocation32_spill] sm:$0xff] }
 0xa38   : > { %v16633_v23 = vpop.f32.mrb[168].mxu1  ;;  %v20389_v6 = vadd.f32 %v12742_v42, %v21703_v24 }
 0xa39   : > { %v12745_v31 = vadd.f32 %v16633_v23, %v20248_v58  ;;  %v12677_v10 = vpop.f32.mrb[169].mxu1  ;;  %v12853_v14 = vsel %vm662_vm3, %v20383_v62, 0.0 }
 0xa3a   : > { %v12744_v13 = vadd.f32 %v20248_v58, %v12677_v10  ;;  %12854 = vadd.xlane.f32.xlu1 %v12853_v14  ;;  %v12850_v45 = vsel %vm662_vm3, %v20389_v6, 0.0 }
 0xa3b   : > { %v20395_v28 = vadd.f32 %v12745_v31, %v21704_v46  ;;  %12845 = vadd.xlane.f32.xlu0 %v12844_v30  ;;  %v21711_v31 = vld [vmem:[#allocation33_spill] sm:$0xff] }
 0xa3c   : > { %v16636_v12 = vpop.f32.mrb[170].mxu1  ;;  %v20401_v18 = vadd.f32 %v12744_v13, %v21705_v47 }
 0xa3d   : > { %v12747_v22 = vadd.f32 %v16636_v12, %v20248_v58  ;;  %v12687_v56 = vpop.f32.mrb[171].mxu1  ;;  %v12859_v29 = vsel %vm662_vm3, %v20395_v28, 0.0 }
 0xa3e   : > { %v12746_v17 = vadd.f32 %v20248_v58, %v12687_v56  ;;  %12860 = vadd.xlane.f32.xlu1 %v12859_v29  ;;  %v12856_v20 = vsel %vm662_vm3, %v20401_v18, 0.0 }
 0xa3f   : > { %v20407_v9 = vadd.f32 %v12747_v22, %v21706_v53  ;;  %12851 = vadd.xlane.f32.xlu0 %v12850_v45 }
 0xa40   : > { %v16639_v48 = vpop.f32.mrb[172].mxu1  ;;  %v20413_v60 = vadd.f32 %v12746_v17, %v21707_v37 }
 0xa41   : > { %v12749_v0 = vadd.f32 %v16639_v48, %v20248_v58  ;;  %v12697_v43 = vpop.f32.mrb[173].mxu1  ;;  %v12865_v50 = vsel %vm662_vm3, %v20407_v9, 0.0 }
 0xa42   : > { %v12748_v25 = vadd.f32 %v20248_v58, %v12697_v43  ;;  %12866 = vadd.xlane.f32.xlu1 %v12865_v50  ;;  %v12862_v42 = vsel %vm662_vm3, %v20413_v60, 0.0 }
 0xa43   : > { %v20419_v2 = vadd.f32 %v12749_v0, %v21708_v3  ;;  %12857 = vadd.xlane.f32.xlu0 %v12856_v20 }
 0xa44   : > { %v16642_v1 = vpop.f32.mrb[174].mxu1  ;;  %v20425_v4 = vadd.f32 %v12748_v25, %v21709_v39 }
 0xa45   : > { %v12751_v49 = vadd.f32 %v16642_v1, %v20248_v58  ;;  %v12707_v38 = vpop.f32.mrb[175].mxu1  ;;  %v12871_v32 = vsel %vm662_vm3, %v20419_v2, 0.0 }
 0xa46   : > { %v12750_v33 = vadd.f32 %v20248_v58, %v12707_v38  ;;  %12872 = vadd.xlane.f32.xlu1 %v12871_v32  ;;  %v12868_v14 = vsel %vm662_vm3, %v20425_v4, 0.0 }
 0xa47   : > { %v20431_v61 = vadd.f32 %v12751_v49, %v21710_v57  ;;  %12863 = vadd.xlane.f32.xlu0 %v12862_v42 }
 0xa48   : > { %v20436_v10 = vadd.f32 %v12750_v33, %v21711_v31 }
 0xa49   : > { %v12877_v23 = vsel %vm662_vm3, %v20431_v61, 0.0 }
 0xa4a   : > { %12878 = vadd.xlane.f32.xlu1 %v12877_v23  ;;  %v12874_v58 = vsel %vm662_vm3, %v20436_v10, 0.0 }
 0xa4b   : > { %12869 = vadd.xlane.f32.xlu0 %v12868_v14 }
 0xa4f   : > { %12875 = vadd.xlane.f32.xlu0 %v12874_v58 }
 0xa9b   : > { %v12789_v24 = vpop.xlane.xlu1 %12788 }
 0xa9c   : > { %v12881_v13 = vmul.f32 0.03125, %v12789_v24  ;;  %v12786_v30 = vpop.xlane.xlu0 %12785 }
 0xa9d   : > { %v12880_v46 = vmul.f32 0.03125, %v12786_v30 }
 0xa9e   : > { %v20443_v12 = vsub.f32 %v20253_v63, %v12881_v13 }
 0xa9f   : > { %v20446_v22 = vsub.f32 %v20256_v41, %v12880_v46 }
 0xaa0   : > { %v12795_v56 = vpop.xlane.xlu0 %12794  ;;  %v12945_v29 = vmul.f32 %v20443_v12, %v20443_v12 }
 0xaa1   : > { %v12883_v47 = vmul.f32 0.03125, %v12795_v56  ;;  %v12944_v17 = vmul.f32 %v20446_v22, %v20446_v22 }
 0xaa2   : > { %v12979_v45 = vsel %vm662_vm3, %v12945_v29, 0.0 }
 0xaa3   : > { %v20454_v53 = vsub.f32 %v20265_v8, %v12883_v47  ;;  %v12801_v48 = vpop.xlane.xlu1 %12800  ;;  %12980 = vadd.xlane.f32.xlu1 %v12979_v45  ;;  %v12976_v63 = vsel %vm662_vm3, %v12944_v17, 0.0 }
 0xaa4   : > { %v12885_v0 = vmul.f32 0.03125, %v12801_v48  ;;  %v12792_v41 = vpop.xlane.xlu0 %12791  ;;  %12977 = vadd.xlane.f32.xlu0 %v12976_v63 }
 0xaa5   : > { %v12882_v43 = vmul.f32 0.03125, %v12792_v41  ;;  %v12947_v50 = vmul.f32 %v20454_v53, %v20454_v53 }
 0xaa6   : > { %v20460_v37 = vsub.f32 %v20275_v16, %v12885_v0 }
 0xaa7   : > { %v20463_v25 = vsub.f32 %v20271_v51, %v12882_v43  ;;  %v12807_v20 = vpop.xlane.xlu1 %12806  ;;  %v12985_v8 = vsel %vm662_vm3, %v12947_v50, 0.0 }
 0xaa8   : > { %v12887_v3 = vmul.f32 0.03125, %v12807_v20  ;;  %v12798_v1 = vpop.xlane.xlu0 %12797  ;;  %12986 = vadd.xlane.f32.xlu1 %v12985_v8  ;;  %v12949_v49 = vmul.f32 %v20460_v37, %v20460_v37 }
 0xaa9   : > { %v12884_v38 = vmul.f32 0.03125, %v12798_v1  ;;  %v12946_v32 = vmul.f32 %v20463_v25, %v20463_v25 }
 0xaaa   : > { %v20471_v39 = vsub.f32 %v20287_v11, %v12887_v3  ;;  %v12991_v16 = vsel %vm662_vm3, %v12949_v49, 0.0 }
 0xaab   : > { %v20475_v51 = vsub.f32 %v20281_v7, %v12884_v38  ;;  %v12813_v33 = vpop.xlane.xlu1 %12812  ;;  %v12982_v42 = vsel %vm662_vm3, %v12946_v32, 0.0 }
 0xaac   : > { %v12889_v57 = vmul.f32 0.03125, %v12813_v33  ;;  %v12804_v23 = vpop.xlane.xlu0 %12803  ;;  %12992 = vadd.xlane.f32.xlu1 %v12991_v16  ;;  %12983 = vadd.xlane.f32.xlu0 %v12982_v42  ;;  %v12951_v31 = vmul.f32 %v20471_v39, %v20471_v39 }
 0xaad   : > { %v12886_v14 = vmul.f32 0.03125, %v12804_v23  ;;  %v12948_v11 = vmul.f32 %v20475_v51, %v20475_v51 }
 0xaae   : > { %v20483_v58 = vsub.f32 %v20299_v36, %v12889_v57  ;;  %v12997_v7 = vsel %vm662_vm3, %v12951_v31, 0.0 }
 0xaaf   : > { %v20487_v24 = vsub.f32 %v20293_v5, %v12886_v14  ;;  %v12819_v13 = vpop.xlane.xlu1 %12818  ;;  %v12988_v30 = vsel %vm662_vm3, %v12948_v11, 0.0 }
 0xab0   : > { %v12891_v46 = vmul.f32 0.03125, %v12819_v13  ;;  %v12810_v56 = vpop.xlane.xlu0 %12809  ;;  %12998 = vadd.xlane.f32.xlu1 %v12997_v7  ;;  %12989 = vadd.xlane.f32.xlu0 %v12988_v30  ;;  %v12953_v29 = vmul.f32 %v20483_v58, %v20483_v58 }
 0xab1   : > { %v12888_v47 = vmul.f32 0.03125, %v12810_v56  ;;  %v12950_v36 = vmul.f32 %v20487_v24, %v20487_v24 }
 0xab2   : > { %v20495_v17 = vsub.f32 %v20311_v54, %v12891_v46  ;;  %v13003_v5 = vsel %vm662_vm3, %v12953_v29, 0.0 }
 0xab3   : > { %v20499_v45 = vsub.f32 %v20305_v19, %v12888_v47  ;;  %v12825_v48 = vpop.xlane.xlu1 %12824  ;;  %v12994_v63 = vsel %vm662_vm3, %v12950_v36, 0.0 }
 0xab4   : > { %v12893_v0 = vmul.f32 0.03125, %v12825_v48  ;;  %v12816_v41 = vpop.xlane.xlu0 %12815  ;;  %13004 = vadd.xlane.f32.xlu1 %v13003_v5  ;;  %12995 = vadd.xlane.f32.xlu0 %v12994_v63  ;;  %v12955_v43 = vmul.f32 %v20495_v17, %v20495_v17  ;;  %v153_v63 = vld [vmem:[%s21349_s1 + $0x50] sm:$0xff] }
 0xab5   : > { %v12890_v50 = vmul.f32 0.03125, %v12816_v41  ;;  %v12952_v54 = vmul.f32 %v20499_v45, %v20499_v45 }
 0xab6   : > { %v20507_v20 = vsub.f32 %v20323_v21, %v12893_v0  ;;  %v13009_v19 = vsel %vm662_vm3, %v12955_v43, 0.0  ;;  %v154_v0 = vld [vmem:[%s21349_s1 + $0x58] sm:$0xff] }
 0xab7   : > { %v20511_v8 = vsub.f32 %v20317_v40, %v12890_v50  ;;  %v12831_v3 = vpop.xlane.xlu1 %12830  ;;  %v13000_v1 = vsel %vm662_vm3, %v12952_v54, 0.0  ;;  %v16831_v54 = vpack.c.bf16 %v154_v0, %v153_v63 }
 0xab8   : > { %v12895_v49 = vmul.f32 0.03125, %v12831_v3  ;;  %v12822_v38 = vpop.xlane.xlu0 %12821  ;;  %13010 = vadd.xlane.f32.xlu1 %v13009_v19  ;;  %13001 = vadd.xlane.f32.xlu0 %v13000_v1  ;;  %v12957_v32 = vmul.f32 %v20507_v20, %v20507_v20 }
 0xab9   : > { %v12892_v16 = vmul.f32 0.03125, %v12822_v38  ;;  %v12954_v21 = vmul.f32 %v20511_v8, %v20511_v8  ;;  %16832 = vmatprep.subr.bf16.mxu0 %v16831_v54 }
 0xaba   : > { %v20519_v33 = vsub.f32 %v20335_v27, %v12895_v49  ;;  %v13015_v40 = vsel %vm662_vm3, %v12957_v32, 0.0  ;;  %16834 = vmatpush3.bf16.msra.mxu0 %v16831_v54  ;;  %v155_v32 = vld [vmem:[%s21349_s1 + $0x60] sm:$0xff] }
 0xabb   : > { %v20523_v42 = vsub.f32 %v20329_v15, %v12892_v16  ;;  %v12837_v57 = vpop.xlane.xlu1 %12836  ;;  %v13006_v23 = vsel %vm662_vm3, %v12954_v21, 0.0  ;;  %v156_v16 = vld [vmem:[%s21349_s1 + $0x68] sm:$0xff] }
 0xabc   : > { %v12897_v31 = vmul.f32 0.03125, %v12837_v57  ;;  %v12828_v14 = vpop.xlane.xlu0 %12827  ;;  %13016 = vadd.xlane.f32.xlu1 %v13015_v40  ;;  %13007 = vadd.xlane.f32.xlu0 %v13006_v23  ;;  %v12959_v11 = vmul.f32 %v20519_v33, %v20519_v33  ;;  %v16835_v23 = vpack.c.bf16 %v156_v16, %v155_v32 }
 0xabd   : > { %v12894_v7 = vmul.f32 0.03125, %v12828_v14  ;;  %v12956_v27 = vmul.f32 %v20523_v42, %v20523_v42 }
 0xabe   : > { %v20531_v13 = vsub.f32 %v20347_v52, %v12897_v31  ;;  %v13021_v15 = vsel %vm662_vm3, %v12959_v11, 0.0  ;;  %16836 = vmatprep.subr.bf16.mxu0 %v16835_v23 }
 0xabf   : > { %v20535_v30 = vsub.f32 %v20341_v35, %v12894_v7  ;;  %v12843_v46 = vpop.xlane.xlu1 %12842  ;;  %v13012_v56 = vsel %vm662_vm3, %v12956_v27, 0.0  ;;  %16838 = vmatpush3.bf16.msra.mxu0 %v16835_v23 }
 0xac0   : > { %v12899_v29 = vmul.f32 0.03125, %v12843_v46  ;;  %v12834_v47 = vpop.xlane.xlu0 %12833  ;;  %13022 = vadd.xlane.f32.xlu1 %v13021_v15  ;;  %13013 = vadd.xlane.f32.xlu0 %v13012_v56  ;;  %v12961_v36 = vmul.f32 %v20531_v13, %v20531_v13 }
 0xac1   : > { %v12896_v5 = vmul.f32 0.03125, %v12834_v47  ;;  %v12958_v52 = vmul.f32 %v20535_v30, %v20535_v30 }
 0xac2   : > { %v20543_v48 = vsub.f32 %v20359_v26, %v12899_v29  ;;  %v13027_v35 = vsel %vm662_vm3, %v12961_v36, 0.0 }
 0xac3   : > { %v20553_v41 = vsub.f32 %v20353_v59, %v12896_v5  ;;  %v12849_v43 = vpop.xlane.xlu1 %12848  ;;  %v13018_v50 = vsel %vm662_vm3, %v12958_v52, 0.0 }
 0xac4   : > { %v12901_v19 = vmul.f32 0.03125, %v12849_v43  ;;  %v12840_v26 = vpop.xlane.xlu0 %12839  ;;  %13028 = vadd.xlane.f32.xlu1 %v13027_v35  ;;  %13019 = vadd.xlane.f32.xlu0 %v13018_v50  ;;  %v12963_v3 = vmul.f32 %v20543_v48, %v20543_v48 }
 0xac5   : > { %v12898_v1 = vmul.f32 0.03125, %v12840_v26  ;;  %v12960_v49 = vmul.f32 %v20553_v41, %v20553_v41 }
 0xac6   : > { %v20561_v38 = vsub.f32 %v20371_v44, %v12901_v19  ;;  %v13033_v59 = vsel %vm662_vm3, %v12963_v3, 0.0 }
 0xac7   : > { %v20571_v21 = vsub.f32 %v20365_v55, %v12898_v1  ;;  %v12855_v40 = vpop.xlane.xlu1 %12854  ;;  %v13024_v57 = vsel %vm662_vm3, %v12960_v49, 0.0 }
 0xac8   : > { %v12903_v44 = vmul.f32 0.03125, %v12855_v40  ;;  %v12846_v31 = vpop.xlane.xlu0 %12845  ;;  %13034 = vadd.xlane.f32.xlu1 %v13033_v59  ;;  %13025 = vadd.xlane.f32.xlu0 %v13024_v57  ;;  %v12965_v14 = vmul.f32 %v20561_v38, %v20561_v38 }
 0xac9   : > { %v12900_v11 = vmul.f32 0.03125, %v12846_v31  ;;  %v12962_v7 = vmul.f32 %v20571_v21, %v20571_v21 }
 0xaca   : > { %v20579_v27 = vsub.f32 %v20383_v62, %v12903_v44  ;;  %v13039_v55 = vsel %vm662_vm3, %v12965_v14, 0.0 }
 0xacb   : > { %v20583_v15 = vsub.f32 %v20377_v34, %v12900_v11  ;;  %v12861_v46 = vpop.xlane.xlu1 %12860  ;;  %v13030_v56 = vsel %vm662_vm3, %v12962_v7, 0.0 }
 0xacc   : > { %v12905_v29 = vmul.f32 0.03125, %v12861_v46  ;;  %v12852_v47 = vpop.xlane.xlu0 %12851  ;;  %13040 = vadd.xlane.f32.xlu1 %v13039_v55  ;;  %13031 = vadd.xlane.f32.xlu0 %v13030_v56  ;;  %v12967_v36 = vmul.f32 %v20579_v27, %v20579_v27 }
 0xacd   : > { %v12902_v5 = vmul.f32 0.03125, %v12852_v47  ;;  %v12964_v62 = vmul.f32 %v20583_v15, %v20583_v15 }
 0xace   : > { %v20591_v52 = vsub.f32 %v20395_v28, %v12905_v29  ;;  %v13045_v34 = vsel %vm662_vm3, %v12967_v36, 0.0 }
 0xacf   : > { %v20595_v35 = vsub.f32 %v20389_v6, %v12902_v5  ;;  %v12867_v63 = vpop.xlane.xlu1 %12866  ;;  %v13036_v0 = vsel %vm662_vm3, %v12964_v62, 0.0 }
 0xad0   : > { %v12907_v43 = vmul.f32 0.03125, %v12867_v63  ;;  %v12858_v50 = vpop.xlane.xlu0 %12857  ;;  %13046 = vadd.xlane.f32.xlu1 %v13045_v34  ;;  %13037 = vadd.xlane.f32.xlu0 %v13036_v0  ;;  %v12969_v54 = vmul.f32 %v20591_v52, %v20591_v52 }
 0xad1   : > { %v12904_v19 = vmul.f32 0.03125, %v12858_v50  ;;  %v12966_v28 = vmul.f32 %v20595_v35, %v20595_v35  ;;  %v158_v50 = vld [vmem:[%s21349_s1 + $0x78] sm:$0xff] }
 0xad2   : > { %v20603_v26 = vsub.f32 %v20407_v9, %v12907_v43  ;;  %v13051_v6 = vsel %vm662_vm3, %v12969_v54, 0.0  ;;  %v157_v43 = vld [vmem:[%s21349_s1 + $0x70] sm:$0xff] }
 0xad3   : > { %v20607_v3 = vsub.f32 %v20401_v18, %v12904_v19  ;;  %v12873_v1 = vpop.xlane.xlu1 %12872  ;;  %v13042_v49 = vsel %vm662_vm3, %v12966_v28, 0.0 }
 0xad4   : > { %v12909_v59 = vmul.f32 0.03125, %v12873_v1  ;;  %v12864_v32 = vpop.xlane.xlu0 %12863  ;;  %13052 = vadd.xlane.f32.xlu1 %v13051_v6  ;;  %13043 = vadd.xlane.f32.xlu0 %v13042_v49  ;;  %v12971_v16 = vmul.f32 %v20603_v26, %v20603_v26 }
 0xad5   : > { %v12906_v40 = vmul.f32 0.03125, %v12864_v32  ;;  %v12968_v9 = vmul.f32 %v20607_v3, %v20607_v3 }
 0xad6   : > { %v20615_v57 = vsub.f32 %v20419_v2, %v12909_v59  ;;  %v13057_v18 = vsel %vm662_vm3, %v12971_v16, 0.0 }
 0xad7   : > { %v20619_v23 = vsub.f32 %v20413_v60, %v12906_v40  ;;  %v12879_v44 = vpop.xlane.xlu1 %12878  ;;  %v13048_v31 = vsel %vm662_vm3, %v12968_v9, 0.0 }
 0xad8   : > { %v12911_v14 = vmul.f32 0.03125, %v12879_v44  ;;  %v12870_v11 = vpop.xlane.xlu0 %12869  ;;  %13058 = vadd.xlane.f32.xlu1 %v13057_v18  ;;  %13049 = vadd.xlane.f32.xlu0 %v13048_v31  ;;  %v12973_v7 = vmul.f32 %v20615_v57, %v20615_v57 }
 0xad9   : > { %v12908_v55 = vmul.f32 0.03125, %v12870_v11  ;;  %v12970_v2 = vmul.f32 %v20619_v23, %v20619_v23 }
 0xada   : > { %v20627_v46 = vsub.f32 %v20431_v61, %v12911_v14  ;;  %v13063_v60 = vsel %vm662_vm3, %v12973_v7, 0.0 }
 0xadb   : > { %v20631_v56 = vsub.f32 %v20425_v4, %v12908_v55  ;;  %v13054_v29 = vsel %vm662_vm3, %v12970_v2, 0.0 }
 0xadc   : > { %13064 = vadd.xlane.f32.xlu1 %v13063_v60  ;;  %13055 = vadd.xlane.f32.xlu0 %v13054_v29  ;;  %v12876_v47 = vpop.xlane.xlu0 %12875  ;;  %v12975_v36 = vmul.f32 %v20627_v46, %v20627_v46  ;;  %v20655_v29 = vld [vmem:[%s21349_s1 + $0xb5] ss:$0 sm:$0xff] }
 0xadd   : > { %v12910_v5 = vmul.f32 0.03125, %v12876_v47  ;;  %v12972_v62 = vmul.f32 %v20631_v56, %v20631_v56 }
 0xade   : > { %v13069_v61 = vsel %vm662_vm3, %v12975_v36, 0.0 }
 0xadf   : > { %v20640_v34 = vsub.f32 %v20436_v10, %v12910_v5  ;;  %v13060_v4 = vsel %vm662_vm3, %v12972_v62, 0.0  ;;  %v16839_v10 = vpack.c.bf16 %v158_v50, %v157_v43  ;;  %v20662_v50 = vld [vmem:[%s21349_s1 + $0xb6] ss:$0 sm:$0xff] }
 0xae0   : > { %13070 = vadd.xlane.f32.xlu1 %v13069_v61  ;;  %13061 = vadd.xlane.f32.xlu0 %v13060_v4 }
 0xae1   : > { %v12974_v63 = vmul.f32 %v20640_v34, %v20640_v34  ;;  %16840 = vmatprep.subr.bf16.mxu0 %v16839_v10 }
 0xae3   : > { %v13066_v0 = vsel %vm662_vm3, %v12974_v63, 0.0 }
 0xae4   : > { %13067 = vadd.xlane.f32.xlu0 %v13066_v0 }
 0xb30   : > { %v12981_v54 = vpop.xlane.xlu1 %12980 }
 0xb31   : > { %v13073_v19 = vmul.f32 0.03125, %v12981_v54  ;;  %v12978_v28 = vpop.xlane.xlu0 %12977 }
 0xb32   : > { %v13072_v6 = vmul.f32 0.03125, %v12978_v28 }
 0xb33   : > { %v13105_v1 = vadd.f32 1e-05, %v13073_v19 }
 0xb34   : > { %v13104_v49 = vadd.f32 1e-05, %v13072_v6 }
 0xb35   : > { %17226 = vrsqrt.f32 %v13105_v1  ;;  %v12987_v59 = vpop.xlane.xlu1 %12986 }
 0xb36   : > { %17228 = vrsqrt.f32 %v13104_v49  ;;  %v13075_v32 = vmul.f32 0.03125, %v12987_v59 }
 0xb38   : > { %v13107_v16 = vadd.f32 1e-05, %v13075_v32 }
 0xb39   : > { %v12993_v40 = vpop.xlane.xlu1 %12992  ;;  %v12984_v9 = vpop.xlane.xlu0 %12983 }
 0xb3a   : > { %17230 = vrsqrt.f32 %v13107_v16  ;;  %v13077_v18 = vmul.f32 0.03125, %v12993_v40  ;;  %v13074_v44 = vmul.f32 0.03125, %v12984_v9 }
 0xb3c   : > { %v13109_v31 = vadd.f32 1e-05, %v13077_v18  ;;  %v13106_v14 = vadd.f32 1e-05, %v13074_v44 }
 0xb3d   : > { %v12999_v11 = vpop.xlane.xlu1 %12998  ;;  %v12990_v7 = vpop.xlane.xlu0 %12989 }
 0xb3e   : > { %17232 = vrsqrt.f32 %v13109_v31  ;;  %v13079_v55 = vmul.f32 0.03125, %v12999_v11  ;;  %v13076_v2 = vmul.f32 0.03125, %v12990_v7 }
 0xb3f   : > { %v17227_v60 = vpop.eup %17226  ;;  %17234 = vrsqrt.f32 %v13106_v14 }
 0xb40   : > { %v17229_v47 = vpop.eup %17228  ;;  %v13169_v36 = vmul.f32 %v17227_v60, %v20443_v12  ;;  %v13111_v5 = vadd.f32 1e-05, %v13079_v55  ;;  %v13108_v62 = vadd.f32 1e-05, %v13076_v2 }
 0xb41   : > { %v13005_v61 = vpop.xlane.xlu1 %13004  ;;  %v12996_v4 = vpop.xlane.xlu0 %12995  ;;  %v13168_v63 = vmul.f32 %v17229_v47, %v20446_v22 }
 0xb42   : > { %17236 = vrsqrt.f32 %v13111_v5  ;;  %v13081_v0 = vmul.f32 0.03125, %v13005_v61  ;;  %v13078_v43 = vmul.f32 0.03125, %v12996_v4  ;;  %v13205_v54 = vmul.f32 %v20655_v29, %v13169_v36 }
 0xb43   : > { %17238 = vrsqrt.f32 %v13108_v62  ;;  %v13204_v19 = vmul.f32 %v20655_v29, %v13168_v63 }
 0xb44   : > { %v17231_v12 = vpop.eup %17230  ;;  %v13113_v28 = vadd.f32 1e-05, %v13081_v0  ;;  %v13110_v6 = vadd.f32 1e-05, %v13078_v43  ;;  %v13241_v16 = vadd.f32 %v20662_v50, %v13205_v54 }
 0xb45   : > { %v13011_v1 = vpop.xlane.xlu1 %13010  ;;  %v13002_v49 = vpop.xlane.xlu0 %13001  ;;  %v13240_v22 = vadd.f32 %v20662_v50, %v13204_v19  ;;  %v13171_v40 = vmul.f32 %v17231_v12, %v20454_v53 }
 0xb46   : > { %17240 = vrsqrt.f32 %v13113_v28  ;;  %v13083_v59 = vmul.f32 0.03125, %v13011_v1  ;;  %v13080_v32 = vmul.f32 0.03125, %v13002_v49 }
 0xb47   : > { %17242 = vrsqrt.f32 %v13110_v6  ;;  %16651 = vmatprep.mubr.msk.f32.mxu0 %vm662_vm3, %v13240_v22  ;;  %v13207_v60 = vmul.f32 %v20655_v29, %v13171_v40 }
 0xb48   : > { %v17233_v9 = vpop.eup %17232  ;;  %v13115_v18 = vadd.f32 1e-05, %v13083_v59  ;;  %v13112_v44 = vadd.f32 1e-05, %v13080_v32  ;;  %16652 = vmatmul.mubr.msk.f32.vlgmr.msra.gmra.mrb[176].mxu0 %vm662_vm3, %v13241_v16 }
 0xb49   : > { %v17235_v31 = vpop.eup %17234  ;;  %v13017_v14 = vpop.xlane.xlu1 %13016  ;;  %16842 = vmatpush3.bf16.msra.mxu0 %v16839_v10  ;;  %v13173_v47 = vmul.f32 %v17233_v9, %v20460_v37 }
 0xb4a   : > { %v13008_v11 = vpop.xlane.xlu0 %13007  ;;  %17244 = vrsqrt.f32 %v13115_v18  ;;  %v13085_v7 = vmul.f32 0.03125, %v13017_v14  ;;  %v13170_v2 = vmul.f32 %v17235_v31, %v20463_v25  ;;  %v13243_v25 = vadd.f32 %v20662_v50, %v13207_v60 }
 0xb4b   : > { %v13082_v55 = vmul.f32 0.03125, %v13008_v11  ;;  %17246 = vrsqrt.f32 %v13112_v44  ;;  %v13209_v37 = vmul.f32 %v20655_v29, %v13173_v47 }
 0xb4c   : > { %v17237_v53 = vpop.eup %17236  ;;  %v13117_v36 = vadd.f32 1e-05, %v13085_v7  ;;  %v13206_v62 = vmul.f32 %v20655_v29, %v13170_v2 }
 0xb4d   : > { %v13114_v5 = vadd.f32 1e-05, %v13082_v55  ;;  %v17239_v61 = vpop.eup %17238  ;;  %v13023_v4 = vpop.xlane.xlu1 %13022  ;;  %v13175_v6 = vmul.f32 %v17237_v53, %v20471_v39  ;;  %v13245_v9 = vadd.f32 %v20662_v50, %v13209_v37 }
 0xb4e   : > { %v13014_v63 = vpop.xlane.xlu0 %13013  ;;  %17248 = vrsqrt.f32 %v13117_v36  ;;  %v13087_v10 = vmul.f32 0.03125, %v13023_v4  ;;  %v13242_v43 = vadd.f32 %v20662_v50, %v13206_v62  ;;  %v13172_v54 = vmul.f32 %v17239_v61, %v20475_v51 }
 0xb4f   : > { %v13084_v0 = vmul.f32 0.03125, %v13014_v63  ;;  %17250 = vrsqrt.f32 %v13114_v5  ;;  %v13211_v11 = vmul.f32 %v20655_v29, %v13175_v6 }
 0xb50   : > { %v17241_v19 = vpop.eup %17240  ;;  %v13119_v12 = vadd.f32 1e-05, %v13087_v10  ;;  %16654 = vmatprep.mubr.msk.f32.mxu0 %vm662_vm3, %v13242_v43  ;;  %v13208_v59 = vmul.f32 %v20655_v29, %v13172_v54 }
 0xb51   : > { %v13116_v28 = vadd.f32 1e-05, %v13084_v0  ;;  %v17243_v1 = vpop.eup %17242  ;;  %16655 = vmatmul.mubr.msk.f32.gmra.mrb[178].mxu0 %vm662_vm3, %v13243_v25  ;;  %v13029_v49 = vpop.xlane.xlu1 %13028  ;;  %v13177_v18 = vmul.f32 %v17241_v19, %v20483_v58  ;;  %v13247_v61 = vadd.f32 %v20662_v50, %v13211_v11 }
 0xb52   : > { %v13020_v22 = vpop.xlane.xlu0 %13019  ;;  %17252 = vrsqrt.f32 %v13119_v12  ;;  %v13089_v32 = vmul.f32 0.03125, %v13029_v49  ;;  %v13174_v51 = vmul.f32 %v17243_v1, %v20487_v24  ;;  %v13244_v40 = vadd.f32 %v20662_v50, %v13208_v59 }
 0xb53   : > { %v13086_v16 = vmul.f32 0.03125, %v13020_v22  ;;  %17254 = vrsqrt.f32 %v13116_v28  ;;  %v13213_v53 = vmul.f32 %v20655_v29, %v13177_v18 }
 0xb54   : > { %v17245_v39 = vpop.eup %17244  ;;  %v13121_v44 = vadd.f32 1e-05, %v13089_v32  ;;  %v13210_v14 = vmul.f32 %v20655_v29, %v13174_v51  ;;  %16657 = vmatprep.mubr.msk.f32.mxu0 %vm662_vm3, %v13244_v40 }
 0xb55   : > { %v13118_v31 = vadd.f32 1e-05, %v13086_v16  ;;  %v17247_v7 = vpop.eup %17246  ;;  %v13035_v55 = vpop.xlane.xlu1 %13034  ;;  %16658 = vmatmul.mubr.msk.f32.gmra.mrb[180].mxu0 %vm662_vm3, %v13245_v9  ;;  %v13179_v4 = vmul.f32 %v17245_v39, %v20495_v17  ;;  %v13249_v19 = vadd.f32 %v20662_v50, %v13213_v53 }
 0xb56   : > { %v13026_v2 = vpop.xlane.xlu0 %13025  ;;  %17256 = vrsqrt.f32 %v13121_v44  ;;  %v13091_v24 = vmul.f32 0.03125, %v13035_v55  ;;  %v13246_v47 = vadd.f32 %v20662_v50, %v13210_v14  ;;  %v13176_v58 = vmul.f32 %v17247_v7, %v20499_v45 }
 0xb57   : > { %v13088_v60 = vmul.f32 0.03125, %v13026_v2  ;;  %17258 = vrsqrt.f32 %v13118_v31  ;;  %v13215_v49 = vmul.f32 %v20655_v29, %v13179_v4 }
 0xb58   : > { %v17249_v36 = vpop.eup %17248  ;;  %v13123_v5 = vadd.f32 1e-05, %v13091_v24  ;;  %16660 = vmatprep.mubr.msk.f32.mxu0 %vm662_vm3, %v13246_v47  ;;  %v13212_v43 = vmul.f32 %v20655_v29, %v13176_v58 }
 0xb59   : > { %v13120_v62 = vadd.f32 1e-05, %v13088_v60  ;;  %v17251_v63 = vpop.eup %17250  ;;  %v13041_v10 = vpop.xlane.xlu1 %13040  ;;  %16661 = vmatmul.mubr.msk.f32.gmra.mrb[182].mxu0 %vm662_vm3, %v13247_v61  ;;  %v13181_v12 = vmul.f32 %v17249_v36, %v20507_v20  ;;  %v13251_v44 = vadd.f32 %v20662_v50, %v13215_v49 }
 0xb5a   : > { %v13032_v0 = vpop.xlane.xlu0 %13031  ;;  %17260 = vrsqrt.f32 %v13123_v5  ;;  %v13093_v45 = vmul.f32 0.03125, %v13041_v10  ;;  %v13178_v54 = vmul.f32 %v17251_v63, %v20511_v8  ;;  %v13248_v37 = vadd.f32 %v20662_v50, %v13212_v43 }
 0xb5b   : > { %v13090_v25 = vmul.f32 0.03125, %v13032_v0  ;;  %17262 = vrsqrt.f32 %v13120_v62  ;;  %v13217_v40 = vmul.f32 %v20655_v29, %v13181_v12 }
 0xb5c   : > { %v17253_v17 = vpop.eup %17252  ;;  %v13125_v28 = vadd.f32 1e-05, %v13093_v45  ;;  %v13214_v1 = vmul.f32 %v20655_v29, %v13178_v54  ;;  %16663 = vmatprep.mubr.msk.f32.mxu0 %vm662_vm3, %v13248_v37 }
 0xb5d   : > { %v13122_v6 = vadd.f32 1e-05, %v13090_v25  ;;  %v17255_v22 = vpop.eup %17254  ;;  %v13047_v59 = vpop.xlane.xlu1 %13046  ;;  %16664 = vmatmul.mubr.msk.f32.gmra.mrb[184].mxu0 %vm662_vm3, %v13249_v19  ;;  %v13183_v31 = vmul.f32 %v17253_v17, %v20519_v33  ;;  %v13253_v47 = vadd.f32 %v20662_v50, %v13217_v40 }
 0xb5e   : > { %v13038_v32 = vpop.xlane.xlu0 %13037  ;;  %17264 = vrsqrt.f32 %v13125_v28  ;;  %v13095_v8 = vmul.f32 0.03125, %v13047_v59  ;;  %v13250_v51 = vadd.f32 %v20662_v50, %v13214_v1  ;;  %v13180_v20 = vmul.f32 %v17255_v22, %v20523_v42 }
 0xb5f   : > { %v13092_v16 = vmul.f32 0.03125, %v13038_v32  ;;  %17266 = vrsqrt.f32 %v13122_v6  ;;  %v13219_v62 = vmul.f32 %v20655_v29, %v13183_v31 }
 0xb60   : > { %v17257_v9 = vpop.eup %17256  ;;  %v13127_v18 = vadd.f32 1e-05, %v13095_v8  ;;  %16666 = vmatprep.mubr.msk.f32.mxu0 %vm662_vm3, %v13250_v51  ;;  %v13216_v55 = vmul.f32 %v20655_v29, %v13180_v20 }
 0xb61   : > { %v13124_v39 = vadd.f32 1e-05, %v13092_v16  ;;  %v17259_v14 = vpop.eup %17258  ;;  %v13053_v11 = vpop.xlane.xlu1 %13052  ;;  %16667 = vmatmul.mubr.msk.f32.gmra.mrb[186].mxu0 %vm662_vm3, %v13251_v44  ;;  %v13185_v58 = vmul.f32 %v17257_v9, %v20531_v13  ;;  %v13255_v37 = vadd.f32 %v20662_v50, %v13219_v62 }
 0xb62   : > { %v13044_v7 = vpop.xlane.xlu0 %13043  ;;  %17268 = vrsqrt.f32 %v13127_v18  ;;  %v13097_v42 = vmul.f32 0.03125, %v13053_v11  ;;  %v13182_v24 = vmul.f32 %v17259_v14, %v20535_v30  ;;  %v13252_v60 = vadd.f32 %v20662_v50, %v13216_v55 }
 0xb63   : > { %v13094_v2 = vmul.f32 0.03125, %v13044_v7  ;;  %17270 = vrsqrt.f32 %v13124_v39  ;;  %v13221_v43 = vmul.f32 %v20655_v29, %v13185_v58 }
 0xb64   : > { %v17261_v33 = vpop.eup %17260  ;;  %v13129_v53 = vadd.f32 1e-05, %v13097_v42  ;;  %v13218_v5 = vmul.f32 %v20655_v29, %v13182_v24  ;;  %16669 = vmatprep.mubr.msk.f32.mxu0 %vm662_vm3, %v13252_v60 }
 0xb65   : > { %v13126_v36 = vadd.f32 1e-05, %v13094_v2  ;;  %v17263_v61 = vpop.eup %17262  ;;  %v13059_v4 = vpop.xlane.xlu1 %13058  ;;  %16670 = vmatmul.mubr.msk.f32.gmra.mrb[188].mxu0 %vm662_vm3, %v13253_v47  ;;  %v13187_v19 = vmul.f32 %v17261_v33, %v20543_v48  ;;  %v13257_v59 = vadd.f32 %v20662_v50, %v13221_v43 }
 0xb66   : > { %v13050_v63 = vpop.xlane.xlu0 %13049  ;;  %17272 = vrsqrt.f32 %v13129_v53  ;;  %v13099_v30 = vmul.f32 0.03125, %v13059_v4  ;;  %v13254_v0 = vadd.f32 %v20662_v50, %v13218_v5  ;;  %v13184_v13 = vmul.f32 %v17263_v61, %v20553_v41 }
 0xb67   : > { %v13096_v10 = vmul.f32 0.03125, %v13050_v63  ;;  %17274 = vrsqrt.f32 %v13126_v36  ;;  %v13223_v20 = vmul.f32 %v20655_v29, %v13187_v19 }
 0xb68   : > { %v17265_v45 = vpop.eup %17264  ;;  %v13131_v25 = vadd.f32 1e-05, %v13099_v30  ;;  %16672 = vmatprep.mubr.msk.f32.mxu0 %vm662_vm3, %v13254_v0  ;;  %v13220_v6 = vmul.f32 %v20655_v29, %v13184_v13 }
 0xb69   : > { %v13128_v54 = vadd.f32 1e-05, %v13096_v10  ;;  %v17267_v12 = vpop.eup %17266  ;;  %v13065_v17 = vpop.xlane.xlu1 %13064  ;;  %16673 = vmatmul.mubr.msk.f32.gmra.mrb[190].mxu0 %vm662_vm3, %v13255_v37  ;;  %v13189_v32 = vmul.f32 %v17265_v45, %v20561_v38  ;;  %v13259_v55 = vadd.f32 %v20662_v50, %v13223_v20 }
 0xb6a   : > { %v13056_v28 = vpop.xlane.xlu0 %13055  ;;  %17276 = vrsqrt.f32 %v13131_v25  ;;  %v13101_v41 = vmul.f32 0.03125, %v13065_v17  ;;  %v13186_v49 = vmul.f32 %v17267_v12, %v20571_v21  ;;  %v13256_v22 = vadd.f32 %v20662_v50, %v13220_v6 }
 0xb6b   : > { %v13098_v1 = vmul.f32 0.03125, %v13056_v28  ;;  %17278 = vrsqrt.f32 %v13128_v54  ;;  %v13225_v31 = vmul.f32 %v20655_v29, %v13189_v32 }
 0xb6c   : > { %v17269_v48 = vpop.eup %17268  ;;  %v13133_v8 = vadd.f32 1e-05, %v13101_v41  ;;  %v13222_v51 = vmul.f32 %v20655_v29, %v13186_v49  ;;  %16675 = vmatprep.mubr.msk.f32.mxu0 %vm662_vm3, %v13256_v22 }
 0xb6d   : > { %v13130_v16 = vadd.f32 1e-05, %v13098_v1  ;;  %v17271_v40 = vpop.eup %17270  ;;  %v13071_v9 = vpop.xlane.xlu1 %13070  ;;  %16676 = vmatmul.mubr.msk.f32.gmra.mrb[192].mxu0 %vm662_vm3, %v13257_v59  ;;  %v13191_v42 = vmul.f32 %v17269_v48, %v20579_v27  ;;  %v13261_v33 = vadd.f32 %v20662_v50, %v13225_v31  ;;  %v160_v48 = vld [vmem:[%s21349_s1 + $0x88] sm:$0xff] }
 0xb6e   : > { %v13062_v18 = vpop.xlane.xlu0 %13061  ;;  %17280 = vrsqrt.f32 %v13133_v8  ;;  %v13103_v21 = vmul.f32 0.03125, %v13071_v9  ;;  %v13258_v44 = vadd.f32 %v20662_v50, %v13222_v51  ;;  %v13188_v38 = vmul.f32 %v17271_v40, %v20583_v15  ;;  %v20805_v51 = vld [vmem:[%s21349_s1 + $0xb7] ss:$0 sm:$0xff] }
 0xb6f   : > { %v13100_v39 = vmul.f32 0.03125, %v13062_v18  ;;  %17282 = vrsqrt.f32 %v13130_v16  ;;  %v13227_v27 = vmul.f32 %v20655_v29, %v13191_v42 }
 0xb70   : > { %v17273_v14 = vpop.eup %17272  ;;  %v13135_v11 = vadd.f32 1e-05, %v13103_v21  ;;  %16678 = vmatprep.mubr.msk.f32.mxu0 %vm662_vm3, %v13258_v44  ;;  %v13224_v60 = vmul.f32 %v20655_v29, %v13188_v38 }
 0xb71   : > { %v13132_v7 = vadd.f32 1e-05, %v13100_v39  ;;  %v17275_v2 = vpop.eup %17274  ;;  %16679 = vmatmul.mubr.msk.f32.gmra.mrb[194].mxu0 %vm662_vm3, %v13259_v55  ;;  %v13193_v62 = vmul.f32 %v17273_v14, %v20591_v52  ;;  %v13263_v30 = vadd.f32 %v20662_v50, %v13227_v27 }
 0xb72   : > { %v13068_v24 = vpop.xlane.xlu0 %13067  ;;  %17284 = vrsqrt.f32 %v13135_v11  ;;  %v13190_v15 = vmul.f32 %v17275_v2, %v20595_v35  ;;  %v13260_v58 = vadd.f32 %v20662_v50, %v13224_v60 }
 0xb73   : > { %v13102_v47 = vmul.f32 0.03125, %v13068_v24  ;;  %17286 = vrsqrt.f32 %v13132_v7  ;;  %v13229_v0 = vmul.f32 %v20655_v29, %v13193_v62 }
 0xb74   : > { %v17277_v53 = vpop.eup %17276  ;;  %v13226_v5 = vmul.f32 %v20655_v29, %v13190_v15  ;;  %16681 = vmatprep.mubr.msk.f32.mxu0 %vm662_vm3, %v13260_v58 }
 0xb75   : > { %v13134_v36 = vadd.f32 1e-05, %v13102_v47  ;;  %v17279_v61 = vpop.eup %17278  ;;  %16682 = vmatmul.mubr.msk.f32.gmra.mrb[196].mxu0 %vm662_vm3, %v13261_v33  ;;  %v13195_v52 = vmul.f32 %v17277_v53, %v20603_v26 }
 0xb76   : > { %v13262_v35 = vadd.f32 %v20662_v50, %v13226_v5  ;;  %v13192_v4 = vmul.f32 %v17279_v61, %v20607_v3  ;;  %v13265_v3 = vadd.f32 %v20662_v50, %v13229_v0 }
 0xb77   : > { %17288 = vrsqrt.f32 %v13134_v36  ;;  %v13231_v37 = vmul.f32 %v20655_v29, %v13195_v52 }
 0xb78   : > { %v17281_v63 = vpop.eup %17280  ;;  %16684 = vmatprep.mubr.msk.f32.mxu0 %vm662_vm3, %v13262_v35  ;;  %v13228_v10 = vmul.f32 %v20655_v29, %v13192_v4 }
 0xb79   : > { %v17283_v13 = vpop.eup %17282  ;;  %16685 = vmatmul.mubr.msk.f32.gmra.mrb[198].mxu0 %vm662_vm3, %v13263_v30  ;;  %v13197_v19 = vmul.f32 %v17281_v63, %v20615_v57 }
 0xb7a   : > { %v13264_v43 = vadd.f32 %v20662_v50, %v13228_v10  ;;  %v13194_v45 = vmul.f32 %v17283_v13, %v20619_v23  ;;  %v13267_v23 = vadd.f32 %v20662_v50, %v13231_v37 }
 0xb7b   : > { %v13233_v41 = vmul.f32 %v20655_v29, %v13197_v19 }
 0xb7c   : > { %v17285_v25 = vpop.eup %17284  ;;  %16687 = vmatprep.mubr.msk.f32.mxu0 %vm662_vm3, %v13264_v43  ;;  %v13230_v54 = vmul.f32 %v20655_v29, %v13194_v45 }
 0xb7d   : > { %v17287_v12 = vpop.eup %17286  ;;  %16688 = vmatmul.mubr.msk.f32.gmra.mrb[200].mxu0 %vm662_vm3, %v13265_v3  ;;  %v13199_v1 = vmul.f32 %v17285_v25, %v20627_v46 }
 0xb7e   : > { %v13266_v26 = vadd.f32 %v20662_v50, %v13230_v54  ;;  %v13196_v17 = vmul.f32 %v17287_v12, %v20631_v56  ;;  %v13269_v56 = vadd.f32 %v20662_v50, %v13233_v41 }
 0xb7f   : > { %v13235_v59 = vmul.f32 %v20655_v29, %v13199_v1 }
 0xb80   : > { %16690 = vmatprep.mubr.msk.f32.mxu0 %vm662_vm3, %v13266_v26  ;;  %v13232_v6 = vmul.f32 %v20655_v29, %v13196_v17 }
 0xb81   : > { %v17289_v28 = vpop.eup %17288  ;;  %16691 = vmatmul.mubr.msk.f32.gmra.mrb[202].mxu0 %vm662_vm3, %v13267_v23  ;;  %v13271_v46 = vadd.f32 %v20662_v50, %v13235_v59 }
 0xb82   : > { %v13198_v57 = vmul.f32 %v17289_v28, %v20640_v34  ;;  %v13268_v49 = vadd.f32 %v20662_v50, %v13232_v6  ;;  %v159_v34 = vld [vmem:[%s21349_s1 + $0x80] sm:$0xff] }
 0xb83   : > { %v16843_v8 = vpack.c.bf16 %v160_v48, %v159_v34 }
 0xb84   : > { %v13234_v22 = vmul.f32 %v20655_v29, %v13198_v57  ;;  %16693 = vmatprep.mubr.msk.f32.mxu0 %vm662_vm3, %v13268_v49  ;;  %v161_v29 = vld [vmem:[%s21349_s1 + $0x90] sm:$0xff] }
 0xb85   : > { %16694 = vmatmul.mubr.msk.f32.gmra.mrb[204].mxu0 %vm662_vm3, %v13269_v56  ;;  %16844 = vmatprep.subr.bf16.mxu0 %v16843_v8 }
 0xb86   : > { %v13270_v32 = vadd.f32 %v20662_v50, %v13234_v22  ;;  %16846 = vmatpush3.bf16.msra.mxu0 %v16843_v8  ;;  %v162_v50 = vld [vmem:[%s21349_s1 + $0x98] sm:$0xff] }
 0xb87   : > { %v16847_v16 = vpack.c.bf16 %v162_v50, %v161_v29 }
 0xb88   : > { %16696 = vmatprep.mubr.msk.f32.mxu0 %vm662_vm3, %v13270_v32 }
 0xb89   : > { %16697 = vmatmul.mubr.msk.f32.gmra.mrb[206].mxu0 %vm662_vm3, %v13271_v46  ;;  %16848 = vmatprep.subr.bf16.mxu1 %v16847_v16 }
 0xb8a   : > { %16850 = vmatpush3.bf16.msra.mxu1 %v16847_v16 }
 0xc1b   : > { %v16653_v20 = vpop.f32.mrb[176].mxu0 }
 0xc1c   : > { %v13444_v40 = vadd.f32 %v16653_v20, %v20805_v51  ;;  %v13438_v9 = vpop.f32.mrb[177].mxu0 }
 0xc1d   : > { %v13439_v18 = vadd.f32 %v20805_v51, %v13438_v9 }
 0xc1e   : > { %v13630_v21 = vmul.f32 0.01, %v13444_v40  ;;  %vm13598_vm0 = vcmp.gt.f32.partialorder %v13444_v40, 0.0 }
 0xc1f   : > { %vm13597_vm8 = vcmp.gt.f32.partialorder %v13439_v18, 0.0  ;;  %v13629_v39 = vmul.f32 0.01, %v13439_v18 }
 0xc20   : > { %v13662_v38 = vsel %vm13598_vm0, %v13444_v40, %v13630_v21 }
 0xc21   : > { %v13661_v44 = vsel %vm13597_vm8, %v13439_v18, %v13629_v39 }
 0xc22   : > { %16707 = vmatprep.mubr.msk.f32.mxu0 %vm662_vm3, %v13661_v44 }
 0xc23   : > { %16708 = vmatmul.mubr.msk.f32.vlgmr.msra.gmra.mrb[208].mxu0 %vm662_vm3, %v13662_v38 }
 0xc24   : > { %v16656_v31 = vpop.f32.mrb[178].mxu0 }
 0xc25   : > { %v13454_v14 = vadd.f32 %v16656_v31, %v20805_v51  ;;  %v13448_v11 = vpop.f32.mrb[179].mxu0 }
 0xc26   : > { %v13449_v7 = vadd.f32 %v20805_v51, %v13448_v11 }
 0xc27   : > { %v13632_v55 = vmul.f32 0.01, %v13454_v14  ;;  %vm13600_vm9 = vcmp.gt.f32.partialorder %v13454_v14, 0.0 }
 0xc28   : > { %vm13599_vm10 = vcmp.gt.f32.partialorder %v13449_v7, 0.0  ;;  %v13631_v42 = vmul.f32 0.01, %v13449_v7  ;;  %v16659_v2 = vpop.f32.mrb[180].mxu0 }
 0xc29   : > { %v13464_v24 = vadd.f32 %v16659_v2, %v20805_v51  ;;  %v13458_v60 = vpop.f32.mrb[181].mxu0  ;;  %v13664_v58 = vsel %vm13600_vm9, %v13454_v14, %v13632_v55 }
 0xc2a   : > { %v13663_v47 = vsel %vm13599_vm10, %v13449_v7, %v13631_v42  ;;  %v13459_v15 = vadd.f32 %v20805_v51, %v13458_v60 }
 0xc2b   : > { %16710 = vmatprep.mubr.msk.f32.mxu0 %vm662_vm3, %v13663_v47  ;;  %v13634_v33 = vmul.f32 0.01, %v13464_v24  ;;  %vm13602_vm11 = vcmp.gt.f32.partialorder %v13464_v24, 0.0 }
 0xc2c   : > { %16711 = vmatmul.mubr.msk.f32.gmra.mrb[210].mxu0 %vm662_vm3, %v13664_v58  ;;  %vm13601_vm12 = vcmp.gt.f32.partialorder %v13459_v15, 0.0  ;;  %v13633_v53 = vmul.f32 0.01, %v13459_v15  ;;  %v16662_v36 = vpop.f32.mrb[182].mxu0 }
 0xc2d   : > { %v13474_v5 = vadd.f32 %v16662_v36, %v20805_v51  ;;  %v13468_v27 = vpop.f32.mrb[183].mxu0  ;;  %v13666_v4 = vsel %vm13602_vm11, %v13464_v24, %v13634_v33 }
 0xc2e   : > { %v13469_v62 = vadd.f32 %v20805_v51, %v13468_v27  ;;  %v13665_v61 = vsel %vm13601_vm12, %v13459_v15, %v13633_v53 }
 0xc2f   : > { %v13636_v35 = vmul.f32 0.01, %v13474_v5  ;;  %16713 = vmatprep.mubr.msk.f32.mxu0 %vm662_vm3, %v13665_v61  ;;  %vm13604_vm13 = vcmp.gt.f32.partialorder %v13474_v5, 0.0 }
 0xc30   : > { %vm13603_vm14 = vcmp.gt.f32.partialorder %v13469_v62, 0.0  ;;  %v13635_v63 = vmul.f32 0.01, %v13469_v62  ;;  %v16665_v30 = vpop.f32.mrb[184].mxu0  ;;  %16714 = vmatmul.mubr.msk.f32.gmra.mrb[212].mxu0 %vm662_vm3, %v13666_v4 }
 0xc31   : > { %v13484_v10 = vadd.f32 %v16665_v30, %v20805_v51  ;;  %v13478_v0 = vpop.f32.mrb[185].mxu0  ;;  %v13668_v45 = vsel %vm13604_vm13, %v13474_v5, %v13636_v35 }
 0xc32   : > { %v13479_v52 = vadd.f32 %v20805_v51, %v13478_v0  ;;  %v13667_v13 = vsel %vm13603_vm14, %v13469_v62, %v13635_v63 }
 0xc33   : > { %v13638_v43 = vmul.f32 0.01, %v13484_v10  ;;  %16716 = vmatprep.mubr.msk.f32.mxu0 %vm662_vm3, %v13667_v13  ;;  %vm13606_vm15 = vcmp.gt.f32.partialorder %v13484_v10, 0.0 }
 0xc34   : > { %vm13605_vm1 = vcmp.gt.f32.partialorder %v13479_v52, 0.0  ;;  %v13637_v25 = vmul.f32 0.01, %v13479_v52  ;;  %v16668_v3 = vpop.f32.mrb[186].mxu0  ;;  %16717 = vmatmul.mubr.msk.f32.gmra.mrb[214].mxu0 %vm662_vm3, %v13668_v45 }
 0xc35   : > { %v13494_v54 = vadd.f32 %v16668_v3, %v20805_v51  ;;  %v13488_v37 = vpop.f32.mrb[187].mxu0  ;;  %v13670_v17 = vsel %vm13606_vm15, %v13484_v10, %v13638_v43 }
 0xc36   : > { %v13489_v19 = vadd.f32 %v20805_v51, %v13488_v37  ;;  %v13669_v12 = vsel %vm13605_vm1, %v13479_v52, %v13637_v25 }
 0xc37   : > { %v13640_v26 = vmul.f32 0.01, %v13494_v54  ;;  %16719 = vmatprep.mubr.msk.f32.mxu0 %vm662_vm3, %v13669_v12  ;;  %vm13608_vm2 = vcmp.gt.f32.partialorder %v13494_v54, 0.0 }
 0xc38   : > { %vm13607_vm4 = vcmp.gt.f32.partialorder %v13489_v19, 0.0  ;;  %v13639_v28 = vmul.f32 0.01, %v13489_v19  ;;  %v16671_v23 = vpop.f32.mrb[188].mxu0  ;;  %16720 = vmatmul.mubr.msk.f32.gmra.mrb[216].mxu0 %vm662_vm3, %v13670_v17 }
 0xc39   : > { %v13504_v6 = vadd.f32 %v16671_v23, %v20805_v51  ;;  %v13498_v41 = vpop.f32.mrb[189].mxu0  ;;  %v13672_v22 = vsel %vm13608_vm2, %v13494_v54, %v13640_v26 }
 0xc3a   : > { %v13499_v1 = vadd.f32 %v20805_v51, %v13498_v41  ;;  %v13671_v57 = vsel %vm13607_vm4, %v13489_v19, %v13639_v28 }
 0xc3b   : > { %v13642_v49 = vmul.f32 0.01, %v13504_v6  ;;  %16722 = vmatprep.mubr.msk.f32.mxu0 %vm662_vm3, %v13671_v57  ;;  %vm13610_vm5 = vcmp.gt.f32.partialorder %v13504_v6, 0.0 }
 0xc3c   : > { %vm13609_vm6 = vcmp.gt.f32.partialorder %v13499_v1, 0.0  ;;  %v13641_v56 = vmul.f32 0.01, %v13499_v1  ;;  %v16674_v59 = vpop.f32.mrb[190].mxu0  ;;  %16723 = vmatmul.mubr.msk.f32.gmra.mrb[218].mxu0 %vm662_vm3, %v13672_v22 }
 0xc3d   : > { %v13514_v32 = vadd.f32 %v16674_v59, %v20805_v51  ;;  %v13508_v46 = vpop.f32.mrb[191].mxu0  ;;  %v13674_v29 = vsel %vm13610_vm5, %v13504_v6, %v13642_v49 }
 0xc3e   : > { %v13509_v34 = vadd.f32 %v20805_v51, %v13508_v46  ;;  %v13673_v48 = vsel %vm13609_vm6, %v13499_v1, %v13641_v56 }
 0xc3f   : > { %v13644_v8 = vmul.f32 0.01, %v13514_v32  ;;  %16725 = vmatprep.mubr.msk.f32.mxu0 %vm662_vm3, %v13673_v48  ;;  %vm13612_vm7 = vcmp.gt.f32.partialorder %v13514_v32, 0.0 }
 0xc40   : > { %vm13611_vm0 = vcmp.gt.f32.partialorder %v13509_v34, 0.0  ;;  %v13643_v50 = vmul.f32 0.01, %v13509_v34  ;;  %v16677_v16 = vpop.f32.mrb[192].mxu0  ;;  %16726 = vmatmul.mubr.msk.f32.gmra.mrb[220].mxu0 %vm662_vm3, %v13674_v29 }
 0xc41   : > { %v13524_v20 = vadd.f32 %v16677_v16, %v20805_v51  ;;  %v13518_v40 = vpop.f32.mrb[193].mxu0  ;;  %v13676_v39 = vsel %vm13612_vm7, %v13514_v32, %v13644_v8 }
 0xc42   : > { %v13519_v9 = vadd.f32 %v20805_v51, %v13518_v40  ;;  %v13675_v18 = vsel %vm13611_vm0, %v13509_v34, %v13643_v50 }
 0xc43   : > { %v13646_v21 = vmul.f32 0.01, %v13524_v20  ;;  %16728 = vmatprep.mubr.msk.f32.mxu0 %vm662_vm3, %v13675_v18  ;;  %vm13614_vm8 = vcmp.gt.f32.partialorder %v13524_v20, 0.0 }
 0xc44   : > { %vm13613_vm9 = vcmp.gt.f32.partialorder %v13519_v9, 0.0  ;;  %v13645_v44 = vmul.f32 0.01, %v13519_v9  ;;  %v16680_v38 = vpop.f32.mrb[194].mxu0  ;;  %16729 = vmatmul.mubr.msk.f32.gmra.mrb[222].mxu0 %vm662_vm3, %v13676_v39 }
 0xc45   : > { %v13534_v31 = vadd.f32 %v16680_v38, %v20805_v51  ;;  %v13528_v14 = vpop.f32.mrb[195].mxu0  ;;  %v13678_v42 = vsel %vm13614_vm8, %v13524_v20, %v13646_v21  ;;  %v20880_v21 = vld [vmem:[%s21349_s1 + $0xb8] ss:$0 sm:$0xff] }
 0xc46   : > { %v13529_v11 = vadd.f32 %v20805_v51, %v13528_v14  ;;  %v13677_v7 = vsel %vm13613_vm9, %v13519_v9, %v13645_v44  ;;  %v164_v9 = vld [vmem:[%s21349_s1 + $0xa8] sm:$0xff] }
 0xc47   : > { %v13648_v55 = vmul.f32 0.01, %v13534_v31  ;;  %16731 = vmatprep.mubr.msk.f32.mxu0 %vm662_vm3, %v13677_v7  ;;  %vm13616_vm10 = vcmp.gt.f32.partialorder %v13534_v31, 0.0 }
 0xc48   : > { %vm13615_vm11 = vcmp.gt.f32.partialorder %v13529_v11, 0.0  ;;  %v13647_v2 = vmul.f32 0.01, %v13529_v11  ;;  %v16683_v24 = vpop.f32.mrb[196].mxu0  ;;  %16732 = vmatmul.mubr.msk.f32.gmra.mrb[224].mxu0 %vm662_vm3, %v13678_v42 }
 0xc49   : > { %v13544_v60 = vadd.f32 %v16683_v24, %v20805_v51  ;;  %v13538_v47 = vpop.f32.mrb[197].mxu0  ;;  %v13680_v53 = vsel %vm13616_vm10, %v13534_v31, %v13648_v55 }
 0xc4a   : > { %v13539_v15 = vadd.f32 %v20805_v51, %v13538_v47  ;;  %v13679_v58 = vsel %vm13615_vm11, %v13529_v11, %v13647_v2 }
 0xc4b   : > { %v13650_v33 = vmul.f32 0.01, %v13544_v60  ;;  %16734 = vmatprep.mubr.msk.f32.mxu0 %vm662_vm3, %v13679_v58  ;;  %vm13618_vm12 = vcmp.gt.f32.partialorder %v13544_v60, 0.0 }
 0xc4c   : > { %vm13617_vm13 = vcmp.gt.f32.partialorder %v13539_v15, 0.0  ;;  %v13649_v36 = vmul.f32 0.01, %v13539_v15  ;;  %v16686_v5 = vpop.f32.mrb[198].mxu0  ;;  %16735 = vmatmul.mubr.msk.f32.gmra.mrb[226].mxu0 %vm662_vm3, %v13680_v53 }
 0xc4d   : > { %v13554_v27 = vadd.f32 %v16686_v5, %v20805_v51  ;;  %v13548_v62 = vpop.f32.mrb[199].mxu0  ;;  %v13682_v63 = vsel %vm13618_vm12, %v13544_v60, %v13650_v33 }
 0xc4e   : > { %v13549_v61 = vadd.f32 %v20805_v51, %v13548_v62  ;;  %v13681_v35 = vsel %vm13617_vm13, %v13539_v15, %v13649_v36 }
 0xc4f   : > { %v13652_v4 = vmul.f32 0.01, %v13554_v27  ;;  %16737 = vmatprep.mubr.msk.f32.mxu0 %vm662_vm3, %v13681_v35  ;;  %vm13620_vm14 = vcmp.gt.f32.partialorder %v13554_v27, 0.0 }
 0xc50   : > { %vm13619_vm15 = vcmp.gt.f32.partialorder %v13549_v61, 0.0  ;;  %v13651_v30 = vmul.f32 0.01, %v13549_v61  ;;  %v16689_v10 = vpop.f32.mrb[200].mxu0  ;;  %16738 = vmatmul.mubr.msk.f32.gmra.mrb[228].mxu0 %vm662_vm3, %v13682_v63 }
 0xc51   : > { %v13564_v0 = vadd.f32 %v16689_v10, %v20805_v51  ;;  %v13558_v52 = vpop.f32.mrb[201].mxu0  ;;  %v13684_v25 = vsel %vm13620_vm14, %v13554_v27, %v13652_v4 }
 0xc52   : > { %v13559_v13 = vadd.f32 %v20805_v51, %v13558_v52  ;;  %v13683_v43 = vsel %vm13619_vm15, %v13549_v61, %v13651_v30 }
 0xc53   : > { %v13654_v45 = vmul.f32 0.01, %v13564_v0  ;;  %16740 = vmatprep.mubr.msk.f32.mxu0 %vm662_vm3, %v13683_v43  ;;  %vm13622_vm1 = vcmp.gt.f32.partialorder %v13564_v0, 0.0 }
 0xc54   : > { %vm13621_vm2 = vcmp.gt.f32.partialorder %v13559_v13, 0.0  ;;  %v13653_v3 = vmul.f32 0.01, %v13559_v13  ;;  %v16692_v54 = vpop.f32.mrb[202].mxu0  ;;  %16741 = vmatmul.mubr.msk.f32.gmra.mrb[230].mxu0 %vm662_vm3, %v13684_v25 }
 0xc55   : > { %v13574_v37 = vadd.f32 %v16692_v54, %v20805_v51  ;;  %v13568_v19 = vpop.f32.mrb[203].mxu0  ;;  %v13686_v28 = vsel %vm13622_vm1, %v13564_v0, %v13654_v45 }
 0xc56   : > { %v13569_v12 = vadd.f32 %v20805_v51, %v13568_v19  ;;  %v13685_v26 = vsel %vm13621_vm2, %v13559_v13, %v13653_v3 }
 0xc57   : > { %v13656_v17 = vmul.f32 0.01, %v13574_v37  ;;  %16743 = vmatprep.mubr.msk.f32.mxu0 %vm662_vm3, %v13685_v26  ;;  %vm13624_vm4 = vcmp.gt.f32.partialorder %v13574_v37, 0.0 }
 0xc58   : > { %vm13623_vm5 = vcmp.gt.f32.partialorder %v13569_v12, 0.0  ;;  %v13655_v23 = vmul.f32 0.01, %v13569_v12  ;;  %v16695_v6 = vpop.f32.mrb[204].mxu0  ;;  %16744 = vmatmul.mubr.msk.f32.gmra.mrb[232].mxu0 %vm662_vm3, %v13686_v28 }
 0xc59   : > { %v13584_v41 = vadd.f32 %v16695_v6, %v20805_v51  ;;  %v13578_v1 = vpop.f32.mrb[205].mxu0  ;;  %v13688_v56 = vsel %vm13624_vm4, %v13574_v37, %v13656_v17 }
 0xc5a   : > { %v13579_v57 = vadd.f32 %v20805_v51, %v13578_v1  ;;  %v13687_v49 = vsel %vm13623_vm5, %v13569_v12, %v13655_v23 }
 0xc5b   : > { %v13658_v22 = vmul.f32 0.01, %v13584_v41  ;;  %16746 = vmatprep.mubr.msk.f32.mxu0 %vm662_vm3, %v13687_v49  ;;  %vm13626_vm6 = vcmp.gt.f32.partialorder %v13584_v41, 0.0 }
 0xc5c   : > { %vm13625_vm7 = vcmp.gt.f32.partialorder %v13579_v57, 0.0  ;;  %v13657_v59 = vmul.f32 0.01, %v13579_v57  ;;  %v16698_v32 = vpop.f32.mrb[206].mxu0  ;;  %16747 = vmatmul.mubr.msk.f32.gmra.mrb[234].mxu0 %vm662_vm3, %v13688_v56 }
 0xc5d   : > { %v13594_v46 = vadd.f32 %v16698_v32, %v20805_v51  ;;  %v13588_v34 = vpop.f32.mrb[207].mxu0  ;;  %v13690_v50 = vsel %vm13626_vm6, %v13584_v41, %v13658_v22 }
 0xc5e   : > { %v13589_v48 = vadd.f32 %v20805_v51, %v13588_v34  ;;  %v13689_v8 = vsel %vm13625_vm7, %v13579_v57, %v13657_v59  ;;  %v163_v51 = vld [vmem:[%s21349_s1 + $0xa0] sm:$0xff] }
 0xc5f   : > { %v13660_v29 = vmul.f32 0.01, %v13594_v46  ;;  %16749 = vmatprep.mubr.msk.f32.mxu0 %vm662_vm3, %v13689_v8  ;;  %vm13628_vm0 = vcmp.gt.f32.partialorder %v13594_v46, 0.0  ;;  %v16851_v18 = vpack.c.bf16 %v164_v9, %v163_v51 }
 0xc60   : > { %vm13627_vm8 = vcmp.gt.f32.partialorder %v13589_v48, 0.0  ;;  %v13659_v16 = vmul.f32 0.01, %v13589_v48  ;;  %16750 = vmatmul.mubr.msk.f32.gmra.mrb[236].mxu0 %vm662_vm3, %v13690_v50 }
 0xc61   : > { %v13692_v40 = vsel %vm13628_vm0, %v13594_v46, %v13660_v29  ;;  %16852 = vmatprep.subr.bf16.mxu1 %v16851_v18 }
 0xc62   : > { %v13691_v20 = vsel %vm13627_vm8, %v13589_v48, %v13659_v16  ;;  %16854 = vmatpush3.bf16.msra.mxu1 %v16851_v18 }
 0xc63   : > { %16752 = vmatprep.mubr.msk.f32.mxu0 %vm662_vm3, %v13691_v20 }
 0xc64   : > { %16753 = vmatmul.mubr.msk.f32.gmra.mrb[238].mxu0 %vm662_vm3, %v13692_v40 }
 0xcf6   : > { %v16709_v39 = vpop.f32.mrb[208].mxu0 }
 0xcf7   : > { %v13865_v44 = vadd.f32 %v16709_v39, %v20880_v21  ;;  %v13859_v38 = vpop.f32.mrb[209].mxu0 }
 0xcf8   : > { %v13860_v31 = vadd.f32 %v20880_v21, %v13859_v38 }
 0xcf9   : > { %v14051_v14 = vmul.f32 0.01, %v13865_v44  ;;  %vm14019_vm9 = vcmp.gt.f32.partialorder %v13865_v44, 0.0 }
 0xcfa   : > { %vm14018_vm10 = vcmp.gt.f32.partialorder %v13860_v31, 0.0  ;;  %v14050_v11 = vmul.f32 0.01, %v13860_v31 }
 0xcfb   : > { %v14083_v55 = vsel %vm14019_vm9, %v13865_v44, %v14051_v14 }
 0xcfc   : > { %v14082_v7 = vsel %vm14018_vm10, %v13860_v31, %v14050_v11 }
 0xcfd   : > { %16763 = vmatprep.mubr.msk.f32.mxu1 %vm662_vm3, %v14082_v7 }
 0xcfe   : > { %16764 = vmatmul.mubr.msk.f32.vlgmr.msra.gmra.mrb[176].mxu1 %vm662_vm3, %v14083_v55 }
 0xcff   : > { %v16712_v42 = vpop.f32.mrb[210].mxu0 }
 0xd00   : > { %v13875_v2 = vadd.f32 %v16712_v42, %v20880_v21  ;;  %v13869_v24 = vpop.f32.mrb[211].mxu0 }
 0xd01   : > { %v13870_v60 = vadd.f32 %v20880_v21, %v13869_v24 }
 0xd02   : > { %v14053_v47 = vmul.f32 0.01, %v13875_v2  ;;  %vm14021_vm11 = vcmp.gt.f32.partialorder %v13875_v2, 0.0 }
 0xd03   : > { %vm14020_vm12 = vcmp.gt.f32.partialorder %v13870_v60, 0.0  ;;  %v14052_v15 = vmul.f32 0.01, %v13870_v60  ;;  %v16715_v58 = vpop.f32.mrb[212].mxu0 }
 0xd04   : > { %v13885_v33 = vadd.f32 %v16715_v58, %v20880_v21  ;;  %v13879_v53 = vpop.f32.mrb[213].mxu0  ;;  %v14085_v27 = vsel %vm14021_vm11, %v13875_v2, %v14053_v47 }
 0xd05   : > { %v14084_v36 = vsel %vm14020_vm12, %v13870_v60, %v14052_v15  ;;  %v13880_v5 = vadd.f32 %v20880_v21, %v13879_v53 }
 0xd06   : > { %16766 = vmatprep.mubr.msk.f32.mxu1 %vm662_vm3, %v14084_v36  ;;  %v14055_v62 = vmul.f32 0.01, %v13885_v33  ;;  %vm14023_vm13 = vcmp.gt.f32.partialorder %v13885_v33, 0.0 }
 0xd07   : > { %16767 = vmatmul.mubr.msk.f32.gmra.mrb[178].mxu1 %vm662_vm3, %v14085_v27  ;;  %vm14022_vm14 = vcmp.gt.f32.partialorder %v13880_v5, 0.0  ;;  %v14054_v61 = vmul.f32 0.01, %v13880_v5  ;;  %v16718_v35 = vpop.f32.mrb[214].mxu0 }
 0xd08   : > { %v13895_v4 = vadd.f32 %v16718_v35, %v20880_v21  ;;  %v13889_v63 = vpop.f32.mrb[215].mxu0  ;;  %v14087_v52 = vsel %vm14023_vm13, %v13885_v33, %v14055_v62 }
 0xd09   : > { %v13890_v30 = vadd.f32 %v20880_v21, %v13889_v63  ;;  %v14086_v10 = vsel %vm14022_vm14, %v13880_v5, %v14054_v61 }
 0xd0a   : > { %v14057_v0 = vmul.f32 0.01, %v13895_v4  ;;  %16769 = vmatprep.mubr.msk.f32.mxu1 %vm662_vm3, %v14086_v10  ;;  %vm14025_vm15 = vcmp.gt.f32.partialorder %v13895_v4, 0.0 }
 0xd0b   : > { %vm14024_vm1 = vcmp.gt.f32.partialorder %v13890_v30, 0.0  ;;  %v14056_v13 = vmul.f32 0.01, %v13890_v30  ;;  %v16721_v43 = vpop.f32.mrb[216].mxu0  ;;  %16770 = vmatmul.mubr.msk.f32.gmra.mrb[180].mxu1 %vm662_vm3, %v14087_v52 }
 0xd0c   : > { %v13905_v45 = vadd.f32 %v16721_v43, %v20880_v21  ;;  %v13899_v25 = vpop.f32.mrb[217].mxu0  ;;  %v14089_v19 = vsel %vm14025_vm15, %v13895_v4, %v14057_v0 }
 0xd0d   : > { %v13900_v3 = vadd.f32 %v20880_v21, %v13899_v25  ;;  %v14088_v54 = vsel %vm14024_vm1, %v13890_v30, %v14056_v13 }
 0xd0e   : > { %v14059_v37 = vmul.f32 0.01, %v13905_v45  ;;  %16772 = vmatprep.mubr.msk.f32.mxu1 %vm662_vm3, %v14088_v54  ;;  %vm14027_vm2 = vcmp.gt.f32.partialorder %v13905_v45, 0.0 }
 0xd0f   : > { %vm14026_vm4 = vcmp.gt.f32.partialorder %v13900_v3, 0.0  ;;  %v14058_v12 = vmul.f32 0.01, %v13900_v3  ;;  %v16724_v26 = vpop.f32.mrb[218].mxu0  ;;  %16773 = vmatmul.mubr.msk.f32.gmra.mrb[182].mxu1 %vm662_vm3, %v14089_v19 }
 0xd10   : > { %v13915_v17 = vadd.f32 %v16724_v26, %v20880_v21  ;;  %v13909_v28 = vpop.f32.mrb[219].mxu0  ;;  %v14091_v1 = vsel %vm14027_vm2, %v13905_v45, %v14059_v37 }
 0xd11   : > { %v13910_v23 = vadd.f32 %v20880_v21, %v13909_v28  ;;  %v14090_v6 = vsel %vm14026_vm4, %v13900_v3, %v14058_v12 }
 0xd12   : > { %v14061_v41 = vmul.f32 0.01, %v13915_v17  ;;  %16775 = vmatprep.mubr.msk.f32.mxu1 %vm662_vm3, %v14090_v6  ;;  %vm14029_vm5 = vcmp.gt.f32.partialorder %v13915_v17, 0.0 }
 0xd13   : > { %vm14028_vm6 = vcmp.gt.f32.partialorder %v13910_v23, 0.0  ;;  %v14060_v57 = vmul.f32 0.01, %v13910_v23  ;;  %v16727_v49 = vpop.f32.mrb[220].mxu0  ;;  %16776 = vmatmul.mubr.msk.f32.gmra.mrb[184].mxu1 %vm662_vm3, %v14091_v1 }
 0xd14   : > { %v13925_v22 = vadd.f32 %v16727_v49, %v20880_v21  ;;  %v13919_v56 = vpop.f32.mrb[221].mxu0  ;;  %v14093_v34 = vsel %vm14029_vm5, %v13915_v17, %v14061_v41 }
 0xd15   : > { %v13920_v59 = vadd.f32 %v20880_v21, %v13919_v56  ;;  %v14092_v32 = vsel %vm14028_vm6, %v13910_v23, %v14060_v57 }
 0xd16   : > { %v14063_v46 = vmul.f32 0.01, %v13925_v22  ;;  %16778 = vmatprep.mubr.msk.f32.mxu1 %vm662_vm3, %v14092_v32  ;;  %vm14031_vm7 = vcmp.gt.f32.partialorder %v13925_v22, 0.0 }
 0xd17   : > { %vm14030_vm0 = vcmp.gt.f32.partialorder %v13920_v59, 0.0  ;;  %v14062_v48 = vmul.f32 0.01, %v13920_v59  ;;  %v16730_v8 = vpop.f32.mrb[222].mxu0  ;;  %16779 = vmatmul.mubr.msk.f32.gmra.mrb[186].mxu1 %vm662_vm3, %v14093_v34 }
 0xd18   : > { %v13935_v29 = vadd.f32 %v16730_v8, %v20880_v21  ;;  %v13929_v50 = vpop.f32.mrb[223].mxu0  ;;  %v14095_v51 = vsel %vm14031_vm7, %v13925_v22, %v14063_v46 }
 0xd19   : > { %v13930_v16 = vadd.f32 %v20880_v21, %v13929_v50  ;;  %v14094_v20 = vsel %vm14030_vm0, %v13920_v59, %v14062_v48 }
 0xd1a   : > { %v14065_v40 = vmul.f32 0.01, %v13935_v29  ;;  %16781 = vmatprep.mubr.msk.f32.mxu1 %vm662_vm3, %v14094_v20  ;;  %vm14033_vm8 = vcmp.gt.f32.partialorder %v13935_v29, 0.0 }
 0xd1b   : > { %vm14032_vm9 = vcmp.gt.f32.partialorder %v13930_v16, 0.0  ;;  %v14064_v9 = vmul.f32 0.01, %v13930_v16  ;;  %v16733_v18 = vpop.f32.mrb[224].mxu0  ;;  %16782 = vmatmul.mubr.msk.f32.gmra.mrb[188].mxu1 %vm662_vm3, %v14095_v51 }
 0xd1c   : > { %v13945_v39 = vadd.f32 %v16733_v18, %v20880_v21  ;;  %v13939_v44 = vpop.f32.mrb[225].mxu0  ;;  %v14097_v11 = vsel %vm14033_vm8, %v13935_v29, %v14065_v40 }
 0xd1d   : > { %v13940_v38 = vadd.f32 %v20880_v21, %v13939_v44  ;;  %v14096_v31 = vsel %vm14032_vm9, %v13930_v16, %v14064_v9 }
 0xd1e   : > { %v14067_v14 = vmul.f32 0.01, %v13945_v39  ;;  %16784 = vmatprep.mubr.msk.f32.mxu1 %vm662_vm3, %v14096_v31  ;;  %vm14035_vm10 = vcmp.gt.f32.partialorder %v13945_v39, 0.0 }
 0xd1f   : > { %vm14034_vm11 = vcmp.gt.f32.partialorder %v13940_v38, 0.0  ;;  %v14066_v7 = vmul.f32 0.01, %v13940_v38  ;;  %v16736_v55 = vpop.f32.mrb[226].mxu0  ;;  %16785 = vmatmul.mubr.msk.f32.gmra.mrb[190].mxu1 %vm662_vm3, %v14097_v11 }
 0xd20   : > { %v13955_v42 = vadd.f32 %v16736_v55, %v20880_v21  ;;  %v13949_v2 = vpop.f32.mrb[227].mxu0  ;;  %v14099_v15 = vsel %vm14035_vm10, %v13945_v39, %v14067_v14 }
 0xd21   : > { %v13950_v24 = vadd.f32 %v20880_v21, %v13949_v2  ;;  %v14098_v60 = vsel %vm14034_vm11, %v13940_v38, %v14066_v7  ;;  %v14439_v38 = vlaneseq }
 0xd22   : > { %v14069_v47 = vmul.f32 0.01, %v13955_v42  ;;  %16787 = vmatprep.mubr.msk.f32.mxu1 %vm662_vm3, %v14098_v60  ;;  %vm14037_vm12 = vcmp.gt.f32.partialorder %v13955_v42, 0.0 }
 0xd23   : > { %vm14036_vm13 = vcmp.gt.f32.partialorder %v13950_v24, 0.0  ;;  %v14068_v58 = vmul.f32 0.01, %v13950_v24  ;;  %v16739_v33 = vpop.f32.mrb[228].mxu0  ;;  %16788 = vmatmul.mubr.msk.f32.gmra.mrb[192].mxu1 %vm662_vm3, %v14099_v15  ;;  %v20946_v31 = vand.u32 127, %v14439_v38 }
 0xd24   : > { %v13965_v53 = vadd.f32 %v16739_v33, %v20880_v21  ;;  %v13959_v36 = vpop.f32.mrb[229].mxu0  ;;  %v14101_v61 = vsel %vm14037_vm12, %v13955_v42, %v14069_v47 }
 0xd25   : > { %v13960_v5 = vadd.f32 %v20880_v21, %v13959_v36  ;;  %v14100_v27 = vsel %vm14036_vm13, %v13950_v24, %v14068_v58  ;;  %vm14441_vm11 = vcmp.lt.s32.totalorder %v20946_v31, 6 }
 0xd26   : > { %v14071_v62 = vmul.f32 0.01, %v13965_v53  ;;  %16790 = vmatprep.mubr.msk.f32.mxu1 %vm662_vm3, %v14100_v27  ;;  %vm14039_vm14 = vcmp.gt.f32.partialorder %v13965_v53, 0.0 }
 0xd27   : > { %vm14038_vm15 = vcmp.gt.f32.partialorder %v13960_v5, 0.0  ;;  %v14070_v35 = vmul.f32 0.01, %v13960_v5  ;;  %v16742_v4 = vpop.f32.mrb[230].mxu0  ;;  %16791 = vmatmul.mubr.msk.f32.gmra.mrb[194].mxu1 %vm662_vm3, %v14101_v61 }
 0xd28   : > { %v13975_v63 = vadd.f32 %v16742_v4, %v20880_v21  ;;  %v13969_v30 = vpop.f32.mrb[231].mxu0  ;;  %v14103_v13 = vsel %vm14039_vm14, %v13965_v53, %v14071_v62 }
 0xd29   : > { %v13970_v10 = vadd.f32 %v20880_v21, %v13969_v30  ;;  %v14102_v0 = vsel %vm14038_vm15, %v13960_v5, %v14070_v35 }
 0xd2a   : > { %v14073_v52 = vmul.f32 0.01, %v13975_v63  ;;  %16793 = vmatprep.mubr.msk.f32.mxu1 %vm662_vm3, %v14102_v0  ;;  %vm14041_vm1 = vcmp.gt.f32.partialorder %v13975_v63, 0.0 }
 0xd2b   : > { %vm14040_vm2 = vcmp.gt.f32.partialorder %v13970_v10, 0.0  ;;  %v14072_v43 = vmul.f32 0.01, %v13970_v10  ;;  %v16745_v45 = vpop.f32.mrb[232].mxu0  ;;  %16794 = vmatmul.mubr.msk.f32.gmra.mrb[196].mxu1 %vm662_vm3, %v14103_v13 }
 0xd2c   : > { %v13985_v25 = vadd.f32 %v16745_v45, %v20880_v21  ;;  %v13979_v3 = vpop.f32.mrb[233].mxu0  ;;  %v14105_v12 = vsel %vm14041_vm1, %v13975_v63, %v14073_v52 }
 0xd2d   : > { %v13980_v54 = vadd.f32 %v20880_v21, %v13979_v3  ;;  %v14104_v37 = vsel %vm14040_vm2, %v13970_v10, %v14072_v43 }
 0xd2e   : > { %v14075_v19 = vmul.f32 0.01, %v13985_v25  ;;  %16796 = vmatprep.mubr.msk.f32.mxu1 %vm662_vm3, %v14104_v37  ;;  %vm14043_vm4 = vcmp.gt.f32.partialorder %v13985_v25, 0.0 }
 0xd2f   : > { %vm14042_vm5 = vcmp.gt.f32.partialorder %v13980_v54, 0.0  ;;  %v14074_v26 = vmul.f32 0.01, %v13980_v54  ;;  %v16748_v17 = vpop.f32.mrb[234].mxu0  ;;  %16797 = vmatmul.mubr.msk.f32.gmra.mrb[198].mxu1 %vm662_vm3, %v14105_v12 }
 0xd30   : > { %v13995_v28 = vadd.f32 %v16748_v17, %v20880_v21  ;;  %v13989_v23 = vpop.f32.mrb[235].mxu0  ;;  %v14107_v57 = vsel %vm14043_vm4, %v13985_v25, %v14075_v19 }
 0xd31   : > { %v13990_v6 = vadd.f32 %v20880_v21, %v13989_v23  ;;  %v14106_v41 = vsel %vm14042_vm5, %v13980_v54, %v14074_v26 }
 0xd32   : > { %v14077_v1 = vmul.f32 0.01, %v13995_v28  ;;  %16799 = vmatprep.mubr.msk.f32.mxu1 %vm662_vm3, %v14106_v41  ;;  %vm14045_vm6 = vcmp.gt.f32.partialorder %v13995_v28, 0.0 }
 0xd33   : > { %vm14044_vm7 = vcmp.gt.f32.partialorder %v13990_v6, 0.0  ;;  %v14076_v49 = vmul.f32 0.01, %v13990_v6  ;;  %v16751_v22 = vpop.f32.mrb[236].mxu0  ;;  %16800 = vmatmul.mubr.msk.f32.gmra.mrb[200].mxu1 %vm662_vm3, %v14107_v57 }
 0xd34   : > { %v14005_v56 = vadd.f32 %v16751_v22, %v20880_v21  ;;  %v13999_v59 = vpop.f32.mrb[237].mxu0  ;;  %v14109_v48 = vsel %vm14045_vm6, %v13995_v28, %v14077_v1 }
 0xd35   : > { %v14000_v32 = vadd.f32 %v20880_v21, %v13999_v59  ;;  %v14108_v46 = vsel %vm14044_vm7, %v13990_v6, %v14076_v49 }
 0xd36   : > { %v14079_v34 = vmul.f32 0.01, %v14005_v56  ;;  %16802 = vmatprep.mubr.msk.f32.mxu1 %vm662_vm3, %v14108_v46  ;;  %vm14047_vm0 = vcmp.gt.f32.partialorder %v14005_v56, 0.0 }
 0xd37   : > { %vm14046_vm8 = vcmp.gt.f32.partialorder %v14000_v32, 0.0  ;;  %v14078_v8 = vmul.f32 0.01, %v14000_v32  ;;  %v16754_v29 = vpop.f32.mrb[238].mxu0  ;;  %16803 = vmatmul.mubr.msk.f32.gmra.mrb[202].mxu1 %vm662_vm3, %v14109_v48 }
 0xd38   : > { %v14015_v50 = vadd.f32 %v16754_v29, %v20880_v21  ;;  %v14009_v16 = vpop.f32.mrb[239].mxu0  ;;  %v14111_v9 = vsel %vm14047_vm0, %v14005_v56, %v14079_v34 }
 0xd39   : > { %v14010_v20 = vadd.f32 %v20880_v21, %v14009_v16  ;;  %v14110_v40 = vsel %vm14046_vm8, %v14000_v32, %v14078_v8  ;;  %v20951_v21 = vld [vmem:[%s21349_s1 + $0xb9] ss:$0 sm:$0xff] }
 0xd3a   : > { %v14081_v51 = vmul.f32 0.01, %v14015_v50  ;;  %16805 = vmatprep.mubr.msk.f32.mxu1 %vm662_vm3, %v14110_v40  ;;  %vm14049_vm9 = vcmp.gt.f32.partialorder %v14015_v50, 0.0 }
 0xd3b   : > { %vm14048_vm10 = vcmp.gt.f32.partialorder %v14010_v20, 0.0  ;;  %v14080_v18 = vmul.f32 0.01, %v14010_v20  ;;  %16806 = vmatmul.mubr.msk.f32.gmra.mrb[204].mxu1 %vm662_vm3, %v14111_v9 }
 0xd3c   : > { %v14113_v44 = vsel %vm14049_vm9, %v14015_v50, %v14081_v51 }
 0xd3d   : > { %v14112_v39 = vsel %vm14048_vm10, %v14010_v20, %v14080_v18 }
 0xd3e   : > { %16808 = vmatprep.mubr.msk.f32.mxu1 %vm662_vm3, %v14112_v39 }
 0xd3f   : > { %16809 = vmatmul.mubr.msk.f32.gmra.mrb[206].mxu1 %vm662_vm3, %v14113_v44 }
 0xdd1   : > { %v16765_v14 = vpop.f32.mrb[176].mxu1 }
 0xdd2   : > { %v14286_v11 = vadd.f32 %v16765_v14, %v20951_v21  ;;  %v14280_v7 = vpop.f32.mrb[177].mxu1 }
 0xdd3   : > { %v14281_v55 = vadd.f32 %v20951_v21, %v14280_v7 }
 0xdd4   : > { %v20958_v42 = vsel %vm14441_vm11, %v14286_v11, -1e+30 }
 0xdd5   : > { %14478 = vmax.xlane.f32.xlu1 %v20958_v42  ;;  %v20963_v2 = vsel %vm14441_vm11, %v14281_v55, -1e+30 }
 0xdd6   : > { %14476 = vmax.xlane.f32.xlu0 %v20963_v2 }
 0xdda   : > { %v16768_v24 = vpop.f32.mrb[178].mxu1 }
 0xddb   : > { %v14296_v60 = vadd.f32 %v16768_v24, %v20951_v21  ;;  %v14290_v47 = vpop.f32.mrb[179].mxu1 }
 0xddc   : > { %v14291_v15 = vadd.f32 %v20951_v21, %v14290_v47 }
 0xddd   : > { %v20970_v58 = vsel %vm14441_vm11, %v14296_v60, -1e+30 }
 0xdde   : > { %14482 = vmax.xlane.f32.xlu1 %v20970_v58  ;;  %v20975_v33 = vsel %vm14441_vm11, %v14291_v15, -1e+30  ;;  %v16771_v53 = vpop.f32.mrb[180].mxu1 }
 0xddf   : > { %14480 = vmax.xlane.f32.xlu0 %v20975_v33  ;;  %v14306_v36 = vadd.f32 %v16771_v53, %v20951_v21  ;;  %v14300_v5 = vpop.f32.mrb[181].mxu1 }
 0xde0   : > { %v14301_v27 = vadd.f32 %v20951_v21, %v14300_v5 }
 0xde1   : > { %v20982_v62 = vsel %vm14441_vm11, %v14306_v36, -1e+30 }
 0xde2   : > { %14486 = vmax.xlane.f32.xlu1 %v20982_v62  ;;  %v16774_v61 = vpop.f32.mrb[182].mxu1  ;;  %v20987_v35 = vsel %vm14441_vm11, %v14301_v27, -1e+30 }
 0xde3   : > { %v14316_v4 = vadd.f32 %v16774_v61, %v20951_v21  ;;  %v14310_v63 = vpop.f32.mrb[183].mxu1  ;;  %14484 = vmax.xlane.f32.xlu0 %v20987_v35 }
 0xde4   : > { %v14311_v30 = vadd.f32 %v20951_v21, %v14310_v63 }
 0xde5   : > { %v20994_v10 = vsel %vm14441_vm11, %v14316_v4, -1e+30 }
 0xde6   : > { %14490 = vmax.xlane.f32.xlu1 %v20994_v10  ;;  %v16777_v0 = vpop.f32.mrb[184].mxu1  ;;  %v20999_v52 = vsel %vm14441_vm11, %v14311_v30, -1e+30 }
 0xde7   : > { %v14326_v13 = vadd.f32 %v16777_v0, %v20951_v21  ;;  %v14320_v43 = vpop.f32.mrb[185].mxu1  ;;  %14488 = vmax.xlane.f32.xlu0 %v20999_v52 }
 0xde8   : > { %v14321_v45 = vadd.f32 %v20951_v21, %v14320_v43 }
 0xde9   : > { %v21006_v25 = vsel %vm14441_vm11, %v14326_v13, -1e+30 }
 0xdea   : > { %14494 = vmax.xlane.f32.xlu1 %v21006_v25  ;;  %v16780_v3 = vpop.f32.mrb[186].mxu1  ;;  %v21011_v54 = vsel %vm14441_vm11, %v14321_v45, -1e+30 }
 0xdeb   : > { %v14336_v37 = vadd.f32 %v16780_v3, %v20951_v21  ;;  %v14330_v19 = vpop.f32.mrb[187].mxu1  ;;  %14492 = vmax.xlane.f32.xlu0 %v21011_v54 }
 0xdec   : > { %v14331_v12 = vadd.f32 %v20951_v21, %v14330_v19 }
 0xded   : > { %v21018_v26 = vsel %vm14441_vm11, %v14336_v37, -1e+30 }
 0xdee   : > { %14498 = vmax.xlane.f32.xlu1 %v21018_v26  ;;  %v16783_v17 = vpop.f32.mrb[188].mxu1  ;;  %v21023_v28 = vsel %vm14441_vm11, %v14331_v12, -1e+30 }
 0xdef   : > { %v14346_v23 = vadd.f32 %v16783_v17, %v20951_v21  ;;  %v14340_v6 = vpop.f32.mrb[189].mxu1  ;;  %14496 = vmax.xlane.f32.xlu0 %v21023_v28 }
 0xdf0   : > { %v14341_v41 = vadd.f32 %v20951_v21, %v14340_v6 }
 0xdf1   : > { %v21030_v1 = vsel %vm14441_vm11, %v14346_v23, -1e+30 }
 0xdf2   : > { %14502 = vmax.xlane.f32.xlu1 %v21030_v1  ;;  %v16786_v57 = vpop.f32.mrb[190].mxu1  ;;  %v21035_v49 = vsel %vm14441_vm11, %v14341_v41, -1e+30 }
 0xdf3   : > { %v14356_v22 = vadd.f32 %v16786_v57, %v20951_v21  ;;  %v14350_v56 = vpop.f32.mrb[191].mxu1  ;;  %14500 = vmax.xlane.f32.xlu0 %v21035_v49 }
 0xdf4   : > { %v14351_v59 = vadd.f32 %v20951_v21, %v14350_v56 }
 0xdf5   : > { %v21042_v32 = vsel %vm14441_vm11, %v14356_v22, -1e+30 }
 0xdf6   : > { %14506 = vmax.xlane.f32.xlu1 %v21042_v32  ;;  %v16789_v46 = vpop.f32.mrb[192].mxu1  ;;  %v21047_v34 = vsel %vm14441_vm11, %v14351_v59, -1e+30 }
 0xdf7   : > { %v14366_v48 = vadd.f32 %v16789_v46, %v20951_v21  ;;  %v14360_v8 = vpop.f32.mrb[193].mxu1  ;;  %14504 = vmax.xlane.f32.xlu0 %v21047_v34 }
 0xdf8   : > { %v14361_v29 = vadd.f32 %v20951_v21, %v14360_v8 }
 0xdf9   : > { %v21054_v50 = vsel %vm14441_vm11, %v14366_v48, -1e+30 }
 0xdfa   : > { %14510 = vmax.xlane.f32.xlu1 %v21054_v50  ;;  %v16792_v16 = vpop.f32.mrb[194].mxu1  ;;  %v21059_v20 = vsel %vm14441_vm11, %v14361_v29, -1e+30 }
 0xdfb   : > { %v14376_v40 = vadd.f32 %v16792_v16, %v20951_v21  ;;  %v14370_v51 = vpop.f32.mrb[195].mxu1  ;;  %14508 = vmax.xlane.f32.xlu0 %v21059_v20 }
 0xdfc   : > { %v14371_v9 = vadd.f32 %v20951_v21, %v14370_v51 }
 0xdfd   : > { %v21066_v18 = vsel %vm14441_vm11, %v14376_v40, -1e+30 }
 0xdfe   : > { %14514 = vmax.xlane.f32.xlu1 %v21066_v18  ;;  %v16795_v39 = vpop.f32.mrb[196].mxu1  ;;  %v21071_v44 = vsel %vm14441_vm11, %v14371_v9, -1e+30 }
 0xdff   : > { %v14386_v38 = vadd.f32 %v16795_v39, %v20951_v21  ;;  %v14380_v14 = vpop.f32.mrb[197].mxu1  ;;  %14512 = vmax.xlane.f32.xlu0 %v21071_v44 }
 0xe00   : > { %v14381_v11 = vadd.f32 %v20951_v21, %v14380_v14 }
 0xe01   : > { %v21078_v7 = vsel %vm14441_vm11, %v14386_v38, -1e+30 }
 0xe02   : > { %14518 = vmax.xlane.f32.xlu1 %v21078_v7  ;;  %v16798_v55 = vpop.f32.mrb[198].mxu1  ;;  %v21083_v24 = vsel %vm14441_vm11, %v14381_v11, -1e+30 }
 0xe03   : > { %v14396_v60 = vadd.f32 %v16798_v55, %v20951_v21  ;;  %v14390_v47 = vpop.f32.mrb[199].mxu1  ;;  %14516 = vmax.xlane.f32.xlu0 %v21083_v24 }
 0xe04   : > { %v14391_v15 = vadd.f32 %v20951_v21, %v14390_v47 }
 0xe05   : > { %v21090_v53 = vsel %vm14441_vm11, %v14396_v60, -1e+30 }
 0xe06   : > { %14522 = vmax.xlane.f32.xlu1 %v21090_v53  ;;  %v16801_v36 = vpop.f32.mrb[200].mxu1  ;;  %v21095_v5 = vsel %vm14441_vm11, %v14391_v15, -1e+30 }
 0xe07   : > { %v14406_v27 = vadd.f32 %v16801_v36, %v20951_v21  ;;  %v14400_v61 = vpop.f32.mrb[201].mxu1  ;;  %14520 = vmax.xlane.f32.xlu0 %v21095_v5 }
 0xe08   : > { %v14401_v4 = vadd.f32 %v20951_v21, %v14400_v61 }
 0xe09   : > { %v21102_v63 = vsel %vm14441_vm11, %v14406_v27, -1e+30 }
 0xe0a   : > { %14526 = vmax.xlane.f32.xlu1 %v21102_v63  ;;  %v16804_v30 = vpop.f32.mrb[202].mxu1  ;;  %v21107_v0 = vsel %vm14441_vm11, %v14401_v4, -1e+30 }
 0xe0b   : > { %v14416_v13 = vadd.f32 %v16804_v30, %v20951_v21  ;;  %v14410_v43 = vpop.f32.mrb[203].mxu1  ;;  %14524 = vmax.xlane.f32.xlu0 %v21107_v0 }
 0xe0c   : > { %v14411_v45 = vadd.f32 %v20951_v21, %v14410_v43 }
 0xe0d   : > { %v21114_v3 = vsel %vm14441_vm11, %v14416_v13, -1e+30 }
 0xe0e   : > { %14530 = vmax.xlane.f32.xlu1 %v21114_v3  ;;  %v16807_v37 = vpop.f32.mrb[204].mxu1  ;;  %v21119_v19 = vsel %vm14441_vm11, %v14411_v45, -1e+30 }
 0xe0f   : > { %v14426_v12 = vadd.f32 %v16807_v37, %v20951_v21  ;;  %v14420_v17 = vpop.f32.mrb[205].mxu1  ;;  %14528 = vmax.xlane.f32.xlu0 %v21119_v19 }
 0xe10   : > { %v14421_v23 = vadd.f32 %v20951_v21, %v14420_v17 }
 0xe11   : > { %v21126_v6 = vsel %vm14441_vm11, %v14426_v12, -1e+30 }
 0xe12   : > { %14534 = vmax.xlane.f32.xlu1 %v21126_v6  ;;  %v16810_v41 = vpop.f32.mrb[206].mxu1  ;;  %v21131_v57 = vsel %vm14441_vm11, %v14421_v23, -1e+30 }
 0xe13   : > { %v14436_v22 = vadd.f32 %v16810_v41, %v20951_v21  ;;  %14532 = vmax.xlane.f32.xlu0 %v21131_v57  ;;  %v14430_v56 = vpop.f32.mrb[207].mxu1 }
 0xe14   : > { %v14431_v59 = vadd.f32 %v20951_v21, %v14430_v56 }
 0xe15   : > { %v21138_v46 = vsel %vm14441_vm11, %v14436_v22, -1e+30 }
 0xe16   : > { %14538 = vmax.xlane.f32.xlu1 %v21138_v46  ;;  %v21143_v48 = vsel %vm14441_vm11, %v14431_v59, -1e+30 }
 0xe17   : > { %14536 = vmax.xlane.f32.xlu0 %v21143_v48 }
 0xe62   : > { %v14479_v8 = vpop.xlane.xlu1 %14478 }
 0xe63   : > { %v14541_v29 = vsub.f32 %v20958_v42, %v14479_v8  ;;  %v14477_v16 = vpop.xlane.xlu0 %14476 }
 0xe64   : > { %v14540_v40 = vsub.f32 %v20963_v2, %v14477_v16 }
 0xe65   : > { %v14574_v51 = vmul.f32 1.442695, %v14541_v29 }
 0xe66   : > { %v14572_v21 = vmul.f32 1.442695, %v14540_v40 }
 0xe67   : > { %17290 = vpow2.f32 %v14574_v51 }
 0xe68   : > { %17292 = vpow2.f32 %v14572_v21 }
 0xe6b   : > { %v14483_v9 = vpop.xlane.xlu1 %14482 }
 0xe6c   : > { %v14543_v39 = vsub.f32 %v20970_v58, %v14483_v9  ;;  %v14481_v38 = vpop.xlane.xlu0 %14480 }
 0xe6d   : > { %v14542_v31 = vsub.f32 %v20975_v33, %v14481_v38 }
 0xe6e   : > { %v14578_v14 = vmul.f32 1.442695, %v14543_v39 }
 0xe6f   : > { %v14576_v11 = vmul.f32 1.442695, %v14542_v31  ;;  %v14487_v55 = vpop.xlane.xlu1 %14486 }
 0xe70   : > { %17294 = vpow2.f32 %v14578_v14  ;;  %v14545_v42 = vsub.f32 %v20982_v62, %v14487_v55  ;;  %v14485_v2 = vpop.xlane.xlu0 %14484 }
 0xe71   : > { %v21150_v60 = vpop.eup %17290  ;;  %17296 = vpow2.f32 %v14576_v11  ;;  %v14544_v15 = vsub.f32 %v20987_v35, %v14485_v2 }
 0xe72   : > { %v21153_v47 = vpop.eup %17292  ;;  %14638 = vadd.xlane.f32.xlu1 %v21150_v60  ;;  %v14582_v58 = vmul.f32 1.442695, %v14545_v42 }
 0xe73   : > { %14636 = vadd.xlane.f32.xlu0 %v21153_v47  ;;  %v14580_v33 = vmul.f32 1.442695, %v14544_v15  ;;  %v14491_v36 = vpop.xlane.xlu1 %14490 }
 0xe74   : > { %17298 = vpow2.f32 %v14582_v58  ;;  %v14547_v27 = vsub.f32 %v20994_v10, %v14491_v36  ;;  %v14489_v61 = vpop.xlane.xlu0 %14488 }
 0xe75   : > { %17300 = vpow2.f32 %v14580_v33  ;;  %v14546_v4 = vsub.f32 %v20999_v52, %v14489_v61 }
 0xe76   : > { %v14586_v62 = vmul.f32 1.442695, %v14547_v27 }
 0xe77   : > { %v14584_v30 = vmul.f32 1.442695, %v14546_v4  ;;  %v14495_v13 = vpop.xlane.xlu1 %14494 }
 0xe78   : > { %17302 = vpow2.f32 %v14586_v62  ;;  %v14549_v35 = vsub.f32 %v21006_v25, %v14495_v13  ;;  %v14493_v43 = vpop.xlane.xlu0 %14492 }
 0xe79   : > { %17304 = vpow2.f32 %v14584_v30  ;;  %v14548_v37 = vsub.f32 %v21011_v54, %v14493_v43 }
 0xe7a   : > { %v21161_v45 = vpop.eup %17294  ;;  %v14590_v17 = vmul.f32 1.442695, %v14549_v35 }
 0xe7b   : > { %v21164_v12 = vpop.eup %17296  ;;  %14642 = vadd.xlane.f32.xlu1 %v21161_v45  ;;  %v14588_v10 = vmul.f32 1.442695, %v14548_v37  ;;  %v14499_v23 = vpop.xlane.xlu1 %14498 }
 0xe7c   : > { %14640 = vadd.xlane.f32.xlu0 %v21164_v12  ;;  %17306 = vpow2.f32 %v14590_v17  ;;  %v14551_v52 = vsub.f32 %v21018_v26, %v14499_v23  ;;  %v14497_v41 = vpop.xlane.xlu0 %14496 }
 0xe7d   : > { %17308 = vpow2.f32 %v14588_v10  ;;  %v14550_v25 = vsub.f32 %v21023_v28, %v14497_v41 }
 0xe7e   : > { %v21170_v22 = vpop.eup %17298  ;;  %v14594_v56 = vmul.f32 1.442695, %v14551_v52 }
 0xe7f   : > { %v21172_v54 = vpop.eup %17300  ;;  %v14592_v59 = vmul.f32 1.442695, %v14550_v25  ;;  %v14503_v8 = vpop.xlane.xlu1 %14502  ;;  %14646 = vadd.xlane.f32.xlu1 %v21170_v22 }
 0xe80   : > { %17310 = vpow2.f32 %v14594_v56  ;;  %v14553_v29 = vsub.f32 %v21030_v1, %v14503_v8  ;;  %v14501_v16 = vpop.xlane.xlu0 %14500  ;;  %14644 = vadd.xlane.f32.xlu0 %v21172_v54 }
 0xe81   : > { %17312 = vpow2.f32 %v14592_v59  ;;  %v14552_v26 = vsub.f32 %v21035_v49, %v14501_v16 }
 0xe82   : > { %v21178_v40 = vpop.eup %17302  ;;  %v14598_v28 = vmul.f32 1.442695, %v14553_v29 }
 0xe83   : > { %v21180_v51 = vpop.eup %17304  ;;  %v14596_v21 = vmul.f32 1.442695, %v14552_v26  ;;  %v14507_v9 = vpop.xlane.xlu1 %14506  ;;  %14650 = vadd.xlane.f32.xlu1 %v21178_v40 }
 0xe84   : > { %17314 = vpow2.f32 %v14598_v28  ;;  %v14555_v39 = vsub.f32 %v21042_v32, %v14507_v9  ;;  %v14505_v38 = vpop.xlane.xlu0 %14504  ;;  %14648 = vadd.xlane.f32.xlu0 %v21180_v51 }
 0xe85   : > { %17316 = vpow2.f32 %v14596_v21  ;;  %v14554_v1 = vsub.f32 %v21047_v34, %v14505_v38 }
 0xe86   : > { %v21186_v31 = vpop.eup %17306  ;;  %v14602_v49 = vmul.f32 1.442695, %v14555_v39 }
 0xe87   : > { %v21188_v14 = vpop.eup %17308  ;;  %v14600_v11 = vmul.f32 1.442695, %v14554_v1  ;;  %v14511_v55 = vpop.xlane.xlu1 %14510  ;;  %14654 = vadd.xlane.f32.xlu1 %v21186_v31 }
 0xe88   : > { %17318 = vpow2.f32 %v14602_v49  ;;  %v14557_v42 = vsub.f32 %v21054_v50, %v14511_v55  ;;  %v14509_v2 = vpop.xlane.xlu0 %14508  ;;  %14652 = vadd.xlane.f32.xlu0 %v21188_v14 }
 0xe89   : > { %17320 = vpow2.f32 %v14600_v11  ;;  %v14556_v32 = vsub.f32 %v21059_v20, %v14509_v2 }
 0xe8a   : > { %v21194_v15 = vpop.eup %17310  ;;  %v14606_v34 = vmul.f32 1.442695, %v14557_v42 }
 0xe8b   : > { %v21196_v58 = vpop.eup %17312  ;;  %v14604_v33 = vmul.f32 1.442695, %v14556_v32  ;;  %v14515_v36 = vpop.xlane.xlu1 %14514  ;;  %14658 = vadd.xlane.f32.xlu1 %v21194_v15 }
 0xe8c   : > { %17322 = vpow2.f32 %v14606_v34  ;;  %v14559_v27 = vsub.f32 %v21066_v18, %v14515_v36  ;;  %v14513_v61 = vpop.xlane.xlu0 %14512  ;;  %14656 = vadd.xlane.f32.xlu0 %v21196_v58 }
 0xe8d   : > { %17324 = vpow2.f32 %v14604_v33  ;;  %v14558_v50 = vsub.f32 %v21071_v44, %v14513_v61 }
 0xe8e   : > { %v21202_v4 = vpop.eup %17314  ;;  %v14610_v20 = vmul.f32 1.442695, %v14559_v27 }
 0xe8f   : > { %v21204_v62 = vpop.eup %17316  ;;  %v14608_v30 = vmul.f32 1.442695, %v14558_v50  ;;  %v14519_v13 = vpop.xlane.xlu1 %14518  ;;  %14662 = vadd.xlane.f32.xlu1 %v21202_v4 }
 0xe90   : > { %17326 = vpow2.f32 %v14610_v20  ;;  %v14561_v35 = vsub.f32 %v21078_v7, %v14519_v13  ;;  %v14517_v43 = vpop.xlane.xlu0 %14516  ;;  %14660 = vadd.xlane.f32.xlu0 %v21204_v62 }
 0xe91   : > { %17328 = vpow2.f32 %v14608_v30  ;;  %v14560_v18 = vsub.f32 %v21083_v24, %v14517_v43 }
 0xe92   : > { %v21210_v37 = vpop.eup %17318  ;;  %v14614_v44 = vmul.f32 1.442695, %v14561_v35 }
 0xe93   : > { %v21212_v17 = vpop.eup %17320  ;;  %v14612_v10 = vmul.f32 1.442695, %v14560_v18  ;;  %v14523_v23 = vpop.xlane.xlu1 %14522  ;;  %14666 = vadd.xlane.f32.xlu1 %v21210_v37 }
 0xe94   : > { %17330 = vpow2.f32 %v14614_v44  ;;  %v14563_v52 = vsub.f32 %v21090_v53, %v14523_v23  ;;  %v14521_v41 = vpop.xlane.xlu0 %14520  ;;  %14664 = vadd.xlane.f32.xlu0 %v21212_v17 }
 0xe95   : > { %17332 = vpow2.f32 %v14612_v10  ;;  %v14562_v7 = vsub.f32 %v21095_v5, %v14521_v41 }
 0xe96   : > { %v21218_v25 = vpop.eup %17322  ;;  %v14618_v24 = vmul.f32 1.442695, %v14563_v52 }
 0xe97   : > { %v21220_v56 = vpop.eup %17324  ;;  %v14616_v59 = vmul.f32 1.442695, %v14562_v7  ;;  %v14527_v8 = vpop.xlane.xlu1 %14526  ;;  %14670 = vadd.xlane.f32.xlu1 %v21218_v25 }
 0xe98   : > { %17334 = vpow2.f32 %v14618_v24  ;;  %v14565_v29 = vsub.f32 %v21102_v63, %v14527_v8  ;;  %v14525_v16 = vpop.xlane.xlu0 %14524  ;;  %14668 = vadd.xlane.f32.xlu0 %v21220_v56 }
 0xe99   : > { %17336 = vpow2.f32 %v14616_v59  ;;  %v14564_v53 = vsub.f32 %v21107_v0, %v14525_v16 }
 0xe9a   : > { %v21226_v26 = vpop.eup %17326  ;;  %v14622_v5 = vmul.f32 1.442695, %v14565_v29 }
 0xe9b   : > { %v21228_v28 = vpop.eup %17328  ;;  %v14620_v21 = vmul.f32 1.442695, %v14564_v53  ;;  %v14531_v9 = vpop.xlane.xlu1 %14530  ;;  %14674 = vadd.xlane.f32.xlu1 %v21226_v26 }
 0xe9c   : > { %17338 = vpow2.f32 %v14622_v5  ;;  %v14567_v39 = vsub.f32 %v21114_v3, %v14531_v9  ;;  %v14529_v38 = vpop.xlane.xlu0 %14528  ;;  %14672 = vadd.xlane.f32.xlu0 %v21228_v28 }
 0xe9d   : > { %17340 = vpow2.f32 %v14620_v21  ;;  %v14566_v63 = vsub.f32 %v21119_v19, %v14529_v38 }
 0xe9e   : > { %v21234_v1 = vpop.eup %17330  ;;  %v14626_v0 = vmul.f32 1.442695, %v14567_v39 }
 0xe9f   : > { %v21236_v49 = vpop.eup %17332  ;;  %v14624_v11 = vmul.f32 1.442695, %v14566_v63  ;;  %v14535_v55 = vpop.xlane.xlu1 %14534  ;;  %14678 = vadd.xlane.f32.xlu1 %v21234_v1 }
 0xea0   : > { %17342 = vpow2.f32 %v14626_v0  ;;  %v14569_v42 = vsub.f32 %v21126_v6, %v14535_v55  ;;  %v14533_v2 = vpop.xlane.xlu0 %14532  ;;  %14676 = vadd.xlane.f32.xlu0 %v21236_v49 }
 0xea1   : > { %17344 = vpow2.f32 %v14624_v11  ;;  %v14568_v3 = vsub.f32 %v21131_v57, %v14533_v2 }
 0xea2   : > { %v21242_v32 = vpop.eup %17334  ;;  %v14630_v19 = vmul.f32 1.442695, %v14569_v42 }
 0xea3   : > { %v21244_v34 = vpop.eup %17336  ;;  %v14628_v33 = vmul.f32 1.442695, %v14568_v3  ;;  %14682 = vadd.xlane.f32.xlu1 %v21242_v32  ;;  %v14539_v36 = vpop.xlane.xlu1 %14538 }
 0xea4   : > { %17346 = vpow2.f32 %v14630_v19  ;;  %v14571_v27 = vsub.f32 %v21138_v46, %v14539_v36  ;;  %14680 = vadd.xlane.f32.xlu0 %v21244_v34  ;;  %v14537_v6 = vpop.xlane.xlu0 %14536 }
 0xea5   : > { %17348 = vpow2.f32 %v14628_v33  ;;  %v14570_v61 = vsub.f32 %v21143_v48, %v14537_v6 }
 0xea6   : > { %v21250_v50 = vpop.eup %17338  ;;  %v14634_v57 = vmul.f32 1.442695, %v14571_v27 }
 0xea7   : > { %v21252_v20 = vpop.eup %17340  ;;  %v14632_v30 = vmul.f32 1.442695, %v14570_v61  ;;  %14686 = vadd.xlane.f32.xlu1 %v21250_v50 }
 0xea8   : > { %17350 = vpow2.f32 %v14634_v57  ;;  %14684 = vadd.xlane.f32.xlu0 %v21252_v20 }
 0xea9   : > { %17352 = vpow2.f32 %v14632_v30 }
 0xeaa   : > { %v21256_v13 = vpop.eup %17342 }
 0xeab   : > { %v21258_v46 = vpop.eup %17344  ;;  %14690 = vadd.xlane.f32.xlu1 %v21256_v13 }
 0xeac   : > { %14688 = vadd.xlane.f32.xlu0 %v21258_v46 }
 0xeae   : > { %v21262_v48 = vpop.eup %17346 }
 0xeaf   : > { %v21264_v35 = vpop.eup %17348  ;;  %14694 = vadd.xlane.f32.xlu1 %v21262_v48 }
 0xeb0   : > { %14692 = vadd.xlane.f32.xlu0 %v21264_v35 }
 0xeb2   : > { %v21268_v43 = vpop.eup %17350 }
 0xeb3   : > { %v21270_v18 = vpop.eup %17352  ;;  %14698 = vadd.xlane.f32.xlu1 %v21268_v43 }
 0xeb4   : > { %14696 = vadd.xlane.f32.xlu0 %v21270_v18 }
 0xeff   : > { %v14639_v44 = vpop.xlane.xlu1 %14638 }
 0xf00   : > { %17354 = vrcp.f32 %v14639_v44  ;;  %v14637_v10 = vpop.xlane.xlu0 %14636 }
 0xf01   : > { %17356 = vrcp.f32 %v14637_v10 }
 0xf08   : > { %v14643_v23 = vpop.xlane.xlu1 %14642 }
 0xf09   : > { %17358 = vrcp.f32 %v14643_v23  ;;  %v14641_v52 = vpop.xlane.xlu0 %14640 }
 0xf0a   : > { %v17355_v41 = vpop.eup %17354  ;;  %17360 = vrcp.f32 %v14641_v52 }
 0xf0b   : > { %v17357_v7 = vpop.eup %17356  ;;  %v14733_v24 = vmul.f32 %v17355_v41, %v21150_v60 }
 0xf0c   : > { %v14732_v59 = vmul.f32 %v17357_v7, %v21153_v47  ;;  %v14647_v8 = vpop.xlane.xlu1 %14646 }
 0xf0d   : > { %14765 = vst [vmem:[%s21279_s12 + $0x8] sm:$0xff] %v14733_v24  ;;  %17362 = vrcp.f32 %v14647_v8  ;;  %v14645_v29 = vpop.xlane.xlu0 %14644 }
 0xf0e   : > { %14764 = vst [vmem:[%s21279_s12] sm:$0xff] %v14732_v59  ;;  %17364 = vrcp.f32 %v14645_v29 }
 0xf10   : > { %v14651_v16 = vpop.xlane.xlu1 %14650 }
 0xf11   : > { %17366 = vrcp.f32 %v14651_v16  ;;  %v14649_v53 = vpop.xlane.xlu0 %14648 }
 0xf12   : > { %17368 = vrcp.f32 %v14649_v53 }
 0xf13   : > { %v17359_v5 = vpop.eup %17358 }
 0xf14   : > { %v17361_v21 = vpop.eup %17360  ;;  %v14735_v9 = vmul.f32 %v17359_v5, %v21161_v45  ;;  %v14655_v47 = vpop.xlane.xlu1 %14654 }
 0xf15   : > { %v14734_v60 = vmul.f32 %v17361_v21, %v21164_v12  ;;  %17370 = vrcp.f32 %v14655_v47  ;;  %v14653_v39 = vpop.xlane.xlu0 %14652 }
 0xf16   : > { %14767 = vst [vmem:[%s21279_s12 + $0x18] sm:$0xff] %v14735_v9  ;;  %17372 = vrcp.f32 %v14653_v39 }
 0xf17   : > { %14766 = vst [vmem:[%s21279_s12 + $0x10] sm:$0xff] %v14734_v60  ;;  %v17363_v38 = vpop.eup %17362 }
 0xf18   : > { %v17365_v63 = vpop.eup %17364  ;;  %v14737_v0 = vmul.f32 %v17363_v38, %v21170_v22  ;;  %v14659_v11 = vpop.xlane.xlu1 %14658 }
 0xf19   : > { %v14736_v55 = vmul.f32 %v17365_v63, %v21172_v54  ;;  %17374 = vrcp.f32 %v14659_v11  ;;  %v14657_v45 = vpop.xlane.xlu0 %14656 }
 0xf1a   : > { %14769 = vst [vmem:[%s21279_s12 + $0x28] sm:$0xff] %v14737_v0  ;;  %17376 = vrcp.f32 %v14657_v45 }
 0xf1b   : > { %v17367_v12 = vpop.eup %17366  ;;  %14768 = vst [vmem:[%s21279_s12 + $0x20] sm:$0xff] %v14736_v55 }
 0xf1c   : > { %v17369_v42 = vpop.eup %17368  ;;  %v14739_v2 = vmul.f32 %v17367_v12, %v21178_v40  ;;  %v14663_v3 = vpop.xlane.xlu1 %14662 }
 0xf1d   : > { %v14738_v19 = vmul.f32 %v17369_v42, %v21180_v51  ;;  %17378 = vrcp.f32 %v14663_v3  ;;  %v14661_v22 = vpop.xlane.xlu0 %14660 }
 0xf1e   : > { %14771 = vst [vmem:[%s21279_s12 + $0x38] sm:$0xff] %v14739_v2  ;;  %17380 = vrcp.f32 %v14661_v22 }
 0xf1f   : > { %v17371_v54 = vpop.eup %17370  ;;  %14770 = vst [vmem:[%s21279_s12 + $0x30] sm:$0xff] %v14738_v19 }
 0xf20   : > { %v17373_v33 = vpop.eup %17372  ;;  %v14741_v36 = vmul.f32 %v17371_v54, %v21186_v31  ;;  %v14667_v27 = vpop.xlane.xlu1 %14666 }
 0xf21   : > { %v14740_v6 = vmul.f32 %v17373_v33, %v21188_v14  ;;  %17382 = vrcp.f32 %v14667_v27  ;;  %v14665_v40 = vpop.xlane.xlu0 %14664 }
 0xf22   : > { %14773 = vst [vmem:[%s21279_s12 + $0x48] sm:$0xff] %v14741_v36  ;;  %17384 = vrcp.f32 %v14665_v40 }
 0xf23   : > { %v17375_v51 = vpop.eup %17374  ;;  %14772 = vst [vmem:[%s21279_s12 + $0x40] sm:$0xff] %v14740_v6 }
 0xf24   : > { %v17377_v61 = vpop.eup %17376  ;;  %v14743_v57 = vmul.f32 %v17375_v51, %v21194_v15  ;;  %v14671_v30 = vpop.xlane.xlu1 %14670 }
 0xf25   : > { %v14742_v44 = vmul.f32 %v17377_v61, %v21196_v58  ;;  %17386 = vrcp.f32 %v14671_v30  ;;  %v14669_v31 = vpop.xlane.xlu0 %14668 }
 0xf26   : > { %14775 = vst [vmem:[%s21279_s12 + $0x58] sm:$0xff] %v14743_v57  ;;  %17388 = vrcp.f32 %v14669_v31 }
 0xf27   : > { %v17379_v14 = vpop.eup %17378  ;;  %14774 = vst [vmem:[%s21279_s12 + $0x50] sm:$0xff] %v14742_v44 }
 0xf28   : > { %v17381_v10 = vpop.eup %17380  ;;  %v14745_v23 = vmul.f32 %v17379_v14, %v21202_v4  ;;  %v14675_v52 = vpop.xlane.xlu1 %14674 }
 0xf29   : > { %v14744_v41 = vmul.f32 %v17381_v10, %v21204_v62  ;;  %17390 = vrcp.f32 %v14675_v52  ;;  %v14673_v15 = vpop.xlane.xlu0 %14672 }
 0xf2a   : > { %14777 = vst [vmem:[%s21279_s12 + $0x68] sm:$0xff] %v14745_v23  ;;  %17392 = vrcp.f32 %v14673_v15 }
 0xf2b   : > { %v17383_v58 = vpop.eup %17382  ;;  %14776 = vst [vmem:[%s21279_s12 + $0x60] sm:$0xff] %v14744_v41 }
 0xf2c   : > { %v17385_v7 = vpop.eup %17384  ;;  %v14747_v24 = vmul.f32 %v17383_v58, %v21210_v37  ;;  %v14679_v59 = vpop.xlane.xlu1 %14678 }
 0xf2d   : > { %v14746_v8 = vmul.f32 %v17385_v7, %v21212_v17  ;;  %17394 = vrcp.f32 %v14679_v59  ;;  %v14677_v4 = vpop.xlane.xlu0 %14676 }
 0xf2e   : > { %14779 = vst [vmem:[%s21279_s12 + $0x78] sm:$0xff] %v14747_v24  ;;  %17396 = vrcp.f32 %v14677_v4 }
 0xf2f   : > { %v17387_v62 = vpop.eup %17386  ;;  %14778 = vst [vmem:[%s21279_s12 + $0x70] sm:$0xff] %v14746_v8 }
 0xf30   : > { %v17389_v29 = vpop.eup %17388  ;;  %v14749_v16 = vmul.f32 %v17387_v62, %v21218_v25  ;;  %v14683_v53 = vpop.xlane.xlu1 %14682 }
 0xf31   : > { %v14748_v5 = vmul.f32 %v17389_v29, %v21220_v56  ;;  %17398 = vrcp.f32 %v14683_v53  ;;  %v14681_v37 = vpop.xlane.xlu0 %14680 }
 0xf32   : > { %14781 = vst [vmem:[%s21279_s12 + $0x88] sm:$0xff] %v14749_v16  ;;  %17400 = vrcp.f32 %v14681_v37 }
 0xf33   : > { %v17391_v17 = vpop.eup %17390  ;;  %14780 = vst [vmem:[%s21279_s12 + $0x80] sm:$0xff] %v14748_v5 }
 0xf34   : > { %v17393_v21 = vpop.eup %17392  ;;  %v14751_v9 = vmul.f32 %v17391_v17, %v21226_v26  ;;  %v14687_v60 = vpop.xlane.xlu1 %14686 }
 0xf35   : > { %v14750_v47 = vmul.f32 %v17393_v21, %v21228_v28  ;;  %17402 = vrcp.f32 %v14687_v60  ;;  %v14685_v25 = vpop.xlane.xlu0 %14684 }
 0xf36   : > { %14783 = vst [vmem:[%s21279_s12 + $0x98] sm:$0xff] %v14751_v9  ;;  %17404 = vrcp.f32 %v14685_v25 }
 0xf37   : > { %v17395_v56 = vpop.eup %17394  ;;  %14782 = vst [vmem:[%s21279_s12 + $0x90] sm:$0xff] %v14750_v47 }
 0xf38   : > { %v17397_v39 = vpop.eup %17396  ;;  %v14753_v38 = vmul.f32 %v17395_v56, %v21234_v1  ;;  %v14691_v63 = vpop.xlane.xlu1 %14690 }
 0xf39   : > { %v14752_v0 = vmul.f32 %v17397_v39, %v21236_v49  ;;  %17406 = vrcp.f32 %v14691_v63  ;;  %v14689_v26 = vpop.xlane.xlu0 %14688 }
 0xf3a   : > { %14785 = vst [vmem:[%s21279_s12 + $0xa8] sm:$0xff] %v14753_v38  ;;  %17408 = vrcp.f32 %v14689_v26 }
 0xf3b   : > { %v17399_v28 = vpop.eup %17398  ;;  %14784 = vst [vmem:[%s21279_s12 + $0xa0] sm:$0xff] %v14752_v0 }
 0xf3c   : > { %v17401_v11 = vpop.eup %17400  ;;  %v14755_v55 = vmul.f32 %v17399_v28, %v21242_v32  ;;  %v14695_v45 = vpop.xlane.xlu1 %14694 }
 0xf3d   : > { %v14754_v12 = vmul.f32 %v17401_v11, %v21244_v34  ;;  %17410 = vrcp.f32 %v14695_v45  ;;  %v14693_v1 = vpop.xlane.xlu0 %14692 }
 0xf3e   : > { %14787 = vst [vmem:[%s21279_s12 + $0xb8] sm:$0xff] %v14755_v55  ;;  %17412 = vrcp.f32 %v14693_v1 }
 0xf3f   : > { %v17403_v49 = vpop.eup %17402  ;;  %14786 = vst [vmem:[%s21279_s12 + $0xb0] sm:$0xff] %v14754_v12 }
 0xf40   : > { %v17405_v42 = vpop.eup %17404  ;;  %v14757_v2 = vmul.f32 %v17403_v49, %v21250_v50  ;;  %v14699_v3 = vpop.xlane.xlu1 %14698 }
 0xf41   : > { %v14756_v19 = vmul.f32 %v17405_v42, %v21252_v20  ;;  %17414 = vrcp.f32 %v14699_v3  ;;  %v14697_v32 = vpop.xlane.xlu0 %14696 }
 0xf42   : > { %14789 = vst [vmem:[%s21279_s12 + $0xc8] sm:$0xff] %v14757_v2  ;;  %17416 = vrcp.f32 %v14697_v32 }
 0xf43   : > { %v17407_v34 = vpop.eup %17406  ;;  %14788 = vst [vmem:[%s21279_s12 + $0xc0] sm:$0xff] %v14756_v19 }
 0xf44   : > { %v17409_v22 = vpop.eup %17408  ;;  %v14759_v54 = vmul.f32 %v17407_v34, %v21256_v13 }
 0xf45   : > { %v14758_v33 = vmul.f32 %v17409_v22, %v21258_v46 }
 0xf46   : > { %14791 = vst [vmem:[%s21279_s12 + $0xd8] sm:$0xff] %v14759_v54 }
 0xf47   : > { %v17411_v50 = vpop.eup %17410  ;;  %14790 = vst [vmem:[%s21279_s12 + $0xd0] sm:$0xff] %v14758_v33 }
 0xf48   : > { %v17413_v36 = vpop.eup %17412  ;;  %v14761_v20 = vmul.f32 %v17411_v50, %v21262_v48 }
 0xf49   : > { %v14760_v27 = vmul.f32 %v17413_v36, %v21264_v35 }
 0xf4a   : > { %14793 = vst [vmem:[%s21279_s12 + $0xe8] sm:$0xff] %v14761_v20 }
 0xf4b   : > { %v17415_v6 = vpop.eup %17414  ;;  %14792 = vst [vmem:[%s21279_s12 + $0xe0] sm:$0xff] %v14760_v27 }
 0xf4c   : > { %v17417_v40 = vpop.eup %17416  ;;  %v14763_v51 = vmul.f32 %v17415_v6, %v21268_v43 }
 0xf4d   : > { %v14762_v61 = vmul.f32 %v17417_v40, %v21270_v18 }
 0xf4e   : > { %14795 = vst [vmem:[%s21279_s12 + $0xf8] sm:$0xff] %v14763_v51 }
 0xf4f   : > { %14794 = vst [vmem:[%s21279_s12 + $0xf0] sm:$0xff] %v14762_v61 }
 0xf50 PF: > { %s12_s9 = sadd.s32 1, %s17424_s9  }
 0xf51   : > { %p9_p4 = scmp.ge.s32.totalorder %s12_s9, 4  }
 0xf53   :  { %11 = sbr.rel (!%p9_p4) target bundleno = 1 (0x1), region = 58 }

</bundles_post_ra>
